<compile_context>
chip_gen: v5e
topology: v5e:2x2
jax: 0.10.0
libtpu: 0.0.40
codegen_flags: <defaults>
</compile_context>

<pallas_src>
import functools

import jax
import jax.numpy as jnp
from jax.experimental import pallas as pl
from jax.experimental.pallas import tpu as pltpu


def _round_up(n, m):
    return ((n + m - 1) // m) * m


# Conservative per-kernel budget for the double-buffered streaming tiles.
# Chosen to fit v7x (64 MiB physical / 32 MiB default-scoped VMEM) with
# headroom; v5e/v6e (128 MiB) are also covered.
_VMEM_TILE_BUDGET = 6 << 20
_MAX_TILE_ROWS = 2048


def _choose_row_tile(n, bytes_per_row, budget=_VMEM_TILE_BUDGET):
    """Largest 8-aligned divisor of `n` that fits the VMEM budget, capped at
    n//2 so the "parallel" grid keeps >= 2 steps (v7x megacore).  Falls back to
    a single full-extent block when no aligned divisor exists and `n` is small
    enough; returns None only when the caller must pad rows (never for the
    shapes used by this model)."""
    cap = max(8, min(_MAX_TILE_ROWS, budget // max(bytes_per_row, 1)))
    d = min(n // 2, cap) // 8 * 8
    while d >= 8:
        if n % d == 0:
            return d
        d -= 8
    if n <= cap:
        return n
    return None


# --------------------------------------------------------------------------
# In-kernel elementwise helpers
# --------------------------------------------------------------------------
def _erf(x):
    # Abramowitz & Stegun 7.1.26 polynomial, |err| <= 1.5e-7 (~ f32 eps).
    # Kept (proven to lower in Mosaic); exp goes to the EUP slot, the few extra
    # VALU ops are hidden under the mem-bound pipeline.
    p = 0.3275911
    a1, a2, a3, a4, a5 = (0.254829592, -0.284496736, 1.421413741,
                          -1.453152027, 1.061405429)
    s = jnp.where(x >= 0.0, 1.0, -1.0)
    ax = jnp.abs(x)
    t = 1.0 / (1.0 + p * ax)
    poly = ((((a5 * t + a4) * t + a3) * t + a2) * t + a1) * t
    return s * (1.0 - poly * jnp.exp(-ax * ax))


def _gelu(x):
    # exact (erf-based) GELU, matching torch.nn.functional.gelu default.
    return 0.5 * x * (1.0 + _erf(x * 0.7071067811865476))


# --------------------------------------------------------------------------
# Pallas kernel 1: fused pointwise linear  y = act(x @ w + b [+ add])
# Covers fc0 and the 1x1 convs (with fused spectral residual + GELU).
# --------------------------------------------------------------------------
def _make_linear_kernel(has_add, apply_act):
    def kernel(*refs):
        if has_add:
            x_ref, w_ref, b_ref, add_ref, o_ref = refs
        else:
            x_ref, w_ref, b_ref, o_ref = refs
        y = jnp.dot(x_ref[...], w_ref[...], preferred_element_type=jnp.float32)
        y = y + b_ref[...]
        if has_add:
            y = y + add_ref[...]
        if apply_act:
            y = _gelu(y)
        o_ref[...] = y.astype(o_ref.dtype)
    return kernel


def pallas_linear(x, w, b, add=None, act=False):
    """x: (N, Cin), w: (Cin, Cout), b: (Cout,), add: (N, Cout) or None.
    Row tile divides N exactly (no row padding); channel dims ride as
    full-extent block dims (only fc0's tiny d_in+2 input gets an 8-pad)."""
    n, cin = x.shape
    cout = w.shape[1]

    # Tiny channel pads (multiple of 8) only where needed; a no-op for the
    # width-sized dims of this model.
    kp, cp = _round_up(cin, 8), _round_up(cout, 8)
    if kp != cin:
        x = jnp.pad(x, ((0, 0), (0, kp - cin)))
        w = jnp.pad(w, ((0, kp - cin), (0, 0)))
    if cp != cout:
        w = jnp.pad(w, ((0, 0), (0, cp - cout)))
        b = jnp.pad(b, ((0, cp - cout),))
        if add is not None:
            add = jnp.pad(add, ((0, 0), (0, cp - cout)))

    streams = kp + cp + (cp if add is not None else 0)
    tn = _choose_row_tile(n, 4 * streams * 2)
    pad_rows = 0
    if tn is None:  # rare fallback: no aligned divisor fits the budget
        tn = max(8, min(_MAX_TILE_ROWS,
                        (_VMEM_TILE_BUDGET // (4 * streams * 2)) // 8 * 8))
        pad_rows = _round_up(n, tn) - n
        x = jnp.pad(x, ((0, pad_rows), (0, 0)))
        if add is not None:
            add = jnp.pad(add, ((0, pad_rows), (0, 0)))
    n_tot = n + pad_rows

    args = [x, w, b.reshape(1, cp)]
    in_specs = [
        pl.BlockSpec((tn, kp), lambda i: (i, 0)),
        pl.BlockSpec((kp, cp), lambda i: (0, 0)),
        pl.BlockSpec((1, cp), lambda i: (0, 0)),
    ]
    if add is not None:
        args.append(add)
        in_specs.append(pl.BlockSpec((tn, cp), lambda i: (i, 0)))

    cost = pl.CostEstimate(
        flops=2 * n_tot * kp * cp,
        transcendentals=n_tot * cp if act else 0,
        bytes_accessed=4 * (n_tot * streams + kp * cp + cp),
    )
    out = pl.pallas_call(
        _make_linear_kernel(add is not None, act),
        out_shape=jax.ShapeDtypeStruct((n_tot, cp), jnp.float32),
        grid=(n_tot // tn,),
        in_specs=in_specs,
        out_specs=pl.BlockSpec((tn, cp), lambda i: (i, 0)),
        compiler_params=pltpu.CompilerParams(
            dimension_semantics=("parallel",)),
        cost_estimate=cost,
    )(*args)
    if pad_rows or cp != cout:
        out = out[:n, :cout]
    return out


# --------------------------------------------------------------------------
# Pallas kernel 2: fused mlpfunc0 + double trapezoid integration.
# y = gelu(x @ w1 + b1) @ w2 + b2 per pixel, weighted-summed over (Hp, Wp)
# on-chip; the (B, Hp, Wp, wl) intermediate never touches HBM.
# --------------------------------------------------------------------------
def _mlp_trapz_kernel(x_ref, w1_ref, b1_ref, w2_ref, b2_ref, tw_ref,
                      o_ref, acc_ref):
    s = pl.program_id(1)

    @pl.when(s == 0)
    def _():
        acc_ref[...] = jnp.zeros_like(acc_ref)

    xt = x_ref[0]                                          # (ts, width)
    h = jnp.dot(xt, w1_ref[...], preferred_element_type=jnp.float32)
    h = _gelu(h + b1_ref[...])
    y = jnp.dot(h, w2_ref[...], preferred_element_type=jnp.float32) + b2_ref[...]
    acc_ref[...] += jnp.sum(y * tw_ref[0], axis=0, keepdims=True)

    @pl.when(s == pl.num_programs(1) - 1)
    def _():
        o_ref[0] = acc_ref[...]


def pallas_mlp_trapz(x, w1, b1, w2, b2):
    """x: (B, Hp, Wp, width) -> (B, wl).
    Equivalent to mlpfunc0 followed by torch.trapz(., dx=1/Wp) over W and
    torch.trapz(., dx=1/Hp) over H (separable trapezoid weights)."""
    bsz, hp, wp, width = x.shape
    wf, wl = w1.shape[1], w2.shape[1]
    wfp, wlp = _round_up(wf, 8), _round_up(wl, 8)
    if wfp != wf:
        w1 = jnp.pad(w1, ((0, 0), (0, wfp - wf)))
        b1 = jnp.pad(b1, ((0, wfp - wf),))
        w2 = jnp.pad(w2, ((0, wfp - wf), (0, 0)))
    if wlp != wl:
        w2 = jnp.pad(w2, ((0, 0), (0, wlp - wl)))
        b2 = jnp.pad(b2, ((0, wlp - wl),))

    s_tot = hp * wp
    xf = x.reshape(bsz, s_tot, width)

    def trap_w(npts):
        wv = jnp.full((npts,), 1.0 / npts, jnp.float32)
        return wv.at[0].mul(0.5).at[-1].mul(0.5)

    tw = (trap_w(hp)[:, None] * trap_w(wp)[None, :]).reshape(1, s_tot, 1)

    ts = _choose_row_tile(s_tot, 4 * (width + 1) * 2)
    if ts is None:
        ts = s_tot                       # whole-spatial block; fine at these sizes
    grid = (bsz, s_tot // ts)

    cost = pl.CostEstimate(
        flops=2 * bsz * s_tot * (width * wfp + wfp * wlp),
        transcendentals=bsz * s_tot * wfp,
        bytes_accessed=4 * (bsz * s_tot * (width + 1) + width * wfp
                            + wfp * wlp + wfp + wlp + bsz * wlp),
    )
    out = pl.pallas_call(
        _mlp_trapz_kernel,
        out_shape=jax.ShapeDtypeStruct((bsz, 1, wlp), jnp.float32),
        grid=grid,
        in_specs=[
            pl.BlockSpec((1, ts, width), lambda b, s: (b, s, 0)),
            pl.BlockSpec((width, wfp), lambda b, s: (0, 0)),
            pl.BlockSpec((1, wfp), lambda b, s: (0, 0)),
            pl.BlockSpec((wfp, wlp), lambda b, s: (0, 0)),
            pl.BlockSpec((1, wlp), lambda b, s: (0, 0)),
            pl.BlockSpec((1, ts, 1), lambda b, s: (0, s, 0)),
        ],
        out_specs=pl.BlockSpec((1, 1, wlp), lambda b, s: (b, 0, 0)),
        scratch_shapes=[pltpu.VMEM((1, wlp), jnp.float32)],
        compiler_params=pltpu.CompilerParams(
            dimension_semantics=("parallel", "arbitrary")),
        cost_estimate=cost,
    )(xf, w1, b1.reshape(1, wfp), w2, b2.reshape(1, wlp), tw)
    return out[:, 0, :wl]


# --------------------------------------------------------------------------
# Pallas kernel 3: final MLP head on the tiny (B, 2*wl) vector — one launch,
# both linears + GELU fused, whole arrays resident in VMEM.
# --------------------------------------------------------------------------
def _mlp_head_kernel(z_ref, w1_ref, b1_ref, w2_ref, b2_ref, o_ref):
    h = jnp.dot(z_ref[...], w1_ref[...], preferred_element_type=jnp.float32)
    h = _gelu(h + b1_ref[...])
    o_ref[...] = (jnp.dot(h, w2_ref[...], preferred_element_type=jnp.float32)
                  + b2_ref[...]).astype(o_ref.dtype)


def pallas_mlp_head(z, w1, b1, w2, b2):
    bsz, _ = z.shape
    dh, dout = w1.shape[1], w2.shape[1]
    bp = _round_up(bsz, 8)
    dhp, dop = _round_up(dh, 8), _round_up(dout, 8)
    if bp != bsz:
        z = jnp.pad(z, ((0, bp - bsz), (0, 0)))
    if dhp != dh:
        w1 = jnp.pad(w1, ((0, 0), (0, dhp - dh)))
        b1 = jnp.pad(b1, ((0, dhp - dh),))
        w2 = jnp.pad(w2, ((0, dhp - dh), (0, 0)))
    if dop != dout:
        w2 = jnp.pad(w2, ((0, 0), (0, dop - dout)))
        b2 = jnp.pad(b2, ((0, dop - dout),))
    vm = pl.BlockSpec(memory_space=pltpu.MemorySpace.VMEM)
    out = pl.pallas_call(
        _mlp_head_kernel,
        out_shape=jax.ShapeDtypeStruct((bp, dop), jnp.float32),
        in_specs=[vm] * 5,
        out_specs=vm,
    )(z, w1, b1.reshape(1, dhp), w2, b2.reshape(1, dop))
    return out[:bsz, :dout]


# --------------------------------------------------------------------------
# Spectral parts (plain JAX: FFT has no Pallas equivalent)
# --------------------------------------------------------------------------
def spectral_conv2d(x, w1, w2, m1, m2):
    """x: (B, Hp, Wp, C) real; w1, w2: (C, Cout, m1, m2) complex64."""
    bsz, hp, wp, _ = x.shape
    cout = w1.shape[1]
    xft = jnp.fft.rfft2(x, axes=(1, 2))                       # (B, Hp, Wp//2+1, C)
    top = jnp.einsum('bxyi,ioxy->bxyo', xft[:, :m1, :m2, :], w1)
    bot = jnp.einsum('bxyi,ioxy->bxyo', xft[:, -m1:, :m2, :], w2)
    out_ft = jnp.zeros((bsz, hp, wp // 2 + 1, cout), dtype=jnp.complex64)
    out_ft = out_ft.at[:, :m1, :m2, :].set(top)
    out_ft = out_ft.at[:, -m1:, :m2, :].set(bot)
    return jnp.fft.irfft2(out_ft, s=(hp, wp), axes=(1, 2))    # (B, Hp, Wp, Cout)


def linear_functionals2d(x, w, m1, m2):
    """x: (B, Hp, Wp, C); w: (C, out, 2*m1, m2) complex64  ->  (B, out)."""
    xft = jnp.fft.rfft2(x, axes=(1, 2), norm="forward")
    top = jnp.einsum('bxyi,ioxy->boxy', xft[:, :m1, :m2, :], w[:, :, :m1, :])
    bot = jnp.einsum('bxyi,ioxy->boxy', xft[:, -m1:, :m2, :], w[:, :, -m1:, :])
    s = top + bot                                              # (B, out, m1, m2)
    # Parseval-style integration of the retained half-spectrum.
    return (2.0 * jnp.sum(s[..., 1:].real, axis=(-2, -1))
            + jnp.sum(s[..., 0].real, axis=-1))


# --------------------------------------------------------------------------
# Parameter init (deterministic, torch-like shapes/scales)
# --------------------------------------------------------------------------
def init_params(key, cfg):
    width, wl, wf = cfg['width'], cfg['width_lfunc'], cfg['width_final']
    m1, m2, nl = cfg['modes1'], cfg['modes2'], cfg['n_layers']

    def linear_init(k, fan_in, fan_out):
        kw, kb = jax.random.split(k)
        bound = 1.0 / (fan_in ** 0.5)
        w = jax.random.uniform(kw, (fan_in, fan_out), jnp.float32, -bound, bound)
        b = jax.random.uniform(kb, (fan_out,), jnp.float32, -bound, bound)
        return w, b

    def spec_init(k, cin, cout, mm1, mm2):
        scale = 1.0 / (cin * cout)
        v = scale * jax.random.uniform(k, (cin, cout, mm1, mm2, 2), jnp.float32)
        return (v[..., 0] + 1j * v[..., 1]).astype(jnp.complex64)

    keys = jax.random.split(key, 1 + 3 * (nl - 1) + 5)
    p = {}
    d_fc0 = cfg['d_in'] + 2 if cfg['get_grid'] else cfg['d_in']
    p['fc0_w'], p['fc0_b'] = linear_init(keys[0], d_fc0, width)
    p['spec_w1'], p['spec_w2'], p['conv_w'], p['conv_b'] = [], [], [], []
    for layer in range(nl - 1):
        p['spec_w1'].append(spec_init(keys[1 + 3 * layer], width, width, m1, m2))
        p['spec_w2'].append(spec_init(keys[2 + 3 * layer], width, width, m1, m2))
        cw, cb = linear_init(keys[3 + 3 * layer], width, width)
        p['conv_w'].append(cw)
        p['conv_b'].append(cb)
    base = 1 + 3 * (nl - 1)
    p['lfunc_w'] = spec_init(keys[base], width, wl, 2 * m1, m2)
    p['mfunc_w1'], p['mfunc_b1'] = linear_init(keys[base + 1], width, wf)
    p['mfunc_w2'], p['mfunc_b2'] = linear_init(keys[base + 2], wf, wl)
    p['mlp0_w1'], p['mlp0_b1'] = linear_init(keys[base + 3], 2 * wl, 2 * wf)
    p['mlp0_w2'], p['mlp0_b2'] = linear_init(keys[base + 4], 2 * wf, cfg['d_out'])
    return p


# --------------------------------------------------------------------------
# Forward pass (mirrors FNF2d.forward)
# --------------------------------------------------------------------------
def fnf2d_forward(params, x, cfg):
    m1, m2 = cfg['modes1'], cfg['modes2']
    padding, width = cfg['padding'], cfg['width']
    bsz, _, h, w = x.shape

    # x.permute(0, 2, 3, 1): NCHW -> NHWC (channels on the lane axis)
    x = jnp.transpose(x, (0, 2, 3, 1)).astype(jnp.float32)
    if cfg['get_grid']:
        gx = jnp.broadcast_to(
            jnp.linspace(0.0, 1.0, h, dtype=jnp.float32)[None, :, None, None],
            (bsz, h, w, 1))
        gy = jnp.broadcast_to(
            jnp.linspace(0.0, 1.0, w, dtype=jnp.float32)[None, None, :, None],
            (bsz, h, w, 1))
        x = jnp.concatenate([x, gx, gy], axis=-1)
    c_in = x.shape[-1]

    # fc0 (pointwise linear) -- Pallas
    x = pallas_linear(x.reshape(-1, c_in), params['fc0_w'], params['fc0_b'])
    x = x.reshape(bsz, h, w, width)

    # F.pad(x, [0, W//padding, 0, H//padding]) in NCHW == pad bottom/right here
    x = jnp.pad(x, ((0, 0), (0, h // padding), (0, w // padding), (0, 0)))
    hp, wp = h + h // padding, w + w // padding

    # Fourier layers: x = gelu(conv1x1(x) + speconv(x)); conv + residual + GELU
    # fused in one Pallas kernel per layer.
    for layer in range(cfg['n_layers'] - 1):
        spec = spectral_conv2d(x, params['spec_w1'][layer],
                               params['spec_w2'][layer], m1, m2)
        x = pallas_linear(x.reshape(-1, width),
                          params['conv_w'][layer], params['conv_b'][layer],
                          add=spec.reshape(-1, width), act=True)
        x = x.reshape(bsz, hp, wp, width)

    # LinearFunctionals2d -> (B, width_lfunc)
    x_temp = linear_functionals2d(x, params['lfunc_w'], m1, m2)

    # mlpfunc0 + double trapezoid, fused into a single Pallas kernel -> (B, wl)
    x_int = pallas_mlp_trapz(x, params['mfunc_w1'], params['mfunc_b1'],
                             params['mfunc_w2'], params['mfunc_b2'])

    # concat functionals, final MLP head (single fused Pallas kernel)
    z = jnp.concatenate([x_temp, x_int], axis=1)
    return pallas_mlp_head(z, params['mlp0_w1'], params['mlp0_b1'],
                           params['mlp0_w2'], params['mlp0_b2'])


if __name__ == "__main__":
    # Small shapes consistent with the module: spatial 16x16, modes reduced so
    # the truncation fits the padded spectrum (18x18 -> rfft width 10 >= 4).
    cfg = dict(modes1=4, modes2=4, width=16, width_final=32, padding=8,
               d_in=1, d_out=1, width_lfunc=16, n_layers=4, get_grid=True)
    key = jax.random.PRNGKey(0)
    kp, kx = jax.random.split(key)
    params = init_params(kp, cfg)
    x = jax.random.normal(kx, (2, cfg['d_in'], 16, 16), dtype=jnp.float32)

    fwd = jax.jit(functools.partial(fnf2d_forward, cfg=cfg))
    out = fwd(params, x)
    out = jax.block_until_ready(out)
    assert out.shape == (2, cfg['d_out']), out.shape
    assert bool(jnp.all(jnp.isfinite(out)))
    print("KERNEL_OK")
</pallas_src>

<mosaic_0001>
module attributes {stable_mosaic.version = 11 : i64} {
  func.func @kernel(%arg0: i32, %arg1: memref<256x8xf32, #tpu.memory_space<vmem>>, %arg2: memref<8x16xf32, #tpu.memory_space<vmem>>, %arg3: memref<1x16xf32, #tpu.memory_space<vmem>>, %arg4: memref<256x16xf32, #tpu.memory_space<vmem>>) attributes {dimension_semantics = [#tpu.dimension_semantics<parallel>], iteration_bounds = array<i64: 2>, scalar_prefetch = 0 : i64, scratch_operands = 0 : i64, tpu.core_type = #tpu.core_type<tc>, window_params = [{transform_indices = @transform_0, window_bounds = array<i64: 256, 8>}, {pipeline_mode = #tpu.pipeline_mode<synchronous>, transform_indices = @transform_1, window_bounds = array<i64: 8, 16>}, {pipeline_mode = #tpu.pipeline_mode<synchronous>, transform_indices = @transform_2, window_bounds = array<i64: 1, 16>}, {transform_indices = @transform_3, window_bounds = array<i64: 256, 16>}]} {
    %c0 = arith.constant 0 : index
    %c0_0 = arith.constant 0 : index
    %0 = vector.load %arg1[%c0, %c0_0] : memref<256x8xf32, #tpu.memory_space<vmem>>, vector<256x8xf32>
    %c0_1 = arith.constant 0 : index
    %c0_2 = arith.constant 0 : index
    %1 = vector.load %arg2[%c0_1, %c0_2] : memref<8x16xf32, #tpu.memory_space<vmem>>, vector<8x16xf32>
    %cst = arith.constant dense<0.000000e+00> : vector<256x16xf32>
    %2 = tpu.matmul %0, %1, %cst {dimension_numbers = #tpu.dot_dimension_numbers<[1], [0], [0], [1], [0, 0, 1, 1], [], []>} : vector<256x8xf32>, vector<8x16xf32>, vector<256x16xf32> -> vector<256x16xf32>
    %c0_3 = arith.constant 0 : index
    %c0_4 = arith.constant 0 : index
    %3 = vector.load %arg3[%c0_3, %c0_4] : memref<1x16xf32, #tpu.memory_space<vmem>>, vector<1x16xf32>
    %4 = vector.broadcast %3 : vector<1x16xf32> to vector<256x16xf32>
    %5 = arith.addf %2, %4 : vector<256x16xf32>
    %c0_5 = arith.constant 0 : index
    %c0_6 = arith.constant 0 : index
    %6 = vector.load %arg4[%c0_5, %c0_6] : memref<256x16xf32, #tpu.memory_space<vmem>>, vector<256x16xf32>
    tpu.vector_store %arg4[%c0_5, %c0_6], %5 {strides = array<i32>} : memref<256x16xf32, #tpu.memory_space<vmem>>, vector<256x16xf32>,
    return
  }
  func.func @transform_0(%arg0: i32) -> (i32, i32) {
    %c0_i32 = arith.constant 0 : i32
    %c0_i32_0 = arith.constant 0 : i32
    return %arg0, %c0_i32 : i32, i32
  }
  func.func @transform_1(%arg0: i32) -> (i32, i32) {
    %c0_i32 = arith.constant 0 : i32
    %c0_i32_0 = arith.constant 0 : i32
    %c0_i32_1 = arith.constant 0 : i32
    return %c0_i32, %c0_i32_0 : i32, i32
  }
  func.func @transform_2(%arg0: i32) -> (i32, i32) {
    %c0_i32 = arith.constant 0 : i32
    %c0_i32_0 = arith.constant 0 : i32
    %c0_i32_1 = arith.constant 0 : i32
    return %c0_i32, %c0_i32_0 : i32, i32
  }
  func.func @transform_3(%arg0: i32) -> (i32, i32) {
    %c0_i32 = arith.constant 0 : i32
    %c0_i32_0 = arith.constant 0 : i32
    return %arg0, %c0_i32 : i32, i32
  }
}

module attributes {stable_mosaic.version = 11 : i64} {
  func.func @kernel(%arg0: i32, %arg1: memref<216x16xf32, #tpu.memory_space<vmem>>, %arg2: memref<16x16xf32, #tpu.memory_space<vmem>>, %arg3: memref<1x16xf32, #tpu.memory_space<vmem>>, %arg4: memref<216x16xf32, #tpu.memory_space<vmem>>, %arg5: memref<216x16xf32, #tpu.memory_space<vmem>>) attributes {dimension_semantics = [#tpu.dimension_semantics<parallel>], iteration_bounds = array<i64: 3>, scalar_prefetch = 0 : i64, scratch_operands = 0 : i64, tpu.core_type = #tpu.core_type<tc>, window_params = [{transform_indices = @transform_0, window_bounds = array<i64: 216, 16>}, {pipeline_mode = #tpu.pipeline_mode<synchronous>, transform_indices = @transform_1, window_bounds = array<i64: 16, 16>}, {pipeline_mode = #tpu.pipeline_mode<synchronous>, transform_indices = @transform_2, window_bounds = array<i64: 1, 16>}, {transform_indices = @transform_3, window_bounds = array<i64: 216, 16>}, {transform_indices = @transform_4, window_bounds = array<i64: 216, 16>}]} {
    %c0 = arith.constant 0 : index
    %c0_0 = arith.constant 0 : index
    %0 = vector.load %arg1[%c0, %c0_0] : memref<216x16xf32, #tpu.memory_space<vmem>>, vector<216x16xf32>
    %c0_1 = arith.constant 0 : index
    %c0_2 = arith.constant 0 : index
    %1 = vector.load %arg2[%c0_1, %c0_2] : memref<16x16xf32, #tpu.memory_space<vmem>>, vector<16x16xf32>
    %cst = arith.constant dense<0.000000e+00> : vector<216x16xf32>
    %2 = tpu.matmul %0, %1, %cst {dimension_numbers = #tpu.dot_dimension_numbers<[1], [0], [0], [1], [0, 0, 1, 1], [], []>} : vector<216x16xf32>, vector<16x16xf32>, vector<216x16xf32> -> vector<216x16xf32>
    %c0_3 = arith.constant 0 : index
    %c0_4 = arith.constant 0 : index
    %3 = vector.load %arg3[%c0_3, %c0_4] : memref<1x16xf32, #tpu.memory_space<vmem>>, vector<1x16xf32>
    %4 = vector.broadcast %3 : vector<1x16xf32> to vector<216x16xf32>
    %5 = arith.addf %2, %4 : vector<216x16xf32>
    %c0_5 = arith.constant 0 : index
    %c0_6 = arith.constant 0 : index
    %6 = vector.load %arg4[%c0_5, %c0_6] : memref<216x16xf32, #tpu.memory_space<vmem>>, vector<216x16xf32>
    %7 = arith.addf %5, %6 : vector<216x16xf32>
    %cst_7 = arith.constant 5.000000e-01 : f32
    %8 = vector.broadcast %cst_7 : f32 to vector<216x16xf32>
    %9 = arith.mulf %8, %7 : vector<216x16xf32>
    %cst_8 = arith.constant 0.707106769 : f32
    %10 = vector.broadcast %cst_8 : f32 to vector<216x16xf32>
    %11 = arith.mulf %7, %10 : vector<216x16xf32>
    %cst_9 = arith.constant 0.000000e+00 : f32
    %12 = vector.broadcast %cst_9 : f32 to vector<216x16xf32>
    %13 = arith.cmpf oge, %11, %12 : vector<216x16xf32>
    %cst_10 = arith.constant 1.000000e+00 : f32
    %cst_11 = arith.constant -1.000000e+00 : f32
    %14 = vector.broadcast %cst_10 : f32 to vector<216x16xf32>
    %15 = vector.broadcast %cst_11 : f32 to vector<216x16xf32>
    %16 = arith.select %13, %14, %15 : vector<216x16xi1>, vector<216x16xf32>
    %17 = math.absf %11 : vector<216x16xf32>
    %cst_12 = arith.constant 0.327591091 : f32
    %18 = vector.broadcast %cst_12 : f32 to vector<216x16xf32>
    %19 = arith.mulf %18, %17 : vector<216x16xf32>
    %cst_13 = arith.constant 1.000000e+00 : f32
    %20 = vector.broadcast %cst_13 : f32 to vector<216x16xf32>
    %21 = arith.addf %20, %19 : vector<216x16xf32>
    %cst_14 = arith.constant 1.000000e+00 : f32
    %22 = vector.broadcast %cst_14 : f32 to vector<216x16xf32>
    %23 = arith.divf %22, %21 : vector<216x16xf32>
    %cst_15 = arith.constant 1.06140542 : f32
    %24 = vector.broadcast %cst_15 : f32 to vector<216x16xf32>
    %25 = arith.mulf %24, %23 : vector<216x16xf32>
    %cst_16 = arith.constant -1.45315206 : f32
    %26 = vector.broadcast %cst_16 : f32 to vector<216x16xf32>
    %27 = arith.addf %25, %26 : vector<216x16xf32>
    %28 = arith.mulf %27, %23 : vector<216x16xf32>
    %cst_17 = arith.constant 1.42141378 : f32
    %29 = vector.broadcast %cst_17 : f32 to vector<216x16xf32>
    %30 = arith.addf %28, %29 : vector<216x16xf32>
    %31 = arith.mulf %30, %23 : vector<216x16xf32>
    %cst_18 = arith.constant -0.284496725 : f32
    %32 = vector.broadcast %cst_18 : f32 to vector<216x16xf32>
    %33 = arith.addf %31, %32 : vector<216x16xf32>
    %34 = arith.mulf %33, %23 : vector<216x16xf32>
    %cst_19 = arith.constant 0.254829586 : f32
    %35 = vector.broadcast %cst_19 : f32 to vector<216x16xf32>
    %36 = arith.addf %34, %35 : vector<216x16xf32>
    %37 = arith.mulf %36, %23 : vector<216x16xf32>
    %cst_20 = arith.constant 0.000000e+00 : f32
    %38 = vector.broadcast %cst_20 : f32 to vector<216x16xf32>
    %39 = arith.subf %38, %17 : vector<216x16xf32>
    %40 = arith.mulf %39, %17 : vector<216x16xf32>
    %41 = math.exp %40 : vector<216x16xf32>
    %42 = arith.mulf %37, %41 : vector<216x16xf32>
    %cst_21 = arith.constant 1.000000e+00 : f32
    %43 = vector.broadcast %cst_21 : f32 to vector<216x16xf32>
    %44 = arith.subf %43, %42 : vector<216x16xf32>
    %45 = arith.mulf %16, %44 : vector<216x16xf32>
    %cst_22 = arith.constant 1.000000e+00 : f32
    %46 = vector.broadcast %cst_22 : f32 to vector<216x16xf32>
    %47 = arith.addf %46, %45 : vector<216x16xf32>
    %48 = arith.mulf %9, %47 : vector<216x16xf32>
    %c0_23 = arith.constant 0 : index
    %c0_24 = arith.constant 0 : index
    %49 = vector.load %arg5[%c0_23, %c0_24] : memref<216x16xf32, #tpu.memory_space<vmem>>, vector<216x16xf32>
    tpu.vector_store %arg5[%c0_23, %c0_24], %48 {strides = array<i32>} : memref<216x16xf32, #tpu.memory_space<vmem>>, vector<216x16xf32>,
    return
  }
  func.func @transform_0(%arg0: i32) -> (i32, i32) {
    %c0_i32 = arith.constant 0 : i32
    %c0_i32_0 = arith.constant 0 : i32
    return %arg0, %c0_i32 : i32, i32
  }
  func.func @transform_1(%arg0: i32) -> (i32, i32) {
    %c0_i32 = arith.constant 0 : i32
    %c0_i32_0 = arith.constant 0 : i32
    %c0_i32_1 = arith.constant 0 : i32
    return %c0_i32, %c0_i32_0 : i32, i32
  }
  func.func @transform_2(%arg0: i32) -> (i32, i32) {
    %c0_i32 = arith.constant 0 : i32
    %c0_i32_0 = arith.constant 0 : i32
    %c0_i32_1 = arith.constant 0 : i32
    return %c0_i32, %c0_i32_0 : i32, i32
  }
  func.func @transform_3(%arg0: i32) -> (i32, i32) {
    %c0_i32 = arith.constant 0 : i32
    %c0_i32_0 = arith.constant 0 : i32
    return %arg0, %c0_i32 : i32, i32
  }
  func.func @transform_4(%arg0: i32) -> (i32, i32) {
    %c0_i32 = arith.constant 0 : i32
    %c0_i32_0 = arith.constant 0 : i32
    return %arg0, %c0_i32 : i32, i32
  }
}

module attributes {stable_mosaic.version = 11 : i64} {
  func.func @_mlp_trapz_kernel(%arg0: i32, %arg1: i32, %arg2: memref<1x324x16xf32, #tpu.memory_space<vmem>>, %arg3: memref<16x32xf32, #tpu.memory_space<vmem>>, %arg4: memref<1x32xf32, #tpu.memory_space<vmem>>, %arg5: memref<32x16xf32, #tpu.memory_space<vmem>>, %arg6: memref<1x16xf32, #tpu.memory_space<vmem>>, %arg7: memref<1x324x1xf32, #tpu.memory_space<vmem>>, %arg8: memref<1x1x16xf32, #tpu.memory_space<vmem>>, %arg9: memref<1x16xf32, #tpu.memory_space<vmem>>) attributes {dimension_semantics = [#tpu.dimension_semantics<parallel>, #tpu.dimension_semantics<arbitrary>], iteration_bounds = array<i64: 2, 1>, scalar_prefetch = 0 : i64, scratch_operands = 1 : i64, tpu.core_type = #tpu.core_type<tc>, window_params = [{transform_indices = @transform_0, window_bounds = array<i64: 1, 324, 16>}, {pipeline_mode = #tpu.pipeline_mode<synchronous>, transform_indices = @transform_1, window_bounds = array<i64: 16, 32>}, {pipeline_mode = #tpu.pipeline_mode<synchronous>, transform_indices = @transform_2, window_bounds = array<i64: 1, 32>}, {pipeline_mode = #tpu.pipeline_mode<synchronous>, transform_indices = @transform_3, window_bounds = array<i64: 32, 16>}, {pipeline_mode = #tpu.pipeline_mode<synchronous>, transform_indices = @transform_4, window_bounds = array<i64: 1, 16>}, {transform_indices = @transform_5, window_bounds = array<i64: 1, 324, 1>}, {transform_indices = @transform_6, window_bounds = array<i64: 1, 1, 16>}]} {
    %c0_i32 = arith.constant 0 : i32
    %0 = arith.cmpi eq, %arg1, %c0_i32 : i32
    %1 = arith.extui %0 : i1 to i32
    %c0_i32_0 = arith.constant 0 : i32
    %2 = arith.cmpi ne, %1, %c0_i32_0 : i32
    scf.if %2 {
      %cst_38 = arith.constant 0.000000e+00 : f32
      %68 = vector.broadcast %cst_38 : f32 to vector<1x16xf32>
      %c0_39 = arith.constant 0 : index
      %c0_40 = arith.constant 0 : index
      %69 = vector.load %arg9[%c0_39, %c0_40] : memref<1x16xf32, #tpu.memory_space<vmem>>, vector<1x16xf32>
      tpu.vector_store %arg9[%c0_39, %c0_40], %68 {strides = array<i32>} : memref<1x16xf32, #tpu.memory_space<vmem>>, vector<1x16xf32>,
    } else {
    }
    %c0 = arith.constant 0 : index
    %c0_1 = arith.constant 0 : index
    %c0_2 = arith.constant 0 : index
    %3 = vector.load %arg2[%c0, %c0_1, %c0_2] : memref<1x324x16xf32, #tpu.memory_space<vmem>>, vector<1x324x16xf32>
    %4 = vector.shape_cast %3 : vector<1x324x16xf32> to vector<324x16xf32>
    %c0_3 = arith.constant 0 : index
    %c0_4 = arith.constant 0 : index
    %5 = vector.load %arg3[%c0_3, %c0_4] : memref<16x32xf32, #tpu.memory_space<vmem>>, vector<16x32xf32>
    %cst = arith.constant dense<0.000000e+00> : vector<324x32xf32>
    %6 = tpu.matmul %4, %5, %cst {dimension_numbers = #tpu.dot_dimension_numbers<[1], [0], [0], [1], [0, 0, 1, 1], [], []>} : vector<324x16xf32>, vector<16x32xf32>, vector<324x32xf32> -> vector<324x32xf32>
    %c0_5 = arith.constant 0 : index
    %c0_6 = arith.constant 0 : index
    %7 = vector.load %arg4[%c0_5, %c0_6] : memref<1x32xf32, #tpu.memory_space<vmem>>, vector<1x32xf32>
    %8 = vector.broadcast %7 : vector<1x32xf32> to vector<324x32xf32>
    %9 = arith.addf %6, %8 : vector<324x32xf32>
    %cst_7 = arith.constant 5.000000e-01 : f32
    %10 = vector.broadcast %cst_7 : f32 to vector<324x32xf32>
    %11 = arith.mulf %10, %9 : vector<324x32xf32>
    %cst_8 = arith.constant 0.707106769 : f32
    %12 = vector.broadcast %cst_8 : f32 to vector<324x32xf32>
    %13 = arith.mulf %9, %12 : vector<324x32xf32>
    %cst_9 = arith.constant 0.000000e+00 : f32
    %14 = vector.broadcast %cst_9 : f32 to vector<324x32xf32>
    %15 = arith.cmpf oge, %13, %14 : vector<324x32xf32>
    %cst_10 = arith.constant 1.000000e+00 : f32
    %cst_11 = arith.constant -1.000000e+00 : f32
    %16 = vector.broadcast %cst_10 : f32 to vector<324x32xf32>
    %17 = vector.broadcast %cst_11 : f32 to vector<324x32xf32>
    %18 = arith.select %15, %16, %17 : vector<324x32xi1>, vector<324x32xf32>
    %19 = math.absf %13 : vector<324x32xf32>
    %cst_12 = arith.constant 0.327591091 : f32
    %20 = vector.broadcast %cst_12 : f32 to vector<324x32xf32>
    %21 = arith.mulf %20, %19 : vector<324x32xf32>
    %cst_13 = arith.constant 1.000000e+00 : f32
    %22 = vector.broadcast %cst_13 : f32 to vector<324x32xf32>
    %23 = arith.addf %22, %21 : vector<324x32xf32>
    %cst_14 = arith.constant 1.000000e+00 : f32
    %24 = vector.broadcast %cst_14 : f32 to vector<324x32xf32>
    %25 = arith.divf %24, %23 : vector<324x32xf32>
    %cst_15 = arith.constant 1.06140542 : f32
    %26 = vector.broadcast %cst_15 : f32 to vector<324x32xf32>
    %27 = arith.mulf %26, %25 : vector<324x32xf32>
    %cst_16 = arith.constant -1.45315206 : f32
    %28 = vector.broadcast %cst_16 : f32 to vector<324x32xf32>
    %29 = arith.addf %27, %28 : vector<324x32xf32>
    %30 = arith.mulf %29, %25 : vector<324x32xf32>
    %cst_17 = arith.constant 1.42141378 : f32
    %31 = vector.broadcast %cst_17 : f32 to vector<324x32xf32>
    %32 = arith.addf %30, %31 : vector<324x32xf32>
    %33 = arith.mulf %32, %25 : vector<324x32xf32>
    %cst_18 = arith.constant -0.284496725 : f32
    %34 = vector.broadcast %cst_18 : f32 to vector<324x32xf32>
    %35 = arith.addf %33, %34 : vector<324x32xf32>
    %36 = arith.mulf %35, %25 : vector<324x32xf32>
    %cst_19 = arith.constant 0.254829586 : f32
    %37 = vector.broadcast %cst_19 : f32 to vector<324x32xf32>
    %38 = arith.addf %36, %37 : vector<324x32xf32>
    %39 = arith.mulf %38, %25 : vector<324x32xf32>
    %cst_20 = arith.constant 0.000000e+00 : f32
    %40 = vector.broadcast %cst_20 : f32 to vector<324x32xf32>
    %41 = arith.subf %40, %19 : vector<324x32xf32>
    %42 = arith.mulf %41, %19 : vector<324x32xf32>
    %43 = math.exp %42 : vector<324x32xf32>
    %44 = arith.mulf %39, %43 : vector<324x32xf32>
    %cst_21 = arith.constant 1.000000e+00 : f32
    %45 = vector.broadcast %cst_21 : f32 to vector<324x32xf32>
    %46 = arith.subf %45, %44 : vector<324x32xf32>
    %47 = arith.mulf %18, %46 : vector<324x32xf32>
    %cst_22 = arith.constant 1.000000e+00 : f32
    %48 = vector.broadcast %cst_22 : f32 to vector<324x32xf32>
    %49 = arith.addf %48, %47 : vector<324x32xf32>
    %50 = arith.mulf %11, %49 : vector<324x32xf32>
    %c0_23 = arith.constant 0 : index
    %c0_24 = arith.constant 0 : index
    %51 = vector.load %arg5[%c0_23, %c0_24] : memref<32x16xf32, #tpu.memory_space<vmem>>, vector<32x16xf32>
    %cst_25 = arith.constant dense<0.000000e+00> : vector<324x16xf32>
    %52 = tpu.matmul %50, %51, %cst_25 {dimension_numbers = #tpu.dot_dimension_numbers<[1], [0], [0], [1], [0, 0, 1, 1], [], []>} : vector<324x32xf32>, vector<32x16xf32>, vector<324x16xf32> -> vector<324x16xf32>
    %c0_26 = arith.constant 0 : index
    %c0_27 = arith.constant 0 : index
    %53 = vector.load %arg6[%c0_26, %c0_27] : memref<1x16xf32, #tpu.memory_space<vmem>>, vector<1x16xf32>
    %54 = vector.broadcast %53 : vector<1x16xf32> to vector<324x16xf32>
    %55 = arith.addf %52, %54 : vector<324x16xf32>
    %c0_28 = arith.constant 0 : index
    %c0_29 = arith.constant 0 : index
    %56 = vector.load %arg9[%c0_28, %c0_29] : memref<1x16xf32, #tpu.memory_space<vmem>>, vector<1x16xf32>
    %c0_30 = arith.constant 0 : index
    %c0_31 = arith.constant 0 : index
    %c0_32 = arith.constant 0 : index
    %57 = vector.load %arg7[%c0_30, %c0_31, %c0_32] : memref<1x324x1xf32, #tpu.memory_space<vmem>>, vector<1x324x1xf32>
    %58 = vector.shape_cast %57 : vector<1x324x1xf32> to vector<324x1xf32>
    %59 = vector.broadcast %58 : vector<324x1xf32> to vector<324x16xf32>
    %60 = arith.mulf %55, %59 : vector<324x16xf32>
    %cst_33 = arith.constant dense<0.000000e+00> : vector<16xf32>
    %61 = vector.multi_reduction <add>, %60, %cst_33 [0] : vector<324x16xf32> to vector<16xf32>
    %62 = vector.shape_cast %61 : vector<16xf32> to vector<1x16xf32>
    %63 = arith.addf %56, %62 : vector<1x16xf32>
    %c0_34 = arith.constant 0 : index
    %c0_35 = arith.constant 0 : index
    %64 = vector.load %arg9[%c0_34, %c0_35] : memref<1x16xf32, #tpu.memory_space<vmem>>, vector<1x16xf32>
    tpu.vector_store %arg9[%c0_34, %c0_35], %63 {strides = array<i32>} : memref<1x16xf32, #tpu.memory_space<vmem>>, vector<1x16xf32>,
    %c0_i32_36 = arith.constant 0 : i32
    %65 = arith.cmpi eq, %arg1, %c0_i32_36 : i32
    %66 = arith.extui %65 : i1 to i32
    %c0_i32_37 = arith.constant 0 : i32
    %67 = arith.cmpi ne, %66, %c0_i32_37 : i32
    scf.if %67 {
      %c0_38 = arith.constant 0 : index
      %c0_39 = arith.constant 0 : index
      %68 = vector.load %arg9[%c0_38, %c0_39] : memref<1x16xf32, #tpu.memory_space<vmem>>, vector<1x16xf32>
      %c0_40 = arith.constant 0 : index
      %c0_41 = arith.constant 0 : index
      %c0_42 = arith.constant 0 : index
      %69 = vector.load %arg8[%c0_40, %c0_41, %c0_42] : memref<1x1x16xf32, #tpu.memory_space<vmem>>, vector<1x1x16xf32>
      %70 = vector.shape_cast %69 : vector<1x1x16xf32> to vector<1x16xf32>
      %71 = vector.shape_cast %68 : vector<1x16xf32> to vector<1x1x16xf32>
      tpu.vector_store %arg8[%c0_40, %c0_41, %c0_42], %71 {strides = array<i32>} : memref<1x1x16xf32, #tpu.memory_space<vmem>>, vector<1x1x16xf32>,
    } else {
    }
    return
  }
  func.func @transform_0(%arg0: i32, %arg1: i32) -> (i32, i32, i32) {
    %c0_i32 = arith.constant 0 : i32
    %c0_i32_0 = arith.constant 0 : i32
    return %arg0, %arg1, %c0_i32 : i32, i32, i32
  }
  func.func @transform_1(%arg0: i32, %arg1: i32) -> (i32, i32) {
    %c0_i32 = arith.constant 0 : i32
    %c0_i32_0 = arith.constant 0 : i32
    %c0_i32_1 = arith.constant 0 : i32
    return %c0_i32, %c0_i32_0 : i32, i32
  }
  func.func @transform_2(%arg0: i32, %arg1: i32) -> (i32, i32) {
    %c0_i32 = arith.constant 0 : i32
    %c0_i32_0 = arith.constant 0 : i32
    %c0_i32_1 = arith.constant 0 : i32
    return %c0_i32, %c0_i32_0 : i32, i32
  }
  func.func @transform_3(%arg0: i32, %arg1: i32) -> (i32, i32) {
    %c0_i32 = arith.constant 0 : i32
    %c0_i32_0 = arith.constant 0 : i32
    %c0_i32_1 = arith.constant 0 : i32
    return %c0_i32, %c0_i32_0 : i32, i32
  }
  func.func @transform_4(%arg0: i32, %arg1: i32) -> (i32, i32) {
    %c0_i32 = arith.constant 0 : i32
    %c0_i32_0 = arith.constant 0 : i32
    %c0_i32_1 = arith.constant 0 : i32
    return %c0_i32, %c0_i32_0 : i32, i32
  }
  func.func @transform_5(%arg0: i32, %arg1: i32) -> (i32, i32, i32) {
    %c0_i32 = arith.constant 0 : i32
    %c0_i32_0 = arith.constant 0 : i32
    %c0_i32_1 = arith.constant 0 : i32
    return %c0_i32, %arg1, %c0_i32_0 : i32, i32, i32
  }
  func.func @transform_6(%arg0: i32, %arg1: i32) -> (i32, i32, i32) {
    %c0_i32 = arith.constant 0 : i32
    %c0_i32_0 = arith.constant 0 : i32
    %c0_i32_1 = arith.constant 0 : i32
    return %arg0, %c0_i32, %c0_i32_0 : i32, i32, i32
  }
}

module attributes {stable_mosaic.version = 11 : i64} {
  func.func @_mlp_head_kernel(%arg0: memref<8x32xf32, #tpu.memory_space<vmem>>, %arg1: memref<32x64xf32, #tpu.memory_space<vmem>>, %arg2: memref<1x64xf32, #tpu.memory_space<vmem>>, %arg3: memref<64x8xf32, #tpu.memory_space<vmem>>, %arg4: memref<1x8xf32, #tpu.memory_space<vmem>>, %arg5: memref<8x8xf32, #tpu.memory_space<vmem>>) attributes {dimension_semantics = [], scalar_prefetch = 0 : i64, scratch_operands = 0 : i64, tpu.core_type = #tpu.core_type<tc>} {
    %c0 = arith.constant 0 : index
    %c0_0 = arith.constant 0 : index
    %0 = vector.load %arg0[%c0, %c0_0] : memref<8x32xf32, #tpu.memory_space<vmem>>, vector<8x32xf32>
    %c0_1 = arith.constant 0 : index
    %c0_2 = arith.constant 0 : index
    %1 = vector.load %arg1[%c0_1, %c0_2] : memref<32x64xf32, #tpu.memory_space<vmem>>, vector<32x64xf32>
    %cst = arith.constant dense<0.000000e+00> : vector<8x64xf32>
    %2 = tpu.matmul %0, %1, %cst {dimension_numbers = #tpu.dot_dimension_numbers<[1], [0], [0], [1], [0, 0, 1, 1], [], []>} : vector<8x32xf32>, vector<32x64xf32>, vector<8x64xf32> -> vector<8x64xf32>
    %c0_3 = arith.constant 0 : index
    %c0_4 = arith.constant 0 : index
    %3 = vector.load %arg2[%c0_3, %c0_4] : memref<1x64xf32, #tpu.memory_space<vmem>>, vector<1x64xf32>
    %4 = vector.broadcast %3 : vector<1x64xf32> to vector<8x64xf32>
    %5 = arith.addf %2, %4 : vector<8x64xf32>
    %cst_5 = arith.constant 5.000000e-01 : f32
    %6 = vector.broadcast %cst_5 : f32 to vector<8x64xf32>
    %7 = arith.mulf %6, %5 : vector<8x64xf32>
    %cst_6 = arith.constant 0.707106769 : f32
    %8 = vector.broadcast %cst_6 : f32 to vector<8x64xf32>
    %9 = arith.mulf %5, %8 : vector<8x64xf32>
    %cst_7 = arith.constant 0.000000e+00 : f32
    %10 = vector.broadcast %cst_7 : f32 to vector<8x64xf32>
    %11 = arith.cmpf oge, %9, %10 : vector<8x64xf32>
    %cst_8 = arith.constant 1.000000e+00 : f32
    %cst_9 = arith.constant -1.000000e+00 : f32
    %12 = vector.broadcast %cst_8 : f32 to vector<8x64xf32>
    %13 = vector.broadcast %cst_9 : f32 to vector<8x64xf32>
    %14 = arith.select %11, %12, %13 : vector<8x64xi1>, vector<8x64xf32>
    %15 = math.absf %9 : vector<8x64xf32>
    %cst_10 = arith.constant 0.327591091 : f32
    %16 = vector.broadcast %cst_10 : f32 to vector<8x64xf32>
    %17 = arith.mulf %16, %15 : vector<8x64xf32>
    %cst_11 = arith.constant 1.000000e+00 : f32
    %18 = vector.broadcast %cst_11 : f32 to vector<8x64xf32>
    %19 = arith.addf %18, %17 : vector<8x64xf32>
    %cst_12 = arith.constant 1.000000e+00 : f32
    %20 = vector.broadcast %cst_12 : f32 to vector<8x64xf32>
    %21 = arith.divf %20, %19 : vector<8x64xf32>
    %cst_13 = arith.constant 1.06140542 : f32
    %22 = vector.broadcast %cst_13 : f32 to vector<8x64xf32>
    %23 = arith.mulf %22, %21 : vector<8x64xf32>
    %cst_14 = arith.constant -1.45315206 : f32
    %24 = vector.broadcast %cst_14 : f32 to vector<8x64xf32>
    %25 = arith.addf %23, %24 : vector<8x64xf32>
    %26 = arith.mulf %25, %21 : vector<8x64xf32>
    %cst_15 = arith.constant 1.42141378 : f32
    %27 = vector.broadcast %cst_15 : f32 to vector<8x64xf32>
    %28 = arith.addf %26, %27 : vector<8x64xf32>
    %29 = arith.mulf %28, %21 : vector<8x64xf32>
    %cst_16 = arith.constant -0.284496725 : f32
    %30 = vector.broadcast %cst_16 : f32 to vector<8x64xf32>
    %31 = arith.addf %29, %30 : vector<8x64xf32>
    %32 = arith.mulf %31, %21 : vector<8x64xf32>
    %cst_17 = arith.constant 0.254829586 : f32
    %33 = vector.broadcast %cst_17 : f32 to vector<8x64xf32>
    %34 = arith.addf %32, %33 : vector<8x64xf32>
    %35 = arith.mulf %34, %21 : vector<8x64xf32>
    %cst_18 = arith.constant 0.000000e+00 : f32
    %36 = vector.broadcast %cst_18 : f32 to vector<8x64xf32>
    %37 = arith.subf %36, %15 : vector<8x64xf32>
    %38 = arith.mulf %37, %15 : vector<8x64xf32>
    %39 = math.exp %38 : vector<8x64xf32>
    %40 = arith.mulf %35, %39 : vector<8x64xf32>
    %cst_19 = arith.constant 1.000000e+00 : f32
    %41 = vector.broadcast %cst_19 : f32 to vector<8x64xf32>
    %42 = arith.subf %41, %40 : vector<8x64xf32>
    %43 = arith.mulf %14, %42 : vector<8x64xf32>
    %cst_20 = arith.constant 1.000000e+00 : f32
    %44 = vector.broadcast %cst_20 : f32 to vector<8x64xf32>
    %45 = arith.addf %44, %43 : vector<8x64xf32>
    %46 = arith.mulf %7, %45 : vector<8x64xf32>
    %c0_21 = arith.constant 0 : index
    %c0_22 = arith.constant 0 : index
    %47 = vector.load %arg3[%c0_21, %c0_22] : memref<64x8xf32, #tpu.memory_space<vmem>>, vector<64x8xf32>
    %cst_23 = arith.constant dense<0.000000e+00> : vector<8x8xf32>
    %48 = tpu.matmul %46, %47, %cst_23 {dimension_numbers = #tpu.dot_dimension_numbers<[1], [0], [0], [1], [0, 0, 1, 1], [], []>} : vector<8x64xf32>, vector<64x8xf32>, vector<8x8xf32> -> vector<8x8xf32>
    %c0_24 = arith.constant 0 : index
    %c0_25 = arith.constant 0 : index
    %49 = vector.load %arg4[%c0_24, %c0_25] : memref<1x8xf32, #tpu.memory_space<vmem>>, vector<1x8xf32>
    %50 = vector.broadcast %49 : vector<1x8xf32> to vector<8x8xf32>
    %51 = arith.addf %48, %50 : vector<8x8xf32>
    %c0_26 = arith.constant 0 : index
    %c0_27 = arith.constant 0 : index
    %52 = vector.load %arg5[%c0_26, %c0_27] : memref<8x8xf32, #tpu.memory_space<vmem>>, vector<8x8xf32>
    tpu.vector_store %arg5[%c0_26, %c0_27], %51 {strides = array<i32>} : memref<8x8xf32, #tpu.memory_space<vmem>>, vector<8x8xf32>,
    return
  }
}

</mosaic_0001>

<bundles_post_ra>
// kernel: fnf2d_forward.6
= control target key start
LH: loop header
LB: loop body
LE: loop exit
PB: predicated region body
PF: predicated region fallthrough
CT: control target
= control target key end

     0   :  { %s593_s12 = smov 0   ;;  %s789_s0 = inlined_call_operand.vmem [shape: f32[512,8], index: 0, kind: input, shape index: {}]   ;;  %s790_s1 = inlined_call_operand.vmem [shape: f32[8,16], index: 1, kind: input, shape index: {}]   ;;  %s791_s2 = inlined_call_operand.vmem [shape: f32[1,16], index: 2, kind: input, shape index: {}]   ;;  %s792_s3 = inlined_call_operand.vmem [shape: f32[512,16], index: 3, kind: output, shape index: {}]  }
   0x1 LB: > { %s510_s13 = sadd.s32 4294967295, %s571_s12   ;;  %p514_p0 = scmp.ge.s32.totalorder %s571_s12, 1  ;;  %s571_s12 = sphi %s593_s12, %s13_s12  }
   0x2   : > { %p138_p1 = scmp.lt.s32.totalorder %s571_s12, 3 }
   0x4   : > { %p139_p2 = pnand %p514_p0, %p138_p1 }
   0x5   : > { %s515_s16 = sshll.u32 (!%p139_p2), %s510_s13, 5 }
   0x6   : > { %142 = sbr.rel (%p139_p2) target bundleno = 207 (0xcf), region = 32  ;;  %p163_p3 = scmp.lt.s32.totalorder (!%p139_p2), %s515_s16, 63 }
   0xb   : > { %v206_v0 = vld [vmem:[%s790_s1] sm:$0xff]  ;;  %s794_s16 = smov (!%p163_p3, %s515_s16), 63  ;;  %vm211_vm0 = vcmask 64512   ;;  %vm421_vm1 = vcmask 130048  }
   0xc   : > { %554 = vmatpush.msra.mxu2 %v206_v0  ;;  %555 = vmatpush.msra.mxu3 %v206_v0  ;;  %s516_s17 = sshll.u32 %s794_s16, 3  ;;  %v681_v33 = vld [vmem:[%s791_s2] ss:$0 sm:$0xff] }
   0xd   : > { %323 = vmatpush.msra.mxu0 %v206_v0  ;;  %553 = vmatpush.msra.mxu1 %v206_v0  ;;  %s612_s20 = scalar_lea.vmem %s789_s0, %s516_s17  ;;  %s688_s25 = scalar_lea.vmem %s792_s3, %s516_s17 }
   0xe   : > { %v190_v1 = vld [vmem:[%s612_s20 + $0x80] sm:$0xff]  ;;  %v191_v5 = vld [vmem:[%s612_s20 + $0x88] sm:$0xff]  ;;  %v192_v9 = vld [vmem:[%s612_s20 + $0x90] sm:$0xff] }
   0xf   : > { %v198_v2 = vld [vmem:[%s612_s20 + $0xc0] sm:$0xff]  ;;  %535 = vmatmul.msk.f32.vlgmr.msra.gmra.mxu2 %vm211_vm0, %v190_v1  ;;  %v199_v6 = vld [vmem:[%s612_s20 + $0xc8] sm:$0xff]  ;;  %v200_v10 = vld [vmem:[%s612_s20 + $0xd0] sm:$0xff] }
  0x10   : > { %v174_v3 = vld [vmem:[%s612_s20] sm:$0xff]  ;;  %543 = vmatmul.msk.f32.vlgmr.msra.gmra.mxu3 %vm211_vm0, %v198_v2  ;;  %v175_v7 = vld [vmem:[%s612_s20 + $0x8] sm:$0xff]  ;;  %v176_v11 = vld [vmem:[%s612_s20 + $0x10] sm:$0xff] }
  0x11   : > { %v182_v4 = vld [vmem:[%s612_s20 + $0x40] sm:$0xff]  ;;  %519 = vmatmul.msk.f32.vlgmr.msra.gmra.mxu0 %vm211_vm0, %v174_v3  ;;  %v183_v8 = vld [vmem:[%s612_s20 + $0x48] sm:$0xff]  ;;  %v184_v12 = vld [vmem:[%s612_s20 + $0x50] sm:$0xff] }
  0x12   : > { %527 = vmatmul.msk.f32.vlgmr.msra.gmra.mxu1 %vm211_vm0, %v182_v4  ;;  %v193_v13 = vld [vmem:[%s612_s20 + $0x98] sm:$0xff]  ;;  %v194_v17 = vld [vmem:[%s612_s20 + $0xa0] sm:$0xff]  ;;  %v195_v21 = vld [vmem:[%s612_s20 + $0xa8] sm:$0xff] }
  0x13   : > { %v201_v14 = vld [vmem:[%s612_s20 + $0xd8] sm:$0xff]  ;;  %v202_v18 = vld [vmem:[%s612_s20 + $0xe0] sm:$0xff]  ;;  %v203_v22 = vld [vmem:[%s612_s20 + $0xe8] sm:$0xff] }
  0x14   : > { %v177_v15 = vld [vmem:[%s612_s20 + $0x18] sm:$0xff]  ;;  %v178_v19 = vld [vmem:[%s612_s20 + $0x20] sm:$0xff]  ;;  %v179_v23 = vld [vmem:[%s612_s20 + $0x28] sm:$0xff] }
  0x15   : > { %v185_v16 = vld [vmem:[%s612_s20 + $0x58] sm:$0xff]  ;;  %v186_v20 = vld [vmem:[%s612_s20 + $0x60] sm:$0xff]  ;;  %v187_v24 = vld [vmem:[%s612_s20 + $0x68] sm:$0xff] }
  0x16   : > { %v196_v25 = vld [vmem:[%s612_s20 + $0xb0] sm:$0xff]  ;;  %v197_v29 = vld [vmem:[%s612_s20 + $0xb8] sm:$0xff] }
  0x17   : > { %536 = vmatmul.msk.f32.gmra.mxu2 %vm211_vm0, %v191_v5  ;;  %v204_v26 = vld [vmem:[%s612_s20 + $0xf0] sm:$0xff]  ;;  %v205_v30 = vld [vmem:[%s612_s20 + $0xf8] sm:$0xff] }
  0x18   : > { %544 = vmatmul.msk.f32.gmra.mxu3 %vm211_vm0, %v199_v6  ;;  %v180_v27 = vld [vmem:[%s612_s20 + $0x30] sm:$0xff]  ;;  %v181_v31 = vld [vmem:[%s612_s20 + $0x38] sm:$0xff] }
  0x19   : > { %520 = vmatmul.msk.f32.gmra.mxu0 %vm211_vm0, %v175_v7  ;;  %v188_v28 = vld [vmem:[%s612_s20 + $0x70] sm:$0xff]  ;;  %v189_v32 = vld [vmem:[%s612_s20 + $0x78] sm:$0xff] }
  0x1a   : > { %528 = vmatmul.msk.f32.gmra.mxu1 %vm211_vm0, %v183_v8 }
  0x1f   : > { %537 = vmatmul.msk.f32.gmra.mxu2 %vm211_vm0, %v192_v9 }
  0x20   : > { %545 = vmatmul.msk.f32.gmra.mxu3 %vm211_vm0, %v200_v10 }
  0x21   : > { %521 = vmatmul.msk.f32.gmra.mxu0 %vm211_vm0, %v176_v11 }
  0x22   : > { %529 = vmatmul.msk.f32.gmra.mxu1 %vm211_vm0, %v184_v12 }
  0x27   : > { %538 = vmatmul.msk.f32.gmra.mxu2 %vm211_vm0, %v193_v13 }
  0x28   : > { %546 = vmatmul.msk.f32.gmra.mxu3 %vm211_vm0, %v201_v14 }
  0x29   : > { %522 = vmatmul.msk.f32.gmra.mxu0 %vm211_vm0, %v177_v15 }
  0x2a   : > { %530 = vmatmul.msk.f32.gmra.mxu1 %vm211_vm0, %v185_v16 }
  0x2f   : > { %539 = vmatmul.msk.f32.gmra.mxu2 %vm211_vm0, %v194_v17 }
  0x30   : > { %547 = vmatmul.msk.f32.gmra.mxu3 %vm211_vm0, %v202_v18 }
  0x31   : > { %523 = vmatmul.msk.f32.gmra.mxu0 %vm211_vm0, %v178_v19 }
  0x32   : > { %531 = vmatmul.msk.f32.gmra.mxu1 %vm211_vm0, %v186_v20 }
  0x37   : > { %540 = vmatmul.msk.f32.gmra.mxu2 %vm211_vm0, %v195_v21 }
  0x38   : > { %548 = vmatmul.msk.f32.gmra.mxu3 %vm211_vm0, %v203_v22 }
  0x39   : > { %524 = vmatmul.msk.f32.gmra.mxu0 %vm211_vm0, %v179_v23 }
  0x3a   : > { %532 = vmatmul.msk.f32.gmra.mxu1 %vm211_vm0, %v187_v24 }
  0x3f   : > { %541 = vmatmul.msk.f32.gmra.mxu2 %vm211_vm0, %v196_v25 }
  0x40   : > { %549 = vmatmul.msk.f32.gmra.mxu3 %vm211_vm0, %v204_v26 }
  0x41   : > { %525 = vmatmul.msk.f32.gmra.mxu0 %vm211_vm0, %v180_v27 }
  0x42   : > { %533 = vmatmul.msk.f32.gmra.mxu1 %vm211_vm0, %v188_v28 }
  0x47   : > { %542 = vmatmul.msk.f32.gmra.mxu2 %vm211_vm0, %v197_v29 }
  0x48   : > { %550 = vmatmul.msk.f32.gmra.mxu3 %vm211_vm0, %v205_v30 }
  0x49   : > { %526 = vmatmul.msk.f32.gmra.mxu0 %vm211_vm0, %v181_v31 }
  0x4a   : > { %534 = vmatmul.msk.f32.gmra.mxu1 %vm211_vm0, %v189_v32 }
  0x8e   : > { %v325_v34 = vpop.f32.mrf.mxu0 }
  0x8f   : > { %v349_v35 = vpop.f32.mrf.mxu1  ;;  %v326_v36 = vadd.f32 %v681_v33, %v325_v34 }
  0x90   : > { %v350_v37 = vadd.f32 %v681_v33, %v349_v35 }
  0x91   : > { %422 = vst.msk [vmem:[%s688_s25] sm:$0xff] %vm421_vm1, %v326_v36 }
  0x92   : > { %430 = vst.msk [vmem:[%s688_s25 + $0x40] sm:$0xff] %vm421_vm1, %v350_v37  ;;  %v373_v38 = vpop.f32.mrf.mxu2 }
  0x93   : > { %v397_v39 = vpop.f32.mrf.mxu3  ;;  %v374_v40 = vadd.f32 %v681_v33, %v373_v38 }
  0x94   : > { %v398_v41 = vadd.f32 %v681_v33, %v397_v39 }
  0x95   : > { %438 = vst.msk [vmem:[%s688_s25 + $0x80] sm:$0xff] %vm421_vm1, %v374_v40 }
  0x96   : > { %v328_v42 = vpop.f32.mrf.mxu0  ;;  %446 = vst.msk [vmem:[%s688_s25 + $0xc0] sm:$0xff] %vm421_vm1, %v398_v41 }
  0x97   : > { %v352_v43 = vpop.f32.mrf.mxu1  ;;  %v329_v44 = vadd.f32 %v681_v33, %v328_v42 }
  0x98   : > { %v353_v45 = vadd.f32 %v681_v33, %v352_v43 }
  0x99   : > { %423 = vst.msk [vmem:[%s688_s25 + $0x8] sm:$0xff] %vm421_vm1, %v329_v44 }
  0x9a   : > { %431 = vst.msk [vmem:[%s688_s25 + $0x48] sm:$0xff] %vm421_vm1, %v353_v45  ;;  %v376_v46 = vpop.f32.mrf.mxu2 }
  0x9b   : > { %v400_v47 = vpop.f32.mrf.mxu3  ;;  %v377_v48 = vadd.f32 %v681_v33, %v376_v46 }
  0x9c   : > { %v401_v49 = vadd.f32 %v681_v33, %v400_v47 }
  0x9d   : > { %439 = vst.msk [vmem:[%s688_s25 + $0x88] sm:$0xff] %vm421_vm1, %v377_v48 }
  0x9e   : > { %v331_v50 = vpop.f32.mrf.mxu0  ;;  %447 = vst.msk [vmem:[%s688_s25 + $0xc8] sm:$0xff] %vm421_vm1, %v401_v49 }
  0x9f   : > { %v355_v51 = vpop.f32.mrf.mxu1  ;;  %v332_v52 = vadd.f32 %v681_v33, %v331_v50 }
  0xa0   : > { %v356_v53 = vadd.f32 %v681_v33, %v355_v51 }
  0xa1   : > { %424 = vst.msk [vmem:[%s688_s25 + $0x10] sm:$0xff] %vm421_vm1, %v332_v52 }
  0xa2   : > { %432 = vst.msk [vmem:[%s688_s25 + $0x50] sm:$0xff] %vm421_vm1, %v356_v53  ;;  %v379_v54 = vpop.f32.mrf.mxu2 }
  0xa3   : > { %v403_v55 = vpop.f32.mrf.mxu3  ;;  %v380_v56 = vadd.f32 %v681_v33, %v379_v54 }
  0xa4   : > { %v404_v57 = vadd.f32 %v681_v33, %v403_v55 }
  0xa5   : > { %440 = vst.msk [vmem:[%s688_s25 + $0x90] sm:$0xff] %vm421_vm1, %v380_v56 }
  0xa6   : > { %v334_v58 = vpop.f32.mrf.mxu0  ;;  %448 = vst.msk [vmem:[%s688_s25 + $0xd0] sm:$0xff] %vm421_vm1, %v404_v57 }
  0xa7   : > { %v358_v59 = vpop.f32.mrf.mxu1  ;;  %v335_v60 = vadd.f32 %v681_v33, %v334_v58 }
  0xa8   : > { %v359_v61 = vadd.f32 %v681_v33, %v358_v59 }
  0xa9   : > { %425 = vst.msk [vmem:[%s688_s25 + $0x18] sm:$0xff] %vm421_vm1, %v335_v60 }
  0xaa   : > { %433 = vst.msk [vmem:[%s688_s25 + $0x58] sm:$0xff] %vm421_vm1, %v359_v61  ;;  %v382_v62 = vpop.f32.mrf.mxu2 }
  0xab   : > { %v406_v63 = vpop.f32.mrf.mxu3  ;;  %v383_v0 = vadd.f32 %v681_v33, %v382_v62 }
  0xac   : > { %v407_v1 = vadd.f32 %v681_v33, %v406_v63 }
  0xad   : > { %441 = vst.msk [vmem:[%s688_s25 + $0x98] sm:$0xff] %vm421_vm1, %v383_v0 }
  0xae   : > { %v337_v2 = vpop.f32.mrf.mxu0  ;;  %449 = vst.msk [vmem:[%s688_s25 + $0xd8] sm:$0xff] %vm421_vm1, %v407_v1 }
  0xaf   : > { %v361_v3 = vpop.f32.mrf.mxu1  ;;  %v338_v4 = vadd.f32 %v681_v33, %v337_v2 }
  0xb0   : > { %v362_v5 = vadd.f32 %v681_v33, %v361_v3 }
  0xb1   : > { %426 = vst.msk [vmem:[%s688_s25 + $0x20] sm:$0xff] %vm421_vm1, %v338_v4 }
  0xb2   : > { %434 = vst.msk [vmem:[%s688_s25 + $0x60] sm:$0xff] %vm421_vm1, %v362_v5  ;;  %v385_v6 = vpop.f32.mrf.mxu2 }
  0xb3   : > { %v409_v7 = vpop.f32.mrf.mxu3  ;;  %v386_v8 = vadd.f32 %v681_v33, %v385_v6 }
  0xb4   : > { %v410_v9 = vadd.f32 %v681_v33, %v409_v7 }
  0xb5   : > { %442 = vst.msk [vmem:[%s688_s25 + $0xa0] sm:$0xff] %vm421_vm1, %v386_v8 }
  0xb6   : > { %v340_v10 = vpop.f32.mrf.mxu0  ;;  %450 = vst.msk [vmem:[%s688_s25 + $0xe0] sm:$0xff] %vm421_vm1, %v410_v9 }
  0xb7   : > { %v364_v11 = vpop.f32.mrf.mxu1  ;;  %v341_v12 = vadd.f32 %v681_v33, %v340_v10 }
  0xb8   : > { %v365_v13 = vadd.f32 %v681_v33, %v364_v11 }
  0xb9   : > { %427 = vst.msk [vmem:[%s688_s25 + $0x28] sm:$0xff] %vm421_vm1, %v341_v12 }
  0xba   : > { %435 = vst.msk [vmem:[%s688_s25 + $0x68] sm:$0xff] %vm421_vm1, %v365_v13  ;;  %v388_v14 = vpop.f32.mrf.mxu2 }
  0xbb   : > { %v412_v15 = vpop.f32.mrf.mxu3  ;;  %v389_v16 = vadd.f32 %v681_v33, %v388_v14 }
  0xbc   : > { %v413_v17 = vadd.f32 %v681_v33, %v412_v15 }
  0xbd   : > { %443 = vst.msk [vmem:[%s688_s25 + $0xa8] sm:$0xff] %vm421_vm1, %v389_v16 }
  0xbe   : > { %v343_v18 = vpop.f32.mrf.mxu0  ;;  %451 = vst.msk [vmem:[%s688_s25 + $0xe8] sm:$0xff] %vm421_vm1, %v413_v17 }
  0xbf   : > { %v367_v19 = vpop.f32.mrf.mxu1  ;;  %v344_v20 = vadd.f32 %v681_v33, %v343_v18 }
  0xc0   : > { %v368_v21 = vadd.f32 %v681_v33, %v367_v19 }
  0xc1   : > { %428 = vst.msk [vmem:[%s688_s25 + $0x30] sm:$0xff] %vm421_vm1, %v344_v20 }
  0xc2   : > { %436 = vst.msk [vmem:[%s688_s25 + $0x70] sm:$0xff] %vm421_vm1, %v368_v21  ;;  %v391_v22 = vpop.f32.mrf.mxu2 }
  0xc3   : > { %v415_v23 = vpop.f32.mrf.mxu3  ;;  %v392_v24 = vadd.f32 %v681_v33, %v391_v22 }
  0xc4   : > { %v416_v25 = vadd.f32 %v681_v33, %v415_v23 }
  0xc5   : > { %444 = vst.msk [vmem:[%s688_s25 + $0xb0] sm:$0xff] %vm421_vm1, %v392_v24 }
  0xc6   : > { %v346_v26 = vpop.f32.mrf.mxu0  ;;  %452 = vst.msk [vmem:[%s688_s25 + $0xf0] sm:$0xff] %vm421_vm1, %v416_v25 }
  0xc7   : > { %v370_v27 = vpop.f32.mrf.mxu1  ;;  %v347_v28 = vadd.f32 %v681_v33, %v346_v26 }
  0xc8   : > { %v371_v29 = vadd.f32 %v681_v33, %v370_v27 }
  0xc9   : > { %429 = vst.msk [vmem:[%s688_s25 + $0x38] sm:$0xff] %vm421_vm1, %v347_v28 }
  0xca   : > { %437 = vst.msk [vmem:[%s688_s25 + $0x78] sm:$0xff] %vm421_vm1, %v371_v29  ;;  %v394_v30 = vpop.f32.mrf.mxu2 }
  0xcb   : > { %v418_v31 = vpop.f32.mrf.mxu3  ;;  %v395_v32 = vadd.f32 %v681_v33, %v394_v30 }
  0xcc   : > { %v419_v34 = vadd.f32 %v681_v33, %v418_v31 }
  0xcd   : > { %445 = vst.msk [vmem:[%s688_s25 + $0xb8] sm:$0xff] %vm421_vm1, %v395_v32 }
  0xce   : > { %453 = vst.msk [vmem:[%s688_s25 + $0xf8] sm:$0xff] %vm421_vm1, %v419_v34 }
  0xcf PF: > { %s13_s12 = sadd.s32 1, %s571_s12  }
  0xd0   : > { %p10_p4 = scmp.ge.s32.totalorder %s13_s12, 4  }
  0xd2   :  { %12 = sbr.rel (!%p10_p4) target bundleno = 1 (0x1), region = 62 }

// kernel: custom-call.2
= control target key start
LH: loop header
LB: loop body
LE: loop exit
PB: predicated region body
PF: predicated region fallthrough
CT: control target
= control target key end

     0   :  { %2 = vsyncpa [#allocation0], 0  ;;  %s55_s0 = inlined_call_operand.hbm [shape: c64[16,16,4,4], index: 0, kind: input, shape index: {}]   ;;  %s56_s1 = inlined_call_operand.vmem [shape: f32[16,16,4,4], index: 1, kind: output, shape index: {}]  }
   0x1   :  { %s4_s8 = sshll.u32 %s55_s0, 4  ;;  %s6_s11 = sshll.u32 %s56_s1, 4  ;;  %s5_s8 = int_to_ptr.hbm [resolvable:$true] %s4_s8  ;;  %s7_s11 = int_to_ptr.vmem [resolvable:$true] %s6_s11 }
   0x2   :  { %9 = dma.hbm_to_vmem [thread:$0]  %s5_s8, 4096, %s7_s11, [#allocation0] }
   0x3   :  { %37 = dma.done.wait [#allocation0], 4096  }
   0x4   :  { %38 = vsyncadd [#allocation0], 4294963200 }
   0x5   :  { %12 = vsyncpa [#allocation0], 1 }

// kernel: custom-call.3
= control target key start
LH: loop header
LB: loop body
LE: loop exit
PB: predicated region body
PF: predicated region fallthrough
CT: control target
= control target key end

     0   :  { %s56_s0 = inlined_call_operand.hbm [shape: c64[16,16,4,4], index: 0, kind: input, shape index: {}]   ;;  %s57_s1 = inlined_call_operand.vmem [shape: f32[16,16,4,4], index: 1, kind: output, shape index: {}]  }
   0x1   :  { %s2_s8 = scalar_lea.hbm %s56_s0, 256 }
   0x2   :  { %3 = vsyncpa [#allocation0], 0  ;;  %s5_s9 = sshll.u32 %s2_s8, 4  ;;  %s7_s12 = sshll.u32 %s57_s1, 4  ;;  %s6_s9 = int_to_ptr.hbm [resolvable:$true] %s5_s9  ;;  %s8_s12 = int_to_ptr.vmem [resolvable:$true] %s7_s12 }
   0x3   :  { %10 = dma.hbm_to_vmem [thread:$0]  %s6_s9, 4096, %s8_s12, [#allocation0] }
   0x4   :  { %38 = dma.done.wait [#allocation0], 4096  }
   0x5   :  { %39 = vsyncadd [#allocation0], 4294963200 }
   0x6   :  { %13 = vsyncpa [#allocation0], 1 }

// kernel: reverse.6
= control target key start
LH: loop header
LB: loop body
LE: loop exit
PB: predicated region body
PF: predicated region fallthrough
CT: control target
= control target key end

     0   :  { %s392_s0 = inlined_call_operand.vmem [shape: f32[2,16,18,8], index: 0, kind: input, shape index: {}]   ;;  %s393_s1 = inlined_call_operand.vmem [shape: f32[2,16,18,8], index: 1, kind: output, shape index: {}]  }
   0x1   :  { %v128_v0 = vld [vmem:[%s392_s0 + $0x70] sm:$0xff]  ;;  %v131_v2 = vld [vmem:[%s392_s0 + $0x60] sm:$0xff]  ;;  %v158_v16 = vld [vmem:[%s392_s0 + $0x78] sm:$0xff] }
   0x2   :  { %v129_v1 = vld [vmem:[%s392_s0 + $0xf0] sm:$0xff]  ;;  %4 = vst [vmem:[%s393_s1] sm:$0xff] %v128_v0  ;;  %v133_v3 = vld [vmem:[%s392_s0 + $0xe0] sm:$0xff]  ;;  %v160_v17 = vld [vmem:[%s392_s0 + $0xf8] sm:$0xff] }
   0x3   :  { %130 = vst [vmem:[%s393_s1 + $0x80] sm:$0xff] %v129_v1  ;;  %v135_v4 = vld [vmem:[%s392_s0 + $0x50] sm:$0xff]  ;;  %v139_v6 = vld [vmem:[%s392_s0 + $0x40] sm:$0xff]  ;;  %v162_v18 = vld [vmem:[%s392_s0 + $0x68] sm:$0xff] }
   0x4   :  { %132 = vst [vmem:[%s393_s1 + $0x10] sm:$0xff] %v131_v2  ;;  %v137_v5 = vld [vmem:[%s392_s0 + $0xd0] sm:$0xff]  ;;  %v141_v7 = vld [vmem:[%s392_s0 + $0xc0] sm:$0xff]  ;;  %v164_v19 = vld [vmem:[%s392_s0 + $0xe8] sm:$0xff] }
   0x5   :  { %134 = vst [vmem:[%s393_s1 + $0x90] sm:$0xff] %v133_v3  ;;  %v143_v8 = vld [vmem:[%s392_s0 + $0x30] sm:$0xff]  ;;  %v147_v10 = vld [vmem:[%s392_s0 + $0x20] sm:$0xff]  ;;  %v166_v20 = vld [vmem:[%s392_s0 + $0x58] sm:$0xff] }
   0x6   :  { %136 = vst [vmem:[%s393_s1 + $0x20] sm:$0xff] %v135_v4  ;;  %v145_v9 = vld [vmem:[%s392_s0 + $0xb0] sm:$0xff]  ;;  %v149_v11 = vld [vmem:[%s392_s0 + $0xa0] sm:$0xff]  ;;  %v168_v21 = vld [vmem:[%s392_s0 + $0xd8] sm:$0xff] }
   0x7   :  { %138 = vst [vmem:[%s393_s1 + $0xa0] sm:$0xff] %v137_v5  ;;  %v151_v12 = vld [vmem:[%s392_s0 + $0x10] sm:$0xff]  ;;  %v57_v14 = vld [vmem:[%s392_s0] sm:$0xff]  ;;  %v170_v22 = vld [vmem:[%s392_s0 + $0x48] sm:$0xff] }
   0x8   :  { %140 = vst [vmem:[%s393_s1 + $0x30] sm:$0xff] %v139_v6  ;;  %v153_v13 = vld [vmem:[%s392_s0 + $0x90] sm:$0xff]  ;;  %v156_v15 = vld [vmem:[%s392_s0 + $0x80] sm:$0xff]  ;;  %v172_v23 = vld [vmem:[%s392_s0 + $0xc8] sm:$0xff] }
   0x9   :  { %142 = vst [vmem:[%s393_s1 + $0xb0] sm:$0xff] %v141_v7  ;;  %v174_v24 = vld [vmem:[%s392_s0 + $0x38] sm:$0xff]  ;;  %v178_v26 = vld [vmem:[%s392_s0 + $0x28] sm:$0xff] }
   0xa   :  { %144 = vst [vmem:[%s393_s1 + $0x40] sm:$0xff] %v143_v8  ;;  %v176_v25 = vld [vmem:[%s392_s0 + $0xb8] sm:$0xff]  ;;  %v180_v27 = vld [vmem:[%s392_s0 + $0xa8] sm:$0xff] }
   0xb   :  { %146 = vst [vmem:[%s393_s1 + $0xc0] sm:$0xff] %v145_v9  ;;  %v182_v28 = vld [vmem:[%s392_s0 + $0x18] sm:$0xff]  ;;  %v186_v30 = vld [vmem:[%s392_s0 + $0x8] sm:$0xff] }
   0xc   :  { %148 = vst [vmem:[%s393_s1 + $0x50] sm:$0xff] %v147_v10  ;;  %v184_v29 = vld [vmem:[%s392_s0 + $0x98] sm:$0xff]  ;;  %v188_v31 = vld [vmem:[%s392_s0 + $0x88] sm:$0xff] }
   0xd   :  { %150 = vst [vmem:[%s393_s1 + $0xd0] sm:$0xff] %v149_v11 }
   0xe   :  { %152 = vst [vmem:[%s393_s1 + $0x60] sm:$0xff] %v151_v12 }
   0xf   :  { %154 = vst [vmem:[%s393_s1 + $0xe0] sm:$0xff] %v153_v13 }
  0x10   :  { %155 = vst [vmem:[%s393_s1 + $0x70] sm:$0xff] %v57_v14 }
  0x11   :  { %157 = vst [vmem:[%s393_s1 + $0xf0] sm:$0xff] %v156_v15 }
  0x12   :  { %159 = vst [vmem:[%s393_s1 + $0x8] sm:$0xff] %v158_v16 }
  0x13   :  { %161 = vst [vmem:[%s393_s1 + $0x88] sm:$0xff] %v160_v17 }
  0x14   :  { %163 = vst [vmem:[%s393_s1 + $0x18] sm:$0xff] %v162_v18 }
  0x15   :  { %165 = vst [vmem:[%s393_s1 + $0x98] sm:$0xff] %v164_v19 }
  0x16   :  { %167 = vst [vmem:[%s393_s1 + $0x28] sm:$0xff] %v166_v20 }
  0x17   :  { %169 = vst [vmem:[%s393_s1 + $0xa8] sm:$0xff] %v168_v21 }
  0x18   :  { %171 = vst [vmem:[%s393_s1 + $0x38] sm:$0xff] %v170_v22 }
  0x19   :  { %173 = vst [vmem:[%s393_s1 + $0xb8] sm:$0xff] %v172_v23 }
  0x1a   :  { %175 = vst [vmem:[%s393_s1 + $0x48] sm:$0xff] %v174_v24 }
  0x1b   :  { %177 = vst [vmem:[%s393_s1 + $0xc8] sm:$0xff] %v176_v25 }
  0x1c   :  { %179 = vst [vmem:[%s393_s1 + $0x58] sm:$0xff] %v178_v26 }
  0x1d   :  { %181 = vst [vmem:[%s393_s1 + $0xd8] sm:$0xff] %v180_v27 }
  0x1e   :  { %183 = vst [vmem:[%s393_s1 + $0x68] sm:$0xff] %v182_v28 }
  0x1f   :  { %185 = vst [vmem:[%s393_s1 + $0xe8] sm:$0xff] %v184_v29 }
  0x20   :  { %187 = vst [vmem:[%s393_s1 + $0x78] sm:$0xff] %v186_v30 }
  0x21   :  { %189 = vst [vmem:[%s393_s1 + $0xf8] sm:$0xff] %v188_v31 }

// kernel: fnf2d_forward.7
= control target key start
LH: loop header
LB: loop body
LE: loop exit
PB: predicated region body
PF: predicated region fallthrough
CT: control target
= control target key end

     0   :  { %s1862_s15 = smov 0   ;;  %s2952_s0 = inlined_call_operand.vmem [shape: f32[648,16], index: 0, kind: input, shape index: {}]   ;;  %s2953_s1 = inlined_call_operand.vmem [shape: f32[16,16], index: 1, kind: input, shape index: {}]   ;;  %s2954_s2 = inlined_call_operand.vmem [shape: f32[1,16], index: 2, kind: input, shape index: {}]   ;;  %s2955_s3 = inlined_call_operand.vmem [shape: f32[648,16], index: 3, kind: input, shape index: {}]   ;;  %s2956_s4 = inlined_call_operand.vmem [shape: f32[648,16], index: 4, kind: output, shape index: {}]  }
   0x1 LB: > { %s1665_s16 = sadd.s32 4294967295, %s1834_s15   ;;  %p1669_p0 = scmp.ge.s32.totalorder %s1834_s15, 1  ;;  %s1834_s15 = sphi %s1862_s15, %s14_s15  }
   0x2   : > { %p174_p1 = scmp.lt.s32.totalorder %s1834_s15, 4 }
   0x4   : > { %p175_p2 = pnand %p1669_p0, %p174_p1 }
   0x5   : > { %s205_s21 = smul.u32 (!%p175_p2), 27, %s1665_s16 }
   0x6   : > { %178 = sbr.rel (%p175_p2) target bundleno = 439 (0x1b7), region = 36 }
   0x7   : > { %p206_p3 = scmp.lt.s32.totalorder (!%p175_p2), %s205_s21, 80 }
   0xb   : > { %v251_v0 = vld [vmem:[%s2953_s1 + $0x8] sm:$0xff]  ;;  %v250_v1 = vld [vmem:[%s2953_s1] sm:$0xff]  ;;  %s2970_s21 = smov (!%p206_p3, %s205_s21), 80  ;;  %vm256_vm0 = vcmask 130048   ;;  %v1836_v63 = vmov -1.0  }
   0xc   : > { %352 = vmatpush.msra.mxu0 %v251_v0  ;;  %1702 = vmatpush.msra.mxu1 %v251_v0  ;;  %s1876_s22 = sshll.u32 %s2970_s21, 3  ;;  %v1947_v29 = vld [vmem:[%s2954_s2] ss:$0 sm:$0xff] }
   0xd   : > { %1703 = vmatpush.msra.mxu2 %v251_v0  ;;  %1704 = vmatpush.msra.mxu3 %v251_v0  ;;  %s1882_s25 = scalar_lea.vmem %s2952_s0, %s1876_s22  ;;  %s1942_s28 = scalar_lea.vmem %s2955_s3, %s1876_s22 }
   0xe   : > { %353 = vmatpush.msra.mxu0 %v250_v1  ;;  %1705 = vmatpush.msra.mxu1 %v250_v1  ;;  %v223_v2 = vld [vmem:[%s1882_s25] sm:$0xff]  ;;  %v230_v3 = vld [vmem:[%s1882_s25 + $0x38] sm:$0xff]  ;;  %v237_v4 = vld [vmem:[%s1882_s25 + $0x70] sm:$0xff]  ;;  %s2124_s7 = scalar_lea.vmem %s2956_s4, %s1876_s22 }
   0xf   : > { %1706 = vmatpush.msra.mxu2 %v250_v1  ;;  %1707 = vmatpush.msra.mxu3 %v250_v1  ;;  %v244_v5 = vld [vmem:[%s1882_s25 + $0xa8] sm:$0xff]  ;;  %v231_v7 = vld [vmem:[%s1882_s25 + $0x40] sm:$0xff]  ;;  %v238_v8 = vld [vmem:[%s1882_s25 + $0x78] sm:$0xff] }
  0x10   : > { %1673 = vmatmul.msk.f32.vlgmr.msra.gmra.mxu0 %vm256_vm0, %v223_v2  ;;  %1680 = vmatmul.msk.f32.vlgmr.msra.gmra.mxu1 %vm256_vm0, %v230_v3  ;;  %v224_v6 = vld [vmem:[%s1882_s25 + $0x8] sm:$0xff]  ;;  %v245_v9 = vld [vmem:[%s1882_s25 + $0xb0] sm:$0xff]  ;;  %v239_v12 = vld [vmem:[%s1882_s25 + $0x80] sm:$0xff] }
  0x11   : > { %1687 = vmatmul.msk.f32.vlgmr.msra.gmra.mxu2 %vm256_vm0, %v237_v4  ;;  %1694 = vmatmul.msk.f32.vlgmr.msra.gmra.mxu3 %vm256_vm0, %v244_v5  ;;  %v225_v10 = vld [vmem:[%s1882_s25 + $0x10] sm:$0xff]  ;;  %v232_v11 = vld [vmem:[%s1882_s25 + $0x48] sm:$0xff]  ;;  %v246_v13 = vld [vmem:[%s1882_s25 + $0xb8] sm:$0xff] }
  0x12   : > { %v226_v14 = vld [vmem:[%s1882_s25 + $0x18] sm:$0xff]  ;;  %v233_v15 = vld [vmem:[%s1882_s25 + $0x50] sm:$0xff]  ;;  %v240_v16 = vld [vmem:[%s1882_s25 + $0x88] sm:$0xff] }
  0x13   : > { %v247_v17 = vld [vmem:[%s1882_s25 + $0xc0] sm:$0xff]  ;;  %v234_v19 = vld [vmem:[%s1882_s25 + $0x58] sm:$0xff]  ;;  %v241_v20 = vld [vmem:[%s1882_s25 + $0x90] sm:$0xff] }
  0x14   : > { %v227_v18 = vld [vmem:[%s1882_s25 + $0x20] sm:$0xff]  ;;  %v248_v21 = vld [vmem:[%s1882_s25 + $0xc8] sm:$0xff]  ;;  %v242_v24 = vld [vmem:[%s1882_s25 + $0x98] sm:$0xff] }
  0x15   : > { %v228_v22 = vld [vmem:[%s1882_s25 + $0x28] sm:$0xff]  ;;  %v235_v23 = vld [vmem:[%s1882_s25 + $0x60] sm:$0xff]  ;;  %v249_v25 = vld [vmem:[%s1882_s25 + $0xd0] sm:$0xff] }
  0x16   : > { %v229_v26 = vld [vmem:[%s1882_s25 + $0x30] sm:$0xff]  ;;  %v236_v27 = vld [vmem:[%s1882_s25 + $0x68] sm:$0xff]  ;;  %v243_v28 = vld [vmem:[%s1882_s25 + $0xa0] sm:$0xff] }
  0x17   : > { %v436_v31 = vld [vmem:[%s1942_s28] sm:$0xff]  ;;  %v443_v33 = vld [vmem:[%s1942_s28 + $0x38] sm:$0xff]  ;;  %v450_v43 = vld [vmem:[%s1942_s28 + $0x70] sm:$0xff] }
  0x18   : > { %1674 = vmatmul.msk.f32.gmra.mxu0 %vm256_vm0, %v224_v6  ;;  %1681 = vmatmul.msk.f32.gmra.mxu1 %vm256_vm0, %v231_v7  ;;  %v457_v45 = vld [vmem:[%s1942_s28 + $0xa8] sm:$0xff] }
  0x19   : > { %1688 = vmatmul.msk.f32.gmra.mxu2 %vm256_vm0, %v238_v8  ;;  %1695 = vmatmul.msk.f32.gmra.mxu3 %vm256_vm0, %v245_v9 }
  0x20   : > { %1675 = vmatmul.msk.f32.gmra.mxu0 %vm256_vm0, %v225_v10  ;;  %1682 = vmatmul.msk.f32.gmra.mxu1 %vm256_vm0, %v232_v11 }
  0x21   : > { %1689 = vmatmul.msk.f32.gmra.mxu2 %vm256_vm0, %v239_v12  ;;  %1696 = vmatmul.msk.f32.gmra.mxu3 %vm256_vm0, %v246_v13 }
  0x28   : > { %1676 = vmatmul.msk.f32.gmra.mxu0 %vm256_vm0, %v226_v14  ;;  %1683 = vmatmul.msk.f32.gmra.mxu1 %vm256_vm0, %v233_v15 }
  0x29   : > { %1690 = vmatmul.msk.f32.gmra.mxu2 %vm256_vm0, %v240_v16  ;;  %1697 = vmatmul.msk.f32.gmra.mxu3 %vm256_vm0, %v247_v17  ;;  %v437_v16 = vld [vmem:[%s1942_s28 + $0x8] sm:$0xff] }
  0x30   : > { %1677 = vmatmul.msk.f32.gmra.mxu0 %vm256_vm0, %v227_v18  ;;  %1684 = vmatmul.msk.f32.gmra.mxu1 %vm256_vm0, %v234_v19 }
  0x31   : > { %1691 = vmatmul.msk.f32.gmra.mxu2 %vm256_vm0, %v241_v20  ;;  %1698 = vmatmul.msk.f32.gmra.mxu3 %vm256_vm0, %v248_v21  ;;  %v444_v20 = vld [vmem:[%s1942_s28 + $0x40] sm:$0xff] }
  0x38   : > { %1678 = vmatmul.msk.f32.gmra.mxu0 %vm256_vm0, %v228_v22  ;;  %1685 = vmatmul.msk.f32.gmra.mxu1 %vm256_vm0, %v235_v23 }
  0x39   : > { %1692 = vmatmul.msk.f32.gmra.mxu2 %vm256_vm0, %v242_v24  ;;  %1699 = vmatmul.msk.f32.gmra.mxu3 %vm256_vm0, %v249_v25 }
  0x40   : > { %1679 = vmatmul.msk.f32.gmra.mxu0 %vm256_vm0, %v229_v26  ;;  %1686 = vmatmul.msk.f32.gmra.mxu1 %vm256_vm0, %v236_v27 }
  0x41   : > { %1693 = vmatmul.msk.f32.gmra.mxu2 %vm256_vm0, %v243_v28 }
  0x8d   : > { %v355_v30 = vpop.f32.mrf.mxu0  ;;  %v376_v32 = vpop.f32.mrf.mxu1 }
  0x8e   : > { %v356_v34 = vadd.f32 %v1947_v29, %v355_v30  ;;  %v377_v35 = vadd.f32 %v1947_v29, %v376_v32 }
  0x90   : > { %v463_v36 = vadd.f32 %v436_v31, %v356_v34  ;;  %v470_v37 = vadd.f32 %v443_v33, %v377_v35 }
  0x92   : > { %v517_v38 = vmul.f32 0.70710677, %v463_v36  ;;  %v524_v39 = vmul.f32 0.70710677, %v470_v37  ;;  %v1971_v62 = vmul.f32 0.5, %v463_v36  ;;  %v1976_v2 = vmul.f32 0.5, %v470_v37 }
  0x94   : > { %v598_v40 = vand.u32 2147483647, %v517_v38  ;;  %v605_v41 = vand.u32 2147483647, %v524_v39  ;;  %v397_v42 = vpop.f32.mrf.mxu2  ;;  %v418_v44 = vpop.f32.mrf.mxu3  ;;  %vm544_vm1 = vcmp.ge.f32.partialorder %v517_v38, 0.0  ;;  %vm551_vm2 = vcmp.ge.f32.partialorder %v524_v39, 0.0 }
  0x95   : > { %v398_v46 = vadd.f32 %v1947_v29, %v397_v42  ;;  %v419_v47 = vadd.f32 %v1947_v29, %v418_v44  ;;  %v358_v60 = vpop.f32.mrf.mxu0  ;;  %v379_v61 = vpop.f32.mrf.mxu1  ;;  %v1974_v0 = vsel %vm544_vm1, 1.0, %v1836_v63  ;;  %v1979_v4 = vsel %vm551_vm2, 1.0, %v1836_v63 }
  0x96   : > { %v625_v48 = vmul.f32 0.3275911, %v598_v40  ;;  %v632_v49 = vmul.f32 0.3275911, %v605_v41  ;;  %v1327_v54 = vsub.f32 0.0, %v598_v40  ;;  %v1334_v57 = vsub.f32 0.0, %v605_v41 }
  0x97   : > { %v1957_v50 = vadd.f32 %v450_v43, %v398_v46  ;;  %v1959_v51 = vadd.f32 %v457_v45, %v419_v47  ;;  %v359_v9 = vadd.f32 %v1947_v29, %v358_v60  ;;  %v380_v10 = vadd.f32 %v1947_v29, %v379_v61 }
  0x98   : > { %v652_v52 = vadd.f32 1.0, %v625_v48  ;;  %v1961_v53 = vadd.f32 1.0, %v632_v49  ;;  %v1354_v58 = vmul.f32 %v1327_v54, %v598_v40  ;;  %v1361_v8 = vmul.f32 %v1334_v57, %v605_v41 }
  0x99   : > { %v1964_v55 = vmul.f32 0.70710677, %v1957_v50  ;;  %v1968_v56 = vmul.f32 0.70710677, %v1959_v51  ;;  %v1999_v27 = vadd.f32 %v437_v16, %v359_v9  ;;  %v2001_v31 = vadd.f32 %v444_v20, %v380_v10 }
  0x9a   : > { %1718 = vrcp.f32 %v652_v52  ;;  %v688_v1 = vand.u32 2147483647, %v652_v52  ;;  %v690_v3 = vand.u32 2147483648, %v652_v52  ;;  %vm684_vm3 = vweird.f32 %v652_v52 }
  0x9b   : > { %1720 = vrcp.f32 %v1961_v53  ;;  %v612_v59 = vand.u32 2147483647, %v1964_v55  ;;  %v619_v6 = vand.u32 2147483647, %v1968_v56  ;;  %v1381_v13 = vmul.f32 1.442695, %v1354_v58 }
  0x9c   : > { %vm789_vm4 = vweird.f32 %v1961_v53  ;;  %v793_v18 = vand.u32 2147483647, %v1961_v53  ;;  %vm1991_vm5 = vcmp.eq.f32.partialorder %v688_v1, 8.507059e+37  ;;  %v691_v23 = vor.u32 1.1754944e-38, %v690_v3 }
  0x9d   : > { %v639_v5 = vmul.f32 0.3275911, %v612_v59  ;;  %v1341_v15 = vsub.f32 0.0, %v612_v59  ;;  %v646_v19 = vmul.f32 0.3275911, %v619_v6  ;;  %v795_v25 = vand.u32 2147483648, %v1961_v53 }
  0x9e   : > { %v1395_v33 = vmul.f32 1.442695, %v1361_v8  ;;  %vm2003_vm8 = vcmp.eq.f32.partialorder %v793_v18, 8.507059e+37  ;;  %v1348_v39 = vsub.f32 0.0, %v619_v6  ;;  %v2011_v40 = vmul.f32 0.70710677, %v1999_v27  ;;  %v400_v18 = vpop.f32.mrf.mxu2 }
  0x9f   : > { %v1984_v14 = vadd.f32 1.0, %v639_v5  ;;  %v1997_v26 = vadd.f32 1.0, %v646_v19  ;;  %v1368_v30 = vmul.f32 %v1341_v15, %v612_v59  ;;  %v796_v38 = vor.u32 1.1754944e-38, %v795_v25 }
  0xa0   : > { %v1719_v7 = vpop.eup %1718  ;;  %v2017_v45 = vmul.f32 0.70710677, %v2001_v31  ;;  %v1375_v59 = vmul.f32 %v1348_v39, %v619_v6  ;;  %v599_v60 = vand.u32 2147483647, %v2011_v40 }
  0xa1   : > { %v1721_v11 = vpop.eup %1720  ;;  %v680_v12 = vmul.f32 %v1719_v7, %v652_v52  ;;  %1722 = vrcp.f32 %v1984_v14  ;;  %vm685_vm6 = vweird.f32 %v1719_v7  ;;  %v898_v36 = vand.u32 2147483647, %v1984_v14 }
  0xa2   : > { %v785_v17 = vmul.f32 %v1721_v11, %v1961_v53  ;;  %1724 = vpow2.f32 %v1381_v13  ;;  %vm790_vm7 = vweird.f32 %v1721_v11  ;;  %vm686_vm9 = vmor %vm684_vm3, %vm685_vm6  ;;  %v900_v43 = vand.u32 2147483648, %v1984_v14 }
  0xa3   : > { %v681_v21 = vsub.f32 1.0, %v680_v12  ;;  %1726 = vrcp.f32 %v1997_v26  ;;  %vm791_vm10 = vmor %vm789_vm4, %vm790_vm7  ;;  %v1409_v44 = vmul.f32 1.442695, %v1368_v30  ;;  %vm894_vm11 = vweird.f32 %v1984_v14 }
  0xa4   : > { %v786_v24 = vsub.f32 1.0, %v785_v17  ;;  %1728 = vpow2.f32 %v1395_v33  ;;  %vm2030_vm12 = vcmp.eq.f32.partialorder %v898_v36, 8.507059e+37  ;;  %v901_v3 = vor.u32 1.1754944e-38, %v900_v43 }
  0xa5   : > { %v682_v28 = vmul.f32 %v1719_v7, %v681_v21  ;;  %1730 = vpow2.f32 %v1409_v44  ;;  %v2039_v5 = vand.u32 2147483647, %v2017_v45  ;;  %vm999_vm14 = vweird.f32 %v1997_v26  ;;  %v451_v44 = vld [vmem:[%s1942_s28 + $0x78] sm:$0xff] }
  0xa6   : > { %v787_v32 = vmul.f32 %v1721_v11, %v786_v24  ;;  %v1003_v6 = vand.u32 2147483647, %v1997_v26  ;;  %v1005_v20 = vand.u32 2147483648, %v1997_v26  ;;  %v1423_v36 = vmul.f32 1.442695, %v1375_v59 }
  0xa7   : > { %v683_v34 = vadd.f32 %v1719_v7, %v682_v28  ;;  %v1723_v41 = vpop.eup %1722  ;;  %v633_v17 = vmul.f32 0.3275911, %v2039_v5  ;;  %v1328_v39 = vsub.f32 0.0, %v599_v60 }
  0xa8   : > { %v788_v37 = vadd.f32 %v1721_v11, %v787_v32  ;;  %v890_v48 = vmul.f32 %v1723_v41, %v1984_v14  ;;  %v2034_v54 = vpop.eup %1724  ;;  %vm895_vm13 = vweird.f32 %v1723_v41  ;;  %v401_v14 = vadd.f32 %v1947_v29, %v400_v18 }
  0xa9   : > { %v687_v42 = vsel %vm686_vm9, %v1719_v7, %v683_v34  ;;  %v1727_v61 = vpop.eup %1726  ;;  %vm896_vm15 = vmor %vm894_vm11, %vm895_vm13  ;;  %v2054_v25 = vadd.f32 1.0, %v633_v17  ;;  %vm1004_vm3 = vcmp.eq.f32.partialorder %v1003_v6, 8.507059e+37  ;;  %vm565_vm13 = vcmp.ge.f32.partialorder %v1968_v56, 0.0 }
  0xaa   : > { %v2021_v46 = vsel %vm1991_vm5, %v691_v23, %v687_v42  ;;  %v792_v47 = vsel %vm791_vm10, %v1721_v11, %v788_v37  ;;  %v891_v58 = vsub.f32 1.0, %v890_v48  ;;  %v995_v9 = vmul.f32 %v1727_v61, %v1997_v26  ;;  %v2045_v12 = vpop.eup %1728 }
  0xab   : > { %v1084_v49 = vmul.f32 1.0614054, %v2021_v46  ;;  %v2027_v52 = vsel %vm2003_vm8, %v796_v38, %v792_v47  ;;  %v626_v11 = vmul.f32 0.3275911, %v599_v60  ;;  %vm1000_vm1 = vweird.f32 %v1727_v61  ;;  %v2056_v28 = vpop.eup %1730 }
  0xac   : > { %v1091_v57 = vmul.f32 1.0614054, %v2027_v52  ;;  %v892_v8 = vmul.f32 %v1723_v41, %v891_v58  ;;  %v996_v16 = vsub.f32 1.0, %v995_v9  ;;  %vm1001_vm2 = vmor %vm999_vm14, %vm1000_vm1  ;;  %v1006_v38 = vor.u32 1.1754944e-38, %v1005_v20 }
  0xad   : > { %v1111_v1 = vadd.f32 -1.4531521, %v1084_v49  ;;  %v2052_v21 = vadd.f32 1.0, %v626_v11  ;;  %vm804_vm7 = vweird.f32 %v2054_v25  ;;  %vm558_vm8 = vcmp.ge.f32.partialorder %v1964_v55, 0.0 }
  0xae   : > { %v1118_v7 = vadd.f32 -1.4531521, %v1091_v57  ;;  %v893_v15 = vadd.f32 %v1723_v41, %v892_v8  ;;  %v997_v24 = vmul.f32 %v1727_v61, %v996_v16  ;;  %v808_v16 = vand.u32 2147483647, %v2054_v25 }
  0xaf   : > { %v1138_v10 = vmul.f32 %v1111_v1, %v2021_v46  ;;  %1732 = vrcp.f32 %v2052_v21  ;;  %v703_v49 = vand.u32 2147483647, %v2052_v21  ;;  %v705_v53 = vand.u32 2147483648, %v2052_v21 }
  0xb0   : > { %v1145_v13 = vmul.f32 %v1118_v7, %v2027_v52  ;;  %v897_v23 = vsel %vm896_vm15, %v1723_v41, %v893_v15  ;;  %v998_v35 = vadd.f32 %v1727_v61, %v997_v24  ;;  %1734 = vrcp.f32 %v2054_v25 }
  0xb1   : > { %v1165_v19 = vadd.f32 1.4214138, %v1138_v10  ;;  %v2061_v32 = vsel %vm2030_vm12, %v901_v3, %v897_v23  ;;  %1736 = vpow2.f32 %v1423_v36  ;;  %vm699_vm4 = vweird.f32 %v2052_v21 }
  0xb2   : > { %v1172_v22 = vadd.f32 1.4214138, %v1145_v13  ;;  %v1098_v34 = vmul.f32 1.0614054, %v2061_v32  ;;  %v1002_v43 = vsel %vm1001_vm2, %v1727_v61, %v998_v35  ;;  %v2081_v61 = vmul.f32 %v1328_v39, %v599_v60 }
  0xb3   : > { %v1192_v30 = vmul.f32 %v1165_v19, %v2021_v46  ;;  %v2073_v48 = vsel %vm1004_vm3, %v1006_v38, %v1002_v43  ;;  %v2083_v3 = vadd.f32 %v451_v44, %v401_v14  ;;  %vm2087_vm5 = vcmp.eq.f32.partialorder %v703_v49, 8.507059e+37  ;;  %v421_v38 = vpop.f32.mrf.mxu3 }
  0xb4   : > { %v1199_v33 = vmul.f32 %v1172_v22, %v2027_v52  ;;  %v1125_v42 = vadd.f32 -1.4531521, %v1098_v34  ;;  %v1105_v58 = vmul.f32 1.0614054, %v2073_v48  ;;  %v706_v15 = vor.u32 1.1754944e-38, %v705_v53 }
  0xb5   : > { %v1219_v37 = vadd.f32 -0.28449672, %v1192_v30  ;;  %v1733_v59 = vpop.eup %1732  ;;  %vm2100_vm9 = vcmp.eq.f32.partialorder %v808_v16, 8.507059e+37  ;;  %v1335_v16 = vsub.f32 0.0, %v2039_v5  ;;  %v592_v34 = vsel %vm565_vm13, 1.0, %v1836_v63 }
  0xb6   : > { %v1226_v41 = vadd.f32 -0.28449672, %v1199_v33  ;;  %v1152_v57 = vmul.f32 %v1125_v42, %v2061_v32  ;;  %v1132_v9 = vadd.f32 -1.4531521, %v1105_v58  ;;  %v695_v10 = vmul.f32 %v1733_v59, %v2052_v21  ;;  %v1735_v6 = vpop.eup %1734 }
  0xb7   : > { %v1246_v47 = vmul.f32 %v1219_v37, %v2021_v46  ;;  %vm700_vm6 = vweird.f32 %v1733_v59  ;;  %v800_v22 = vmul.f32 %v1735_v6, %v2054_v25  ;;  %vm805_vm11 = vweird.f32 %v1735_v6 }
  0xb8   : > { %v1253_v26 = vmul.f32 %v1226_v41, %v2027_v52  ;;  %v1179_v8 = vadd.f32 1.4214138, %v1152_v57  ;;  %v1159_v18 = vmul.f32 %v1132_v9, %v2073_v48  ;;  %v696_v19 = vsub.f32 1.0, %v695_v10  ;;  %vm701_vm10 = vmor %vm699_vm4, %vm700_vm6 }
  0xb9   : > { %v1273_v1 = vadd.f32 0.2548296, %v1246_v47  ;;  %v801_v33 = vsub.f32 1.0, %v800_v22  ;;  %v2112_v42 = vmul.f32 0.70710677, %v2083_v3  ;;  %v422_v21 = vadd.f32 %v1947_v29, %v421_v38  ;;  %vm806_vm12 = vmor %vm804_vm7, %vm805_vm11 }
  0xba   : > { %v1280_v7 = vadd.f32 0.2548296, %v1253_v26  ;;  %v1206_v17 = vmul.f32 %v1179_v8, %v2061_v32  ;;  %v1186_v30 = vadd.f32 1.4214138, %v1159_v18  ;;  %v504_v18 = vmul.f32 0.5, %v1957_v50 }
  0xbb   : > { %v1300_v11 = vmul.f32 %v1273_v1, %v2021_v46  ;;  %v1737_v46 = vpop.eup %1736  ;;  %v802_v41 = vmul.f32 %v1735_v6, %v801_v33  ;;  %v458_v1 = vld [vmem:[%s1942_s28 + $0xb0] sm:$0xff]  ;;  %v2135_v10 = vand.u32 2147483647, %v2112_v42  ;;  %vm545_vm14 = vcmp.ge.f32.partialorder %v2011_v40, 0.0 }
  0xbc   : > { %v1307_v60 = vmul.f32 %v1280_v7, %v2027_v52  ;;  %v1233_v24 = vadd.f32 -0.28449672, %v1206_v17  ;;  %v697_v52 = vmul.f32 %v1733_v59, %v696_v19  ;;  %v1213_v37 = vmul.f32 %v1186_v30, %v2073_v48 }
  0xbd   : > { %v1435_v20 = vmul.f32 %v2034_v54, %v1300_v11  ;;  %v810_v54 = vand.u32 2147483648, %v2054_v25  ;;  %v585_v19 = vsel %vm558_vm8, 1.0, %v1836_v63  ;;  %vm552_vm1 = vcmp.ge.f32.partialorder %v2017_v45, 0.0 }
  0xbe   : > { %v1442_v23 = vmul.f32 %v2045_v12, %v1307_v60  ;;  %v1260_v36 = vmul.f32 %v1233_v24, %v2061_v32  ;;  %v698_v12 = vadd.f32 %v1733_v59, %v697_v52  ;;  %v1240_v47 = vadd.f32 -0.28449672, %v1213_v37 }
  0xbf   : > { %v1462_v14 = vsub.f32 1.0, %v1435_v20  ;;  %v811_v9 = vor.u32 1.1754944e-38, %v810_v54  ;;  %v1362_v52 = vmul.f32 %v1335_v16, %v2039_v5  ;;  %v438_v5 = vld [vmem:[%s1942_s28 + $0x10] sm:$0xff] }
  0xc0   : > { %v1469_v35 = vsub.f32 1.0, %v1442_v23  ;;  %v1287_v44 = vadd.f32 0.2548296, %v1260_v36  ;;  %v702_v49 = vsel %vm701_vm10, %v1733_v59, %v698_v12  ;;  %v1267_v58 = vmul.f32 %v1240_v47, %v2073_v48 }
  0xc1   : > { %v1489_v39 = vmul.f32 %v1462_v14, %v1974_v0  ;;  %v2117_v26 = vsel %vm2087_vm5, %v706_v15, %v702_v49  ;;  %v803_v0 = vadd.f32 %v1735_v6, %v802_v41  ;;  %v1397_v37 = vmul.f32 1.442695, %v1362_v52 }
  0xc2   : > { %v1496_v43 = vmul.f32 %v1469_v35, %v1979_v4  ;;  %v1314_v4 = vmul.f32 %v1287_v44, %v2061_v32  ;;  %v1085_v59 = vmul.f32 1.0614054, %v2117_v26  ;;  %v1294_v13 = vadd.f32 0.2548296, %v1267_v58 }
  0xc3   : > { %v1516_v53 = vadd.f32 1.0, %v1489_v39  ;;  %v807_v8 = vsel %vm806_vm12, %v1735_v6, %v803_v0  ;;  %v2147_v6 = vadd.f32 %v458_v1, %v422_v21  ;;  %v511_v39 = vmul.f32 0.5, %v1959_v51 }
  0xc4   : > { %v1523_v57 = vadd.f32 1.0, %v1496_v43  ;;  %v1449_v32 = vmul.f32 %v2056_v28, %v1314_v4  ;;  %v1112_v15 = vadd.f32 -1.4531521, %v1085_v59  ;;  %v2143_v25 = vsel %vm2100_vm9, %v811_v9, %v807_v8  ;;  %v382_v9 = vpop.f32.mrf.mxu1 }
  0xc5   : > { %v1543_v7 = vmul.f32 %v1516_v53, %v1971_v62  ;;  %v640_v62 = vmul.f32 0.3275911, %v2135_v10  ;;  %v1092_v17 = vmul.f32 1.0614054, %v2143_v25  ;;  %v2165_v50 = vmul.f32 0.70710677, %v2147_v6 }
  0xc6   : > { %v1550_v11 = vmul.f32 %v1523_v57, %v1976_v2  ;;  %v1476_v60 = vsub.f32 1.0, %v1449_v32  ;;  %v1321_v2 = vmul.f32 %v1294_v13, %v2073_v48  ;;  %v1139_v28 = vmul.f32 %v1112_v15, %v2117_v26 }
  0xc7   : > { %1570 = vst.msk [vmem:[%s2124_s7] sm:$0xff] %vm256_vm0, %v1543_v7  ;;  %v2159_v20 = vadd.f32 1.0, %v640_v62  ;;  %v1119_v30 = vadd.f32 -1.4531521, %v1092_v17  ;;  %v1383_v48 = vmul.f32 1.442695, %v2081_v61 }
  0xc8   : > { %1577 = vst.msk [vmem:[%s2124_s7 + $0x38] sm:$0xff] %vm256_vm0, %v1550_v11  ;;  %v1503_v22 = vmul.f32 %v1476_v60, %v585_v19  ;;  %v1456_v23 = vmul.f32 %v1737_v46, %v1321_v2  ;;  %v1166_v24 = vadd.f32 1.4214138, %v1139_v28  ;;  %v361_v46 = vpop.f32.mrf.mxu0  ;;  %v2172_v12 = vand.u32 2147483647, %v2165_v50  ;;  %v445_v19 = vld [vmem:[%s1942_s28 + $0x48] sm:$0xff] }
  0xc9   : > { %1738 = vrcp.f32 %v2159_v20  ;;  %v1146_v33 = vmul.f32 %v1119_v30, %v2143_v25  ;;  %v362_v38 = vadd.f32 %v1947_v29, %v361_v46  ;;  %v491_v58 = vmul.f32 0.5, %v1999_v27 }
  0xca   : > { %v1530_v55 = vadd.f32 1.0, %v1503_v22  ;;  %v1483_v14 = vsub.f32 1.0, %v1456_v23  ;;  %v1193_v56 = vmul.f32 %v1166_v24, %v2117_v26  ;;  %1740 = vpow2.f32 %v1383_v48 }
  0xcb   : > { %v1173_v36 = vadd.f32 1.4214138, %v1146_v33  ;;  %v647_v49 = vmul.f32 0.3275911, %v2172_v12  ;;  %v2181_v53 = vadd.f32 %v438_v5, %v362_v38  ;;  %1742 = vpow2.f32 %v1397_v37  ;;  %v452_v38 = vld [vmem:[%s1942_s28 + $0x80] sm:$0xff] }
  0xcc   : > { %v1557_v54 = vmul.f32 %v1530_v55, %v504_v18  ;;  %v1510_v35 = vmul.f32 %v1483_v14, %v592_v34  ;;  %v1220_v61 = vadd.f32 -0.28449672, %v1193_v56  ;;  %v913_v32 = vand.u32 2147483647, %v2159_v20 }
  0xcd   : > { %v1200_v44 = vmul.f32 %v1173_v36, %v2143_v25  ;;  %v2186_v51 = vadd.f32 1.0, %v647_v49  ;;  %v2193_v8 = vmul.f32 0.70710677, %v2181_v53  ;;  %v915_v27 = vand.u32 2147483648, %v2159_v20 }
  0xce   : > { %1584 = vst.msk [vmem:[%s2124_s7 + $0x70] sm:$0xff] %vm256_vm0, %v1557_v54  ;;  %v1537_v41 = vadd.f32 1.0, %v1510_v35  ;;  %v1247_v43 = vmul.f32 %v1220_v61, %v2117_v26  ;;  %v1342_v13 = vsub.f32 0.0, %v2135_v10  ;;  %v498_v62 = vmul.f32 0.5, %v2001_v31 }
  0xcf   : > { %v1739_v47 = vpop.eup %1738  ;;  %v1227_v57 = vadd.f32 -0.28449672, %v1200_v44  ;;  %1744 = vrcp.f32 %v2186_v51  ;;  %v2202_v60 = vand.u32 2147483647, %v2193_v8  ;;  %v383_v2 = vadd.f32 %v1947_v29, %v382_v9 }
  0xd0   : > { %v1564_v0 = vmul.f32 %v1537_v41, %v511_v39  ;;  %v1274_v21 = vadd.f32 0.2548296, %v1247_v43  ;;  %v905_v4 = vmul.f32 %v1739_v47, %v2159_v20  ;;  %v1741_v11 = vpop.eup %1740  ;;  %vm910_vm15 = vweird.f32 %v1739_v47 }
  0xd1   : > { %v1254_v1 = vmul.f32 %v1227_v57, %v2143_v25  ;;  %vm909_vm2 = vweird.f32 %v2159_v20  ;;  %v1743_v22 = vpop.eup %1742  ;;  %v572_v23 = vsel %vm545_vm14, 1.0, %v1836_v63  ;;  %v916_v31 = vor.u32 1.1754944e-38, %v915_v27 }
  0xd2   : > { %1591 = vst.msk [vmem:[%s2124_s7 + $0xa8] sm:$0xff] %vm256_vm0, %v1564_v0  ;;  %v1301_v59 = vmul.f32 %v1274_v21, %v2117_v26  ;;  %v906_v7 = vsub.f32 1.0, %v905_v4  ;;  %vm911_vm3 = vmor %vm909_vm2, %vm910_vm15  ;;  %v1369_v24 = vmul.f32 %v1342_v13, %v2135_v10  ;;  %v627_v30 = vmul.f32 0.3275911, %v2202_v60  ;;  %v424_v13 = vpop.f32.mrf.mxu3 }
  0xd3   : > { %v1281_v16 = vadd.f32 0.2548296, %v1254_v1  ;;  %vm914_vm4 = vcmp.eq.f32.partialorder %v913_v32, 8.507059e+37  ;;  %v579_v20 = vsel %vm552_vm1, 1.0, %v1836_v63  ;;  %v2220_v33 = vadd.f32 %v445_v19, %v383_v2 }
  0xd4   : > { %v1436_v15 = vmul.f32 %v1741_v11, %v1301_v59  ;;  %v907_v26 = vmul.f32 %v1739_v47, %v906_v7  ;;  %v2218_v40 = vadd.f32 1.0, %v627_v30  ;;  %vm559_vm5 = vcmp.ge.f32.partialorder %v2112_v42, 0.0 }
  0xd5   : > { %v1308_v17 = vmul.f32 %v1281_v16, %v2143_v25  ;;  %v403_v25 = vpop.f32.mrf.mxu2  ;;  %v1745_v14 = vpop.eup %1744  ;;  %v1411_v35 = vmul.f32 1.442695, %v1369_v24  ;;  %vm1014_vm6 = vweird.f32 %v2186_v51  ;;  %v1018_v39 = vand.u32 2147483647, %v2186_v51 }
  0xd6   : > { %v1463_v28 = vsub.f32 1.0, %v1436_v15  ;;  %v908_v18 = vadd.f32 %v1739_v47, %v907_v26  ;;  %v1010_v54 = vmul.f32 %v1745_v14, %v2186_v51  ;;  %1746 = vrcp.f32 %v2218_v40 }
  0xd7   : > { %v1443_v52 = vmul.f32 %v1743_v22, %v1308_v17  ;;  %v404_v45 = vadd.f32 %v1947_v29, %v403_v25  ;;  %v1020_v41 = vand.u32 2147483648, %v2186_v51  ;;  %v2232_v43 = vmul.f32 0.70710677, %v2220_v33 }
  0xd8   : > { %v1490_v48 = vmul.f32 %v1463_v28, %v572_v23  ;;  %v912_v55 = vsel %vm911_vm3, %v1739_v47, %v908_v18  ;;  %v1011_v37 = vsub.f32 1.0, %v1010_v54  ;;  %vm1015_vm7 = vweird.f32 %v1745_v14 }
  0xd9   : > { %v2216_v56 = vsel %vm914_vm4, %v916_v31, %v912_v55  ;;  %v1470_v46 = vsub.f32 1.0, %v1443_v52  ;;  %v2238_v0 = vmul.f32 0.5, %v2083_v3  ;;  %v1349_v21 = vsub.f32 0.0, %v2172_v12  ;;  %vm1016_vm9 = vmor %vm1014_vm6, %vm1015_vm7  ;;  %v459_v31 = vld [vmem:[%s1942_s28 + $0xb8] sm:$0xff] }
  0xda   : > { %v1517_v10 = vadd.f32 1.0, %v1490_v48  ;;  %v1099_v34 = vmul.f32 1.0614054, %v2216_v56  ;;  %v1012_v49 = vmul.f32 %v1745_v14, %v1011_v37  ;;  %v2242_v57 = vand.u32 2147483647, %v2232_v43 }
  0xdb   : > { %v1497_v36 = vmul.f32 %v1470_v46, %v579_v20  ;;  %v2244_v4 = vadd.f32 %v452_v38, %v404_v45  ;;  %v2249_v59 = vsel %vm559_vm5, 1.0, %v1836_v63  ;;  %1748 = vpow2.f32 %v1411_v35 }
  0xdc   : > { %v1544_v61 = vmul.f32 %v1517_v10, %v491_v58  ;;  %v1126_v5 = vadd.f32 -1.4531521, %v1099_v34  ;;  %v1013_v7 = vadd.f32 %v1745_v14, %v1012_v49  ;;  %v1747_v9 = vpop.eup %1746  ;;  %vm566_vm8 = vcmp.ge.f32.partialorder %v2165_v50, 0.0 }
  0xdd   : > { %v1524_v44 = vadd.f32 1.0, %v1497_v36  ;;  %v1021_v3 = vor.u32 1.1754944e-38, %v1020_v41  ;;  %v634_v11 = vmul.f32 0.3275911, %v2242_v57  ;;  %vm1019_vm10 = vcmp.eq.f32.partialorder %v1018_v39, 8.507059e+37  ;;  %v364_v39 = vpop.f32.mrf.mxu0 }
  0xde   : > { %1571 = vst.msk [vmem:[%s2124_s7 + $0x8] sm:$0xff] %vm256_vm0, %v1544_v61  ;;  %v1153_v47 = vmul.f32 %v1126_v5, %v2216_v56  ;;  %v1017_v27 = vsel %vm1016_vm9, %v1745_v14, %v1013_v7  ;;  %v710_v42 = vmul.f32 %v1747_v9, %v2218_v40  ;;  %v1376_v16 = vmul.f32 %v1349_v21, %v2172_v12 }
  0xdf   : > { %v1551_v58 = vmul.f32 %v1524_v44, %v498_v62  ;;  %v2259_v15 = vsel %vm1019_vm10, %v1021_v3, %v1017_v27  ;;  %v2262_v26 = vadd.f32 1.0, %v634_v11  ;;  %v2265_v51 = vmul.f32 0.70710677, %v2244_v4 }
  0xe0   : > { %v1180_v1 = vadd.f32 1.4214138, %v1153_v47  ;;  %v1106_v2 = vmul.f32 1.0614054, %v2259_v15  ;;  %v711_v28 = vsub.f32 1.0, %v710_v42  ;;  %vm714_vm11 = vweird.f32 %v2218_v40 }
  0xe1   : > { %1578 = vst.msk [vmem:[%s2124_s7 + $0x40] sm:$0xff] %vm256_vm0, %v1551_v58  ;;  %v718_v17 = vand.u32 2147483647, %v2218_v40  ;;  %v720_v18 = vand.u32 2147483648, %v2218_v40  ;;  %1750 = vrcp.f32 %v2262_v26  ;;  %v425_v19 = vadd.f32 %v1947_v29, %v424_v13  ;;  %v1749_v24 = vpop.eup %1748 }
  0xe2   : > { %v1207_v32 = vmul.f32 %v1180_v1, %v2216_v56  ;;  %v1133_v22 = vadd.f32 -1.4531521, %v1106_v2  ;;  %v712_v23 = vmul.f32 %v1747_v9, %v711_v28  ;;  %vm715_vm12 = vweird.f32 %v1747_v9 }
  0xe3   : > { %v2276_v30 = vmul.f32 0.5, %v2147_v6  ;;  %v2281_v48 = vsel %vm566_vm8, 1.0, %v1836_v63  ;;  %v1425_v52 = vmul.f32 1.442695, %v1376_v16  ;;  %v2284_v55 = vand.u32 2147483647, %v2265_v51  ;;  %vm716_vm13 = vmor %vm714_vm11, %vm715_vm12 }
  0xe4   : > { %v1234_v62 = vadd.f32 -0.28449672, %v1207_v32  ;;  %v1160_v14 = vmul.f32 %v1133_v22, %v2259_v15  ;;  %v2288_v20 = vmul.f32 0.5, %v2181_v53  ;;  %v713_v10 = vadd.f32 %v1747_v9, %v712_v23  ;;  %v439_v32 = vld [vmem:[%s1942_s28 + $0x18] sm:$0xff] }
  0xe5   : > { %v721_v6 = vor.u32 1.1754944e-38, %v720_v18  ;;  %v1329_v46 = vsub.f32 0.0, %v2202_v60  ;;  %v641_v50 = vmul.f32 0.3275911, %v2284_v55  ;;  %v2294_v34 = vadd.f32 %v459_v31, %v425_v19 }
  0xe6   : > { %v1261_v12 = vmul.f32 %v1234_v62, %v2216_v56  ;;  %v1187_v35 = vadd.f32 1.4214138, %v1160_v14  ;;  %v717_v45 = vsel %vm716_vm13, %v1747_v9, %v713_v10  ;;  %vm719_vm14 = vcmp.eq.f32.partialorder %v718_v17, 8.507059e+37 }
  0xe7   : > { %v1751_v61 = vpop.eup %1750  ;;  %1752 = vpow2.f32 %v1425_v52  ;;  %vm546_vm15 = vcmp.ge.f32.partialorder %v2193_v8, 0.0  ;;  %v2298_v53 = vsel %vm719_vm14, %v721_v6, %v717_v45  ;;  %v2300_v40 = vadd.f32 1.0, %v641_v50 }
  0xe8   : > { %v1288_v25 = vadd.f32 0.2548296, %v1261_v12  ;;  %v1214_v5 = vmul.f32 %v1187_v35, %v2259_v15  ;;  %v1086_v37 = vmul.f32 1.0614054, %v2298_v53  ;;  %v815_v38 = vmul.f32 %v1751_v61, %v2262_v26 }
  0xe9   : > { %vm819_vm1 = vweird.f32 %v2262_v26  ;;  %1754 = vrcp.f32 %v2300_v40  ;;  %v2309_v41 = vmul.f32 0.70710677, %v2294_v34  ;;  %vm820_vm2 = vweird.f32 %v1751_v61 }
  0xea   : > { %v1315_v54 = vmul.f32 %v1288_v25, %v2216_v56  ;;  %v1356_v56 = vmul.f32 %v1329_v46, %v2202_v60  ;;  %v1241_v47 = vadd.f32 -0.28449672, %v1214_v5  ;;  %v1113_v49 = vadd.f32 -1.4531521, %v1086_v37  ;;  %vm821_vm3 = vmor %vm819_vm1, %vm820_vm2 }
  0xeb   : > { %v816_v21 = vsub.f32 1.0, %v815_v38  ;;  %v823_v58 = vand.u32 2147483647, %v2262_v26  ;;  %v825_v1 = vand.u32 2147483648, %v2262_v26  ;;  %v365_v7 = vadd.f32 %v1947_v29, %v364_v39 }
  0xec   : > { %v1450_v36 = vmul.f32 %v1749_v24, %v1315_v54  ;;  %v1268_v9 = vmul.f32 %v1241_v47, %v2259_v15  ;;  %v1140_v3 = vmul.f32 %v1113_v49, %v2298_v53  ;;  %v2321_v42 = vsel %vm546_vm15, 1.0, %v1836_v63 }
  0xed   : > { %v817_v11 = vmul.f32 %v1751_v61, %v816_v21  ;;  %v1753_v27 = vpop.eup %1752  ;;  %v1385_v13 = vmul.f32 1.442695, %v1356_v56  ;;  %v1336_v16 = vsub.f32 0.0, %v2242_v57  ;;  %v2325_v62 = vand.u32 2147483647, %v2309_v41 }
  0xee   : > { %v1477_v44 = vsub.f32 1.0, %v1450_v36  ;;  %v1167_v28 = vadd.f32 1.4214138, %v1140_v3  ;;  %vm824_vm4 = vcmp.eq.f32.partialorder %v823_v58, 8.507059e+37  ;;  %v826_v8 = vor.u32 1.1754944e-38, %v825_v1 }
  0xef   : > { %v818_v17 = vadd.f32 %v1751_v61, %v817_v11  ;;  %v1755_v18 = vpop.eup %1754  ;;  %v648_v19 = vmul.f32 0.3275911, %v2325_v62  ;;  %v2331_v12 = vadd.f32 %v439_v32, %v365_v7  ;;  %1756 = vpow2.f32 %v1385_v13 }
  0xf0   : > { %v1504_v60 = vmul.f32 %v1477_v44, %v2249_v59  ;;  %v1295_v59 = vadd.f32 0.2548296, %v1268_v9  ;;  %v1194_v31 = vmul.f32 %v1167_v28, %v2298_v53  ;;  %v920_v25 = vmul.f32 %v1755_v18, %v2300_v40  ;;  %v385_v44 = vpop.f32.mrf.mxu1 }
  0xf1   : > { %v822_v24 = vsel %vm821_vm3, %v1751_v61, %v818_v17  ;;  %v2339_v26 = vadd.f32 1.0, %v648_v19  ;;  %v2348_v50 = vmul.f32 0.70710677, %v2331_v12  ;;  %v930_v61 = vand.u32 2147483648, %v2300_v40 }
  0xf2   : > { %v1531_v2 = vadd.f32 1.0, %v1504_v60  ;;  %v1322_v23 = vmul.f32 %v1295_v59, %v2259_v15  ;;  %v2336_v52 = vsel %vm824_vm4, %v826_v8, %v822_v24  ;;  %v1221_v10 = vadd.f32 -0.28449672, %v1194_v31 }
  0xf3   : > { %v1093_v6 = vmul.f32 1.0614054, %v2336_v52  ;;  %v921_v46 = vsub.f32 1.0, %v920_v25  ;;  %v1343_v15 = vsub.f32 0.0, %v2284_v55  ;;  %1758 = vrcp.f32 %v2339_v26  ;;  %v406_v25 = vpop.f32.mrf.mxu2 }
  0xf4   : > { %v1558_v22 = vmul.f32 %v1531_v2, %v2238_v0  ;;  %v1457_v14 = vmul.f32 %v1753_v27, %v1322_v23  ;;  %v1363_v0 = vmul.f32 %v1336_v16, %v2242_v57  ;;  %v1248_v35 = vmul.f32 %v1221_v10, %v2298_v53 }
  0xf5   : > { %v1120_v45 = vadd.f32 -1.4531521, %v1093_v6  ;;  %v2353_v36 = vmul.f32 0.5, %v2220_v33  ;;  %v922_v5 = vmul.f32 %v1755_v18, %v921_v46  ;;  %vm925_vm5 = vweird.f32 %v1755_v18  ;;  %v1757_v47 = vpop.eup %1756 }
  0xf6   : > { %1585 = vst.msk [vmem:[%s2124_s7 + $0x78] sm:$0xff] %vm256_vm0, %v1558_v22  ;;  %v1484_v54 = vsub.f32 1.0, %v1457_v14  ;;  %v928_v57 = vand.u32 2147483647, %v2300_v40  ;;  %v1275_v38 = vadd.f32 0.2548296, %v1248_v35  ;;  %vm924_vm6 = vweird.f32 %v2300_v40 }
  0xf7   : > { %v1147_v39 = vmul.f32 %v1120_v45, %v2336_v52  ;;  %v1399_v56 = vmul.f32 1.442695, %v1363_v0  ;;  %v923_v49 = vadd.f32 %v1755_v18, %v922_v5  ;;  %v1370_v21 = vmul.f32 %v1343_v15, %v2284_v55  ;;  %vm926_vm7 = vmor %vm924_vm6, %vm925_vm5 }
  0xf8   : > { %v1511_v37 = vmul.f32 %v1484_v54, %v2281_v48  ;;  %v2361_v33 = vand.u32 2147483647, %v2348_v50  ;;  %v1302_v1 = vmul.f32 %v1275_v38, %v2298_v53  ;;  %v931_v48 = vor.u32 1.1754944e-38, %v930_v61  ;;  %v446_v53 = vld [vmem:[%s1942_s28 + $0x50] sm:$0xff]  ;;  %v2402_v61 = vld [vmem:[%s2954_s2] ss:$0 sm:$0xff] }
  0xf9   : > { %v1174_v7 = vadd.f32 1.4214138, %v1147_v39  ;;  %v1759_v60 = vpop.eup %1758  ;;  %v927_v9 = vsel %vm926_vm7, %v1755_v18, %v923_v49  ;;  %vm929_vm8 = vcmp.eq.f32.partialorder %v928_v57, 8.507059e+37  ;;  %v386_v40 = vadd.f32 %v1947_v29, %v385_v44 }
  0xfa   : > { %v1538_v58 = vadd.f32 1.0, %v1511_v37  ;;  %v628_v3 = vmul.f32 0.3275911, %v2361_v33  ;;  %v1437_v11 = vmul.f32 %v1757_v47, %v1302_v1  ;;  %v2369_v27 = vsel %vm929_vm8, %v931_v48, %v927_v9 }
  0xfb   : > { %v1201_v32 = vmul.f32 %v1174_v7, %v2336_v52  ;;  %vm553_vm9 = vcmp.ge.f32.partialorder %v2232_v43, 0.0  ;;  %v1100_v13 = vmul.f32 1.0614054, %v2369_v27  ;;  %v1025_v16 = vmul.f32 %v1759_v60, %v2339_v26 }
  0xfc   : > { %v1565_v55 = vmul.f32 %v1538_v58, %v2276_v30  ;;  %v2375_v2 = vadd.f32 1.0, %v628_v3  ;;  %v1464_v59 = vsub.f32 1.0, %v1437_v11  ;;  %1760 = vpow2.f32 %v1399_v56 }
  0xfd   : > { %v1228_v29 = vadd.f32 -0.28449672, %v1201_v32  ;;  %v1413_v30 = vmul.f32 1.442695, %v1370_v21  ;;  %v1127_v28 = vadd.f32 -1.4531521, %v1100_v13  ;;  %v2380_v18 = vadd.f32 %v446_v53, %v386_v40 }
  0xfe   : > { %1592 = vst.msk [vmem:[%s2124_s7 + $0xb0] sm:$0xff] %vm256_vm0, %v1565_v55  ;;  %v1026_v17 = vsub.f32 1.0, %v1025_v16  ;;  %1762 = vrcp.f32 %v2375_v2  ;;  %v1491_v8 = vmul.f32 %v1464_v59, %v2321_v42  ;;  %vm1029_vm10 = vweird.f32 %v2339_v26 }
  0xff   : > { %v1255_v19 = vmul.f32 %v1228_v29, %v2336_v52  ;;  %v1035_v22 = vand.u32 2147483648, %v2339_v26  ;;  %v1154_v23 = vmul.f32 %v1127_v28, %v2369_v27  ;;  %vm1030_vm11 = vweird.f32 %v1759_v60 }
 0x100   : > { %v1027_v31 = vmul.f32 %v1759_v60, %v1026_v17  ;;  %v1033_v24 = vand.u32 2147483647, %v2339_v26  ;;  %v1518_v14 = vadd.f32 1.0, %v1491_v8  ;;  %v580_v10 = vsel %vm553_vm9, 1.0, %v1836_v63  ;;  %vm1031_vm12 = vmor %vm1029_vm10, %vm1030_vm11 }
 0x101   : > { %v1282_v6 = vadd.f32 0.2548296, %v1255_v19  ;;  %v1350_v42 = vsub.f32 0.0, %v2325_v62  ;;  %v1181_v0 = vadd.f32 1.4214138, %v1154_v23  ;;  %1764 = vpow2.f32 %v1413_v30  ;;  %v460_v23 = vld [vmem:[%s1942_s28 + $0xc0] sm:$0xff] }
 0x102   : > { %v1028_v46 = vadd.f32 %v1759_v60, %v1027_v31  ;;  %v2393_v15 = vmul.f32 0.70710677, %v2380_v18  ;;  %v1761_v54 = vpop.eup %1760  ;;  %v1545_v35 = vmul.f32 %v1518_v14, %v2288_v20  ;;  %v1036_v43 = vor.u32 1.1754944e-38, %v1035_v22 }
 0x103   : > { %v1309_v45 = vmul.f32 %v1282_v6, %v2336_v52  ;;  %v407_v5 = vadd.f32 %v2402_v61, %v406_v25  ;;  %v1208_v37 = vmul.f32 %v1181_v0, %v2369_v27  ;;  %vm1034_vm13 = vcmp.eq.f32.partialorder %v1033_v24, 8.507059e+37  ;;  %v453_v52 = vld [vmem:[%s1942_s28 + $0x88] sm:$0xff] }
 0x104   : > { %v1763_v57 = vpop.eup %1762  ;;  %v1032_v38 = vsel %vm1031_vm12, %v1759_v60, %v1028_v46  ;;  %v2407_v20 = vand.u32 2147483647, %v2393_v15  ;;  %1572 = vst.msk [vmem:[%s2124_s7 + $0x10] sm:$0xff] %vm256_vm0, %v1545_v35  ;;  %v1377_v56 = vmul.f32 %v1350_v42, %v2325_v62  ;;  %vm729_vm14 = vweird.f32 %v2375_v2  ;;  %v427_v60 = vpop.f32.mrf.mxu3 }
 0x105   : > { %v1444_v26 = vmul.f32 %v1761_v54, %v1309_v45  ;;  %v2412_v39 = vsel %vm1034_vm13, %v1036_v43, %v1032_v38  ;;  %v725_v44 = vmul.f32 %v1763_v57, %v2375_v2  ;;  %v1235_v47 = vadd.f32 -0.28449672, %v1208_v37  ;;  %v367_v38 = vpop.f32.mrf.mxu0 }
 0x106   : > { %v1107_v49 = vmul.f32 1.0614054, %v2412_v39  ;;  %v1330_v21 = vsub.f32 0.0, %v2361_v33  ;;  %v635_v7 = vmul.f32 0.3275911, %v2407_v20  ;;  %v2420_v48 = vadd.f32 %v453_v52, %v407_v5 }
 0x107   : > { %v1471_v58 = vsub.f32 1.0, %v1444_v26  ;;  %v726_v1 = vsub.f32 1.0, %v725_v44  ;;  %v1765_v9 = vpop.eup %1764  ;;  %v1262_v3 = vmul.f32 %v1235_v47, %v2369_v27  ;;  %v733_v40 = vand.u32 2147483647, %v2375_v2 }
 0x108   : > { %v1134_v62 = vadd.f32 -1.4531521, %v1107_v49  ;;  %v735_v55 = vand.u32 2147483648, %v2375_v2  ;;  %vm730_vm15 = vweird.f32 %v1763_v57  ;;  %v2425_v53 = vadd.f32 1.0, %v635_v7 }
 0x109   : > { %v1498_v11 = vmul.f32 %v1471_v58, %v580_v10  ;;  %v727_v32 = vmul.f32 %v1763_v57, %v726_v1  ;;  %vm560_vm1 = vcmp.ge.f32.partialorder %v2265_v51, 0.0  ;;  %v1289_v13 = vadd.f32 0.2548296, %v1262_v3  ;;  %vm731_vm2 = vmor %vm729_vm14, %vm730_vm15  ;;  %v440_v3 = vld [vmem:[%s1942_s28 + $0x20] sm:$0xff] }
 0x10a   : > { %v1161_v16 = vmul.f32 %v1134_v62, %v2412_v39  ;;  %v428_v59 = vadd.f32 %v2402_v61, %v427_v60  ;;  %1766 = vrcp.f32 %v2425_v53  ;;  %v2432_v28 = vmul.f32 0.70710677, %v2420_v48 }
 0x10b   : > { %v1525_v29 = vadd.f32 1.0, %v1498_v11  ;;  %v728_v30 = vadd.f32 %v1763_v57, %v727_v32  ;;  %v1316_v17 = vmul.f32 %v1289_v13, %v2369_v27  ;;  %v1427_v19 = vmul.f32 1.442695, %v1377_v56 }
 0x10c   : > { %v1188_v8 = vadd.f32 1.4214138, %v1161_v16  ;;  %v736_v22 = vor.u32 1.1754944e-38, %v735_v55  ;;  %vm734_vm3 = vcmp.eq.f32.partialorder %v733_v40, 8.507059e+37  ;;  %v1357_v25 = vmul.f32 %v1330_v21, %v2361_v33 }
 0x10d   : > { %v1552_v31 = vmul.f32 %v1525_v29, %v2353_v36  ;;  %v732_v24 = vsel %vm731_vm2, %v1763_v57, %v728_v30  ;;  %v1451_v14 = vmul.f32 %v1765_v9, %v1316_v17  ;;  %v506_v27 = vmul.f32 0.5, %v2244_v4 }
 0x10e   : > { %v1215_v10 = vmul.f32 %v1188_v8, %v2412_v39  ;;  %v2441_v6 = vsel %vm734_vm3, %v736_v22, %v732_v24  ;;  %v2448_v42 = vand.u32 2147483647, %v2432_v28  ;;  %v2450_v0 = vadd.f32 %v460_v23, %v428_v59 }
 0x10f   : > { %1579 = vst.msk [vmem:[%s2124_s7 + $0x48] sm:$0xff] %vm256_vm0, %v1552_v31  ;;  %v1087_v2 = vmul.f32 1.0614054, %v2441_v6  ;;  %v587_v36 = vsel %vm560_vm1, 1.0, %v1836_v63  ;;  %v1478_v33 = vsub.f32 1.0, %v1451_v14  ;;  %vm567_vm4 = vcmp.ge.f32.partialorder %v2309_v41, 0.0 }
 0x110   : > { %v1242_v46 = vadd.f32 -0.28449672, %v1215_v10  ;;  %v1767_v54 = vpop.eup %1766  ;;  %1768 = vpow2.f32 %v1427_v19  ;;  %v1387_v45 = vmul.f32 1.442695, %v1357_v25  ;;  %v642_v4 = vmul.f32 0.3275911, %v2448_v42 }
 0x111   : > { %v1114_v35 = vadd.f32 -1.4531521, %v1087_v2  ;;  %v1505_v43 = vmul.f32 %v1478_v33, %v587_v36  ;;  %v830_v57 = vmul.f32 %v1767_v54, %v2425_v53  ;;  %v1337_v37 = vsub.f32 0.0, %v2407_v20 }
 0x112   : > { %v1269_v5 = vmul.f32 %v1242_v46, %v2412_v39  ;;  %vm834_vm5 = vweird.f32 %v2425_v53  ;;  %v2462_v52 = vadd.f32 1.0, %v642_v4  ;;  %v2465_v26 = vmul.f32 0.70710677, %v2450_v0  ;;  %v388_v46 = vpop.f32.mrf.mxu1 }
 0x113   : > { %v1141_v51 = vmul.f32 %v1114_v35, %v2441_v6  ;;  %v1532_v56 = vadd.f32 1.0, %v1505_v43  ;;  %v831_v47 = vsub.f32 1.0, %v830_v57  ;;  %v838_v49 = vand.u32 2147483647, %v2425_v53 }
 0x114   : > { %v1296_v44 = vadd.f32 0.2548296, %v1269_v5  ;;  %v840_v58 = vand.u32 2147483648, %v2425_v53  ;;  %1770 = vrcp.f32 %v2462_v52  ;;  %v368_v1 = vadd.f32 %v2402_v61, %v367_v38 }
 0x115   : > { %v1168_v21 = vadd.f32 1.4214138, %v1141_v51  ;;  %v1559_v7 = vmul.f32 %v1532_v56, %v506_v27  ;;  %v832_v9 = vmul.f32 %v1767_v54, %v831_v47  ;;  %vm835_vm6 = vweird.f32 %v1767_v54  ;;  %v447_v56 = vld [vmem:[%s1942_s28 + $0x58] sm:$0xff] }
 0x116   : > { %v1323_v60 = vmul.f32 %v1296_v44, %v2412_v39  ;;  %v1769_v62 = vpop.eup %1768  ;;  %v513_v40 = vmul.f32 0.5, %v2294_v34  ;;  %v594_v55 = vsel %vm567_vm4, 1.0, %v1836_v63  ;;  %v2479_v32 = vand.u32 2147483647, %v2465_v26  ;;  %vm836_vm8 = vmor %vm834_vm5, %vm835_vm6 }
 0x117   : > { %v1195_v11 = vmul.f32 %v1168_v21, %v2441_v6  ;;  %1586 = vst.msk [vmem:[%s2124_s7 + $0x80] sm:$0xff] %vm256_vm0, %v1559_v7  ;;  %vm547_vm7 = vcmp.ge.f32.partialorder %v2348_v50, 0.0  ;;  %1772 = vpow2.f32 %v1387_v45  ;;  %v833_v39 = vadd.f32 %v1767_v54, %v832_v9 }
 0x118   : > { %v1458_v13 = vmul.f32 %v1769_v62, %v1323_v60  ;;  %v841_v34 = vor.u32 1.1754944e-38, %v840_v58  ;;  %v649_v41 = vmul.f32 0.3275911, %v2479_v32  ;;  %v2487_v59 = vadd.f32 %v440_v3, %v368_v1 }
 0x119   : > { %v1222_v16 = vadd.f32 -0.28449672, %v1195_v11  ;;  %v837_v30 = vsel %vm836_vm8, %v1767_v54, %v833_v39  ;;  %vm839_vm9 = vcmp.eq.f32.partialorder %v838_v49, 8.507059e+37  ;;  %v1364_v17 = vmul.f32 %v1337_v37, %v2407_v20 }
 0x11a   : > { %v1485_v29 = vsub.f32 1.0, %v1458_v13  ;;  %v1771_v8 = vpop.eup %1770  ;;  %v2491_v19 = vmul.f32 0.5, %v2331_v12  ;;  %v2494_v23 = vsel %vm839_vm9, %v841_v34, %v837_v30  ;;  %v2496_v53 = vadd.f32 1.0, %v649_v41 }
 0x11b   : > { %v1249_v22 = vmul.f32 %v1222_v16, %v2441_v6  ;;  %v574_v24 = vsel %vm547_vm7, 1.0, %v1836_v63  ;;  %v1094_v25 = vmul.f32 1.0614054, %v2494_v23  ;;  %v935_v14 = vmul.f32 %v1771_v8, %v2462_v52 }
 0x11c   : > { %v1512_v31 = vmul.f32 %v1485_v29, %v594_v55  ;;  %v2504_v10 = vmul.f32 0.5, %v2380_v18  ;;  %1774 = vrcp.f32 %v2496_v53  ;;  %v2508_v12 = vmul.f32 0.70710677, %v2487_v59 }
 0x11d   : > { %v1276_v20 = vadd.f32 0.2548296, %v1249_v22  ;;  %v1773_v27 = vpop.eup %1772  ;;  %v1121_v36 = vadd.f32 -1.4531521, %v1094_v25  ;;  %v1401_v33 = vmul.f32 1.442695, %v1364_v17  ;;  %vm940_vm10 = vweird.f32 %v1771_v8 }
 0x11e   : > { %v1539_v2 = vadd.f32 1.0, %v1512_v31  ;;  %v936_v50 = vsub.f32 1.0, %v935_v14  ;;  %v943_v35 = vand.u32 2147483647, %v2462_v52  ;;  %v945_v18 = vand.u32 2147483648, %v2462_v52 }
 0x11f   : > { %v1303_v54 = vmul.f32 %v1276_v20, %v2441_v6  ;;  %v1344_v45 = vsub.f32 0.0, %v2448_v42  ;;  %v1148_v43 = vmul.f32 %v1121_v36, %v2494_v23  ;;  %vm554_vm11 = vcmp.ge.f32.partialorder %v2393_v15, 0.0 }
 0x120   : > { %v1566_v4 = vmul.f32 %v1539_v2, %v513_v40  ;;  %v937_v5 = vmul.f32 %v1771_v8, %v936_v50  ;;  %v2517_v37 = vand.u32 2147483647, %v2508_v12  ;;  %v389_v6 = vadd.f32 %v2402_v61, %v388_v46 }
 0x121   : > { %v1438_v57 = vmul.f32 %v1773_v27, %v1303_v54  ;;  %v1175_v38 = vadd.f32 1.4214138, %v1148_v43  ;;  %1776 = vpow2.f32 %v1401_v33  ;;  %vm939_vm12 = vweird.f32 %v2462_v52  ;;  %v454_v27 = vld [vmem:[%s1942_s28 + $0x90] sm:$0xff] }
 0x122   : > { %1593 = vst.msk [vmem:[%s2124_s7 + $0xb8] sm:$0xff] %vm256_vm0, %v1566_v4  ;;  %v938_v51 = vadd.f32 %v1771_v8, %v937_v5  ;;  %v1775_v44 = vpop.eup %1774  ;;  %vm941_vm13 = vmor %vm939_vm12, %vm940_vm10  ;;  %v946_v49 = vor.u32 1.1754944e-38, %v945_v18  ;;  %v1371_v21 = vmul.f32 %v1344_v45, %v2448_v42  ;;  %v629_v58 = vmul.f32 0.3275911, %v2517_v37  ;;  %v409_v42 = vpop.f32.mrf.mxu2 }
 0x123   : > { %v1465_v47 = vsub.f32 1.0, %v1438_v57  ;;  %v1202_v1 = vmul.f32 %v1175_v38, %v2494_v23  ;;  %vm944_vm14 = vcmp.eq.f32.partialorder %v943_v35, 8.507059e+37  ;;  %v1040_v60 = vmul.f32 %v1775_v44, %v2496_v53 }
 0x124   : > { %v942_v7 = vsel %vm941_vm13, %v1771_v8, %v938_v51  ;;  %v2530_v62 = vadd.f32 1.0, %v629_v58  ;;  %v2532_v52 = vadd.f32 %v447_v56, %v389_v6  ;;  %vm1044_vm15 = vweird.f32 %v2496_v53 }
 0x125   : > { %v1492_v9 = vmul.f32 %v1465_v47, %v574_v24  ;;  %v2528_v3 = vsel %vm944_vm14, %v946_v49, %v942_v7  ;;  %v1229_v40 = vadd.f32 -0.28449672, %v1202_v1  ;;  %v1041_v11 = vsub.f32 1.0, %v1040_v60 }
 0x126   : > { %v1101_v55 = vmul.f32 1.0614054, %v2528_v3  ;;  %v1048_v39 = vand.u32 2147483647, %v2496_v53  ;;  %v1050_v16 = vand.u32 2147483648, %v2496_v53  ;;  %1778 = vrcp.f32 %v2530_v62 }
 0x127   : > { %v1519_v13 = vadd.f32 1.0, %v1492_v9  ;;  %v1777_v34 = vpop.eup %1776  ;;  %v1256_v41 = vmul.f32 %v1229_v40, %v2494_v23  ;;  %v1042_v30 = vmul.f32 %v1775_v44, %v1041_v11  ;;  %vm1045_vm1 = vweird.f32 %v1775_v44 }
 0x128   : > { %v1128_v29 = vadd.f32 -1.4531521, %v1101_v55  ;;  %v1415_v8 = vmul.f32 1.442695, %v1371_v21  ;;  %v2542_v22 = vmul.f32 0.70710677, %v2532_v52  ;;  %v410_v31 = vadd.f32 %v2402_v61, %v409_v42  ;;  %vm1046_vm3 = vmor %vm1044_vm15, %vm1045_vm1 }
 0x129   : > { %v1546_v17 = vmul.f32 %v1519_v13, %v2491_v19  ;;  %v581_v24 = vsel %vm554_vm11, 1.0, %v1836_v63  ;;  %v1283_v25 = vadd.f32 0.2548296, %v1256_v41  ;;  %v1043_v20 = vadd.f32 %v1775_v44, %v1042_v30 }
 0x12a   : > { %v1155_v14 = vmul.f32 %v1128_v29, %v2528_v3  ;;  %vm561_vm2 = vcmp.ge.f32.partialorder %v2432_v28, 0.0  ;;  %v1051_v19 = vor.u32 1.1754944e-38, %v1050_v16  ;;  %v1351_v2 = vsub.f32 0.0, %v2479_v32  ;;  %v461_v16 = vld [vmem:[%s1942_s28 + $0xc8] sm:$0xff] }
 0x12b   : > { %1573 = vst.msk [vmem:[%s2124_s7 + $0x18] sm:$0xff] %vm256_vm0, %v1546_v17  ;;  %v2557_v36 = vand.u32 2147483647, %v2542_v22  ;;  %v1310_v15 = vmul.f32 %v1283_v25, %v2494_v23  ;;  %v1047_v50 = vsel %vm1046_vm3, %v1775_v44, %v1043_v20  ;;  %vm1049_vm4 = vcmp.eq.f32.partialorder %v1048_v39, 8.507059e+37  ;;  %v430_v44 = vpop.f32.mrf.mxu3 }
 0x12c   : > { %v1182_v33 = vadd.f32 1.4214138, %v1155_v14  ;;  %v1779_v46 = vpop.eup %1778  ;;  %1780 = vpow2.f32 %v1415_v8  ;;  %v2560_v54 = vsel %vm1049_vm4, %v1051_v19, %v1047_v50  ;;  %v2563_v18 = vadd.f32 %v454_v27, %v410_v31 }
 0x12d   : > { %v636_v35 = vmul.f32 0.3275911, %v2557_v36  ;;  %v1445_v53 = vmul.f32 %v1777_v34, %v1310_v15  ;;  %v1108_v4 = vmul.f32 1.0614054, %v2560_v54  ;;  %v740_v43 = vmul.f32 %v1779_v46, %v2530_v62 }
 0x12e   : > { %v1209_v45 = vmul.f32 %v1182_v33, %v2528_v3  ;;  %v1378_v23 = vmul.f32 %v1351_v2, %v2479_v32  ;;  %vm744_vm5 = vweird.f32 %v2530_v62  ;;  %v748_v5 = vand.u32 2147483647, %v2530_v62 }
 0x12f   : > { %v2571_v57 = vadd.f32 1.0, %v636_v35  ;;  %v1472_v6 = vsub.f32 1.0, %v1445_v53  ;;  %v1135_v51 = vadd.f32 -1.4531521, %v1108_v4  ;;  %v741_v56 = vsub.f32 1.0, %v740_v43  ;;  %v370_v43 = vpop.f32.mrf.mxu0 }
 0x130   : > { %v1236_v38 = vadd.f32 -0.28449672, %v1209_v45  ;;  %vm745_vm6 = vweird.f32 %v1779_v46  ;;  %v750_v47 = vand.u32 2147483648, %v2530_v62  ;;  %v2576_v49 = vmul.f32 0.70710677, %v2563_v18 }
 0x131   : > { %1782 = vrcp.f32 %v2571_v57  ;;  %v1499_v32 = vmul.f32 %v1472_v6, %v581_v24  ;;  %v1162_v58 = vmul.f32 %v1135_v51, %v2560_v54  ;;  %v742_v1 = vmul.f32 %v1779_v46, %v741_v56  ;;  %vm746_vm7 = vmor %vm744_vm5, %vm745_vm6 }
 0x132   : > { %v1263_v21 = vmul.f32 %v1236_v38, %v2528_v3  ;;  %v1781_v7 = vpop.eup %1780  ;;  %v507_v60 = vmul.f32 0.5, %v2420_v48  ;;  %v588_v9 = vsel %vm561_vm2, 1.0, %v1836_v63  ;;  %v1429_v40 = vmul.f32 1.442695, %v1378_v23 }
 0x133   : > { %v431_v55 = vadd.f32 %v2402_v61, %v430_v44  ;;  %v1526_v11 = vadd.f32 1.0, %v1499_v32  ;;  %v1189_v13 = vadd.f32 1.4214138, %v1162_v58  ;;  %v743_v39 = vadd.f32 %v1779_v46, %v742_v1 }
 0x134   : > { %v1290_v42 = vadd.f32 0.2548296, %v1263_v21  ;;  %vm749_vm8 = vcmp.eq.f32.partialorder %v748_v5, 8.507059e+37  ;;  %v751_v34 = vor.u32 1.1754944e-38, %v750_v47  ;;  %v1331_v48 = vsub.f32 0.0, %v2517_v37 }
 0x135   : > { %v2591_v28 = vand.u32 2147483647, %v2576_v49  ;;  %v1553_v41 = vmul.f32 %v1526_v11, %v2504_v10  ;;  %v1216_v30 = vmul.f32 %v1189_v13, %v2560_v54  ;;  %v747_v17 = vsel %vm746_vm7, %v1779_v46, %v743_v39 }
 0x136   : > { %v1317_v29 = vmul.f32 %v1290_v42, %v2528_v3  ;;  %1784 = vpow2.f32 %v1429_v40  ;;  %v2596_v31 = vsel %vm749_vm8, %v751_v34, %v747_v17  ;;  %v2599_v24 = vadd.f32 %v461_v16, %v431_v55 }
 0x137   : > { %v1783_v8 = vpop.eup %1782  ;;  %v643_v62 = vmul.f32 0.3275911, %v2591_v28  ;;  %1580 = vst.msk [vmem:[%s2124_s7 + $0x50] sm:$0xff] %vm256_vm0, %v1553_v41  ;;  %v1243_v14 = vadd.f32 -0.28449672, %v1216_v30  ;;  %v1358_v3 = vmul.f32 %v1331_v48, %v2517_v37  ;;  %vm849_vm9 = vweird.f32 %v2571_v57 }
 0x138   : > { %v1452_v25 = vmul.f32 %v1781_v7, %v1317_v29  ;;  %v1088_v20 = vmul.f32 1.0614054, %v2596_v31  ;;  %v845_v10 = vmul.f32 %v1783_v8, %v2571_v57  ;;  %v853_v27 = vand.u32 2147483647, %v2571_v57 }
 0x139   : > { %v2608_v19 = vadd.f32 1.0, %v643_v62  ;;  %v1270_v15 = vmul.f32 %v1243_v14, %v2560_v54  ;;  %vm850_vm10 = vweird.f32 %v1783_v8  ;;  %v855_v46 = vand.u32 2147483648, %v2571_v57 }
 0x13a   : > { %v1479_v2 = vsub.f32 1.0, %v1452_v25  ;;  %v1115_v33 = vadd.f32 -1.4531521, %v1088_v20  ;;  %v846_v50 = vsub.f32 1.0, %v845_v10  ;;  %v2614_v35 = vmul.f32 0.70710677, %v2599_v24  ;;  %vm851_vm12 = vmor %vm849_vm9, %vm850_vm10  ;;  %v391_v20 = vpop.f32.mrf.mxu1 }
 0x13b   : > { %1786 = vrcp.f32 %v2608_v19  ;;  %v1297_v53 = vadd.f32 0.2548296, %v1270_v15  ;;  %v514_v5 = vmul.f32 0.5, %v2450_v0  ;;  %vm568_vm11 = vcmp.ge.f32.partialorder %v2465_v26, 0.0 }
 0x13c   : > { %v1506_v37 = vmul.f32 %v1479_v2, %v588_v9  ;;  %v1142_v45 = vmul.f32 %v1115_v33, %v2596_v31  ;;  %v847_v4 = vmul.f32 %v1783_v8, %v846_v50  ;;  %v1785_v23 = vpop.eup %1784  ;;  %v1389_v6 = vmul.f32 1.442695, %v1358_v3 }
 0x13d   : > { %v1338_v38 = vsub.f32 0.0, %v2557_v36  ;;  %v1324_v56 = vmul.f32 %v1297_v53, %v2560_v54  ;;  %vm854_vm13 = vcmp.eq.f32.partialorder %v853_v27, 8.507059e+37  ;;  %v856_v32 = vor.u32 1.1754944e-38, %v855_v46  ;;  %v441_v54 = vld [vmem:[%s1942_s28 + $0x28] sm:$0xff] }
 0x13e   : > { %v1533_v51 = vadd.f32 1.0, %v1506_v37  ;;  %v1169_v44 = vadd.f32 1.4214138, %v1142_v45  ;;  %v848_v47 = vadd.f32 %v1783_v8, %v847_v4  ;;  %v2625_v0 = vand.u32 2147483647, %v2614_v35 }
 0x13f   : > { %v371_v21 = vadd.f32 %v2402_v61, %v370_v43  ;;  %v1459_v1 = vmul.f32 %v1785_v23, %v1324_v56  ;;  %v595_v57 = vsel %vm568_vm11, 1.0, %v1836_v63  ;;  %v2634_v55 = vmul.f32 0.5, %v2487_v59 }
 0x140   : > { %v1560_v58 = vmul.f32 %v1533_v51, %v507_v60  ;;  %v1196_v7 = vmul.f32 %v1169_v44, %v2596_v31  ;;  %v852_v9 = vsel %vm851_vm12, %v1783_v8, %v848_v47  ;;  %v650_v42 = vmul.f32 0.3275911, %v2625_v0 }
 0x141   : > { %v1787_v40 = vpop.eup %1786  ;;  %v2636_v11 = vsel %vm854_vm13, %v856_v32, %v852_v9  ;;  %v1486_v60 = vsub.f32 1.0, %v1459_v1  ;;  %1788 = vpow2.f32 %v1389_v6  ;;  %v1365_v34 = vmul.f32 %v1338_v38, %v2557_v36 }
 0x142   : > { %1587 = vst.msk [vmem:[%s2124_s7 + $0x88] sm:$0xff] %vm256_vm0, %v1560_v58  ;;  %v1223_v13 = vadd.f32 -0.28449672, %v1196_v7  ;;  %v1095_v39 = vmul.f32 1.0614054, %v2636_v11  ;;  %v950_v16 = vmul.f32 %v1787_v40, %v2608_v19  ;;  %v2644_v26 = vadd.f32 1.0, %v650_v42 }
 0x143   : > { %v2646_v48 = vadd.f32 %v441_v54, %v371_v21  ;;  %v1513_v59 = vmul.f32 %v1486_v60, %v595_v57  ;;  %vm955_vm14 = vweird.f32 %v1787_v40  ;;  %v958_v17 = vand.u32 2147483647, %v2608_v19 }
 0x144   : > { %v1250_v41 = vmul.f32 %v1223_v13, %v2596_v31  ;;  %v1122_v29 = vadd.f32 -1.4531521, %v1095_v39  ;;  %v951_v30 = vsub.f32 1.0, %v950_v16  ;;  %v960_v8 = vand.u32 2147483648, %v2608_v19  ;;  %v412_v13 = vpop.f32.mrf.mxu2 }
 0x145   : > { %1790 = vrcp.f32 %v2644_v26  ;;  %v1540_v62 = vadd.f32 1.0, %v1513_v59  ;;  %vm548_vm15 = vcmp.ge.f32.partialorder %v2508_v12, 0.0  ;;  %v1403_v10 = vmul.f32 1.442695, %v1365_v34 }
 0x146   : > { %v1277_v25 = vadd.f32 0.2548296, %v1250_v41  ;;  %v1149_v36 = vmul.f32 %v1122_v29, %v2636_v11  ;;  %v952_v14 = vmul.f32 %v1787_v40, %v951_v30  ;;  %vm954_vm1 = vweird.f32 %v2608_v19 }
 0x147   : > { %v2656_v3 = vmul.f32 0.70710677, %v2646_v48  ;;  %v1567_v27 = vmul.f32 %v1540_v62, %v514_v5  ;;  %v1789_v50 = vpop.eup %1788  ;;  %vm956_vm2 = vmor %vm954_vm1, %vm955_vm14  ;;  %v961_v46 = vor.u32 1.1754944e-38, %v960_v8  ;;  %v1345_v37 = vsub.f32 0.0, %v2591_v28 }
 0x148   : > { %v1304_v2 = vmul.f32 %v1277_v25, %v2596_v31  ;;  %v1176_v15 = vadd.f32 1.4214138, %v1149_v36  ;;  %v953_v33 = vadd.f32 %v1787_v40, %v952_v14  ;;  %v392_v19 = vadd.f32 %v2402_v61, %v391_v20  ;;  %v448_v31 = vld [vmem:[%s1942_s28 + $0x60] sm:$0xff]  ;;  %v455_v14 = vld [vmem:[%s1942_s28 + $0x98] sm:$0xff] }
 0x149   : > { %v2662_v53 = vand.u32 2147483647, %v2656_v3  ;;  %1594 = vst.msk [vmem:[%s2124_s7 + $0xc0] sm:$0xff] %vm256_vm0, %v1567_v27  ;;  %vm959_vm3 = vcmp.eq.f32.partialorder %v958_v17, 8.507059e+37  ;;  %v575_v5 = vsel %vm548_vm15, 1.0, %v1836_v63  ;;  %1792 = vpow2.f32 %v1403_v10 }
 0x14a   : > { %v1439_v45 = vmul.f32 %v1789_v50, %v1304_v2  ;;  %v1203_v4 = vmul.f32 %v1176_v15, %v2636_v11  ;;  %v957_v43 = vsel %vm956_vm2, %v1787_v40, %v953_v33  ;;  %v1372_v32 = vmul.f32 %v1345_v37, %v2591_v28 }
 0x14b   : > { %v1791_v23 = vpop.eup %1790  ;;  %v2672_v6 = vsel %vm959_vm3, %v961_v46, %v957_v43  ;;  %v630_v38 = vmul.f32 0.3275911, %v2662_v53  ;;  %vm1059_vm4 = vweird.f32 %v2644_v26  ;;  %v2681_v58 = vadd.f32 %v448_v31, %v392_v19 }
 0x14c   : > { %v1466_v51 = vsub.f32 1.0, %v1439_v45  ;;  %v1230_v56 = vadd.f32 -0.28449672, %v1203_v4  ;;  %v1102_v44 = vmul.f32 1.0614054, %v2672_v6  ;;  %v1055_v47 = vmul.f32 %v1791_v23, %v2644_v26 }
 0x14d   : > { %v2679_v21 = vadd.f32 1.0, %v630_v38  ;;  %vm1060_vm5 = vweird.f32 %v1791_v23  ;;  %v1063_v54 = vand.u32 2147483647, %v2644_v26  ;;  %v1065_v40 = vand.u32 2147483648, %v2644_v26 }
 0x14e   : > { %v1493_v12 = vmul.f32 %v1466_v51, %v575_v5  ;;  %v1257_v1 = vmul.f32 %v1230_v56, %v2636_v11  ;;  %v1129_v7 = vadd.f32 -1.4531521, %v1102_v44  ;;  %v1056_v9 = vsub.f32 1.0, %v1055_v47  ;;  %vm1061_vm7 = vmor %vm1059_vm4, %vm1060_vm5  ;;  %v433_v56 = vpop.f32.mrf.mxu3 }
 0x14f   : > { %1794 = vrcp.f32 %v2679_v21  ;;  %v1793_v39 = vpop.eup %1792  ;;  %v501_v16 = vmul.f32 0.5, %v2532_v52  ;;  %vm555_vm6 = vcmp.ge.f32.partialorder %v2542_v22, 0.0  ;;  %v1417_v34 = vmul.f32 1.442695, %v1372_v32 }
 0x150   : > { %v1520_v57 = vadd.f32 1.0, %v1493_v12  ;;  %v1284_v28 = vadd.f32 0.2548296, %v1257_v1  ;;  %v1156_v42 = vmul.f32 %v1129_v7, %v2672_v6  ;;  %v1057_v60 = vmul.f32 %v1791_v23, %v1056_v9 }
 0x151   : > { %v2691_v59 = vmul.f32 0.70710677, %v2681_v58  ;;  %v1066_v8 = vor.u32 1.1754944e-38, %v1065_v40  ;;  %v1352_v52 = vsub.f32 0.0, %v2625_v0  ;;  %v413_v25 = vadd.f32 %v2402_v61, %v412_v13  ;;  %v462_v13 = vld [vmem:[%s1942_s28 + $0xd0] sm:$0xff] }
 0x152   : > { %v1547_v41 = vmul.f32 %v1520_v57, %v2634_v55  ;;  %v1311_v29 = vmul.f32 %v1284_v28, %v2636_v11  ;;  %v1183_v30 = vadd.f32 1.4214138, %v1156_v42  ;;  %v1058_v17 = vadd.f32 %v1791_v23, %v1057_v60 }
 0x153   : > { %v2700_v62 = vand.u32 2147483647, %v2691_v59  ;;  %vm1064_vm8 = vcmp.eq.f32.partialorder %v1063_v54, 8.507059e+37  ;;  %v582_v26 = vsel %vm555_vm6, 1.0, %v1836_v63  ;;  %1796 = vpow2.f32 %v1417_v34 }
 0x154   : > { %1574 = vst.msk [vmem:[%s2124_s7 + $0x20] sm:$0xff] %vm256_vm0, %v1547_v41  ;;  %v1446_v36 = vmul.f32 %v1793_v39, %v1311_v29  ;;  %v1210_v55 = vmul.f32 %v1183_v30, %v2672_v6  ;;  %v1062_v11 = vsel %vm1061_vm7, %v1791_v23, %v1058_v17  ;;  %v1379_v46 = vmul.f32 %v1352_v52, %v2625_v0 }
 0x155   : > { %v1795_v20 = vpop.eup %1794  ;;  %v2710_v10 = vsel %vm1064_vm8, %v1066_v8, %v1062_v11  ;;  %v637_v27 = vmul.f32 0.3275911, %v2700_v62  ;;  %vm759_vm9 = vweird.f32 %v2679_v21  ;;  %v2719_v19 = vadd.f32 %v455_v14, %v413_v25 }
 0x156   : > { %v1473_v2 = vsub.f32 1.0, %v1446_v36  ;;  %v1237_v15 = vadd.f32 -0.28449672, %v1210_v55  ;;  %v1109_v33 = vmul.f32 1.0614054, %v2710_v10  ;;  %v755_v50 = vmul.f32 %v1795_v20, %v2679_v21 }
 0x157   : > { %v2717_v37 = vadd.f32 1.0, %v637_v27  ;;  %vm760_vm10 = vweird.f32 %v1795_v20  ;;  %v763_v31 = vand.u32 2147483647, %v2679_v21  ;;  %v765_v23 = vand.u32 2147483648, %v2679_v21 }
 0x158   : > { %v1500_v22 = vmul.f32 %v1473_v2, %v582_v26  ;;  %v1264_v45 = vmul.f32 %v1237_v15, %v2672_v6  ;;  %v1136_v4 = vadd.f32 -1.4531521, %v1109_v33  ;;  %v756_v43 = vsub.f32 1.0, %v755_v50  ;;  %vm761_vm12 = vmor %vm759_vm9, %vm760_vm10  ;;  %v373_v15 = vpop.f32.mrf.mxu0 }
 0x159   : > { %1798 = vrcp.f32 %v2717_v37  ;;  %v1797_v44 = vpop.eup %1796  ;;  %v508_v47 = vmul.f32 0.5, %v2563_v18  ;;  %vm562_vm11 = vcmp.ge.f32.partialorder %v2576_v49, 0.0  ;;  %v1431_v32 = vmul.f32 1.442695, %v1379_v46 }
 0x15a   : > { %v1527_v5 = vadd.f32 1.0, %v1500_v22  ;;  %v1291_v0 = vadd.f32 0.2548296, %v1264_v45  ;;  %v1163_v38 = vmul.f32 %v1136_v4, %v2710_v10  ;;  %v757_v51 = vmul.f32 %v1795_v20, %v756_v43 }
 0x15b   : > { %v2729_v12 = vmul.f32 0.70710677, %v2719_v19  ;;  %v766_v40 = vor.u32 1.1754944e-38, %v765_v23  ;;  %v1332_v57 = vsub.f32 0.0, %v2662_v53  ;;  %v434_v28 = vadd.f32 %v2402_v61, %v433_v56  ;;  %v442_v56 = vld [vmem:[%s1942_s28 + $0x30] sm:$0xff] }
 0x15c   : > { %v1554_v1 = vmul.f32 %v1527_v5, %v501_v16  ;;  %v1318_v7 = vmul.f32 %v1291_v0, %v2672_v6  ;;  %v1190_v9 = vadd.f32 1.4214138, %v1163_v38  ;;  %v758_v54 = vadd.f32 %v1795_v20, %v757_v51 }
 0x15d   : > { %v2737_v18 = vand.u32 2147483647, %v2729_v12  ;;  %vm764_vm13 = vcmp.eq.f32.partialorder %v763_v31, 8.507059e+37  ;;  %v589_v21 = vsel %vm562_vm11, 1.0, %v1836_v63  ;;  %1800 = vpow2.f32 %v1431_v32 }
 0x15e   : > { %1581 = vst.msk [vmem:[%s2124_s7 + $0x58] sm:$0xff] %vm256_vm0, %v1554_v1  ;;  %v1453_v42 = vmul.f32 %v1797_v44, %v1318_v7  ;;  %v1217_v60 = vmul.f32 %v1190_v9, %v2710_v10  ;;  %v762_v6 = vsel %vm761_vm12, %v1795_v20, %v758_v54  ;;  %v1359_v8 = vmul.f32 %v1332_v57, %v2662_v53 }
 0x15f   : > { %v1799_v39 = vpop.eup %1798  ;;  %v2747_v16 = vsel %vm764_vm13, %v766_v40, %v762_v6  ;;  %v644_v34 = vmul.f32 0.3275911, %v2737_v18  ;;  %vm864_vm14 = vweird.f32 %v2717_v37  ;;  %v2756_v25 = vadd.f32 %v462_v13, %v434_v28 }
 0x160   : > { %v1480_v41 = vsub.f32 1.0, %v1453_v42  ;;  %v1244_v29 = vadd.f32 -0.28449672, %v1217_v60  ;;  %v1089_v30 = vmul.f32 1.0614054, %v2747_v16  ;;  %v860_v17 = vmul.f32 %v1799_v39, %v2717_v37 }
 0x161   : > { %v2754_v52 = vadd.f32 1.0, %v644_v34  ;;  %vm865_vm15 = vweird.f32 %v1799_v39  ;;  %v868_v14 = vand.u32 2147483647, %v2717_v37  ;;  %v870_v20 = vand.u32 2147483648, %v2717_v37 }
 0x162   : > { %v1507_v49 = vmul.f32 %v1480_v41, %v589_v21  ;;  %v1271_v36 = vmul.f32 %v1244_v29, %v2710_v10  ;;  %v1116_v55 = vadd.f32 -1.4531521, %v1089_v30  ;;  %v861_v11 = vsub.f32 1.0, %v860_v17  ;;  %vm866_vm2 = vmor %vm864_vm14, %vm865_vm15  ;;  %v394_v29 = vpop.f32.mrf.mxu1 }
 0x163   : > { %1802 = vrcp.f32 %v2754_v52  ;;  %v1801_v33 = vpop.eup %1800  ;;  %v515_v50 = vmul.f32 0.5, %v2599_v24  ;;  %vm569_vm1 = vcmp.ge.f32.partialorder %v2614_v35, 0.0  ;;  %v1391_v46 = vmul.f32 1.442695, %v1359_v8 }
 0x164   : > { %v1534_v26 = vadd.f32 1.0, %v1507_v49  ;;  %v1298_v53 = vadd.f32 0.2548296, %v1271_v36  ;;  %v1143_v27 = vmul.f32 %v1116_v55, %v2747_v16  ;;  %v862_v2 = vmul.f32 %v1799_v39, %v861_v11 }
 0x165   : > { %v2766_v22 = vmul.f32 0.70710677, %v2756_v25  ;;  %v871_v23 = vor.u32 1.1754944e-38, %v870_v20  ;;  %v1339_v5 = vsub.f32 0.0, %v2700_v62  ;;  %v374_v0 = vadd.f32 %v2402_v61, %v373_v15 }
 0x166   : > { %v1561_v45 = vmul.f32 %v1534_v26, %v508_v47  ;;  %v1325_v4 = vmul.f32 %v1298_v53, %v2710_v10  ;;  %v1170_v43 = vadd.f32 1.4214138, %v1143_v27  ;;  %v863_v31 = vadd.f32 %v1799_v39, %v862_v2 }
 0x167   : > { %v2774_v24 = vand.u32 2147483647, %v2766_v22  ;;  %vm869_vm3 = vcmp.eq.f32.partialorder %v868_v14, 8.507059e+37  ;;  %v596_v37 = vsel %vm569_vm1, 1.0, %v1836_v63  ;;  %v2785_v47 = vmul.f32 0.5, %v2646_v48 }
 0x168   : > { %1588 = vst.msk [vmem:[%s2124_s7 + $0x90] sm:$0xff] %vm256_vm0, %v1561_v45  ;;  %v1460_v38 = vmul.f32 %v1801_v33, %v1325_v4  ;;  %v1197_v51 = vmul.f32 %v1170_v43, %v2747_v16  ;;  %v867_v10 = vsel %vm866_vm2, %v1799_v39, %v863_v31  ;;  %1804 = vpow2.f32 %v1391_v46 }
 0x169   : > { %v1803_v44 = vpop.eup %1802  ;;  %v2787_v32 = vsel %vm869_vm3, %v871_v23, %v867_v10  ;;  %v651_v1 = vmul.f32 0.3275911, %v2774_v24  ;;  %v1366_v57 = vmul.f32 %v1339_v5, %v2700_v62  ;;  %v2795_v35 = vadd.f32 %v442_v56, %v374_v0 }
 0x16a   : > { %v1487_v7 = vsub.f32 1.0, %v1460_v38  ;;  %v1224_v9 = vadd.f32 -0.28449672, %v1197_v51  ;;  %v1096_v54 = vmul.f32 1.0614054, %v2787_v32  ;;  %v965_v40 = vmul.f32 %v1803_v44, %v2754_v52 }
 0x16b   : > { %v2793_v28 = vadd.f32 1.0, %v651_v1  ;;  %vm970_vm4 = vweird.f32 %v1803_v44  ;;  %v973_v13 = vand.u32 2147483647, %v2754_v52  ;;  %v975_v39 = vand.u32 2147483648, %v2754_v52 }
 0x16c   : > { %v1514_v42 = vmul.f32 %v1487_v7, %v596_v37  ;;  %v1251_v48 = vmul.f32 %v1224_v9, %v2747_v16  ;;  %v1123_v60 = vadd.f32 -1.4531521, %v1096_v54  ;;  %v966_v6 = vsub.f32 1.0, %v965_v40  ;;  %v415_v7 = vpop.f32.mrf.mxu2 }
 0x16d   : > { %1806 = vrcp.f32 %v2793_v28  ;;  %vm549_vm5 = vcmp.ge.f32.partialorder %v2656_v3, 0.0  ;;  %v1405_v30 = vmul.f32 1.442695, %v1366_v57  ;;  %vm969_vm6 = vweird.f32 %v2754_v52 }
 0x16e   : > { %v1541_v21 = vadd.f32 1.0, %v1514_v42  ;;  %v1278_v34 = vadd.f32 0.2548296, %v1251_v48  ;;  %v1150_v62 = vmul.f32 %v1123_v60, %v2787_v32  ;;  %v967_v41 = vmul.f32 %v1803_v44, %v966_v6  ;;  %v1805_v11 = vpop.eup %1804  ;;  %vm971_vm7 = vmor %vm969_vm6, %vm970_vm4 }
 0x16f   : > { %v2805_v17 = vmul.f32 0.70710677, %v2795_v35  ;;  %v976_v14 = vor.u32 1.1754944e-38, %v975_v39  ;;  %v1346_v20 = vsub.f32 0.0, %v2737_v18  ;;  %v395_v52 = vadd.f32 %v2402_v61, %v394_v29 }
 0x170   : > { %v1568_v8 = vmul.f32 %v1541_v21, %v515_v50  ;;  %v1305_v49 = vmul.f32 %v1278_v34, %v2747_v16  ;;  %v1177_v36 = vadd.f32 1.4214138, %v1150_v62  ;;  %v968_v55 = vadd.f32 %v1803_v44, %v967_v41  ;;  %v449_v16 = vld [vmem:[%s1942_s28 + $0x68] sm:$0xff]  ;;  %v456_v41 = vld [vmem:[%s1942_s28 + $0xa0] sm:$0xff] }
 0x171   : > { %v2811_v26 = vand.u32 2147483647, %v2805_v17  ;;  %vm974_vm8 = vcmp.eq.f32.partialorder %v973_v13, 8.507059e+37  ;;  %v576_v33 = vsel %vm549_vm5, 1.0, %v1836_v63  ;;  %1808 = vpow2.f32 %v1405_v30 }
 0x172   : > { %1595 = vst.msk [vmem:[%s2124_s7 + $0xc8] sm:$0xff] %vm256_vm0, %v1568_v8  ;;  %v1440_v53 = vmul.f32 %v1805_v11, %v1305_v49  ;;  %v1204_v27 = vmul.f32 %v1177_v36, %v2787_v32  ;;  %v972_v2 = vsel %vm971_vm7, %v1803_v44, %v968_v55  ;;  %v1373_v31 = vmul.f32 %v1346_v20, %v2737_v18 }
 0x173   : > { %v1807_v15 = vpop.eup %1806  ;;  %v2821_v50 = vsel %vm974_vm8, %v976_v14, %v972_v2  ;;  %v631_v46 = vmul.f32 0.3275911, %v2811_v26  ;;  %vm1074_vm9 = vweird.f32 %v2793_v28  ;;  %v2830_v5 = vadd.f32 %v449_v16, %v395_v52 }
 0x174   : > { %v1467_v45 = vsub.f32 1.0, %v1440_v53  ;;  %v1231_v61 = vadd.f32 -0.28449672, %v1204_v27  ;;  %v1103_v4 = vmul.f32 1.0614054, %v2821_v50  ;;  %v1070_v43 = vmul.f32 %v1807_v15, %v2793_v28 }
 0x175   : > { %v2828_v23 = vadd.f32 1.0, %v631_v46  ;;  %vm1075_vm10 = vweird.f32 %v1807_v15  ;;  %v1078_v10 = vand.u32 2147483647, %v2793_v28  ;;  %v1080_v56 = vand.u32 2147483648, %v2793_v28 }
 0x176   : > { %v1494_v3 = vmul.f32 %v1467_v45, %v576_v33  ;;  %v1258_v0 = vmul.f32 %v1231_v61, %v2787_v32  ;;  %v1130_v38 = vadd.f32 -1.4531521, %v1103_v4  ;;  %v1071_v51 = vsub.f32 1.0, %v1070_v43  ;;  %vm2847_vm12 = vmor %vm1074_vm9, %vm1075_vm10 }
 0x177   : > { %1810 = vrcp.f32 %v2828_v23  ;;  %v1809_v9 = vpop.eup %1808  ;;  %v502_v54 = vmul.f32 0.5, %v2681_v58  ;;  %vm556_vm11 = vcmp.ge.f32.partialorder %v2691_v59, 0.0  ;;  %v1419_v40 = vmul.f32 1.442695, %v1373_v31 }
 0x178   : > { %v1521_v44 = vadd.f32 1.0, %v1494_v3  ;;  %v1285_v18 = vadd.f32 0.2548296, %v1258_v0  ;;  %v1157_v37 = vmul.f32 %v1130_v38, %v2821_v50  ;;  %v1072_v1 = vmul.f32 %v1807_v15, %v1071_v51 }
 0x179   : > { %v2840_v57 = vmul.f32 0.70710677, %v2830_v5  ;;  %v1081_v58 = vor.u32 1.1754944e-38, %v1080_v56  ;;  %v1353_v39 = vsub.f32 0.0, %v2774_v24  ;;  %vm1079_vm13 = vcmp.eq.f32.partialorder %v1078_v10, 8.507059e+37 }
 0x17a   : > { %v1548_v42 = vmul.f32 %v1521_v44, %v2785_v47  ;;  %v1312_v48 = vmul.f32 %v1285_v18, %v2787_v32  ;;  %v1184_v60 = vadd.f32 1.4214138, %v1157_v37  ;;  %v1073_v6 = vadd.f32 %v1807_v15, %v1072_v1  ;;  %v1827_v47 = vld [vmem:[%s2954_s2] ss:$0 sm:$0xff] }
 0x17b   : > { %v2853_v21 = vand.u32 2147483647, %v2840_v57  ;;  %v416_v32 = vadd.f32 %v1827_v47, %v415_v7  ;;  %v583_v30 = vsel %vm556_vm11, 1.0, %v1836_v63  ;;  %1812 = vpow2.f32 %v1419_v40 }
 0x17c   : > { %1575 = vst.msk [vmem:[%s2124_s7 + $0x28] sm:$0xff] %vm256_vm0, %v1548_v42  ;;  %v1447_v34 = vmul.f32 %v1809_v9, %v1312_v48  ;;  %v1211_v28 = vmul.f32 %v1184_v60, %v2821_v50  ;;  %v1077_v62 = vsel %vm2847_vm12, %v1807_v15, %v1073_v6  ;;  %v1380_v20 = vmul.f32 %v1353_v39, %v2774_v24 }
 0x17d   : > { %v1811_v29 = vpop.eup %1810  ;;  %v2867_v8 = vsel %vm1079_vm13, %v1081_v58, %v1077_v62  ;;  %v638_v49 = vmul.f32 0.3275911, %v2853_v21  ;;  %vm774_vm14 = vweird.f32 %v2828_v23  ;;  %v2876_v53 = vadd.f32 %v456_v41, %v416_v32 }
 0x17e   : > { %v1474_v36 = vsub.f32 1.0, %v1447_v34  ;;  %v1238_v55 = vadd.f32 -0.28449672, %v1211_v28  ;;  %v1110_v11 = vmul.f32 1.0614054, %v2867_v8  ;;  %v770_v14 = vmul.f32 %v1811_v29, %v2828_v23 }
 0x17f   : > { %v2874_v52 = vadd.f32 1.0, %v638_v49  ;;  %vm775_vm15 = vweird.f32 %v1811_v29  ;;  %v778_v15 = vand.u32 2147483647, %v2828_v23  ;;  %v780_v33 = vand.u32 2147483648, %v2828_v23 }
 0x180   : > { %v1501_v59 = vmul.f32 %v1474_v36, %v583_v30  ;;  %v1265_v27 = vmul.f32 %v1238_v55, %v2821_v50  ;;  %v1137_v2 = vadd.f32 -1.4531521, %v1110_v11  ;;  %v771_v16 = vsub.f32 1.0, %v770_v14  ;;  %vm776_vm2 = vmor %vm774_vm14, %vm775_vm15 }
 0x181   : > { %1814 = vrcp.f32 %v2874_v52  ;;  %v1813_v4 = vpop.eup %1812  ;;  %vm563_vm1 = vcmp.ge.f32.partialorder %v2729_v12, 0.0  ;;  %v2885_v43 = vmul.f32 0.70710677, %v2876_v53  ;;  %v1433_v51 = vmul.f32 1.442695, %v1380_v20 }
 0x182   : > { %v1528_v46 = vadd.f32 1.0, %v1501_v59  ;;  %v1292_v24 = vadd.f32 0.2548296, %v1265_v27  ;;  %v1164_v45 = vmul.f32 %v1137_v2, %v2867_v8  ;;  %v772_v61 = vmul.f32 %v1811_v29, %v771_v16 }
 0x183   : > { %v781_v10 = vor.u32 1.1754944e-38, %v780_v33  ;;  %v1333_v56 = vsub.f32 0.0, %v2811_v26  ;;  %v2893_v44 = vand.u32 2147483647, %v2885_v43  ;;  %vm779_vm3 = vcmp.eq.f32.partialorder %v778_v15, 8.507059e+37 }
 0x184   : > { %v1555_v31 = vmul.f32 %v1528_v46, %v502_v54  ;;  %v1319_v3 = vmul.f32 %v1292_v24, %v2821_v50  ;;  %v1191_v0 = vadd.f32 1.4214138, %v1164_v45  ;;  %v773_v38 = vadd.f32 %v1811_v29, %v772_v61 }
 0x185   : > { %v509_v7 = vmul.f32 0.5, %v2719_v19  ;;  %v590_v23 = vsel %vm563_vm1, 1.0, %v1836_v63  ;;  %v645_v54 = vmul.f32 0.3275911, %v2893_v44  ;;  %1816 = vpow2.f32 %v1433_v51 }
 0x186   : > { %1582 = vst.msk [vmem:[%s2124_s7 + $0x60] sm:$0xff] %vm256_vm0, %v1555_v31  ;;  %v1454_v18 = vmul.f32 %v1813_v4, %v1319_v3  ;;  %v1218_v37 = vmul.f32 %v1191_v0, %v2867_v8  ;;  %v777_v1 = vsel %vm776_vm2, %v1811_v29, %v773_v38  ;;  %v1360_v6 = vmul.f32 %v1333_v56, %v2811_v26 }
 0x187   : > { %v1815_v50 = vpop.eup %1814  ;;  %v782_v9 = vsel %vm779_vm3, %v781_v10, %v777_v1  ;;  %vm879_vm4 = vweird.f32 %v2874_v52  ;;  %v2906_v13 = vadd.f32 1.0, %v645_v54  ;;  %v883_v47 = vand.u32 2147483647, %v2874_v52 }
 0x188   : > { %v1481_v40 = vsub.f32 1.0, %v1454_v18  ;;  %v1245_v42 = vadd.f32 -0.28449672, %v1218_v37  ;;  %v1090_v48 = vmul.f32 1.0614054, %v782_v9  ;;  %v875_v60 = vmul.f32 %v1815_v50, %v2874_v52 }
 0x189   : > { %vm880_vm5 = vweird.f32 %v1815_v50  ;;  %v885_v32 = vand.u32 2147483648, %v2874_v52  ;;  %1818 = vrcp.f32 %v2906_v13  ;;  %vm570_vm6 = vcmp.ge.f32.partialorder %v2766_v22, 0.0 }
 0x18a   : > { %v1508_v19 = vmul.f32 %v1481_v40, %v590_v23  ;;  %v1272_v58 = vmul.f32 %v1245_v42, %v2867_v8  ;;  %v1117_v12 = vadd.f32 -1.4531521, %v1090_v48  ;;  %v876_v39 = vsub.f32 1.0, %v875_v60  ;;  %vm881_vm7 = vmor %vm879_vm4, %vm880_vm5 }
 0x18b   : > { %v1817_v36 = vpop.eup %1816  ;;  %v1393_v55 = vmul.f32 1.442695, %v1360_v6  ;;  %v886_v11 = vor.u32 1.1754944e-38, %v885_v32  ;;  %vm884_vm8 = vcmp.eq.f32.partialorder %v883_v47, 8.507059e+37  ;;  %v516_v24 = vmul.f32 0.5, %v2756_v25 }
 0x18c   : > { %v1535_v34 = vadd.f32 1.0, %v1508_v19  ;;  %v1299_v28 = vadd.f32 0.2548296, %v1272_v58  ;;  %v1144_v26 = vmul.f32 %v1117_v12, %v782_v9  ;;  %v877_v62 = vmul.f32 %v1815_v50, %v876_v39 }
 0x18d   : > { %v597_v52 = vsel %vm570_vm6, 1.0, %v1836_v63  ;;  %1820 = vpow2.f32 %v1393_v55  ;;  %v988_v0 = vand.u32 2147483647, %v2906_v13  ;;  %v990_v38 = vand.u32 2147483648, %v2906_v13 }
 0x18e   : > { %v1562_v41 = vmul.f32 %v1535_v34, %v509_v7  ;;  %v1326_v29 = vmul.f32 %v1299_v28, %v2867_v8  ;;  %v1171_v30 = vadd.f32 1.4214138, %v1144_v26  ;;  %v878_v49 = vadd.f32 %v1815_v50, %v877_v62 }
 0x18f   : > { %v1819_v27 = vpop.eup %1818  ;;  %v1340_v8 = vsub.f32 0.0, %v2853_v21  ;;  %vm984_vm10 = vweird.f32 %v2906_v13  ;;  %vm550_vm11 = vcmp.ge.f32.partialorder %v2805_v17, 0.0  ;;  %v991_v7 = vor.u32 1.1754944e-38, %v990_v38 }
 0x190   : > { %1589 = vst.msk [vmem:[%s2124_s7 + $0x98] sm:$0xff] %vm256_vm0, %v1562_v41  ;;  %v1461_v14 = vmul.f32 %v1817_v36, %v1326_v29  ;;  %v1198_v20 = vmul.f32 %v1171_v30, %v782_v9  ;;  %v882_v59 = vsel %vm881_vm7, %v1815_v50, %v878_v49  ;;  %v980_v46 = vmul.f32 %v1819_v27, %v2906_v13 }
 0x191   : > { %v887_v2 = vsel %vm884_vm8, %v886_v11, %v882_v59  ;;  %v1367_v3 = vmul.f32 %v1340_v8, %v2853_v21  ;;  %vm985_vm9 = vweird.f32 %v1819_v27  ;;  %vm989_vm13 = vcmp.eq.f32.partialorder %v988_v0, 8.507059e+37 }
 0x192   : > { %v1488_v16 = vsub.f32 1.0, %v1461_v14  ;;  %v1225_v15 = vadd.f32 -0.28449672, %v1198_v20  ;;  %v1097_v33 = vmul.f32 1.0614054, %v887_v2  ;;  %v981_v31 = vsub.f32 1.0, %v980_v46  ;;  %vm986_vm12 = vmor %vm984_vm10, %vm985_vm9 }
 0x193   : > { %v1821_v50 = vpop.eup %1820  ;;  %v1407_v21 = vmul.f32 1.442695, %v1367_v3  ;;  %v1347_v48 = vsub.f32 0.0, %v2893_v44  ;;  %v577_v13 = vsel %vm550_vm11, 1.0, %v1836_v63  ;;  %v496_v39 = vmul.f32 0.5, %v2795_v35 }
 0x194   : > { %v1515_v45 = vmul.f32 %v1488_v16, %v597_v52  ;;  %v1252_v61 = vmul.f32 %v1225_v15, %v782_v9  ;;  %v1124_v4 = vadd.f32 -1.4531521, %v1097_v33  ;;  %v982_v56 = vmul.f32 %v1819_v27, %v981_v31 }
 0x195   : > { %1822 = vpow2.f32 %v1407_v21  ;;  %v1374_v12 = vmul.f32 %v1347_v48, %v2893_v44  ;;  %vm557_vm14 = vcmp.ge.f32.partialorder %v2840_v57, 0.0  ;;  %v503_v14 = vmul.f32 0.5, %v2830_v5 }
 0x196   : > { %v1542_v51 = vadd.f32 1.0, %v1515_v45  ;;  %v1279_v10 = vadd.f32 0.2548296, %v1252_v61  ;;  %v1151_v25 = vmul.f32 %v1124_v4, %v887_v2  ;;  %v983_v1 = vadd.f32 %v1819_v27, %v982_v56 }
 0x197   : > { %v1421_v29 = vmul.f32 1.442695, %v1374_v12  ;;  %v584_v44 = vsel %vm557_vm14, 1.0, %v1836_v63  ;;  %vm564_vm15 = vcmp.ge.f32.partialorder %v2885_v43, 0.0  ;;  %v510_v46 = vmul.f32 0.5, %v2876_v53 }
 0x198   : > { %v1569_v22 = vmul.f32 %v1542_v51, %v516_v24  ;;  %v1306_v18 = vmul.f32 %v1279_v10, %v782_v9  ;;  %v1178_v37 = vadd.f32 1.4214138, %v1151_v25  ;;  %v987_v40 = vsel %vm986_vm12, %v1819_v27, %v983_v1 }
 0x199   : > { %v992_v42 = vsel %vm989_vm13, %v991_v7, %v987_v40  ;;  %1824 = vpow2.f32 %v1421_v29  ;;  %v591_v15 = vsel %vm564_vm15, 1.0, %v1836_v63 }
 0x19a   : > { %1596 = vst.msk [vmem:[%s2124_s7 + $0xd0] sm:$0xff] %vm256_vm0, %v1569_v22  ;;  %v1441_v23 = vmul.f32 %v1821_v50, %v1306_v18  ;;  %v1205_v54 = vmul.f32 %v1178_v37, %v887_v2  ;;  %v1104_v6 = vmul.f32 1.0614054, %v992_v42 }
 0x19b   : > { %v1823_v41 = vpop.eup %1822 }
 0x19c   : > { %v1468_v60 = vsub.f32 1.0, %v1441_v23  ;;  %v1232_v9 = vadd.f32 -0.28449672, %v1205_v54  ;;  %v1131_v58 = vadd.f32 -1.4531521, %v1104_v6 }
 0x19e   : > { %v1495_v17 = vmul.f32 %v1468_v60, %v577_v13  ;;  %v1259_v19 = vmul.f32 %v1232_v9, %v887_v2  ;;  %v1158_v34 = vmul.f32 %v1131_v58, %v992_v42 }
 0x19f   : > { %v1825_v8 = vpop.eup %1824 }
 0x1a0   : > { %v1522_v47 = vadd.f32 1.0, %v1495_v17  ;;  %v1286_v32 = vadd.f32 0.2548296, %v1259_v19  ;;  %v1185_v62 = vadd.f32 1.4214138, %v1158_v34 }
 0x1a2   : > { %v1549_v28 = vmul.f32 %v1522_v47, %v496_v39  ;;  %v1313_v26 = vmul.f32 %v1286_v32, %v887_v2  ;;  %v1212_v49 = vmul.f32 %v1185_v62, %v992_v42 }
 0x1a4   : > { %1576 = vst.msk [vmem:[%s2124_s7 + $0x30] sm:$0xff] %vm256_vm0, %v1549_v28  ;;  %v1448_v30 = vmul.f32 %v1823_v41, %v1313_v26  ;;  %v1239_v55 = vadd.f32 -0.28449672, %v1212_v49 }
 0x1a6   : > { %v1475_v36 = vsub.f32 1.0, %v1448_v30  ;;  %v1266_v11 = vmul.f32 %v1239_v55, %v992_v42 }
 0x1a8   : > { %v1502_v35 = vmul.f32 %v1475_v36, %v584_v44  ;;  %v1293_v59 = vadd.f32 0.2548296, %v1266_v11 }
 0x1aa   : > { %v1529_v20 = vadd.f32 1.0, %v1502_v35  ;;  %v1320_v2 = vmul.f32 %v1293_v59, %v992_v42 }
 0x1ac   : > { %v1556_v27 = vmul.f32 %v1529_v20, %v503_v14  ;;  %v1455_v57 = vmul.f32 %v1825_v8, %v1320_v2 }
 0x1ae   : > { %1583 = vst.msk [vmem:[%s2124_s7 + $0x68] sm:$0xff] %vm256_vm0, %v1556_v27  ;;  %v1482_v16 = vsub.f32 1.0, %v1455_v57 }
 0x1b0   : > { %v1509_v33 = vmul.f32 %v1482_v16, %v591_v15 }
 0x1b2   : > { %v1536_v24 = vadd.f32 1.0, %v1509_v33 }
 0x1b4   : > { %v1563_v52 = vmul.f32 %v1536_v24, %v510_v46 }
 0x1b6   : > { %1590 = vst.msk [vmem:[%s2124_s7 + $0xa0] sm:$0xff] %vm256_vm0, %v1563_v52 }
 0x1b7 PF: > { %s14_s15 = sadd.s32 1, %s1834_s15  }
 0x1b8   : > { %p11_p4 = scmp.ge.s32.totalorder %s14_s15, 5  }
 0x1ba   :  { %13 = sbr.rel (!%p11_p4) target bundleno = 1 (0x1), region = 69 }

// kernel: custom-call.1
= control target key start
LH: loop header
LB: loop body
LE: loop exit
PB: predicated region body
PF: predicated region fallthrough
CT: control target
= control target key end

     0   :  { %s841_s0 = inlined_call_operand.vmem [shape: c64[16,16,8,4], index: 0, kind: input, shape index: {}]   ;;  %s842_s1 = inlined_call_operand.vmem [shape: f32[16,16,8,4], index: 1, kind: output, shape index: {}]  }
   0x1   :  { %v320_v0 = vld [vmem:[%s841_s0 + $0x200] sm:$0xff]  ;;  %v321_v1 = vld [vmem:[%s841_s0 + $0x208] sm:$0xff]  ;;  %v323_v2 = vld [vmem:[%s841_s0 + $0x210] sm:$0xff] }
   0x2   :  { %4 = vst [vmem:[%s842_s1] sm:$0xff] %v320_v0  ;;  %v325_v3 = vld [vmem:[%s841_s0 + $0x218] sm:$0xff]  ;;  %v327_v4 = vld [vmem:[%s841_s0 + $0x220] sm:$0xff]  ;;  %v329_v5 = vld [vmem:[%s841_s0 + $0x228] sm:$0xff] }
   0x3   :  { %322 = vst [vmem:[%s842_s1 + $0x8] sm:$0xff] %v321_v1  ;;  %v331_v6 = vld [vmem:[%s841_s0 + $0x230] sm:$0xff]  ;;  %v333_v7 = vld [vmem:[%s841_s0 + $0x238] sm:$0xff]  ;;  %v335_v8 = vld [vmem:[%s841_s0 + $0x240] sm:$0xff] }
   0x4   :  { %324 = vst [vmem:[%s842_s1 + $0x10] sm:$0xff] %v323_v2  ;;  %v337_v9 = vld [vmem:[%s841_s0 + $0x248] sm:$0xff]  ;;  %v339_v10 = vld [vmem:[%s841_s0 + $0x250] sm:$0xff]  ;;  %v341_v11 = vld [vmem:[%s841_s0 + $0x258] sm:$0xff] }
   0x5   :  { %326 = vst [vmem:[%s842_s1 + $0x18] sm:$0xff] %v325_v3  ;;  %v343_v12 = vld [vmem:[%s841_s0 + $0x260] sm:$0xff]  ;;  %v345_v13 = vld [vmem:[%s841_s0 + $0x268] sm:$0xff]  ;;  %v347_v14 = vld [vmem:[%s841_s0 + $0x270] sm:$0xff] }
   0x6   :  { %328 = vst [vmem:[%s842_s1 + $0x20] sm:$0xff] %v327_v4  ;;  %v349_v15 = vld [vmem:[%s841_s0 + $0x278] sm:$0xff]  ;;  %v351_v16 = vld [vmem:[%s841_s0 + $0x280] sm:$0xff]  ;;  %v353_v17 = vld [vmem:[%s841_s0 + $0x288] sm:$0xff] }
   0x7   :  { %330 = vst [vmem:[%s842_s1 + $0x28] sm:$0xff] %v329_v5  ;;  %v355_v18 = vld [vmem:[%s841_s0 + $0x290] sm:$0xff]  ;;  %v357_v19 = vld [vmem:[%s841_s0 + $0x298] sm:$0xff]  ;;  %v359_v20 = vld [vmem:[%s841_s0 + $0x2a0] sm:$0xff] }
   0x8   :  { %332 = vst [vmem:[%s842_s1 + $0x30] sm:$0xff] %v331_v6  ;;  %v361_v21 = vld [vmem:[%s841_s0 + $0x2a8] sm:$0xff]  ;;  %v363_v22 = vld [vmem:[%s841_s0 + $0x2b0] sm:$0xff]  ;;  %v365_v23 = vld [vmem:[%s841_s0 + $0x2b8] sm:$0xff] }
   0x9   :  { %334 = vst [vmem:[%s842_s1 + $0x38] sm:$0xff] %v333_v7  ;;  %v367_v24 = vld [vmem:[%s841_s0 + $0x2c0] sm:$0xff]  ;;  %v369_v25 = vld [vmem:[%s841_s0 + $0x2c8] sm:$0xff]  ;;  %v371_v26 = vld [vmem:[%s841_s0 + $0x2d0] sm:$0xff] }
   0xa   :  { %336 = vst [vmem:[%s842_s1 + $0x40] sm:$0xff] %v335_v8  ;;  %v373_v27 = vld [vmem:[%s841_s0 + $0x2d8] sm:$0xff]  ;;  %v375_v28 = vld [vmem:[%s841_s0 + $0x2e0] sm:$0xff]  ;;  %v377_v29 = vld [vmem:[%s841_s0 + $0x2e8] sm:$0xff] }
   0xb   :  { %338 = vst [vmem:[%s842_s1 + $0x48] sm:$0xff] %v337_v9  ;;  %v379_v30 = vld [vmem:[%s841_s0 + $0x2f0] sm:$0xff]  ;;  %v381_v31 = vld [vmem:[%s841_s0 + $0x2f8] sm:$0xff]  ;;  %v383_v32 = vld [vmem:[%s841_s0 + $0x300] sm:$0xff] }
   0xc   :  { %340 = vst [vmem:[%s842_s1 + $0x50] sm:$0xff] %v339_v10  ;;  %v385_v33 = vld [vmem:[%s841_s0 + $0x308] sm:$0xff]  ;;  %v387_v34 = vld [vmem:[%s841_s0 + $0x310] sm:$0xff]  ;;  %v389_v35 = vld [vmem:[%s841_s0 + $0x318] sm:$0xff] }
   0xd   :  { %342 = vst [vmem:[%s842_s1 + $0x58] sm:$0xff] %v341_v11  ;;  %v391_v36 = vld [vmem:[%s841_s0 + $0x320] sm:$0xff]  ;;  %v393_v37 = vld [vmem:[%s841_s0 + $0x328] sm:$0xff]  ;;  %v395_v38 = vld [vmem:[%s841_s0 + $0x330] sm:$0xff] }
   0xe   :  { %344 = vst [vmem:[%s842_s1 + $0x60] sm:$0xff] %v343_v12  ;;  %v397_v39 = vld [vmem:[%s841_s0 + $0x338] sm:$0xff]  ;;  %v399_v40 = vld [vmem:[%s841_s0 + $0x340] sm:$0xff]  ;;  %v401_v41 = vld [vmem:[%s841_s0 + $0x348] sm:$0xff] }
   0xf   :  { %346 = vst [vmem:[%s842_s1 + $0x68] sm:$0xff] %v345_v13  ;;  %v403_v42 = vld [vmem:[%s841_s0 + $0x350] sm:$0xff]  ;;  %v405_v43 = vld [vmem:[%s841_s0 + $0x358] sm:$0xff]  ;;  %v407_v44 = vld [vmem:[%s841_s0 + $0x360] sm:$0xff] }
  0x10   :  { %348 = vst [vmem:[%s842_s1 + $0x70] sm:$0xff] %v347_v14  ;;  %v409_v45 = vld [vmem:[%s841_s0 + $0x368] sm:$0xff]  ;;  %v411_v46 = vld [vmem:[%s841_s0 + $0x370] sm:$0xff]  ;;  %v413_v47 = vld [vmem:[%s841_s0 + $0x378] sm:$0xff] }
  0x11   :  { %350 = vst [vmem:[%s842_s1 + $0x78] sm:$0xff] %v349_v15  ;;  %v415_v48 = vld [vmem:[%s841_s0 + $0x380] sm:$0xff]  ;;  %v417_v49 = vld [vmem:[%s841_s0 + $0x388] sm:$0xff]  ;;  %v419_v50 = vld [vmem:[%s841_s0 + $0x390] sm:$0xff] }
  0x12   :  { %352 = vst [vmem:[%s842_s1 + $0x80] sm:$0xff] %v351_v16  ;;  %v421_v51 = vld [vmem:[%s841_s0 + $0x398] sm:$0xff]  ;;  %v423_v52 = vld [vmem:[%s841_s0 + $0x3a0] sm:$0xff]  ;;  %v425_v53 = vld [vmem:[%s841_s0 + $0x3a8] sm:$0xff] }
  0x13   :  { %354 = vst [vmem:[%s842_s1 + $0x88] sm:$0xff] %v353_v17  ;;  %v427_v54 = vld [vmem:[%s841_s0 + $0x3b0] sm:$0xff]  ;;  %v429_v55 = vld [vmem:[%s841_s0 + $0x3b8] sm:$0xff]  ;;  %v431_v56 = vld [vmem:[%s841_s0 + $0x3c0] sm:$0xff] }
  0x14   :  { %356 = vst [vmem:[%s842_s1 + $0x90] sm:$0xff] %v355_v18  ;;  %v433_v57 = vld [vmem:[%s841_s0 + $0x3c8] sm:$0xff]  ;;  %v435_v58 = vld [vmem:[%s841_s0 + $0x3d0] sm:$0xff]  ;;  %v437_v59 = vld [vmem:[%s841_s0 + $0x3d8] sm:$0xff] }
  0x15   :  { %358 = vst [vmem:[%s842_s1 + $0x98] sm:$0xff] %v357_v19  ;;  %v439_v60 = vld [vmem:[%s841_s0 + $0x3e0] sm:$0xff]  ;;  %v441_v61 = vld [vmem:[%s841_s0 + $0x3e8] sm:$0xff]  ;;  %v443_v62 = vld [vmem:[%s841_s0 + $0x3f0] sm:$0xff] }
  0x16   :  { %360 = vst [vmem:[%s842_s1 + $0xa0] sm:$0xff] %v359_v20  ;;  %v445_v63 = vld [vmem:[%s841_s0 + $0x3f8] sm:$0xff] }
  0x17   :  { %362 = vst [vmem:[%s842_s1 + $0xa8] sm:$0xff] %v361_v21 }
  0x18   :  { %364 = vst [vmem:[%s842_s1 + $0xb0] sm:$0xff] %v363_v22 }
  0x19   :  { %366 = vst [vmem:[%s842_s1 + $0xb8] sm:$0xff] %v365_v23 }
  0x1a   :  { %368 = vst [vmem:[%s842_s1 + $0xc0] sm:$0xff] %v367_v24 }
  0x1b   :  { %370 = vst [vmem:[%s842_s1 + $0xc8] sm:$0xff] %v369_v25 }
  0x1c   :  { %372 = vst [vmem:[%s842_s1 + $0xd0] sm:$0xff] %v371_v26 }
  0x1d   :  { %374 = vst [vmem:[%s842_s1 + $0xd8] sm:$0xff] %v373_v27 }
  0x1e   :  { %376 = vst [vmem:[%s842_s1 + $0xe0] sm:$0xff] %v375_v28 }
  0x1f   :  { %378 = vst [vmem:[%s842_s1 + $0xe8] sm:$0xff] %v377_v29 }
  0x20   :  { %380 = vst [vmem:[%s842_s1 + $0xf0] sm:$0xff] %v379_v30 }
  0x21   :  { %382 = vst [vmem:[%s842_s1 + $0xf8] sm:$0xff] %v381_v31 }
  0x22   :  { %384 = vst [vmem:[%s842_s1 + $0x100] sm:$0xff] %v383_v32 }
  0x23   :  { %386 = vst [vmem:[%s842_s1 + $0x108] sm:$0xff] %v385_v33 }
  0x24   :  { %388 = vst [vmem:[%s842_s1 + $0x110] sm:$0xff] %v387_v34 }
  0x25   :  { %390 = vst [vmem:[%s842_s1 + $0x118] sm:$0xff] %v389_v35 }
  0x26   :  { %392 = vst [vmem:[%s842_s1 + $0x120] sm:$0xff] %v391_v36 }
  0x27   :  { %394 = vst [vmem:[%s842_s1 + $0x128] sm:$0xff] %v393_v37 }
  0x28   :  { %396 = vst [vmem:[%s842_s1 + $0x130] sm:$0xff] %v395_v38 }
  0x29   :  { %398 = vst [vmem:[%s842_s1 + $0x138] sm:$0xff] %v397_v39 }
  0x2a   :  { %400 = vst [vmem:[%s842_s1 + $0x140] sm:$0xff] %v399_v40 }
  0x2b   :  { %402 = vst [vmem:[%s842_s1 + $0x148] sm:$0xff] %v401_v41 }
  0x2c   :  { %404 = vst [vmem:[%s842_s1 + $0x150] sm:$0xff] %v403_v42 }
  0x2d   :  { %406 = vst [vmem:[%s842_s1 + $0x158] sm:$0xff] %v405_v43 }
  0x2e   :  { %408 = vst [vmem:[%s842_s1 + $0x160] sm:$0xff] %v407_v44 }
  0x2f   :  { %410 = vst [vmem:[%s842_s1 + $0x168] sm:$0xff] %v409_v45 }
  0x30   :  { %412 = vst [vmem:[%s842_s1 + $0x170] sm:$0xff] %v411_v46 }
  0x31   :  { %414 = vst [vmem:[%s842_s1 + $0x178] sm:$0xff] %v413_v47 }
  0x32   :  { %416 = vst [vmem:[%s842_s1 + $0x180] sm:$0xff] %v415_v48 }
  0x33   :  { %418 = vst [vmem:[%s842_s1 + $0x188] sm:$0xff] %v417_v49 }
  0x34   :  { %420 = vst [vmem:[%s842_s1 + $0x190] sm:$0xff] %v419_v50 }
  0x35   :  { %422 = vst [vmem:[%s842_s1 + $0x198] sm:$0xff] %v421_v51 }
  0x36   :  { %424 = vst [vmem:[%s842_s1 + $0x1a0] sm:$0xff] %v423_v52 }
  0x37   :  { %426 = vst [vmem:[%s842_s1 + $0x1a8] sm:$0xff] %v425_v53 }
  0x38   :  { %428 = vst [vmem:[%s842_s1 + $0x1b0] sm:$0xff] %v427_v54 }
  0x39   :  { %430 = vst [vmem:[%s842_s1 + $0x1b8] sm:$0xff] %v429_v55 }
  0x3a   :  { %432 = vst [vmem:[%s842_s1 + $0x1c0] sm:$0xff] %v431_v56 }
  0x3b   :  { %434 = vst [vmem:[%s842_s1 + $0x1c8] sm:$0xff] %v433_v57 }
  0x3c   :  { %436 = vst [vmem:[%s842_s1 + $0x1d0] sm:$0xff] %v435_v58 }
  0x3d   :  { %438 = vst [vmem:[%s842_s1 + $0x1d8] sm:$0xff] %v437_v59 }
  0x3e   :  { %440 = vst [vmem:[%s842_s1 + $0x1e0] sm:$0xff] %v439_v60 }
  0x3f   :  { %442 = vst [vmem:[%s842_s1 + $0x1e8] sm:$0xff] %v441_v61 }
  0x40   :  { %444 = vst [vmem:[%s842_s1 + $0x1f0] sm:$0xff] %v443_v62 }
  0x41   :  { %446 = vst [vmem:[%s842_s1 + $0x1f8] sm:$0xff] %v445_v63 }

// kernel: custom-call
= control target key start
LH: loop header
LB: loop body
LE: loop exit
PB: predicated region body
PF: predicated region fallthrough
CT: control target
= control target key end

     0   :  { %s776_s0 = inlined_call_operand.vmem [shape: c64[16,16,8,4], index: 0, kind: input, shape index: {}]   ;;  %s777_s1 = inlined_call_operand.vmem [shape: f32[16,16,8,4], index: 1, kind: output, shape index: {}]  }
   0x1   :  { %v2_v0 = vld [vmem:[%s776_s0] sm:$0xff]  ;;  %v256_v1 = vld [vmem:[%s776_s0 + $0x8] sm:$0xff]  ;;  %v258_v2 = vld [vmem:[%s776_s0 + $0x10] sm:$0xff] }
   0x2   :  { %3 = vst [vmem:[%s777_s1] sm:$0xff] %v2_v0  ;;  %v260_v3 = vld [vmem:[%s776_s0 + $0x18] sm:$0xff]  ;;  %v262_v4 = vld [vmem:[%s776_s0 + $0x20] sm:$0xff]  ;;  %v264_v5 = vld [vmem:[%s776_s0 + $0x28] sm:$0xff] }
   0x3   :  { %257 = vst [vmem:[%s777_s1 + $0x8] sm:$0xff] %v256_v1  ;;  %v266_v6 = vld [vmem:[%s776_s0 + $0x30] sm:$0xff]  ;;  %v268_v7 = vld [vmem:[%s776_s0 + $0x38] sm:$0xff]  ;;  %v270_v8 = vld [vmem:[%s776_s0 + $0x40] sm:$0xff] }
   0x4   :  { %259 = vst [vmem:[%s777_s1 + $0x10] sm:$0xff] %v258_v2  ;;  %v272_v9 = vld [vmem:[%s776_s0 + $0x48] sm:$0xff]  ;;  %v274_v10 = vld [vmem:[%s776_s0 + $0x50] sm:$0xff]  ;;  %v276_v11 = vld [vmem:[%s776_s0 + $0x58] sm:$0xff] }
   0x5   :  { %261 = vst [vmem:[%s777_s1 + $0x18] sm:$0xff] %v260_v3  ;;  %v278_v12 = vld [vmem:[%s776_s0 + $0x60] sm:$0xff]  ;;  %v280_v13 = vld [vmem:[%s776_s0 + $0x68] sm:$0xff]  ;;  %v282_v14 = vld [vmem:[%s776_s0 + $0x70] sm:$0xff] }
   0x6   :  { %263 = vst [vmem:[%s777_s1 + $0x20] sm:$0xff] %v262_v4  ;;  %v284_v15 = vld [vmem:[%s776_s0 + $0x78] sm:$0xff]  ;;  %v286_v16 = vld [vmem:[%s776_s0 + $0x80] sm:$0xff]  ;;  %v288_v17 = vld [vmem:[%s776_s0 + $0x88] sm:$0xff] }
   0x7   :  { %265 = vst [vmem:[%s777_s1 + $0x28] sm:$0xff] %v264_v5  ;;  %v290_v18 = vld [vmem:[%s776_s0 + $0x90] sm:$0xff]  ;;  %v292_v19 = vld [vmem:[%s776_s0 + $0x98] sm:$0xff]  ;;  %v294_v20 = vld [vmem:[%s776_s0 + $0xa0] sm:$0xff] }
   0x8   :  { %267 = vst [vmem:[%s777_s1 + $0x30] sm:$0xff] %v266_v6  ;;  %v296_v21 = vld [vmem:[%s776_s0 + $0xa8] sm:$0xff]  ;;  %v298_v22 = vld [vmem:[%s776_s0 + $0xb0] sm:$0xff]  ;;  %v300_v23 = vld [vmem:[%s776_s0 + $0xb8] sm:$0xff] }
   0x9   :  { %269 = vst [vmem:[%s777_s1 + $0x38] sm:$0xff] %v268_v7  ;;  %v302_v24 = vld [vmem:[%s776_s0 + $0xc0] sm:$0xff]  ;;  %v304_v25 = vld [vmem:[%s776_s0 + $0xc8] sm:$0xff]  ;;  %v306_v26 = vld [vmem:[%s776_s0 + $0xd0] sm:$0xff] }
   0xa   :  { %271 = vst [vmem:[%s777_s1 + $0x40] sm:$0xff] %v270_v8  ;;  %v308_v27 = vld [vmem:[%s776_s0 + $0xd8] sm:$0xff]  ;;  %v310_v28 = vld [vmem:[%s776_s0 + $0xe0] sm:$0xff]  ;;  %v312_v29 = vld [vmem:[%s776_s0 + $0xe8] sm:$0xff] }
   0xb   :  { %273 = vst [vmem:[%s777_s1 + $0x48] sm:$0xff] %v272_v9  ;;  %v314_v30 = vld [vmem:[%s776_s0 + $0xf0] sm:$0xff]  ;;  %v316_v31 = vld [vmem:[%s776_s0 + $0xf8] sm:$0xff]  ;;  %v318_v32 = vld [vmem:[%s776_s0 + $0x100] sm:$0xff] }
   0xc   :  { %275 = vst [vmem:[%s777_s1 + $0x50] sm:$0xff] %v274_v10  ;;  %v320_v33 = vld [vmem:[%s776_s0 + $0x108] sm:$0xff]  ;;  %v322_v34 = vld [vmem:[%s776_s0 + $0x110] sm:$0xff]  ;;  %v324_v35 = vld [vmem:[%s776_s0 + $0x118] sm:$0xff] }
   0xd   :  { %277 = vst [vmem:[%s777_s1 + $0x58] sm:$0xff] %v276_v11  ;;  %v326_v36 = vld [vmem:[%s776_s0 + $0x120] sm:$0xff]  ;;  %v328_v37 = vld [vmem:[%s776_s0 + $0x128] sm:$0xff]  ;;  %v330_v38 = vld [vmem:[%s776_s0 + $0x130] sm:$0xff] }
   0xe   :  { %279 = vst [vmem:[%s777_s1 + $0x60] sm:$0xff] %v278_v12  ;;  %v332_v39 = vld [vmem:[%s776_s0 + $0x138] sm:$0xff]  ;;  %v334_v40 = vld [vmem:[%s776_s0 + $0x140] sm:$0xff]  ;;  %v336_v41 = vld [vmem:[%s776_s0 + $0x148] sm:$0xff] }
   0xf   :  { %281 = vst [vmem:[%s777_s1 + $0x68] sm:$0xff] %v280_v13  ;;  %v338_v42 = vld [vmem:[%s776_s0 + $0x150] sm:$0xff]  ;;  %v340_v43 = vld [vmem:[%s776_s0 + $0x158] sm:$0xff]  ;;  %v342_v44 = vld [vmem:[%s776_s0 + $0x160] sm:$0xff] }
  0x10   :  { %283 = vst [vmem:[%s777_s1 + $0x70] sm:$0xff] %v282_v14  ;;  %v344_v45 = vld [vmem:[%s776_s0 + $0x168] sm:$0xff]  ;;  %v346_v46 = vld [vmem:[%s776_s0 + $0x170] sm:$0xff]  ;;  %v348_v47 = vld [vmem:[%s776_s0 + $0x178] sm:$0xff] }
  0x11   :  { %285 = vst [vmem:[%s777_s1 + $0x78] sm:$0xff] %v284_v15  ;;  %v350_v48 = vld [vmem:[%s776_s0 + $0x180] sm:$0xff]  ;;  %v352_v49 = vld [vmem:[%s776_s0 + $0x188] sm:$0xff]  ;;  %v354_v50 = vld [vmem:[%s776_s0 + $0x190] sm:$0xff] }
  0x12   :  { %287 = vst [vmem:[%s777_s1 + $0x80] sm:$0xff] %v286_v16  ;;  %v356_v51 = vld [vmem:[%s776_s0 + $0x198] sm:$0xff]  ;;  %v358_v52 = vld [vmem:[%s776_s0 + $0x1a0] sm:$0xff]  ;;  %v360_v53 = vld [vmem:[%s776_s0 + $0x1a8] sm:$0xff] }
  0x13   :  { %289 = vst [vmem:[%s777_s1 + $0x88] sm:$0xff] %v288_v17  ;;  %v362_v54 = vld [vmem:[%s776_s0 + $0x1b0] sm:$0xff]  ;;  %v364_v55 = vld [vmem:[%s776_s0 + $0x1b8] sm:$0xff]  ;;  %v366_v56 = vld [vmem:[%s776_s0 + $0x1c0] sm:$0xff] }
  0x14   :  { %291 = vst [vmem:[%s777_s1 + $0x90] sm:$0xff] %v290_v18  ;;  %v368_v57 = vld [vmem:[%s776_s0 + $0x1c8] sm:$0xff]  ;;  %v370_v58 = vld [vmem:[%s776_s0 + $0x1d0] sm:$0xff]  ;;  %v372_v59 = vld [vmem:[%s776_s0 + $0x1d8] sm:$0xff] }
  0x15   :  { %293 = vst [vmem:[%s777_s1 + $0x98] sm:$0xff] %v292_v19  ;;  %v374_v60 = vld [vmem:[%s776_s0 + $0x1e0] sm:$0xff]  ;;  %v376_v61 = vld [vmem:[%s776_s0 + $0x1e8] sm:$0xff]  ;;  %v378_v62 = vld [vmem:[%s776_s0 + $0x1f0] sm:$0xff] }
  0x16   :  { %295 = vst [vmem:[%s777_s1 + $0xa0] sm:$0xff] %v294_v20  ;;  %v380_v63 = vld [vmem:[%s776_s0 + $0x1f8] sm:$0xff] }
  0x17   :  { %297 = vst [vmem:[%s777_s1 + $0xa8] sm:$0xff] %v296_v21 }
  0x18   :  { %299 = vst [vmem:[%s777_s1 + $0xb0] sm:$0xff] %v298_v22 }
  0x19   :  { %301 = vst [vmem:[%s777_s1 + $0xb8] sm:$0xff] %v300_v23 }
  0x1a   :  { %303 = vst [vmem:[%s777_s1 + $0xc0] sm:$0xff] %v302_v24 }
  0x1b   :  { %305 = vst [vmem:[%s777_s1 + $0xc8] sm:$0xff] %v304_v25 }
  0x1c   :  { %307 = vst [vmem:[%s777_s1 + $0xd0] sm:$0xff] %v306_v26 }
  0x1d   :  { %309 = vst [vmem:[%s777_s1 + $0xd8] sm:$0xff] %v308_v27 }
  0x1e   :  { %311 = vst [vmem:[%s777_s1 + $0xe0] sm:$0xff] %v310_v28 }
  0x1f   :  { %313 = vst [vmem:[%s777_s1 + $0xe8] sm:$0xff] %v312_v29 }
  0x20   :  { %315 = vst [vmem:[%s777_s1 + $0xf0] sm:$0xff] %v314_v30 }
  0x21   :  { %317 = vst [vmem:[%s777_s1 + $0xf8] sm:$0xff] %v316_v31 }
  0x22   :  { %319 = vst [vmem:[%s777_s1 + $0x100] sm:$0xff] %v318_v32 }
  0x23   :  { %321 = vst [vmem:[%s777_s1 + $0x108] sm:$0xff] %v320_v33 }
  0x24   :  { %323 = vst [vmem:[%s777_s1 + $0x110] sm:$0xff] %v322_v34 }
  0x25   :  { %325 = vst [vmem:[%s777_s1 + $0x118] sm:$0xff] %v324_v35 }
  0x26   :  { %327 = vst [vmem:[%s777_s1 + $0x120] sm:$0xff] %v326_v36 }
  0x27   :  { %329 = vst [vmem:[%s777_s1 + $0x128] sm:$0xff] %v328_v37 }
  0x28   :  { %331 = vst [vmem:[%s777_s1 + $0x130] sm:$0xff] %v330_v38 }
  0x29   :  { %333 = vst [vmem:[%s777_s1 + $0x138] sm:$0xff] %v332_v39 }
  0x2a   :  { %335 = vst [vmem:[%s777_s1 + $0x140] sm:$0xff] %v334_v40 }
  0x2b   :  { %337 = vst [vmem:[%s777_s1 + $0x148] sm:$0xff] %v336_v41 }
  0x2c   :  { %339 = vst [vmem:[%s777_s1 + $0x150] sm:$0xff] %v338_v42 }
  0x2d   :  { %341 = vst [vmem:[%s777_s1 + $0x158] sm:$0xff] %v340_v43 }
  0x2e   :  { %343 = vst [vmem:[%s777_s1 + $0x160] sm:$0xff] %v342_v44 }
  0x2f   :  { %345 = vst [vmem:[%s777_s1 + $0x168] sm:$0xff] %v344_v45 }
  0x30   :  { %347 = vst [vmem:[%s777_s1 + $0x170] sm:$0xff] %v346_v46 }
  0x31   :  { %349 = vst [vmem:[%s777_s1 + $0x178] sm:$0xff] %v348_v47 }
  0x32   :  { %351 = vst [vmem:[%s777_s1 + $0x180] sm:$0xff] %v350_v48 }
  0x33   :  { %353 = vst [vmem:[%s777_s1 + $0x188] sm:$0xff] %v352_v49 }
  0x34   :  { %355 = vst [vmem:[%s777_s1 + $0x190] sm:$0xff] %v354_v50 }
  0x35   :  { %357 = vst [vmem:[%s777_s1 + $0x198] sm:$0xff] %v356_v51 }
  0x36   :  { %359 = vst [vmem:[%s777_s1 + $0x1a0] sm:$0xff] %v358_v52 }
  0x37   :  { %361 = vst [vmem:[%s777_s1 + $0x1a8] sm:$0xff] %v360_v53 }
  0x38   :  { %363 = vst [vmem:[%s777_s1 + $0x1b0] sm:$0xff] %v362_v54 }
  0x39   :  { %365 = vst [vmem:[%s777_s1 + $0x1b8] sm:$0xff] %v364_v55 }
  0x3a   :  { %367 = vst [vmem:[%s777_s1 + $0x1c0] sm:$0xff] %v366_v56 }
  0x3b   :  { %369 = vst [vmem:[%s777_s1 + $0x1c8] sm:$0xff] %v368_v57 }
  0x3c   :  { %371 = vst [vmem:[%s777_s1 + $0x1d0] sm:$0xff] %v370_v58 }
  0x3d   :  { %373 = vst [vmem:[%s777_s1 + $0x1d8] sm:$0xff] %v372_v59 }
  0x3e   :  { %375 = vst [vmem:[%s777_s1 + $0x1e0] sm:$0xff] %v374_v60 }
  0x3f   :  { %377 = vst [vmem:[%s777_s1 + $0x1e8] sm:$0xff] %v376_v61 }
  0x40   :  { %379 = vst [vmem:[%s777_s1 + $0x1f0] sm:$0xff] %v378_v62 }
  0x41   :  { %381 = vst [vmem:[%s777_s1 + $0x1f8] sm:$0xff] %v380_v63 }

// kernel: fnf2d_forward.11
= control target key start
LH: loop header
LB: loop body
LE: loop exit
PB: predicated region body
PF: predicated region fallthrough
CT: control target
= control target key end

     0   :  { %vm29_vm0 = vcmask 261120   ;;  %v144_v45 = vmov -1.0   ;;  %vm105_vm6 = vcmask 523264   ;;  %vm129_vm7 = vcmask 64512   ;;  %s223_s1 = inlined_call_operand.vmem [shape: f32[32,64], index: 1, kind: input, shape index: {}]   ;;  %s224_s2 = inlined_call_operand.vmem [shape: f32[1,64], index: 2, kind: input, shape index: {}]   ;;  %s225_s0 = inlined_call_operand.vmem [shape: f32[8,32], index: 0, kind: input, shape index: {}]   ;;  %s226_s4 = inlined_call_operand.vmem [shape: f32[1,8], index: 4, kind: input, shape index: {}]   ;;  %s227_s3 = inlined_call_operand.vmem [shape: f32[64,8], index: 3, kind: input, shape index: {}]   ;;  %s228_s5 = inlined_call_operand.vmem [shape: f32[8,8], index: 5, kind: output, shape index: {}]  }
   0x1   :  { %v24_v0 = vld [vmem:[%s223_s1 + $0x18] sm:$0xff]  ;;  %v23_v1 = vld [vmem:[%s223_s1 + $0x10] sm:$0xff]  ;;  %v22_v2 = vld [vmem:[%s223_s1 + $0x8] sm:$0xff] }
   0x2   :  { %45 = vmatpush.msra.mxu0 %v24_v0  ;;  %v21_v3 = vld [vmem:[%s223_s1] sm:$0xff]  ;;  %v100_v5 = vld [vmem:[%s227_s3 + $0x38] sm:$0xff]  ;;  %v99_v6 = vld [vmem:[%s227_s3 + $0x30] sm:$0xff] }
   0x3   :  { %v20_v4 = vld [vmem:[%s225_s0] sm:$0xff]  ;;  %117 = vmatpush.msra.mxu1 %v100_v5  ;;  %v98_v7 = vld [vmem:[%s227_s3 + $0x28] sm:$0xff]  ;;  %v96_v9 = vld [vmem:[%s227_s3 + $0x18] sm:$0xff] }
   0x4   :  { %46 = vmatpush.msra.mxu0 %v23_v1  ;;  %v97_v8 = vld [vmem:[%s227_s3 + $0x20] sm:$0xff]  ;;  %v95_v11 = vld [vmem:[%s227_s3 + $0x10] sm:$0xff]  ;;  %v94_v13 = vld [vmem:[%s227_s3 + $0x8] sm:$0xff] }
   0x5   :  { %118 = vmatpush.msra.mxu1 %v99_v6  ;;  %v138_v10 = vld [vmem:[%s224_s2] ss:$0 sm:$0xff] }
   0x6   :  { %47 = vmatpush.msra.mxu0 %v22_v2  ;;  %v93_v15 = vld [vmem:[%s227_s3] sm:$0xff] }
   0x7   :  { %119 = vmatpush.msra.mxu1 %v98_v7  ;;  %v139_v51 = vld [vmem:[%s226_s4] ss:$0 sm:$0xff] }
   0x8   :  { %48 = vmatpush.msra.mxu0 %v21_v3 }
   0x9   :  { %135 = vmatmul.msk.f32.vlgmr.msra.gmra.mxu0 %vm29_vm0, %v20_v4  ;;  %120 = vmatpush.msra.mxu1 %v97_v8 }
   0xb   :  { %121 = vmatpush.msra.mxu1 %v96_v9 }
   0xd   :  { %122 = vmatpush.msra.mxu1 %v95_v11 }
   0xf   :  { %123 = vmatpush.msra.mxu1 %v94_v13 }
  0x11   :  { %124 = vmatpush.msra.mxu1 %v93_v15 }
  0x86   :  { %v50_v12 = vpop.f32.mrf.mxu0 }
  0x87   :  { %v51_v14 = vadd.f32 %v138_v10, %v50_v12 }
  0x89   :  { %v54_v16 = vmul.f32 0.70710677, %v51_v14  ;;  %v53_v48 = vmul.f32 0.5, %v51_v14 }
  0x8b   :  { %v57_v17 = vand.u32 2147483647, %v54_v16  ;;  %vm55_vm5 = vcmp.ge.f32.partialorder %v54_v16, 0.0 }
  0x8c   :  { %v56_v46 = vsel %vm55_vm5, 1.0, %v144_v45 }
  0x8d   :  { %v58_v18 = vmul.f32 0.3275911, %v57_v17  ;;  %v84_v29 = vsub.f32 0.0, %v57_v17 }
  0x8f   :  { %v59_v19 = vadd.f32 1.0, %v58_v18  ;;  %v85_v33 = vmul.f32 %v84_v29, %v57_v17 }
  0x91   :  { %140 = vrcp.f32 %v59_v19  ;;  %v71_v23 = vand.u32 2147483648, %v59_v19  ;;  %v69_v25 = vand.u32 2147483647, %v59_v19  ;;  %vm65_vm2 = vweird.f32 %v59_v19 }
  0x92   :  { %v86_v36 = vmul.f32 1.442695, %v85_v33 }
  0x93   :  { %v72_v27 = vor.u32 1.1754944e-38, %v71_v23  ;;  %vm70_vm4 = vcmp.eq.f32.partialorder %v69_v25, 8.507059e+37 }
  0x94   :  { %142 = vpow2.f32 %v86_v36 }
  0x97   :  { %v141_v20 = vpop.eup %140 }
  0x98   :  { %v61_v21 = vmul.f32 %v141_v20, %v59_v19  ;;  %vm66_vm1 = vweird.f32 %v141_v20 }
  0x99   :  { %vm67_vm3 = vmor %vm65_vm2, %vm66_vm1 }
  0x9a   :  { %v62_v22 = vsub.f32 1.0, %v61_v21  ;;  %v143_v42 = vpop.eup %142 }
  0x9c   :  { %v63_v24 = vmul.f32 %v141_v20, %v62_v22 }
  0x9e   :  { %v64_v26 = vadd.f32 %v141_v20, %v63_v24 }
  0xa0   :  { %v68_v28 = vsel %vm67_vm3, %v141_v20, %v64_v26 }
  0xa1   :  { %v73_v30 = vsel %vm70_vm4, %v72_v27, %v68_v28 }
  0xa2   :  { %v75_v31 = vmul.f32 1.0614054, %v73_v30 }
  0xa4   :  { %v76_v32 = vadd.f32 -1.4531521, %v75_v31 }
  0xa6   :  { %v77_v34 = vmul.f32 %v76_v32, %v73_v30 }
  0xa8   :  { %v78_v35 = vadd.f32 1.4214138, %v77_v34 }
  0xaa   :  { %v79_v37 = vmul.f32 %v78_v35, %v73_v30 }
  0xac   :  { %v80_v38 = vadd.f32 -0.28449672, %v79_v37 }
  0xae   :  { %v81_v39 = vmul.f32 %v80_v38, %v73_v30 }
  0xb0   :  { %v82_v40 = vadd.f32 0.2548296, %v81_v39 }
  0xb2   :  { %v83_v41 = vmul.f32 %v82_v40, %v73_v30 }
  0xb4   :  { %v88_v43 = vmul.f32 %v143_v42, %v83_v41 }
  0xb6   :  { %v89_v44 = vsub.f32 1.0, %v88_v43 }
  0xb8   :  { %v90_v47 = vmul.f32 %v89_v44, %v56_v46 }
  0xba   :  { %v91_v49 = vadd.f32 1.0, %v90_v47 }
  0xbc   :  { %v92_v50 = vmul.f32 %v91_v49, %v53_v48 }
  0xbe   :  { %136 = vmatmul.msk.f32.vlgmr.msra.gmra.mxu1 %vm105_vm6, %v92_v50 }
 0x13b   :  { %v126_v52 = vpop.f32.mrf.mxu1 }
 0x13c   :  { %v127_v53 = vadd.f32 %v139_v51, %v126_v52 }
 0x13e   :  { %130 = vst.msk [vmem:[%s228_s5] sm:$0xff] %vm129_vm7, %v127_v53 }

// kernel: fnf2d_forward.10
= control target key start
LH: loop header
LB: loop body
LE: loop exit
PB: predicated region body
PF: predicated region fallthrough
CT: control target
= control target key end

     0   :  { %s3347_s21 = smov 0   ;;  %s3349_s22 = smov 0   ;;  %s6035_s0 = inlined_call_operand.vmem [shape: f32[2,324,16], index: 0, kind: input, shape index: {}]   ;;  %s6036_s1 = inlined_call_operand.vmem [shape: f32[16,32], index: 1, kind: input, shape index: {}]   ;;  %s6037_s2 = inlined_call_operand.vmem [shape: f32[1,32], index: 2, kind: input, shape index: {}]   ;;  %s6038_s3 = inlined_call_operand.vmem [shape: f32[32,16], index: 3, kind: input, shape index: {}]   ;;  %s6039_s4 = inlined_call_operand.vmem [shape: f32[1,16], index: 4, kind: input, shape index: {}]   ;;  %s6040_s5 = inlined_call_operand.vmem [shape: f32[1,324,1], index: 5, kind: input, shape index: {}]   ;;  %s6041_s6 = inlined_call_operand.vmem [shape: f32[2,1,16], index: 6, kind: output, shape index: {}]  }
   0x1   :  { %s3351_s23 = smov 0  }
   0x2 LB: > { %s28_s24 = sadd.s32 1, %s3303_s22  ;;  %p2993_p0 = scmp.ge.s32.totalorder %s3307_s23, 1  ;;  %s3307_s23 = sphi %s3351_s23, %s16_s23   ;;  %s3303_s22 = sphi %s3349_s22, %s6389_s22   ;;  %s3299_s21 = sphi %s3347_s21, %s6388_s21  }
   0x3   : > { %p30_p1 = scmp.ge.s32.totalorder %s28_s24, 2  ;;  %p242_p2 = scmp.lt.s32.totalorder %s3307_s23, 3 }
   0x5   : > { %s6391_s24 = smov (%p30_p1, %s28_s24), 0  ;;  %p243_p3 = pnand %p2993_p0, %p242_p2 }
   0x7   : > { %246 = sbr.rel (%p243_p3) target bundleno = 767 (0x2ff), region = 44 }
   0xc   : > { %v346_v0 = vld [vmem:[%s6036_s1 + $0x8] sm:$0xff]  ;;  %v345_v1 = vld [vmem:[%s6036_s1] sm:$0xff]  ;;  %p280_p4 = scmp.lt.s32.totalorder %s3299_s21, 1  ;;  %vm351_vm0 = vcmask 130048   ;;  %v3309_v34 = vmov 0   ;;  %v2530_v42 = vld [vmem:[%s6040_s5 + $0x10] sm:$0xff] }
   0xd   : > { %489 = vmatpush.msra.mxu0 %v346_v0  ;;  %3079 = vmatpush.msra.mxu3 %v346_v0  ;;  %v2528_v35 = vld [vmem:[%s6040_s5] sm:$0xff]  ;;  %v2529_v43 = vld [vmem:[%s6040_s5 + $0x8] sm:$0xff]  ;;  %v2531_v51 = vld [vmem:[%s6040_s5 + $0x18] sm:$0xff] }
   0xe   : > { %s6393_s21 = smov (!%p280_p4, %s3299_s21), 1  ;;  %3113 = vset.pattern.permute.xlu0 %v3309_v34  ;;  %3114 = vset.pattern.permute.xlu1 %v3309_v34  ;;  %v3449_v36 = vld [vmem:[%s6037_s2] ss:$0 sm:$0xff]  ;;  %v2534_v52 = vld [vmem:[%s6040_s5 + $0x30] sm:$0xff] }
   0xf   : > { %490 = vmatpush.msra.mxu0 %v345_v1  ;;  %3080 = vmatpush.msra.mxu3 %v345_v1  ;;  %s3085_s29 = smul.u32 328, %s6393_s21  ;;  %s297_s12 = scalar_lea.vmem %s6041_s6, %s6393_s21 }
  0x10   : > { %2571 = vperm.xlu0 %3113, %v2528_v35   ;;  %3115 = vset.pattern.permute.xlu2 %v3309_v34 }
  0x11   : > { %s3377_s8 = scalar_lea.vmem %s6035_s0, %s3085_s29  ;;  %2581 = vperm.xlu1 %3114, %v2530_v42  }
  0x12   : > { %v304_v2 = vld [vmem:[%s3377_s8] sm:$0xff]  ;;  %v325_v3 = vld [vmem:[%s3377_s8 + $0xa8] sm:$0xff]  ;;  %v326_v5 = vld [vmem:[%s3377_s8 + $0xb0] sm:$0xff] }
  0x13   : > { %2995 = vmatmul.msk.f32.vlgmr.msra.gmra.mxu0 %vm351_vm0, %v304_v2  ;;  %3016 = vmatmul.msk.f32.vlgmr.msra.gmra.mxu3 %vm351_vm0, %v325_v3  ;;  %v305_v4 = vld [vmem:[%s3377_s8 + $0x8] sm:$0xff]  ;;  %v306_v6 = vld [vmem:[%s3377_s8 + $0x10] sm:$0xff]  ;;  %v327_v7 = vld [vmem:[%s3377_s8 + $0xb8] sm:$0xff] }
  0x14   : > { %v307_v8 = vld [vmem:[%s3377_s8 + $0x18] sm:$0xff]  ;;  %v328_v9 = vld [vmem:[%s3377_s8 + $0xc0] sm:$0xff]  ;;  %v329_v11 = vld [vmem:[%s3377_s8 + $0xc8] sm:$0xff] }
  0x15   : > { %v308_v10 = vld [vmem:[%s3377_s8 + $0x20] sm:$0xff]  ;;  %v309_v12 = vld [vmem:[%s3377_s8 + $0x28] sm:$0xff]  ;;  %v330_v13 = vld [vmem:[%s3377_s8 + $0xd0] sm:$0xff] }
  0x16   : > { %v310_v14 = vld [vmem:[%s3377_s8 + $0x30] sm:$0xff]  ;;  %v331_v15 = vld [vmem:[%s3377_s8 + $0xd8] sm:$0xff]  ;;  %v332_v17 = vld [vmem:[%s3377_s8 + $0xe0] sm:$0xff] }
  0x17   : > { %v311_v16 = vld [vmem:[%s3377_s8 + $0x38] sm:$0xff]  ;;  %v312_v18 = vld [vmem:[%s3377_s8 + $0x40] sm:$0xff]  ;;  %v333_v19 = vld [vmem:[%s3377_s8 + $0xe8] sm:$0xff] }
  0x18   : > { %v313_v20 = vld [vmem:[%s3377_s8 + $0x48] sm:$0xff]  ;;  %v334_v21 = vld [vmem:[%s3377_s8 + $0xf0] sm:$0xff]  ;;  %v335_v23 = vld [vmem:[%s3377_s8 + $0xf8] sm:$0xff]  ;;  %2576 = vperm.xlu0 %3113, %v2529_v43  }
  0x19   : > { %v314_v22 = vld [vmem:[%s3377_s8 + $0x50] sm:$0xff]  ;;  %v315_v24 = vld [vmem:[%s3377_s8 + $0x58] sm:$0xff]  ;;  %v336_v25 = vld [vmem:[%s3377_s8 + $0x100] sm:$0xff]  ;;  %2586 = vperm.xlu1 %3114, %v2531_v51  }
  0x1a   : > { %v316_v26 = vld [vmem:[%s3377_s8 + $0x60] sm:$0xff]  ;;  %v337_v27 = vld [vmem:[%s3377_s8 + $0x108] sm:$0xff]  ;;  %v338_v29 = vld [vmem:[%s3377_s8 + $0x110] sm:$0xff] }
  0x1b   : > { %2996 = vmatmul.msk.f32.gmra.mxu0 %vm351_vm0, %v305_v4  ;;  %3017 = vmatmul.msk.f32.gmra.mxu3 %vm351_vm0, %v326_v5  ;;  %v317_v28 = vld [vmem:[%s3377_s8 + $0x68] sm:$0xff]  ;;  %v318_v30 = vld [vmem:[%s3377_s8 + $0x70] sm:$0xff]  ;;  %v339_v31 = vld [vmem:[%s3377_s8 + $0x118] sm:$0xff] }
  0x1c   : > { %v319_v32 = vld [vmem:[%s3377_s8 + $0x78] sm:$0xff]  ;;  %v340_v33 = vld [vmem:[%s3377_s8 + $0x120] sm:$0xff]  ;;  %v341_v39 = vld [vmem:[%s3377_s8 + $0x128] sm:$0xff] }
  0x1d   : > { %v320_v38 = vld [vmem:[%s3377_s8 + $0x80] sm:$0xff]  ;;  %v321_v45 = vld [vmem:[%s3377_s8 + $0x88] sm:$0xff]  ;;  %v342_v46 = vld [vmem:[%s3377_s8 + $0x130] sm:$0xff] }
  0x1e   : > { %v322_v54 = vld [vmem:[%s3377_s8 + $0x90] sm:$0xff]  ;;  %v343_v55 = vld [vmem:[%s3377_s8 + $0x138] sm:$0xff]  ;;  %v344_v1 = vld [vmem:[%s3377_s8 + $0x140] sm:$0xf] }
  0x1f   : > { %v323_v0 = vld [vmem:[%s3377_s8 + $0x98] sm:$0xff]  ;;  %v2537_v5 = vld [vmem:[%s6040_s5 + $0x48] sm:$0xff] }
  0x20   : > { %2601 = vperm.xlu0 %3113, %v2534_v52   ;;  %v2535_v4 = vld [vmem:[%s6040_s5 + $0x38] sm:$0xff] }
  0x21   : > { %2606 = vperm.xlu1 %3114, %v2535_v4  }
  0x23   : > { %2997 = vmatmul.msk.f32.gmra.mxu0 %vm351_vm0, %v306_v6  ;;  %3018 = vmatmul.msk.f32.gmra.mxu3 %vm351_vm0, %v327_v7  ;;  %v2258_v6 = vld [vmem:[%s6038_s3 + $0x18] sm:$0xff] }
  0x24   : > { %2399 = vmatpush.msra.mxu1 %v2258_v6  ;;  %3081 = vmatpush.msra.mxu2 %v2258_v6 }
  0x28   : > { %2616 = vperm.xlu0 %3113, %v2537_v5  }
  0x2b   : > { %2998 = vmatmul.msk.f32.gmra.mxu0 %vm351_vm0, %v307_v8  ;;  %3019 = vmatmul.msk.f32.gmra.mxu3 %vm351_vm0, %v328_v9  ;;  %v2257_v9 = vld [vmem:[%s6038_s3 + $0x10] sm:$0xff] }
  0x2c   : > { %2400 = vmatpush.msra.mxu1 %v2257_v9  ;;  %3082 = vmatpush.msra.mxu2 %v2257_v9 }
  0x33   : > { %2999 = vmatmul.msk.f32.gmra.mxu0 %vm351_vm0, %v308_v10  ;;  %3020 = vmatmul.msk.f32.gmra.mxu3 %vm351_vm0, %v329_v11 }
  0x3b   : > { %3000 = vmatmul.msk.f32.gmra.mxu0 %vm351_vm0, %v309_v12  ;;  %3021 = vmatmul.msk.f32.gmra.mxu3 %vm351_vm0, %v330_v13  ;;  %v2256_v13 = vld [vmem:[%s6038_s3 + $0x8] sm:$0xff] }
  0x3c   : > { %2401 = vmatpush.msra.mxu1 %v2256_v13  ;;  %3083 = vmatpush.msra.mxu2 %v2256_v13 }
  0x43   : > { %3001 = vmatmul.msk.f32.gmra.mxu0 %vm351_vm0, %v310_v14  ;;  %3022 = vmatmul.msk.f32.gmra.mxu3 %vm351_vm0, %v331_v15 }
  0x4b   : > { %3002 = vmatmul.msk.f32.gmra.mxu0 %vm351_vm0, %v311_v16  ;;  %3023 = vmatmul.msk.f32.gmra.mxu3 %vm351_vm0, %v332_v17 }
  0x53   : > { %3003 = vmatmul.msk.f32.gmra.mxu0 %vm351_vm0, %v312_v18  ;;  %3024 = vmatmul.msk.f32.gmra.mxu3 %vm351_vm0, %v333_v19 }
  0x5b   : > { %3004 = vmatmul.msk.f32.gmra.mxu0 %vm351_vm0, %v313_v20  ;;  %3025 = vmatmul.msk.f32.gmra.mxu3 %vm351_vm0, %v334_v21 }
  0x63   : > { %3005 = vmatmul.msk.f32.gmra.mxu0 %vm351_vm0, %v314_v22  ;;  %3026 = vmatmul.msk.f32.gmra.mxu3 %vm351_vm0, %v335_v23  ;;  %v2255_v22 = vld [vmem:[%s6038_s3] sm:$0xff] }
  0x64   : > { %2402 = vmatpush.msra.mxu1 %v2255_v22  ;;  %3084 = vmatpush.msra.mxu2 %v2255_v22 }
  0x6b   : > { %3006 = vmatmul.msk.f32.gmra.mxu0 %vm351_vm0, %v315_v24  ;;  %3027 = vmatmul.msk.f32.gmra.mxu3 %vm351_vm0, %v336_v25 }
  0x73   : > { %3007 = vmatmul.msk.f32.gmra.mxu0 %vm351_vm0, %v316_v26  ;;  %3028 = vmatmul.msk.f32.gmra.mxu3 %vm351_vm0, %v337_v27  ;;  %v324_v27 = vld [vmem:[%s3377_s8 + $0xa0] sm:$0xff] }
  0x7b   : > { %3008 = vmatmul.msk.f32.gmra.mxu0 %vm351_vm0, %v317_v28  ;;  %3029 = vmatmul.msk.f32.gmra.mxu3 %vm351_vm0, %v338_v29  ;;  %v6042_v28 = vmov -1.0  }
  0x83   : > { %3009 = vmatmul.msk.f32.gmra.mxu0 %vm351_vm0, %v318_v30  ;;  %3030 = vmatmul.msk.f32.gmra.mxu3 %vm351_vm0, %v339_v31 }
  0x8b   : > { %3010 = vmatmul.msk.f32.gmra.mxu0 %vm351_vm0, %v319_v32  ;;  %3031 = vmatmul.msk.f32.gmra.mxu3 %vm351_vm0, %v340_v33 }
  0x90   : > { %v492_v37 = vpop.f32.mrf.mxu0 }
  0x91   : > { %v3456_v40 = vadd.f32 %v3449_v36, %v492_v37 }
  0x93   : > { %3011 = vmatmul.msk.f32.gmra.mxu0 %vm351_vm0, %v320_v38  ;;  %3032 = vmatmul.msk.f32.gmra.mxu3 %vm351_vm0, %v341_v39  ;;  %v3465_v44 = vmul.f32 0.70710677, %v3456_v40  ;;  %v3545_v23 = vmul.f32 0.5, %v3456_v40 }
  0x95   : > { %v779_v48 = vand.u32 2147483647, %v3465_v44  ;;  %vm697_vm1 = vcmp.ge.f32.partialorder %v3465_v44, 0.0 }
  0x96   : > { %v555_v41 = vpop.f32.mrf.mxu3  ;;  %v3555_v29 = vsel %vm697_vm1, 1.0, %v6042_v28 }
  0x97   : > { %v3473_v50 = vadd.f32 %v3449_v36, %v555_v41  ;;  %v820_v53 = vmul.f32 0.3275911, %v779_v48  ;;  %v1886_v2 = vsub.f32 0.0, %v779_v48 }
  0x98   : > { %v495_v47 = vpop.f32.mrf.mxu0 }
  0x99   : > { %v3484_v56 = vadd.f32 %v3449_v36, %v495_v47  ;;  %v3487_v57 = vmul.f32 0.70710677, %v3473_v50  ;;  %v3491_v59 = vadd.f32 1.0, %v820_v53  ;;  %v1927_v11 = vmul.f32 %v1886_v2, %v779_v48 }
  0x9a   : > { %v3560_v31 = vmul.f32 0.5, %v3473_v50 }
  0x9b   : > { %3012 = vmatmul.msk.f32.gmra.mxu0 %vm351_vm0, %v321_v45  ;;  %3033 = vmatmul.msk.f32.gmra.mxu3 %vm351_vm0, %v342_v46  ;;  %v3497_v61 = vmul.f32 0.70710677, %v3484_v56  ;;  %v800_v62 = vand.u32 2147483647, %v3487_v57  ;;  %3118 = vrcp.f32 %v3491_v59  ;;  %v1968_v24 = vmul.f32 1.442695, %v1927_v11 }
  0x9c   : > { %v913_v34 = vand.u32 2147483648, %v3491_v59  ;;  %vm718_vm2 = vcmp.ge.f32.partialorder %v3487_v57, 0.0  ;;  %v3574_v39 = vmul.f32 0.5, %v3484_v56  ;;  %v911_v52 = vand.u32 2147483647, %v3491_v59 }
  0x9d   : > { %v780_v8 = vand.u32 2147483647, %v3497_v61  ;;  %v841_v10 = vmul.f32 0.3275911, %v800_v62  ;;  %v1907_v17 = vsub.f32 0.0, %v800_v62  ;;  %vm698_vm3 = vcmp.ge.f32.partialorder %v3497_v61, 0.0 }
  0x9e   : > { %v558_v49 = vpop.f32.mrf.mxu3  ;;  %v3589_v47 = vsel %vm718_vm2, 1.0, %v6042_v28  ;;  %v3597_v53 = vor.u32 1.1754944e-38, %v913_v34  ;;  %vm907_vm5 = vweird.f32 %v3491_v59  ;;  %vm3750_vm11 = vcmp.eq.f32.partialorder %v911_v52, 8.507059e+37 }
  0x9f   : > { %v3494_v60 = vadd.f32 %v3449_v36, %v558_v49  ;;  %v821_v18 = vmul.f32 0.3275911, %v780_v8  ;;  %v3539_v20 = vadd.f32 1.0, %v841_v10  ;;  %v1887_v21 = vsub.f32 0.0, %v780_v8 }
  0xa0   : > { %v498_v58 = vpop.f32.mrf.mxu0  ;;  %v1948_v35 = vmul.f32 %v1907_v17, %v800_v62 }
  0xa1   : > { %v3504_v3 = vmul.f32 0.70710677, %v3494_v60  ;;  %v3516_v7 = vadd.f32 %v3449_v36, %v498_v58  ;;  %v3533_v16 = vpop.eup %3118  ;;  %v3566_v37 = vadd.f32 1.0, %v821_v18  ;;  %3120 = vrcp.f32 %v3539_v20 }
  0xa2   : > { %v903_v30 = vmul.f32 %v3533_v16, %v3491_v59  ;;  %v1928_v40 = vmul.f32 %v1887_v21, %v780_v8  ;;  %3122 = vpow2.f32 %v1968_v24  ;;  %v2010_v48 = vmul.f32 1.442695, %v1948_v35 }
  0xa3   : > { %3013 = vmatmul.msk.f32.gmra.mxu0 %vm351_vm0, %v322_v54  ;;  %3034 = vmatmul.msk.f32.gmra.mxu3 %vm351_vm0, %v343_v55  ;;  %v3525_v12 = vand.u32 2147483647, %v3504_v3  ;;  %v3531_v14 = vmul.f32 0.70710677, %v3516_v7  ;;  %3124 = vrcp.f32 %v3566_v37  ;;  %vm719_vm4 = vcmp.ge.f32.partialorder %v3504_v3, 0.0 }
  0xa4   : > { %v904_v44 = vsub.f32 1.0, %v903_v30  ;;  %v1970_v50 = vmul.f32 1.442695, %v1928_v40  ;;  %v3601_v54 = vsel %vm698_vm3, 1.0, %v6042_v28  ;;  %v3614_v61 = vmul.f32 0.5, %v3494_v60 }
  0xa5   : > { %v842_v25 = vmul.f32 0.3275911, %v3525_v12  ;;  %v3563_v32 = vand.u32 2147483647, %v3531_v14  ;;  %v1908_v45 = vsub.f32 0.0, %v3525_v12  ;;  %v3625_v2 = vsel %vm719_vm4, 1.0, %v6042_v28 }
  0xa6   : > { %v561_v63 = vpop.f32.mrf.mxu3  ;;  %v905_v58 = vmul.f32 %v3533_v16, %v904_v44  ;;  %v3630_v60 = vmul.f32 0.5, %v3516_v7  ;;  %vm908_vm6 = vweird.f32 %v3533_v16  ;;  %vm699_vm7 = vcmp.ge.f32.partialorder %v3531_v14, 0.0 }
  0xa7   : > { %v3537_v19 = vadd.f32 %v3449_v36, %v561_v63  ;;  %v3577_v41 = vadd.f32 1.0, %v842_v25  ;;  %v822_v46 = vmul.f32 0.3275911, %v3563_v32  ;;  %v3610_v57 = vpop.eup %3120  ;;  %v1949_v62 = vmul.f32 %v1908_v45, %v3525_v12  ;;  %vm3687_vm8 = vmor %vm907_vm5, %vm908_vm6 }
  0xa8   : > { %v501_v15 = vpop.f32.mrf.mxu0  ;;  %6071 = vst [vmem:[#allocation3_spill] sm:$0xff] %v3630_v60  ;;  %v1888_v6 = vsub.f32 0.0, %v3563_v32  ;;  %v1218_v10 = vmul.f32 %v3610_v57, %v3539_v20  ;;  %v3646_v7 = vadd.f32 %v3533_v16, %v905_v58  ;;  %vm1222_vm14 = vweird.f32 %v3539_v20 }
  0xa9   : > { %v3549_v26 = vadd.f32 %v3449_v36, %v501_v15  ;;  %v3569_v38 = vmul.f32 0.70710677, %v3537_v19  ;;  %3126 = vrcp.f32 %v3577_v41  ;;  %v3617_v63 = vadd.f32 1.0, %v822_v46 }
  0xaa   : > { %3128 = vpow2.f32 %v2010_v48  ;;  %v2012_v13 = vmul.f32 1.442695, %v1949_v62  ;;  %v3653_v17 = vmul.f32 0.5, %v3537_v19  ;;  %v1929_v25 = vmul.f32 %v1888_v6, %v3563_v32 }
  0xab   : > { %3014 = vmatmul.msk.f32.gmra.mxu0 %vm351_vm0, %v323_v0  ;;  %3035 = vmatmul.msk.f32.gmra.mxu3 %vm351_vm0, %v344_v1  ;;  %v3580_v42 = vmul.f32 0.70710677, %v3549_v26  ;;  %v3593_v49 = vand.u32 2147483647, %v3569_v38  ;;  %v3619_v0 = vpop.eup %3122  ;;  %3130 = vpow2.f32 %v1970_v50  ;;  %v3680_v32 = vsel %vm699_vm7, 1.0, %v6042_v28 }
  0xac   : > { %v3633_v9 = vpop.eup %3124  ;;  %3132 = vrcp.f32 %v3617_v63  ;;  %6072 = vst [vmem:[#allocation4_spill] sm:$0xff] %v3653_v17  ;;  %vm720_vm9 = vcmp.ge.f32.partialorder %v3569_v38, 0.0  ;;  %v1972_v62 = vmul.f32 1.442695, %v1929_v25  ;;  %v3713_v24 = vmul.f32 0.5, %v3549_v26 }
  0xad   : > { %v3605_v55 = vand.u32 2147483647, %v3580_v42  ;;  %v843_v4 = vmul.f32 0.3275911, %v3593_v49  ;;  %v918_v22 = vmul.f32 %v3633_v9, %v3566_v37  ;;  %3134 = vpow2.f32 %v2012_v13  ;;  %6073 = vst [vmem:[#allocation5_spill] sm:$0xff] %v3680_v32 }
  0xae   : > { %v564_v33 = vpop.f32.mrf.mxu3  ;;  %vm700_vm10 = vcmp.ge.f32.partialorder %v3580_v42, 0.0  ;;  %6076 = vst [vmem:[#allocation6_spill] sm:$0xff] %v3713_v24  ;;  %vm922_vm4 = vweird.f32 %v3566_v37  ;;  %vm1223_vm5 = vweird.f32 %v3610_v57 }
  0xaf   : > { %v3583_v43 = vadd.f32 %v3449_v36, %v564_v33  ;;  %v823_v3 = vmul.f32 0.3275911, %v3605_v55  ;;  %v3649_v15 = vpop.eup %3126  ;;  %v3655_v18 = vadd.f32 1.0, %v843_v4  ;;  %v1219_v33 = vsub.f32 1.0, %v1218_v10  ;;  %vm3878_vm6 = vmor %vm1222_vm14, %vm1223_vm5 }
  0xb0   : > { %v504_v51 = vpop.f32.mrf.mxu0  ;;  %v3665_v30 = vpop.eup %3128  ;;  %v1233_v44 = vmul.f32 %v3649_v15, %v3577_v41  ;;  %v1889_v45 = vsub.f32 0.0, %v3605_v55  ;;  %v919_v58 = vsub.f32 1.0, %v918_v22  ;;  %vm2263_vm14 = vcmask 261120  }
  0xb1   : > { %v3608_v56 = vmul.f32 0.70710677, %v3583_v43  ;;  %v3642_v12 = vadd.f32 %v3449_v36, %v504_v51  ;;  %v3667_v34 = vadd.f32 1.0, %v823_v3  ;;  %v3673_v40 = vpop.eup %3130  ;;  %3136 = vrcp.f32 %v3655_v18 }
  0xb2   : > { %v3700_v51 = vpop.eup %3132  ;;  %v3710_v3 = vmul.f32 %v3610_v57, %v1219_v33  ;;  %v1234_v13 = vsub.f32 1.0, %v1233_v44  ;;  %v1930_v22 = vmul.f32 %v1889_v45, %v3605_v55  ;;  %v3728_v44 = vmul.f32 %v3633_v9, %v919_v58 }
  0xb3   : > { %3015 = vmatmul.msk.f32.gmra.mxu0 %vm351_vm0, %v324_v27  ;;  %v3639_v11 = vand.u32 2147483647, %v3608_v56  ;;  %v1909_v27 = vsub.f32 0.0, %v3593_v49  ;;  %v3671_v35 = vmul.f32 0.70710677, %v3642_v12  ;;  %3138 = vrcp.f32 %v3667_v34  ;;  %v3725_v33 = vpop.eup %3134 }
  0xb4   : > { %3140 = vpow2.f32 %v1972_v62  ;;  %v3733_v55 = vsel %vm700_vm10, 1.0, %v6042_v28  ;;  %v3742_v5 = vmul.f32 %v3649_v15, %v1234_v13  ;;  %v1974_v62 = vmul.f32 1.442695, %v1930_v22 }
  0xb5   : > { %v844_v19 = vmul.f32 0.3275911, %v3639_v11  ;;  %v1950_v4 = vmul.f32 %v1909_v27, %v3593_v49  ;;  %v933_v49 = vmul.f32 %v3700_v51, %v3617_v63  ;;  %v3722_v27 = vsel %vm720_vm9, 1.0, %v6042_v28  ;;  %6078 = vst [vmem:[#allocation8_spill] sm:$0xff] %v3733_v55 }
  0xb6   : > { %v567_v8 = vpop.f32.mrf.mxu3  ;;  %6077 = vst [vmem:[#allocation7_spill] sm:$0xff] %v3722_v27  ;;  %v1910_v38 = vsub.f32 0.0, %v3639_v11  ;;  %vm721_vm12 = vcmp.ge.f32.partialorder %v3608_v56, 0.0  ;;  %v3761_v22 = vmul.f32 0.5, %v3642_v12  ;;  %vm701_vm13 = vcmp.ge.f32.partialorder %v3671_v35, 0.0 }
  0xb7   : > { %v3658_v21 = vadd.f32 %v3449_v36, %v567_v8  ;;  %v3705_v6 = vadd.f32 1.0, %v844_v19  ;;  %v783_v8 = vand.u32 2147483647, %v3671_v35  ;;  %v2014_v26 = vmul.f32 1.442695, %v1950_v4  ;;  %v3735_v45 = vpop.eup %3136 }
  0xb8   : > { %v507_v46 = vpop.f32.mrf.mxu0  ;;  %v3746_v4 = vmul.f32 0.5, %v3583_v43  ;;  %v934_v14 = vsub.f32 1.0, %v933_v49  ;;  %v1248_v58 = vmul.f32 %v3735_v45, %v3655_v18  ;;  %6082 = vst [vmem:[#allocation10_spill] sm:$0xff] %v3761_v22  ;;  %v1951_v52 = vmul.f32 %v1910_v38, %v3639_v11 }
  0xb9   : > { %v3694_v50 = vmul.f32 0.70710677, %v3658_v21  ;;  %v508_v10 = vadd.f32 %v3449_v36, %v507_v46  ;;  %3142 = vrcp.f32 %v3705_v6  ;;  %v824_v46 = vmul.f32 0.3275911, %v783_v8  ;;  %v3754_v1 = vpop.eup %3138 }
  0xba   : > { %6079 = vst [vmem:[#allocation9_spill] sm:$0xff] %v3746_v4  ;;  %v1890_v28 = vsub.f32 0.0, %v783_v8  ;;  %3144 = vpow2.f32 %v2014_v26  ;;  %v3768_v55 = vpop.eup %3140  ;;  %v948_v26 = vmul.f32 %v3754_v1, %v3667_v34  ;;  %v6084_v43 = vmov -1.0  }
  0xbb   : > { %v804_v19 = vand.u32 2147483647, %v3694_v50  ;;  %v3739_v25 = vmul.f32 0.70710677, %v508_v10  ;;  %v3765_v4 = vadd.f32 1.0, %v824_v46  ;;  %3146 = vpow2.f32 %v1974_v62 }
  0xbc   : > { %v3775_v12 = vsel %vm721_vm12, 1.0, %v6084_v43  ;;  %v3780_v35 = vmul.f32 %v3700_v51, %v934_v14  ;;  %v1931_v38 = vmul.f32 %v1890_v28, %v783_v8  ;;  %v1249_v27 = vsub.f32 1.0, %v1248_v58 }
  0xbd   : > { %v845_v13 = vmul.f32 0.3275911, %v804_v19  ;;  %6083 = vst [vmem:[#allocation11_spill] sm:$0xff] %v3765_v4  ;;  %v784_v49 = vand.u32 2147483647, %v3739_v25  ;;  %v1911_v22 = vsub.f32 0.0, %v804_v19  ;;  %3148 = vrcp.f32 %v3765_v4 }
  0xbe   : > { %v570_v59 = vpop.f32.mrf.mxu3  ;;  %6085 = vst [vmem:[#allocation12_spill] sm:$0xff] %v3775_v12  ;;  %v3786_v60 = vsel %vm701_vm13, 1.0, %v6084_v43  ;;  %v3789_v62 = vmul.f32 0.5, %v3658_v21  ;;  %v2016_v12 = vmul.f32 1.442695, %v1951_v52  ;;  %v3793_v32 = vmul.f32 0.5, %v508_v10 }
  0xbf   : > { %v3777_v11 = vpop.eup %3142  ;;  %v3782_v46 = vadd.f32 1.0, %v845_v13  ;;  %v571_v17 = vadd.f32 %v3449_v36, %v570_v59  ;;  %6088 = vst [vmem:[#allocation15_spill] sm:$0xff] %v3786_v60  ;;  %v825_v14 = vmul.f32 0.3275911, %v784_v49  ;;  %v949_v8 = vsub.f32 1.0, %v948_v26 }
  0xc0   : > { %v510_v24 = vpop.f32.mrf.mxu0  ;;  %6086 = vst [vmem:[#allocation13_spill] sm:$0xff] %v3777_v11  ;;  %v3795_v28 = vpop.eup %3144  ;;  %v1263_v58 = vmul.f32 %v3777_v11, %v3705_v6  ;;  %v1952_v13 = vmul.f32 %v1911_v22, %v804_v19  ;;  %v1891_v59 = vsub.f32 0.0, %v784_v49  ;;  %v1976_v21 = vmul.f32 1.442695, %v1931_v38  ;;  %v2538_v19 = vld [vmem:[%s6040_s5 + $0x50] sm:$0xff]  ;;  %v2540_v22 = vld [vmem:[%s6040_s5 + $0x60] sm:$0xff] }
  0xc1   : > { %6087 = vst [vmem:[#allocation14_spill] sm:$0xff] %v3782_v46  ;;  %v511_v56 = vadd.f32 %v3449_v36, %v510_v24  ;;  %3150 = vrcp.f32 %v3782_v46  ;;  %v682_v24 = vmul.f32 0.70710677, %v571_v17  ;;  %v6092_v10 = vsel %vm3687_vm8, %v3533_v16, %v3646_v7  ;;  %v3817_v26 = vpop.eup %3146  ;;  %2621 = vperm.xlu1 %3114, %v2538_v19   ;;  %2631 = vperm.xlu0 %3113, %v2540_v22  }
  0xc2   : > { %6089 = vst [vmem:[#allocation16_spill] sm:$0xff] %v3789_v62  ;;  %v3809_v52 = vsel %vm3750_vm11, %v3597_v53, %v6092_v10  ;;  %v3820_v48 = vmul.f32 %v3735_v45, %v1249_v27  ;;  %vm722_vm15 = vcmp.ge.f32.partialorder %v3694_v50, 0.0  ;;  %3152 = vpow2.f32 %v2016_v12 }
  0xc3   : > { %6090 = vst [vmem:[#allocation17_spill] sm:$0xff] %v3793_v32  ;;  %v662_v7 = vmul.f32 0.70710677, %v511_v56  ;;  %vm702_vm1 = vcmp.ge.f32.partialorder %v3739_v25, 0.0  ;;  %v3826_v42 = vadd.f32 1.0, %v825_v14  ;;  %v1264_v38 = vsub.f32 1.0, %v1263_v58  ;;  %v3829_v60 = vpop.eup %3148 }
  0xc4   : > { %6091 = vst [vmem:[#allocation18_spill] sm:$0xff] %v3795_v28  ;;  %v2018_v10 = vmul.f32 1.442695, %v1952_v13  ;;  %v1932_v32 = vmul.f32 %v1891_v59, %v784_v49  ;;  %v1517_v27 = vmul.f32 1.0614054, %v3809_v52  ;;  %v3832_v16 = vmul.f32 %v3754_v1, %v949_v8 }
  0xc5   : > { %6093 = vst [vmem:[#allocation19_spill] sm:$0xff] %v3817_v26  ;;  %3154 = vpow2.f32 %v1976_v21  ;;  %v3837_v12 = vsel %vm722_vm15, 1.0, %v6084_v43  ;;  %v805_v25 = vand.u32 2147483647, %v682_v24  ;;  %v3841_v58 = vsel %vm702_vm1, 1.0, %v6084_v43 }
  0xc6   : > { %v573_v62 = vpop.f32.mrf.mxu3  ;;  %6094 = vst [vmem:[#allocation20_spill] sm:$0xff] %v3837_v12  ;;  %v785_v49 = vand.u32 2147483647, %v662_v7  ;;  %v1558_v13 = vadd.f32 -1.4531521, %v1517_v27  ;;  %3156 = vrcp.f32 %v3826_v42  ;;  %v3846_v8 = vmul.f32 0.5, %v571_v17 }
  0xc7   : > { %6095 = vst [vmem:[#allocation21_spill] sm:$0xff] %v3841_v58  ;;  %v3843_v59 = vpop.eup %3150  ;;  %v3848_v21 = vmul.f32 0.5, %v511_v56  ;;  %v574_v50 = vadd.f32 %v3449_v36, %v573_v62  ;;  %v3852_v19 = vmul.f32 %v3777_v11, %v1264_v38  ;;  %v963_v22 = vmul.f32 %v3829_v60, %v3765_v4 }
  0xc8   : > { %6096 = vst [vmem:[#allocation22_spill] sm:$0xff] %v3846_v8  ;;  %3158 = vpow2.f32 %v2018_v10  ;;  %v1978_v14 = vmul.f32 1.442695, %v1932_v32  ;;  %v3856_v53 = vpop.eup %3152  ;;  %vm723_vm2 = vcmp.ge.f32.partialorder %v682_v24, 0.0  ;;  %v846_v27 = vmul.f32 0.3275911, %v805_v25  ;;  %v513_v32 = vpop.f32.mrf.mxu0 }
  0xc9   : > { %6097 = vst [vmem:[#allocation23_spill] sm:$0xff] %v3848_v21  ;;  %vm703_vm3 = vcmp.ge.f32.partialorder %v662_v7, 0.0  ;;  %v1599_v17 = vmul.f32 %v1558_v13, %v3809_v52  ;;  %v1278_v56 = vmul.f32 %v3843_v59, %v3782_v46  ;;  %v1912_v21 = vsub.f32 0.0, %v805_v25 }
  0xca   : > { %6098 = vst [vmem:[#allocation24_spill] sm:$0xff] %v3856_v53  ;;  %v826_v38 = vmul.f32 0.3275911, %v785_v49  ;;  %v1892_v10 = vsub.f32 0.0, %v785_v49  ;;  %v1221_v12 = vadd.f32 %v3610_v57, %v3710_v3  ;;  %v964_v13 = vsub.f32 1.0, %v963_v22 }
  0xcb   : > { %v3862_v8 = vpop.eup %3154  ;;  %v1640_v58 = vadd.f32 1.4214138, %v1599_v17  ;;  %3160 = vpow2.f32 %v1978_v14  ;;  %v3870_v53 = vsel %vm723_vm2, 1.0, %v6084_v43  ;;  %v3874_v62 = vsel %vm703_vm3, 1.0, %v6084_v43 }
  0xcc   : > { %6099 = vst [vmem:[#allocation25_spill] sm:$0xff] %v3862_v8  ;;  %v3882_v17 = vpop.eup %3156  ;;  %v3884_v3 = vadd.f32 1.0, %v846_v27  ;;  %v3886_v22 = vmul.f32 0.5, %v574_v50  ;;  %v683_v14 = vmul.f32 0.70710677, %v574_v50  ;;  %v1279_v7 = vsub.f32 1.0, %v1278_v56 }
  0xcd   : > { %6100 = vst [vmem:[#allocation26_spill] sm:$0xff] %v3870_v53  ;;  %v1681_v24 = vmul.f32 %v1640_v58, %v3809_v52  ;;  %v3891_v26 = vadd.f32 1.0, %v826_v38  ;;  %v1226_v46 = vand.u32 2147483647, %v3539_v20  ;;  %v1953_v28 = vmul.f32 %v1912_v21, %v805_v25 }
  0xce   : > { %6101 = vst [vmem:[#allocation27_spill] sm:$0xff] %v3874_v62  ;;  %v3889_v53 = vpop.eup %3158  ;;  %v514_v62 = vadd.f32 %v3449_v36, %v513_v32  ;;  %v1933_v4 = vmul.f32 %v1892_v10, %v785_v49  ;;  %v1225_v27 = vsel %vm3878_vm6, %v3610_v57, %v1221_v12  ;;  %v978_v50 = vmul.f32 %v3882_v17, %v3826_v42 }
  0xcf   : > { %6104 = vst [vmem:[#allocation28_spill] sm:$0xff] %v3886_v22  ;;  %v1722_v11 = vadd.f32 -0.28449672, %v1681_v24  ;;  %vm724_vm7 = vcmp.ge.f32.partialorder %v683_v14, 0.0  ;;  %vm1227_vm8 = vcmp.eq.f32.partialorder %v1226_v46, 8.507059e+37  ;;  %v6105_v58 = vand.u32 2147483648, %v3539_v20 }
  0xd0   : > { %3162 = vrcp.f32 %v3884_v3  ;;  %v806_v38 = vand.u32 2147483647, %v683_v14  ;;  %v921_v25 = vadd.f32 %v3633_v9, %v3728_v44  ;;  %vm923_vm9 = vweird.f32 %v3633_v9  ;;  %v576_v44 = vpop.f32.mrf.mxu3 }
  0xd1   : > { %v1229_v56 = vor.u32 1.1754944e-38, %v6105_v58  ;;  %v1763_v32 = vmul.f32 %v1722_v11, %v3809_v52  ;;  %v3906_v49 = vpop.eup %3160  ;;  %3164 = vrcp.f32 %v3891_v26  ;;  %v3914_v20 = vmul.f32 %v3829_v60, %v964_v13  ;;  %vm3921_vm10 = vmor %vm922_vm4, %vm923_vm9 }
  0xd2   : > { %6106 = vst [vmem:[#allocation29_spill] sm:$0xff] %v3906_v49  ;;  %v2020_v46 = vmul.f32 1.442695, %v1953_v28  ;;  %v926_v11 = vand.u32 2147483647, %v3566_v37  ;;  %v979_v21 = vsub.f32 1.0, %v978_v50  ;;  %v925_v28 = vsel %vm3921_vm10, %v3633_v9, %v921_v25 }
  0xd3   : > { %v3910_v12 = vsel %vm1227_vm8, %v1229_v56, %v1225_v27  ;;  %v1804_v8 = vadd.f32 0.2548296, %v1763_v32  ;;  %v663_v10 = vmul.f32 0.70710677, %v514_v62  ;;  %v1980_v58 = vmul.f32 1.442695, %v1933_v4 }
  0xd4   : > { %v1538_v24 = vmul.f32 1.0614054, %v3910_v12  ;;  %v847_v56 = vmul.f32 0.3275911, %v806_v38  ;;  %v3930_v50 = vmul.f32 %v3843_v59, %v1279_v7  ;;  %v1913_v32 = vsub.f32 0.0, %v806_v38  ;;  %v2532_v4 = vld [vmem:[%s6040_s5 + $0x20] sm:$0xff] }
  0xd5   : > { %v1845_v13 = vmul.f32 %v1804_v8, %v3809_v52  ;;  %v6109_v22 = vand.u32 2147483648, %v3566_v37  ;;  %v2541_v52 = vld [vmem:[%s6040_s5 + $0x68] sm:$0xff]  ;;  %vm1237_vm11 = vweird.f32 %v3577_v41  ;;  %3166 = vpow2.f32 %v2020_v46  ;;  %2591 = vperm.xlu2 %3115, %v2532_v4  }
  0xd6   : > { %v1579_v57 = vadd.f32 -1.4531521, %v1538_v24  ;;  %v3940_v8 = vpop.eup %3162  ;;  %v3945_v9 = vsel %vm724_vm7, 1.0, %v6084_v43  ;;  %vm927_vm12 = vcmp.eq.f32.partialorder %v926_v11, 8.507059e+37  ;;  %2636 = vperm.xlu1 %3114, %v2541_v52   ;;  %v3953_v25 = vmul.f32 0.5, %v514_v62 }
  0xd7   : > { %v929_v49 = vor.u32 1.1754944e-38, %v6109_v22  ;;  %6110 = vst [vmem:[#allocation30_spill] sm:$0xff] %v3945_v9  ;;  %v2050_v37 = vmul.f32 %v3619_v0, %v1845_v13  ;;  %v2543_v22 = vld [vmem:[%s6040_s5 + $0x78] sm:$0xff]  ;;  %v3951_v7 = vpop.eup %3164  ;;  %v786_v24 = vand.u32 2147483647, %v663_v10  ;;  %v3958_v14 = vadd.f32 1.0, %v847_v56 }
  0xd8   : > { %6111 = vst [vmem:[#allocation31_spill] sm:$0xff] %v3951_v7  ;;  %v1620_v46 = vmul.f32 %v1579_v57, %v3910_v12  ;;  %2646 = vperm.xlu0 %3113, %v2543_v22   ;;  %v577_v11 = vadd.f32 %v3449_v36, %v576_v44  ;;  %v3963_v4 = vmul.f32 %v3882_v17, %v979_v21  ;;  %vm704_vm13 = vcmp.ge.f32.partialorder %v663_v10, 0.0 }
  0xd9   : > { %6112 = vst [vmem:[#allocation32_spill] sm:$0xff] %v3953_v25  ;;  %v3956_v27 = vsel %vm927_vm12, %v929_v49, %v925_v28  ;;  %v2091_v0 = vsub.f32 1.0, %v2050_v37  ;;  %v1954_v52 = vmul.f32 %v1913_v32, %v806_v38  ;;  %v1293_v25 = vmul.f32 %v3940_v8, %v3884_v3  ;;  %v516_v38 = vpop.f32.mrf.mxu0 }
  0xda   : > { %6113 = vst [vmem:[#allocation33_spill] sm:$0xff] %v3958_v14  ;;  %v1518_v13 = vmul.f32 1.0614054, %v3956_v27  ;;  %v1661_v62 = vadd.f32 1.4214138, %v1620_v46  ;;  %v993_v49 = vmul.f32 %v3951_v7, %v3891_v26  ;;  %3168 = vpow2.f32 %v1980_v58 }
  0xdb   : > { %v2132_v57 = vmul.f32 %v2091_v0, %v3555_v29  ;;  %v827_v28 = vmul.f32 0.3275911, %v786_v24  ;;  %v3971_v37 = vpop.eup %3166  ;;  %3170 = vrcp.f32 %v3958_v14  ;;  %v3975_v32 = vmul.f32 0.70710677, %v577_v11 }
  0xdc   : > { %v1559_v56 = vadd.f32 -1.4531521, %v1518_v13  ;;  %v1702_v44 = vmul.f32 %v1661_v62, %v3910_v12  ;;  %6114 = vst [vmem:[#allocation34_spill] sm:$0xff] %v3971_v37  ;;  %v2022_v22 = vmul.f32 1.442695, %v1954_v52  ;;  %v3979_v46 = vsel %vm704_vm13, 1.0, %v6084_v43 }
  0xdd   : > { %v2173_v21 = vadd.f32 1.0, %v2132_v57  ;;  %6115 = vst [vmem:[#allocation35_spill] sm:$0xff] %v3979_v46  ;;  %vm937_vm15 = vweird.f32 %v3617_v63  ;;  %v1294_v0 = vsub.f32 1.0, %v1293_v25  ;;  %v994_v13 = vsub.f32 1.0, %v993_v49  ;;  %v579_v46 = vpop.f32.mrf.mxu3 }
  0xde   : > { %v1743_v29 = vadd.f32 -0.28449672, %v1702_v44  ;;  %v1600_v58 = vmul.f32 %v1559_v56, %v3956_v27  ;;  %v1893_v62 = vsub.f32 0.0, %v786_v24  ;;  %v3984_v37 = vadd.f32 1.0, %v827_v28 }
  0xdf   : > { %v2214_v9 = vmul.f32 %v2173_v21, %v3545_v23  ;;  %v1236_v10 = vadd.f32 %v3649_v15, %v3742_v5  ;;  %v3990_v44 = vmul.f32 0.5, %v577_v11  ;;  %v807_v56 = vand.u32 2147483647, %v3975_v32 }
  0xe0   : > { %v1784_v57 = vmul.f32 %v1743_v29, %v3910_v12  ;;  %v1641_v52 = vadd.f32 1.4214138, %v1600_v58  ;;  %vm1238_vm1 = vweird.f32 %v3649_v15  ;;  %v1241_v25 = vand.u32 2147483647, %v3577_v41  ;;  %v3995_v23 = vpop.eup %3168 }
  0xe1   : > { %3036 = vmatmul.msk.f32.vlgmr.msra.gmra.mxu1 %vm2263_vm14, %v2214_v9  ;;  %6116 = vst [vmem:[#allocation36_spill] sm:$0xff] %v3990_v44  ;;  %3172 = vpow2.f32 %v2022_v22  ;;  %vm4000_vm2 = vmor %vm1237_vm11, %vm1238_vm1  ;;  %v6120_v9 = vand.u32 2147483648, %v3577_v41  ;;  %v4006_v21 = vpop.eup %3170  ;;  %v4009_v29 = vmul.f32 %v3940_v8, %v1294_v0  ;;  %v4012_v58 = vmul.f32 %v3951_v7, %v994_v13 }
  0xe2   : > { %6117 = vst [vmem:[#allocation37_spill] sm:$0xff] %v3995_v23  ;;  %v1825_v49 = vadd.f32 0.2548296, %v1784_v57  ;;  %v1682_v28 = vmul.f32 %v1641_v52, %v3956_v27  ;;  %v1934_v22 = vmul.f32 %v1893_v62, %v786_v24  ;;  %v4015_v57 = vadd.f32 %v3449_v36, %v516_v38 }
  0xe3   : > { %v1244_v11 = vor.u32 1.1754944e-38, %v6120_v9  ;;  %3174 = vrcp.f32 %v3984_v37  ;;  %v1240_v41 = vsel %vm4000_vm2, %v3649_v15, %v1236_v10  ;;  %v848_v9 = vmul.f32 0.3275911, %v807_v56 }
  0xe4   : > { %v1866_v52 = vmul.f32 %v1825_v49, %v3910_v12  ;;  %v1723_v44 = vadd.f32 -0.28449672, %v1682_v28  ;;  %vm1242_vm3 = vcmp.eq.f32.partialorder %v1241_v25, 8.507059e+37  ;;  %v936_v0 = vadd.f32 %v3700_v51, %v3780_v35 }
  0xe5   : > { %vm938_vm4 = vweird.f32 %v3700_v51  ;;  %v4028_v12 = vsel %vm1242_vm3, %v1244_v11, %v1240_v41  ;;  %vm1252_vm5 = vweird.f32 %v3655_v18  ;;  %v1982_v62 = vmul.f32 1.442695, %v1934_v22 }
  0xe6   : > { %v2071_v38 = vmul.f32 %v3665_v30, %v1866_v52  ;;  %v1764_v13 = vmul.f32 %v1723_v44, %v3956_v27  ;;  %v4032_v15 = vmul.f32 0.70710677, %v4015_v57  ;;  %v4035_v10 = vadd.f32 %v3449_v36, %v579_v46  ;;  %vm4044_vm6 = vmor %vm937_vm15, %vm938_vm4 }
  0xe7   : > { %v1539_v35 = vmul.f32 1.0614054, %v4028_v12  ;;  %v4038_v25 = vpop.eup %3172  ;;  %v1308_v30 = vmul.f32 %v4006_v21, %v3958_v14  ;;  %v941_v5 = vand.u32 2147483647, %v3617_v63  ;;  %v4049_v11 = vadd.f32 1.0, %v848_v9  ;;  %v2533_v9 = vld [vmem:[%s6040_s5 + $0x28] sm:$0xff] }
  0xe8   : > { %6121 = vst [vmem:[#allocation38_spill] sm:$0xff] %v4038_v25  ;;  %v2112_v49 = vsub.f32 1.0, %v2071_v38  ;;  %v1805_v44 = vadd.f32 0.2548296, %v1764_v13  ;;  %v1914_v46 = vsub.f32 0.0, %v807_v56  ;;  %v940_v52 = vsel %vm4044_vm6, %v3700_v51, %v936_v0  ;;  %v2546_v51 = vld [vmem:[%s6040_s5 + $0x90] sm:$0xff]  ;;  %2596 = vperm.xlu2 %3115, %v2533_v9  }
  0xe9   : > { %v1580_v22 = vadd.f32 -1.4531521, %v1539_v35  ;;  %v4054_v41 = vpop.eup %3174  ;;  %vm725_vm7 = vcmp.ge.f32.partialorder %v3975_v32, 0.0  ;;  %v6124_v24 = vand.u32 2147483648, %v3617_v63  ;;  %v2544_v35 = vld [vmem:[%s6040_s5 + $0x80] sm:$0xff]  ;;  %vm942_vm8 = vcmp.eq.f32.partialorder %v941_v5, 8.507059e+37  ;;  %2661 = vperm.xlu0 %3113, %v2546_v51  }
  0xea   : > { %v2153_v38 = vmul.f32 %v2112_v49, %v3589_v47  ;;  %v1846_v13 = vmul.f32 %v1805_v44, %v3956_v27  ;;  %v4071_v0 = vand.u32 2147483647, %v4032_v15  ;;  %v4074_v47 = vmul.f32 0.70710677, %v4035_v10  ;;  %2651 = vperm.xlu1 %3114, %v2544_v35  }
  0xeb   : > { %v944_v25 = vor.u32 1.1754944e-38, %v6124_v24  ;;  %v1621_v63 = vmul.f32 %v1580_v22, %v4028_v12  ;;  %v1309_v27 = vsub.f32 1.0, %v1308_v30  ;;  %3176 = vrcp.f32 %v4049_v11 }
  0xec   : > { %v2194_v24 = vadd.f32 1.0, %v2153_v38  ;;  %v2051_v49 = vmul.f32 %v3673_v40, %v1846_v13  ;;  %v1955_v28 = vmul.f32 %v1914_v46, %v807_v56  ;;  %v1008_v7 = vmul.f32 %v4054_v41, %v3984_v37  ;;  %v519_v38 = vpop.f32.mrf.mxu0 }
  0xed   : > { %v4078_v44 = vsel %vm942_vm8, %v944_v25, %v940_v52  ;;  %v1662_v23 = vadd.f32 1.4214138, %v1621_v63  ;;  %v4087_v5 = vsel %vm725_vm7, 1.0, %v6084_v43  ;;  %3178 = vpow2.f32 %v1982_v62 }
  0xee   : > { %v1519_v14 = vmul.f32 1.0614054, %v4078_v44  ;;  %6125 = vst [vmem:[#allocation39_spill] sm:$0xff] %v4087_v5  ;;  %v2235_v30 = vmul.f32 %v2194_v24, %v3560_v31  ;;  %v2092_v40 = vsub.f32 1.0, %v2051_v49  ;;  %v828_v25 = vmul.f32 0.3275911, %v4071_v0 }
  0xef   : > { %v4092_v22 = vand.u32 2147483647, %v4074_v47  ;;  %v1703_v56 = vmul.f32 %v1662_v23, %v4028_v12  ;;  %v4096_v46 = vmul.f32 %v4006_v21, %v1309_v27  ;;  %v2024_v13 = vmul.f32 1.442695, %v1955_v28  ;;  %v2550_v5 = vld [vmem:[%s6040_s5 + $0xb0] sm:$0xff] }
  0xf0   : > { %3057 = vmatmul.msk.f32.vlgmr.msra.gmra.mxu2 %vm2263_vm14, %v2235_v30  ;;  %v2133_v32 = vmul.f32 %v2092_v40, %v3601_v54  ;;  %v1560_v31 = vadd.f32 -1.4531521, %v1519_v14  ;;  %v1251_v9 = vadd.f32 %v3735_v45, %v3820_v48  ;;  %vm1253_vm9 = vweird.f32 %v3735_v45 }
  0xf1   : > { %v1744_v62 = vadd.f32 -0.28449672, %v1703_v56  ;;  %v1009_v35 = vsub.f32 1.0, %v1008_v7  ;;  %vm4107_vm10 = vmor %vm1252_vm5, %vm1253_vm9  ;;  %v1256_v54 = vand.u32 2147483647, %v3655_v18  ;;  %v4112_v14 = vpop.eup %3176  ;;  %vm952_vm11 = vweird.f32 %v3667_v34 }
  0xf2   : > { %v2174_v23 = vadd.f32 1.0, %v2133_v32  ;;  %v1601_v51 = vmul.f32 %v1560_v31, %v4078_v44  ;;  %v4115_v27 = vadd.f32 1.0, %v828_v25  ;;  %v849_v48 = vmul.f32 0.3275911, %v4092_v22 }
  0xf3   : > { %v1785_v7 = vmul.f32 %v1744_v62, %v4028_v12  ;;  %v4120_v24 = vadd.f32 %v3449_v36, %v519_v38  ;;  %v1255_v30 = vsel %vm4107_vm10, %v3735_v45, %v1251_v9  ;;  %vm1257_vm12 = vcmp.eq.f32.partialorder %v1256_v54, 8.507059e+37  ;;  %v4126_v40 = vpop.eup %3178 }
  0xf4   : > { %v2215_v49 = vmul.f32 %v2174_v23, %v3574_v39  ;;  %v1642_v28 = vadd.f32 1.4214138, %v1601_v51  ;;  %3180 = vpow2.f32 %v2024_v13  ;;  %v4129_v25 = vmul.f32 0.5, %v4015_v57 }
  0xf5   : > { %v1826_v56 = vadd.f32 0.2548296, %v1785_v7  ;;  %v6129_v32 = vand.u32 2147483648, %v3655_v18  ;;  %v4135_v36 = vmul.f32 %v4112_v14, %v4049_v11  ;;  %vm705_vm13 = vcmp.ge.f32.partialorder %v4032_v15, 0.0  ;;  %v582_v7 = vpop.f32.mrf.mxu3 }
  0xf6   : > { %6128 = vst [vmem:[#allocation40_spill] sm:$0xff] %v4129_v25  ;;  %v1894_v39 = vsub.f32 0.0, %v4071_v0  ;;  %3037 = vmatmul.msk.f32.gmra.mxu1 %vm2263_vm14, %v2215_v49  ;;  %v1683_v45 = vmul.f32 %v1642_v28, %v4078_v44  ;;  %v4142_v38 = vmul.f32 %v4054_v41, %v1009_v35  ;;  %v4144_v57 = vadd.f32 1.0, %v849_v48 }
  0xf7   : > { %v1259_v31 = vor.u32 1.1754944e-38, %v6129_v32  ;;  %v1867_v18 = vmul.f32 %v1826_v56, %v4028_v12  ;;  %3182 = vrcp.f32 %v4115_v27  ;;  %v4151_v62 = vmul.f32 0.70710677, %v4120_v24 }
  0xf8   : > { %v1724_v15 = vadd.f32 -0.28449672, %v1683_v45  ;;  %v4155_v23 = vsel %vm705_vm13, 1.0, %v6084_v43  ;;  %v4158_v35 = vmul.f32 0.5, %v4035_v10  ;;  %v951_v12 = vadd.f32 %v3754_v1, %v3832_v16  ;;  %v4193_v45 = vld [vmem:[%s6037_s2] ss:$0 sm:$0xff] }
  0xf9   : > { %v4147_v13 = vsel %vm1257_vm12, %v1259_v31, %v1255_v30  ;;  %6130 = vst [vmem:[#allocation41_spill] sm:$0xff] %v4155_v23  ;;  %v2072_v51 = vmul.f32 %v3725_v33, %v1867_v18  ;;  %v1324_v63 = vsub.f32 1.0, %v4135_v36  ;;  %v1935_v54 = vmul.f32 %v1894_v39, %v4071_v0  ;;  %v2536_v31 = vld [vmem:[%s6040_s5 + $0x40] sm:$0xff]  ;;  %v2547_v36 = vld [vmem:[%s6040_s5 + $0x98] sm:$0xff] }
  0xfa   : > { %v1540_v9 = vmul.f32 1.0614054, %v4147_v13  ;;  %6131 = vst [vmem:[#allocation42_spill] sm:$0xff] %v4158_v35  ;;  %v1765_v48 = vmul.f32 %v1724_v15, %v4078_v44  ;;  %v4166_v28 = vpop.eup %3180  ;;  %v1915_v30 = vsub.f32 0.0, %v4092_v22  ;;  %vm953_vm15 = vweird.f32 %v3754_v1  ;;  %2611 = vperm.xlu2 %3115, %v2536_v31   ;;  %2666 = vperm.xlu1 %3114, %v2547_v36  }
  0xfb   : > { %v2113_v56 = vsub.f32 1.0, %v2072_v51  ;;  %v956_v33 = vand.u32 2147483647, %v3667_v34  ;;  %vm1267_vm1 = vweird.f32 %v3705_v6  ;;  %3184 = vrcp.f32 %v4144_v57  ;;  %vm4179_vm2 = vmor %vm952_vm11, %vm953_vm15 }
  0xfc   : > { %v1581_v49 = vadd.f32 -1.4531521, %v1540_v9  ;;  %v4174_v16 = vand.u32 2147483647, %v4151_v62  ;;  %v1806_v10 = vadd.f32 0.2548296, %v1765_v48  ;;  %v4196_v18 = vadd.f32 %v4193_v45, %v582_v7 }
  0xfd   : > { %v2154_v39 = vmul.f32 %v2113_v56, %v3625_v2  ;;  %v955_v15 = vsel %vm4179_vm2, %v3754_v1, %v951_v12  ;;  %v6134_v9 = vand.u32 2147483648, %v3667_v34  ;;  %v2549_v2 = vld [vmem:[%s6040_s5 + $0xa8] sm:$0xff]  ;;  %v4206_v48 = vpop.eup %3182  ;;  %vm726_vm3 = vcmp.ge.f32.partialorder %v4074_v47, 0.0 }
  0xfe   : > { %v1622_v0 = vmul.f32 %v1581_v49, %v4147_v13  ;;  %v1847_v7 = vmul.f32 %v1806_v10, %v4078_v44  ;;  %vm957_vm4 = vcmp.eq.f32.partialorder %v956_v33, 8.507059e+37  ;;  %2676 = vperm.xlu0 %3113, %v2549_v2   ;;  %v1984_v56 = vmul.f32 1.442695, %v1935_v54 }
  0xff   : > { %v959_v51 = vor.u32 1.1754944e-38, %v6134_v9  ;;  %v1956_v1 = vmul.f32 %v1915_v30, %v4092_v22  ;;  %v2195_v34 = vadd.f32 1.0, %v2154_v39  ;;  %v829_v32 = vmul.f32 0.3275911, %v4174_v16  ;;  %v522_v9 = vpop.f32.mrf.mxu0 }
 0x100   : > { %v1663_v49 = vadd.f32 1.4214138, %v1622_v0  ;;  %v2052_v31 = vmul.f32 %v3768_v55, %v1847_v7  ;;  %v1023_v44 = vmul.f32 %v4206_v48, %v4115_v27  ;;  %v4222_v22 = vmul.f32 0.70710677, %v4196_v18  ;;  %v6136_v7 = vld [vmem:[#allocation5_spill] sm:$0xff] }
 0x101   : > { %v4211_v12 = vsel %vm957_vm4, %v959_v51, %v955_v15  ;;  %v2236_v54 = vmul.f32 %v2195_v34, %v3614_v61  ;;  %v4224_v30 = vpop.eup %3184  ;;  %v4227_v10 = vmul.f32 %v4112_v14, %v1324_v63  ;;  %3186 = vpow2.f32 %v1984_v56 }
 0x102   : > { %v1704_v36 = vmul.f32 %v1663_v49, %v4147_v13  ;;  %v1520_v52 = vmul.f32 1.0614054, %v4211_v12  ;;  %v2093_v55 = vsub.f32 1.0, %v2052_v31  ;;  %v4232_v15 = vsel %vm726_vm3, 1.0, %v6084_v43  ;;  %2681 = vperm.xlu1 %3114, %v2550_v5  }
 0x103   : > { %6135 = vst [vmem:[#allocation43_spill] sm:$0xff] %v4232_v15  ;;  %v2026_v51 = vmul.f32 1.442695, %v1956_v1  ;;  %3058 = vmatmul.msk.f32.gmra.mxu2 %vm2263_vm14, %v2236_v54  ;;  %v4236_v61 = vadd.f32 %v4193_v45, %v522_v9  ;;  %v4238_v2 = vadd.f32 1.0, %v829_v32  ;;  %v1024_v56 = vsub.f32 1.0, %v1023_v44  ;;  %v6137_v1 = vld [vmem:[#allocation13_spill] sm:$0xff] }
 0x104   : > { %v1745_v0 = vadd.f32 -0.28449672, %v1704_v36  ;;  %v1561_v39 = vadd.f32 -1.4531521, %v1520_v52  ;;  %v2134_v63 = vmul.f32 %v2093_v55, %v6136_v7  ;;  %v1338_v47 = vmul.f32 %v4224_v30, %v4144_v57  ;;  %v6138_v54 = vld [vmem:[#allocation11_spill] sm:$0xff] }
 0x105   : > { %v4246_v34 = vand.u32 2147483647, %v4222_v22  ;;  %v1266_v31 = vadd.f32 %v6137_v1, %v3852_v19  ;;  %vm1268_vm5 = vweird.f32 %v6137_v1  ;;  %vm967_vm6 = vweird.f32 %v6138_v54 }
 0x106   : > { %v1786_v49 = vmul.f32 %v1745_v0, %v4147_v13  ;;  %v1602_v52 = vmul.f32 %v1561_v39, %v4211_v12  ;;  %v2175_v36 = vadd.f32 1.0, %v2134_v63  ;;  %v1895_v55 = vsub.f32 0.0, %v4174_v16  ;;  %vm4258_vm7 = vmor %vm1267_vm1, %vm1268_vm5  ;;  %v6142_v63 = vld [vmem:[#allocation3_spill] sm:$0xff]  ;;  %v585_v0 = vpop.f32.mrf.mxu3 }
 0x107   : > { %v4254_v44 = vmul.f32 0.70710677, %v4236_v61  ;;  %v1271_v19 = vand.u32 2147483647, %v3705_v6  ;;  %v6141_v39 = vand.u32 2147483648, %v3705_v6  ;;  %3188 = vrcp.f32 %v4238_v2  ;;  %v4269_v35 = vpop.eup %3186 }
 0x108   : > { %v1827_v9 = vadd.f32 0.2548296, %v1786_v49  ;;  %v1643_v32 = vadd.f32 1.4214138, %v1602_v52  ;;  %v2216_v49 = vmul.f32 %v2175_v36, %v6142_v63  ;;  %6143 = vst [vmem:[#allocation5_spill] sm:$0xff] %v4269_v35  ;;  %vm706_vm8 = vcmp.ge.f32.partialorder %v4151_v62, 0.0 }
 0x109   : > { %v1274_v7 = vor.u32 1.1754944e-38, %v6141_v39  ;;  %v850_v15 = vmul.f32 0.3275911, %v4246_v34  ;;  %v1270_v25 = vsel %vm4258_vm7, %v6137_v1, %v1266_v31  ;;  %vm1272_vm9 = vcmp.eq.f32.partialorder %v1271_v19, 8.507059e+37  ;;  %v6144_v39 = vld [vmem:[#allocation18_spill] sm:$0xff]  ;;  %v6147_v19 = vld [vmem:[#allocation7_spill] sm:$0xff] }
 0x10a   : > { %v1868_v52 = vmul.f32 %v1827_v9, %v4147_v13  ;;  %v1684_v33 = vmul.f32 %v1643_v32, %v4211_v12  ;;  %v1339_v6 = vsub.f32 1.0, %v1338_v47  ;;  %3038 = vmatmul.msk.f32.gmra.mxu1 %vm2263_vm14, %v2216_v49  ;;  %v1936_v32 = vmul.f32 %v1895_v55, %v4174_v16 }
 0x10b   : > { %v4278_v13 = vsel %vm1272_vm9, %v1274_v7, %v1270_v25  ;;  %v4283_v23 = vand.u32 2147483647, %v4254_v44  ;;  %3190 = vpow2.f32 %v2026_v51  ;;  %v4287_v1 = vmul.f32 0.5, %v4120_v24 }
 0x10c   : > { %v2073_v36 = vmul.f32 %v6144_v39, %v1868_v52  ;;  %v1725_v63 = vadd.f32 -0.28449672, %v1684_v33  ;;  %v1541_v35 = vmul.f32 1.0614054, %v4278_v13  ;;  %v4291_v25 = vmul.f32 %v4206_v48, %v1024_v56 }
 0x10d   : > { %6145 = vst [vmem:[#allocation13_spill] sm:$0xff] %v4287_v1  ;;  %v4296_v16 = vsel %vm706_vm8, 1.0, %v6084_v43  ;;  %v4298_v33 = vadd.f32 1.0, %v850_v15  ;;  %v966_v51 = vadd.f32 %v3829_v60, %v3914_v20  ;;  %v4302_v55 = vpop.eup %3188  ;;  %v4305_v24 = vmul.f32 %v4224_v30, %v1339_v6 }
 0x10e   : > { %v2114_v47 = vsub.f32 1.0, %v2073_v36  ;;  %v1766_v31 = vmul.f32 %v1725_v63, %v4211_v12  ;;  %6146 = vst [vmem:[#allocation11_spill] sm:$0xff] %v4296_v16  ;;  %v1582_v56 = vadd.f32 -1.4531521, %v1541_v35  ;;  %v1986_v52 = vmul.f32 1.442695, %v1936_v32 }
 0x10f   : > { %v830_v39 = vmul.f32 0.3275911, %v4283_v23  ;;  %v4310_v62 = vadd.f32 %v4193_v45, %v585_v0  ;;  %vm968_vm10 = vweird.f32 %v3829_v60  ;;  %v971_v35 = vand.u32 2147483647, %v6138_v54  ;;  %v6150_v63 = vld [vmem:[#allocation14_spill] sm:$0xff]  ;;  %v6151_v0 = vld [vmem:[#allocation4_spill] sm:$0xff] }
 0x110   : > { %v2155_v7 = vmul.f32 %v2114_v47, %v6147_v19  ;;  %v1807_v49 = vadd.f32 0.2548296, %v1766_v31  ;;  %v1623_v36 = vmul.f32 %v1582_v56, %v4278_v13  ;;  %vm4317_vm11 = vmor %vm967_vm6, %vm968_vm10  ;;  %vm1282_vm12 = vweird.f32 %v6150_v63  ;;  %v2539_v16 = vld [vmem:[%s6040_s5 + $0x58] sm:$0xff] }
 0x111   : > { %v1038_v32 = vmul.f32 %v4302_v55, %v4238_v2  ;;  %3192 = vrcp.f32 %v4298_v33  ;;  %v1916_v47 = vsub.f32 0.0, %v4246_v34  ;;  %v4330_v31 = vpop.eup %3190  ;;  %v6153_v9 = vand.u32 2147483648, %v6138_v54  ;;  %2626 = vperm.xlu2 %3115, %v2539_v16  }
 0x112   : > { %v2196_v15 = vadd.f32 1.0, %v2155_v7  ;;  %v1848_v20 = vmul.f32 %v1807_v49, %v4211_v12  ;;  %v970_v12 = vsel %vm4317_vm11, %v3829_v60, %v966_v51  ;;  %v6152_v7 = vld [vmem:[#allocation19_spill] sm:$0xff]  ;;  %v1664_v56 = vadd.f32 1.4214138, %v1623_v36 }
 0x113   : > { %v974_v1 = vor.u32 1.1754944e-38, %v6153_v9  ;;  %vm727_vm13 = vcmp.ge.f32.partialorder %v4222_v22, 0.0  ;;  %v4345_v51 = vmul.f32 0.70710677, %v4310_v62  ;;  %vm972_vm15 = vcmp.eq.f32.partialorder %v971_v35, 8.507059e+37 }
 0x114   : > { %v2237_v19 = vmul.f32 %v2196_v15, %v6151_v0  ;;  %v2053_v49 = vmul.f32 %v6152_v7, %v1848_v20  ;;  %v4348_v54 = vadd.f32 1.0, %v830_v39  ;;  %v1705_v15 = vmul.f32 %v1664_v56, %v4278_v13  ;;  %v525_v20 = vpop.f32.mrf.mxu0  ;;  %v6156_v39 = vld [vmem:[#allocation8_spill] sm:$0xff] }
 0x115   : > { %v4351_v36 = vsel %vm972_vm15, %v974_v1, %v970_v12  ;;  %3194 = vpow2.f32 %v1986_v52  ;;  %v4354_v6 = vmul.f32 0.5, %v4196_v18  ;;  %v1957_v0 = vmul.f32 %v1916_v47, %v4246_v34 }
 0x116   : > { %3059 = vmatmul.msk.f32.gmra.mxu2 %vm2263_vm14, %v2237_v19  ;;  %v2094_v9 = vsub.f32 1.0, %v2053_v49  ;;  %v1521_v35 = vmul.f32 1.0614054, %v4351_v36  ;;  %v1039_v16 = vsub.f32 1.0, %v1038_v32  ;;  %v4361_v5 = vsel %vm727_vm13, 1.0, %v6084_v43 }
 0x117   : > { %6154 = vst [vmem:[#allocation3_spill] sm:$0xff] %v4354_v6  ;;  %v1746_v7 = vadd.f32 -0.28449672, %v1705_v15  ;;  %v4364_v49 = vpop.eup %3192  ;;  %v4368_v18 = vmul.f32 0.5, %v4236_v61  ;;  %v810_v34 = vand.u32 2147483647, %v4345_v51  ;;  %v4372_v52 = vadd.f32 %v4193_v45, %v525_v20 }
 0x118   : > { %6155 = vst [vmem:[#allocation18_spill] sm:$0xff] %v4361_v5  ;;  %v2135_v19 = vmul.f32 %v2094_v9, %v6156_v39  ;;  %3196 = vrcp.f32 %v4348_v54  ;;  %v1562_v47 = vadd.f32 -1.4531521, %v1521_v35  ;;  %v2028_v12 = vmul.f32 1.442695, %v1957_v0  ;;  %v6158_v15 = vld [vmem:[#allocation6_spill] sm:$0xff] }
 0x119   : > { %6157 = vst [vmem:[#allocation7_spill] sm:$0xff] %v4368_v18  ;;  %v1787_v32 = vmul.f32 %v1746_v7, %v4278_v13  ;;  %vm707_vm1 = vcmp.ge.f32.partialorder %v4254_v44, 0.0  ;;  %v1896_v56 = vsub.f32 0.0, %v4283_v23  ;;  %v1281_v61 = vadd.f32 %v3843_v59, %v3930_v50 }
 0x11a   : > { %v2176_v22 = vadd.f32 1.0, %v2135_v19  ;;  %vm982_vm2 = vweird.f32 %v3826_v42  ;;  %v1353_v9 = vmul.f32 %v4364_v49, %v4298_v33  ;;  %v1603_v19 = vmul.f32 %v1562_v47, %v4351_v36 }
 0x11b   : > { %v1828_v39 = vadd.f32 0.2548296, %v1787_v32  ;;  %v4385_v7 = vpop.eup %3194  ;;  %v851_v0 = vmul.f32 0.3275911, %v810_v34  ;;  %v4388_v35 = vmul.f32 0.70710677, %v4372_v52  ;;  %vm1283_vm3 = vweird.f32 %v3843_v59 }
 0x11c   : > { %v2217_v20 = vmul.f32 %v2176_v22, %v6158_v15  ;;  %v1286_v50 = vand.u32 2147483647, %v6150_v63  ;;  %v4393_v1 = vmul.f32 %v4302_v55, %v1039_v16  ;;  %v1644_v32 = vadd.f32 1.4214138, %v1603_v19  ;;  %vm1284_vm4 = vmor %vm1282_vm12, %vm1283_vm3 }
 0x11d   : > { %v1869_v22 = vmul.f32 %v1828_v39, %v4278_v13  ;;  %v6159_v47 = vand.u32 2147483648, %v6150_v63  ;;  %3198 = vpow2.f32 %v2028_v12  ;;  %v1937_v60 = vmul.f32 %v1896_v56, %v4283_v23  ;;  %v6161_v13 = vld [vmem:[#allocation24_spill] sm:$0xff] }
 0x11e   : > { %3039 = vmatmul.msk.f32.gmra.mxu1 %vm2263_vm14, %v2217_v20  ;;  %v1285_v18 = vsel %vm1284_vm4, %v3843_v59, %v1281_v61  ;;  %vm1287_vm5 = vcmp.eq.f32.partialorder %v1286_v50, 8.507059e+37  ;;  %v4403_v6 = vpop.eup %3196  ;;  %v4408_v16 = vsel %vm707_vm1, 1.0, %v6084_v43  ;;  %v1685_v39 = vmul.f32 %v1644_v32, %v4351_v36  ;;  %v588_v50 = vpop.f32.mrf.mxu3 }
 0x11f   : > { %v1289_v15 = vor.u32 1.1754944e-38, %v6159_v47  ;;  %6160 = vst [vmem:[#allocation14_spill] sm:$0xff] %v4408_v16  ;;  %v2074_v20 = vmul.f32 %v6161_v13, %v1869_v22  ;;  %v1354_v63 = vsub.f32 1.0, %v1353_v9  ;;  %v4414_v12 = vadd.f32 1.0, %v851_v0  ;;  %v6162_v0 = vld [vmem:[#allocation12_spill] sm:$0xff] }
 0x120   : > { %v1917_v23 = vsub.f32 0.0, %v810_v34  ;;  %v4417_v59 = vand.u32 2147483647, %v4388_v35  ;;  %v1726_v61 = vadd.f32 -0.28449672, %v1685_v39  ;;  %v981_v47 = vadd.f32 %v3882_v17, %v3963_v4 }
 0x121   : > { %v4412_v19 = vsel %vm1287_vm5, %v1289_v15, %v1285_v18  ;;  %v2115_v56 = vsub.f32 1.0, %v2074_v20  ;;  %v1053_v22 = vmul.f32 %v4403_v6, %v4348_v54  ;;  %v1988_v9 = vmul.f32 1.442695, %v1937_v60 }
 0x122   : > { %v1542_v44 = vmul.f32 1.0614054, %v4412_v19  ;;  %vm983_vm6 = vweird.f32 %v3882_v17  ;;  %v1767_v15 = vmul.f32 %v1726_v61, %v4351_v36  ;;  %v986_v20 = vand.u32 2147483647, %v3826_v42 }
 0x123   : > { %v2156_v32 = vmul.f32 %v2115_v56, %v6162_v0  ;;  %v4429_v39 = vpop.eup %3198  ;;  %vm1297_vm7 = vweird.f32 %v3884_v3  ;;  %3200 = vrcp.f32 %v4414_v12  ;;  %v1958_v4 = vmul.f32 %v1917_v23, %v810_v34  ;;  %vm4439_vm8 = vmor %vm982_vm2, %vm983_vm6  ;;  %v2542_v34 = vld [vmem:[%s6040_s5 + $0x70] sm:$0xff] }
 0x124   : > { %v1583_v13 = vadd.f32 -1.4531521, %v1542_v44  ;;  %6163 = vst [vmem:[#allocation4_spill] sm:$0xff] %v4429_v39  ;;  %v831_v16 = vmul.f32 0.3275911, %v4417_v59  ;;  %v4435_v60 = vadd.f32 %v4193_v45, %v588_v50  ;;  %v985_v18 = vsel %vm4439_vm8, %v3882_v17, %v981_v47  ;;  %2641 = vperm.xlu2 %3115, %v2542_v34  }
 0x125   : > { %v2197_v61 = vadd.f32 1.0, %v2156_v32  ;;  %v1808_v44 = vadd.f32 0.2548296, %v1767_v15  ;;  %v4451_v23 = vmul.f32 %v4364_v49, %v1354_v63  ;;  %v1054_v50 = vsub.f32 1.0, %v1053_v22  ;;  %v6167_v15 = vld [vmem:[#allocation9_spill] sm:$0xff] }
 0x126   : > { %v1624_v0 = vmul.f32 %v1583_v13, %v4412_v19  ;;  %vm728_vm9 = vcmp.ge.f32.partialorder %v4345_v51, 0.0  ;;  %v6166_v5 = vand.u32 2147483648, %v3826_v42  ;;  %vm987_vm10 = vcmp.eq.f32.partialorder %v986_v20, 8.507059e+37  ;;  %v6169_v42 = vld [vmem:[#allocation25_spill] sm:$0xff] }
 0x127   : > { %v2238_v13 = vmul.f32 %v2197_v61, %v6167_v15  ;;  %v1849_v39 = vmul.f32 %v1808_v44, %v4351_v36  ;;  %3202 = vpow2.f32 %v1988_v9  ;;  %v2030_v17 = vmul.f32 1.442695, %v1958_v4  ;;  %v6173_v15 = vld [vmem:[#allocation15_spill] sm:$0xff] }
 0x128   : > { %v989_v32 = vor.u32 1.1754944e-38, %v6166_v5  ;;  %v1665_v56 = vadd.f32 1.4214138, %v1624_v0  ;;  %v4459_v47 = vmul.f32 0.70710677, %v4435_v60  ;;  %v4464_v22 = vadd.f32 1.0, %v831_v16 }
 0x129   : > { %3060 = vmatmul.msk.f32.gmra.mxu2 %vm2263_vm14, %v2238_v13  ;;  %v2054_v5 = vmul.f32 %v6169_v42, %v1849_v39  ;;  %v4469_v36 = vpop.eup %3200  ;;  %v4472_v9 = vmul.f32 0.5, %v4310_v62  ;;  %v1897_v16 = vsub.f32 0.0, %v4417_v59  ;;  %v4482_v39 = vmul.f32 %v4403_v6, %v1054_v50  ;;  %v528_v50 = vpop.f32.mrf.mxu0 }
 0x12a   : > { %v4461_v63 = vsel %vm987_vm10, %v989_v32, %v985_v18  ;;  %6168 = vst [vmem:[#allocation19_spill] sm:$0xff] %v4464_v22  ;;  %v1706_v34 = vmul.f32 %v1665_v56, %v4412_v19  ;;  %v4477_v18 = vsel %vm728_vm9, 1.0, %v6084_v43  ;;  %3204 = vpow2.f32 %v2030_v17 }
 0x12b   : > { %v1522_v61 = vmul.f32 1.0614054, %v4461_v63  ;;  %6170 = vst [vmem:[#allocation8_spill] sm:$0xff] %v4472_v9  ;;  %v2095_v4 = vsub.f32 1.0, %v2054_v5  ;;  %v4485_v32 = vmul.f32 0.5, %v4372_v52  ;;  %v1296_v51 = vadd.f32 %v3940_v8, %v4009_v29 }
 0x12c   : > { %6171 = vst [vmem:[#allocation6_spill] sm:$0xff] %v4477_v18  ;;  %v1747_v44 = vadd.f32 -0.28449672, %v1706_v34  ;;  %v811_v62 = vand.u32 2147483647, %v4459_v47  ;;  %3206 = vrcp.f32 %v4464_v22  ;;  %v1368_v52 = vmul.f32 %v4469_v36, %v4414_v12 }
 0x12d   : > { %v1563_v0 = vadd.f32 -1.4531521, %v1522_v61  ;;  %6172 = vst [vmem:[#allocation24_spill] sm:$0xff] %v4485_v32  ;;  %v2136_v13 = vmul.f32 %v2095_v4, %v6173_v15  ;;  %v4494_v5 = vpop.eup %3202  ;;  %vm708_vm11 = vcmp.ge.f32.partialorder %v4388_v35, 0.0  ;;  %v1938_v17 = vmul.f32 %v1897_v16, %v4417_v59 }
 0x12e   : > { %v1788_v56 = vmul.f32 %v1747_v44, %v4412_v19  ;;  %6174 = vst [vmem:[#allocation12_spill] sm:$0xff] %v4494_v5  ;;  %vm1298_vm12 = vweird.f32 %v3940_v8  ;;  %vm997_vm13 = vweird.f32 %v3891_v26  ;;  %v6177_v44 = vand.u32 2147483648, %v3884_v3 }
 0x12f   : > { %v1604_v42 = vmul.f32 %v1563_v0, %v4461_v63  ;;  %v2177_v29 = vadd.f32 1.0, %v2136_v13  ;;  %vm4504_vm15 = vmor %vm1297_vm7, %vm1298_vm12  ;;  %v852_v15 = vmul.f32 0.3275911, %v811_v62  ;;  %v4511_v35 = vadd.f32 %v4193_v45, %v528_v50 }
 0x130   : > { %v1829_v34 = vadd.f32 0.2548296, %v1788_v56  ;;  %v1304_v0 = vor.u32 1.1754944e-38, %v6177_v44  ;;  %v1300_v59 = vsel %vm4504_vm15, %v3940_v8, %v1296_v51  ;;  %v1301_v16 = vand.u32 2147483647, %v3884_v3  ;;  %v6179_v56 = vld [vmem:[#allocation10_spill] sm:$0xff]  ;;  %v591_v44 = vpop.f32.mrf.mxu3  ;;  %v4523_v9 = vpop.eup %3204 }
 0x131   : > { %v1645_v61 = vadd.f32 1.4214138, %v1604_v42  ;;  %v4518_v13 = vsel %vm708_vm11, 1.0, %v6084_v43  ;;  %v2218_v42 = vmul.f32 %v2177_v29, %v6179_v56  ;;  %6180 = vst [vmem:[#allocation25_spill] sm:$0xff] %v4523_v9  ;;  %v1369_v50 = vsub.f32 1.0, %v1368_v52 }
 0x132   : > { %6178 = vst [vmem:[#allocation9_spill] sm:$0xff] %v4518_v13  ;;  %v1870_v20 = vmul.f32 %v1829_v34, %v4412_v19  ;;  %v4526_v18 = vmul.f32 0.5, %v4435_v60  ;;  %v1918_v4 = vsub.f32 0.0, %v811_v62  ;;  %vm1302_vm1 = vcmp.eq.f32.partialorder %v1301_v16, 8.507059e+37  ;;  %v4528_v8 = vpop.eup %3206  ;;  %v2545_v34 = vld [vmem:[%s6040_s5 + $0x88] sm:$0xff] }
 0x133   : > { %v1686_v32 = vmul.f32 %v1645_v61, %v4461_v63  ;;  %6182 = vst [vmem:[#allocation10_spill] sm:$0xff] %v4528_v8  ;;  %v1990_v3 = vmul.f32 1.442695, %v1938_v17  ;;  %3040 = vmatmul.msk.f32.gmra.mxu1 %vm2263_vm14, %v2218_v42  ;;  %v4532_v19 = vsel %vm1302_vm1, %v1304_v0, %v1300_v59  ;;  %v4535_v61 = vadd.f32 1.0, %v852_v15  ;;  %v6185_v59 = vld [vmem:[#allocation33_spill] sm:$0xff]  ;;  %v6186_v42 = vld [vmem:[#allocation20_spill] sm:$0xff]  ;;  %2656 = vperm.xlu2 %3115, %v2545_v34  }
 0x134   : > { %6181 = vst [vmem:[#allocation15_spill] sm:$0xff] %v4526_v18  ;;  %v2075_v51 = vmul.f32 %v3889_v53, %v1870_v20  ;;  %v4538_v52 = vmul.f32 0.70710677, %v4511_v35  ;;  %v4541_v60 = vadd.f32 %v4193_v45, %v591_v44  ;;  %v1543_v56 = vmul.f32 1.0614054, %v4532_v19  ;;  %v6184_v53 = vld [vmem:[#allocation31_spill] sm:$0xff] }
 0x135   : > { %v1727_v29 = vadd.f32 -0.28449672, %v1686_v32  ;;  %6183 = vst [vmem:[#allocation44_spill] sm:$0xff] %v4535_v61  ;;  %v996_v20 = vadd.f32 %v6184_v53, %v4012_v58  ;;  %v4548_v32 = vmul.f32 %v4469_v36, %v1369_v50  ;;  %v1068_v0 = vmul.f32 %v4528_v8, %v4464_v22  ;;  %v2552_v18 = vld [vmem:[%s6040_s5 + $0xc0] sm:$0xff] }
 0x136   : > { %v2116_v16 = vsub.f32 1.0, %v2075_v51  ;;  %v1959_v15 = vmul.f32 %v1918_v4, %v811_v62  ;;  %vm998_vm2 = vweird.f32 %v6184_v53  ;;  %vm1312_vm3 = vweird.f32 %v6185_v59  ;;  %2691 = vperm.xlu0 %3113, %v2552_v18  }
 0x137   : > { %v1768_v17 = vmul.f32 %v1727_v29, %v4461_v63  ;;  %3208 = vpow2.f32 %v1990_v3  ;;  %v1584_v29 = vadd.f32 -1.4531521, %v1543_v56  ;;  %v791_v58 = vand.u32 2147483647, %v4538_v52  ;;  %vm4562_vm4 = vmor %vm997_vm13, %vm998_vm2  ;;  %v531_v56 = vpop.f32.mrf.mxu0 }
 0x138   : > { %v2157_v44 = vmul.f32 %v2116_v16, %v6186_v42  ;;  %3210 = vrcp.f32 %v4535_v61  ;;  %v4558_v50 = vmul.f32 0.70710677, %v4541_v60  ;;  %v1001_v4 = vand.u32 2147483647, %v3891_v26 }
 0x139   : > { %v1809_v51 = vadd.f32 0.2548296, %v1768_v17  ;;  %v1625_v17 = vmul.f32 %v1584_v29, %v4532_v19  ;;  %v1000_v42 = vsel %vm4562_vm4, %v6184_v53, %v996_v20  ;;  %v1069_v13 = vsub.f32 1.0, %v1068_v0  ;;  %v6190_v29 = vld [vmem:[#allocation16_spill] sm:$0xff]  ;;  %v6191_v53 = vld [vmem:[#allocation29_spill] sm:$0xff] }
 0x13a   : > { %v2198_v3 = vadd.f32 1.0, %v2157_v44  ;;  %vm729_vm5 = vcmp.ge.f32.partialorder %v4459_v47, 0.0  ;;  %v2032_v44 = vmul.f32 1.442695, %v1959_v15  ;;  %vm1002_vm6 = vcmp.eq.f32.partialorder %v1001_v4, 8.507059e+37 }
 0x13b   : > { %v1850_v16 = vmul.f32 %v1809_v51, %v4461_v63  ;;  %v6189_v63 = vand.u32 2147483648, %v3891_v26  ;;  %v1666_v9 = vadd.f32 1.4214138, %v1625_v17  ;;  %v832_v5 = vmul.f32 0.3275911, %v791_v58 }
 0x13c   : > { %v2239_v62 = vmul.f32 %v2198_v3, %v6190_v29  ;;  %v4584_v22 = vand.u32 2147483647, %v4558_v50  ;;  %v4587_v0 = vadd.f32 %v4193_v45, %v531_v56  ;;  %v4594_v26 = vsel %vm729_vm5, 1.0, %v6084_v43 }
 0x13d   : > { %v1004_v51 = vor.u32 1.1754944e-38, %v6189_v63  ;;  %v2055_v20 = vmul.f32 %v6191_v53, %v1850_v16  ;;  %v4591_v15 = vpop.eup %3208  ;;  %6193 = vst [vmem:[#allocation33_spill] sm:$0xff] %v4594_v26  ;;  %v1707_v34 = vmul.f32 %v1666_v9, %v4532_v19  ;;  %v4602_v16 = vmul.f32 %v4528_v8, %v1069_v13  ;;  %v6195_v63 = vld [vmem:[#allocation21_spill] sm:$0xff] }
 0x13e   : > { %6192 = vst [vmem:[#allocation31_spill] sm:$0xff] %v4591_v15  ;;  %3061 = vmatmul.msk.f32.gmra.mxu2 %vm2263_vm14, %v2239_v62  ;;  %v4599_v3 = vpop.eup %3210  ;;  %3212 = vpow2.f32 %v2032_v44  ;;  %v4606_v56 = vmul.f32 0.5, %v4511_v35  ;;  %v4609_v53 = vadd.f32 1.0, %v832_v5  ;;  %v853_v9 = vmul.f32 0.3275911, %v4584_v22 }
 0x13f   : > { %v4589_v47 = vsel %vm1002_vm6, %v1004_v51, %v1000_v42  ;;  %v2096_v18 = vsub.f32 1.0, %v2055_v20  ;;  %v1898_v42 = vsub.f32 0.0, %v791_v58  ;;  %v1748_v29 = vadd.f32 -0.28449672, %v1707_v34 }
 0x140   : > { %v1523_v4 = vmul.f32 1.0614054, %v4589_v47  ;;  %6194 = vst [vmem:[#allocation20_spill] sm:$0xff] %v4606_v56  ;;  %v4613_v20 = vmul.f32 0.70710677, %v4587_v0  ;;  %v1311_v13 = vadd.f32 %v4006_v21, %v4096_v46  ;;  %vm1313_vm7 = vweird.f32 %v4006_v21 }
 0x141   : > { %v2137_v51 = vmul.f32 %v2096_v18, %v6195_v63  ;;  %v1789_v44 = vmul.f32 %v1748_v29, %v4532_v19  ;;  %v1383_v18 = vmul.f32 %v4599_v3, %v4535_v61  ;;  %vm709_vm8 = vcmp.ge.f32.partialorder %v4538_v52, 0.0  ;;  %vm4625_vm9 = vmor %vm1312_vm3, %vm1313_vm7 }
 0x142   : > { %v1564_v62 = vadd.f32 -1.4531521, %v1523_v4  ;;  %v1316_v46 = vand.u32 2147483647, %v6185_v59  ;;  %v6198_v34 = vand.u32 2147483648, %v6185_v59  ;;  %vm1012_vm10 = vweird.f32 %v3984_v37 }
 0x143   : > { %v2178_v17 = vadd.f32 1.0, %v2137_v51  ;;  %v1939_v63 = vmul.f32 %v1898_v42, %v791_v58  ;;  %v6199_v51 = vld [vmem:[#allocation17_spill] sm:$0xff]  ;;  %v4636_v15 = vadd.f32 1.0, %v853_v9  ;;  %v4639_v61 = vand.u32 2147483647, %v4613_v20 }
 0x144   : > { %v1605_v35 = vmul.f32 %v1564_v62, %v4589_v47  ;;  %v1319_v4 = vor.u32 1.1754944e-38, %v6198_v34  ;;  %v1830_v62 = vadd.f32 0.2548296, %v1789_v44  ;;  %v4634_v26 = vpop.eup %3212  ;;  %v1315_v8 = vsel %vm4625_vm9, %v4006_v21, %v1311_v13 }
 0x145   : > { %v2219_v29 = vmul.f32 %v2178_v17, %v6199_v51  ;;  %6200 = vst [vmem:[#allocation16_spill] sm:$0xff] %v4634_v26  ;;  %vm1317_vm11 = vcmp.eq.f32.partialorder %v1316_v46, 8.507059e+37  ;;  %3214 = vrcp.f32 %v4609_v53  ;;  %v594_v17 = vpop.f32.mrf.mxu3  ;;  %v1384_v9 = vsub.f32 1.0, %v1383_v18 }
 0x146   : > { %v1646_v56 = vadd.f32 1.4214138, %v1605_v35  ;;  %6201 = vst [vmem:[#allocation29_spill] sm:$0xff] %v4636_v15  ;;  %v1871_v59 = vmul.f32 %v1830_v62, %v4532_v19  ;;  %v4648_v42 = vsel %vm1317_vm11, %v1319_v4, %v1315_v8  ;;  %v4653_v44 = vsel %vm709_vm8, 1.0, %v6084_v43  ;;  %v6204_v19 = vld [vmem:[#allocation34_spill] sm:$0xff] }
 0x147   : > { %3041 = vmatmul.msk.f32.gmra.mxu1 %vm2263_vm14, %v2219_v29  ;;  %6202 = vst [vmem:[#allocation21_spill] sm:$0xff] %v4653_v44  ;;  %v1919_v21 = vsub.f32 0.0, %v4584_v22  ;;  %v1544_v13 = vmul.f32 1.0614054, %v4648_v42  ;;  %v1992_v35 = vmul.f32 1.442695, %v1939_v63  ;;  %3216 = vrcp.f32 %v4636_v15 }
 0x148   : > { %v1687_v58 = vmul.f32 %v1646_v56, %v4589_v47  ;;  %v4658_v5 = vmul.f32 0.5, %v4541_v60  ;;  %v2076_v46 = vmul.f32 %v6204_v19, %v1871_v59  ;;  %vm730_vm12 = vcmp.ge.f32.partialorder %v4558_v50, 0.0  ;;  %v6205_v59 = vld [vmem:[#allocation26_spill] sm:$0xff] }
 0x149   : > { %v833_v8 = vmul.f32 0.3275911, %v4639_v61  ;;  %v4665_v52 = vadd.f32 %v4193_v45, %v594_v17  ;;  %v1585_v4 = vadd.f32 -1.4531521, %v1544_v13  ;;  %v1011_v60 = vadd.f32 %v4054_v41, %v4142_v38 }
 0x14a   : > { %6203 = vst [vmem:[#allocation17_spill] sm:$0xff] %v4658_v5  ;;  %v1728_v56 = vadd.f32 -0.28449672, %v1687_v58  ;;  %v2117_v18 = vsub.f32 1.0, %v2076_v46  ;;  %vm1327_vm13 = vweird.f32 %v4049_v11  ;;  %v4672_v63 = vmul.f32 %v4599_v3, %v1384_v9 }
 0x14b   : > { %v1960_v29 = vmul.f32 %v1919_v21, %v4584_v22  ;;  %vm1013_vm15 = vweird.f32 %v4054_v41  ;;  %v4677_v62 = vpop.eup %3214  ;;  %v1626_v13 = vmul.f32 %v1585_v4, %v4648_v42  ;;  %v1016_v38 = vand.u32 2147483647, %v3984_v37  ;;  %v6211_v21 = vld [vmem:[#allocation37_spill] sm:$0xff] }
 0x14c   : > { %v1769_v34 = vmul.f32 %v1728_v56, %v4589_v47  ;;  %v2158_v58 = vmul.f32 %v2117_v18, %v6205_v59  ;;  %3218 = vpow2.f32 %v1992_v35  ;;  %v4685_v9 = vsel %vm730_vm12, 1.0, %v6084_v43  ;;  %vm4694_vm1 = vmor %vm1012_vm10, %vm1013_vm15  ;;  %v534_v18 = vpop.f32.mrf.mxu0 }
 0x14d   : > { %6206 = vst [vmem:[#allocation34_spill] sm:$0xff] %v4685_v9  ;;  %v4687_v19 = vadd.f32 1.0, %v833_v8  ;;  %v4690_v22 = vmul.f32 0.70710677, %v4665_v52  ;;  %v1667_v35 = vadd.f32 1.4214138, %v1626_v13  ;;  %v1015_v50 = vsel %vm4694_vm1, %v4054_v41, %v1011_v60  ;;  %v4708_v4 = vpop.eup %3216 }
 0x14e   : > { %v1810_v17 = vadd.f32 0.2548296, %v1769_v34  ;;  %v2199_v46 = vadd.f32 1.0, %v2158_v58  ;;  %v2548_v8 = vld [vmem:[%s6040_s5 + $0xa0] sm:$0xff]  ;;  %v2553_v34 = vld [vmem:[%s6040_s5 + $0xc8] sm:$0xff]  ;;  %v1083_v59 = vmul.f32 %v4677_v62, %v4609_v53  ;;  %v1899_v58 = vsub.f32 0.0, %v4639_v61 }
 0x14f   : > { %2671 = vperm.xlu2 %3115, %v2548_v8   ;;  %2696 = vperm.xlu1 %3114, %v2553_v34   ;;  %v6210_v41 = vld [vmem:[#allocation22_spill] sm:$0xff]  ;;  %v1708_v5 = vmul.f32 %v1667_v35, %v4648_v42  ;;  %vm1017_vm2 = vcmp.eq.f32.partialorder %v1016_v38, 8.507059e+37  ;;  %v813_v44 = vand.u32 2147483647, %v4690_v22  ;;  %3220 = vrcp.f32 %v4687_v19  ;;  %v6214_v34 = vld [vmem:[#allocation27_spill] sm:$0xff] }
 0x150   : > { %v1851_v56 = vmul.f32 %v1810_v17, %v4589_v47  ;;  %v2034_v47 = vmul.f32 1.442695, %v1960_v29  ;;  %v6209_v17 = vand.u32 2147483648, %v3984_v37  ;;  %v2240_v60 = vmul.f32 %v2199_v46, %v6210_v41 }
 0x151   : > { %v4721_v29 = vadd.f32 %v4193_v45, %v534_v18  ;;  %v1749_v46 = vadd.f32 -0.28449672, %v1708_v5  ;;  %v1084_v38 = vsub.f32 1.0, %v1083_v59  ;;  %v1398_v35 = vmul.f32 %v4708_v4, %v4636_v15 }
 0x152   : > { %v1019_v13 = vor.u32 1.1754944e-38, %v6209_v17  ;;  %v2056_v51 = vmul.f32 %v6211_v21, %v1851_v56  ;;  %3062 = vmatmul.msk.f32.gmra.mxu2 %vm2263_vm14, %v2240_v60  ;;  %v4728_v8 = vpop.eup %3218  ;;  %3222 = vpow2.f32 %v2034_v47  ;;  %v4733_v18 = vmul.f32 0.5, %v4587_v0  ;;  %v597_v21 = vpop.f32.mrf.mxu3 }
 0x153   : > { %6212 = vst [vmem:[#allocation26_spill] sm:$0xff] %v4728_v8  ;;  %v854_v5 = vmul.f32 0.3275911, %v813_v44  ;;  %v4739_v41 = vmul.f32 0.70710677, %v4721_v29  ;;  %v1326_v59 = vadd.f32 %v4112_v14, %v4227_v10  ;;  %vm1328_vm3 = vweird.f32 %v4112_v14 }
 0x154   : > { %v4723_v26 = vsel %vm1017_vm2, %v1019_v13, %v1015_v50  ;;  %v2097_v37 = vsub.f32 1.0, %v2056_v51  ;;  %6213 = vst [vmem:[#allocation22_spill] sm:$0xff] %v4733_v18  ;;  %v1940_v50 = vmul.f32 %v1899_v58, %v4639_v61  ;;  %v1790_v13 = vmul.f32 %v1749_v46, %v4648_v42  ;;  %vm4747_vm4 = vmor %vm1327_vm13, %vm1328_vm3 }
 0x155   : > { %v1524_v56 = vmul.f32 1.0614054, %v4723_v26  ;;  %v1331_v58 = vand.u32 2147483647, %v4049_v11  ;;  %vm710_vm5 = vcmp.ge.f32.partialorder %v4613_v20, 0.0  ;;  %v1330_v10 = vsel %vm4747_vm4, %v4112_v14, %v1326_v59  ;;  %v6219_v59 = vld [vmem:[#allocation38_spill] sm:$0xff] }
 0x156   : > { %v2138_v17 = vmul.f32 %v2097_v37, %v6214_v34  ;;  %v1831_v60 = vadd.f32 0.2548296, %v1790_v13  ;;  %v1399_v37 = vsub.f32 1.0, %v1398_v35  ;;  %v6217_v46 = vand.u32 2147483648, %v4049_v11  ;;  %v4758_v34 = vpop.eup %3220 }
 0x157   : > { %v1565_v51 = vadd.f32 -1.4531521, %v1524_v56  ;;  %vm1027_vm6 = vweird.f32 %v4115_v27  ;;  %v1994_v35 = vmul.f32 1.442695, %v1940_v50  ;;  %v4766_v15 = vand.u32 2147483647, %v4739_v41 }
 0x158   : > { %v2179_v47 = vadd.f32 1.0, %v2138_v17  ;;  %v1334_v56 = vor.u32 1.1754944e-38, %v6217_v46  ;;  %v6218_v17 = vld [vmem:[#allocation23_spill] sm:$0xff]  ;;  %v1872_v9 = vmul.f32 %v1831_v60, %v4648_v42  ;;  %v4762_v8 = vpop.eup %3222  ;;  %v4769_v14 = vadd.f32 %v4193_v45, %v597_v21  ;;  %v6221_v46 = vld [vmem:[#allocation30_spill] sm:$0xff] }
 0x159   : > { %v1606_v0 = vmul.f32 %v1565_v51, %v4723_v26  ;;  %v1920_v51 = vsub.f32 0.0, %v813_v44  ;;  %vm1332_vm7 = vcmp.eq.f32.partialorder %v1331_v58, 8.507059e+37  ;;  %v4772_v11 = vadd.f32 1.0, %v854_v5 }
 0x15a   : > { %v2220_v13 = vmul.f32 %v2179_v47, %v6218_v17  ;;  %v2077_v47 = vmul.f32 %v6219_v59, %v1872_v9  ;;  %v4776_v60 = vsel %vm1332_vm7, %v1334_v56, %v1330_v10  ;;  %v4784_v50 = vsel %vm710_vm5, 1.0, %v6084_v43 }
 0x15b   : > { %v1647_v18 = vadd.f32 1.4214138, %v1606_v0  ;;  %v4779_v0 = vmul.f32 %v4677_v62, %v1084_v38  ;;  %6220 = vst [vmem:[#allocation37_spill] sm:$0xff] %v4784_v50  ;;  %v1098_v21 = vmul.f32 %v4758_v34, %v4687_v19  ;;  %v1545_v5 = vmul.f32 1.0614054, %v4776_v60 }
 0x15c   : > { %3042 = vmatmul.msk.f32.gmra.mxu1 %vm2263_vm14, %v2220_v13  ;;  %v1961_v9 = vmul.f32 %v1920_v51, %v813_v44  ;;  %v2118_v58 = vsub.f32 1.0, %v2077_v47  ;;  %vm1342_vm8 = vweird.f32 %v4144_v57  ;;  %v4792_v38 = vmul.f32 %v4708_v4, %v1399_v37 }
 0x15d   : > { %v1688_v42 = vmul.f32 %v1647_v18, %v4723_v26  ;;  %3224 = vpow2.f32 %v1994_v35  ;;  %v834_v20 = vmul.f32 0.3275911, %v4766_v15  ;;  %v4796_v10 = vmul.f32 0.70710677, %v4769_v14 }
 0x15e   : > { %3226 = vrcp.f32 %v4772_v11  ;;  %v2159_v56 = vmul.f32 %v2118_v58, %v6221_v46  ;;  %v1586_v44 = vadd.f32 -1.4531521, %v1545_v5  ;;  %v1099_v13 = vsub.f32 1.0, %v1098_v21  ;;  %v6223_v21 = vld [vmem:[#allocation28_spill] sm:$0xff] }
 0x15f   : > { %v1729_v18 = vadd.f32 -0.28449672, %v1688_v42  ;;  %v4802_v51 = vmul.f32 0.5, %v4665_v52  ;;  %vm731_vm9 = vcmp.ge.f32.partialorder %v4690_v22, 0.0  ;;  %v1026_v37 = vadd.f32 %v4206_v48, %v4291_v25  ;;  %v537_v25 = vpop.f32.mrf.mxu0 }
 0x160   : > { %v2036_v35 = vmul.f32 1.442695, %v1961_v9  ;;  %v2200_v59 = vadd.f32 1.0, %v2159_v56  ;;  %v1627_v42 = vmul.f32 %v1586_v44, %v4776_v60  ;;  %v4808_v61 = vadd.f32 1.0, %v834_v20  ;;  %v2551_v56 = vld [vmem:[%s6040_s5 + $0xb8] sm:$0xff] }
 0x161   : > { %v1770_v17 = vmul.f32 %v1729_v18, %v4723_v26  ;;  %6222 = vst [vmem:[#allocation27_spill] sm:$0xff] %v4802_v51  ;;  %v4811_v58 = vand.u32 2147483647, %v4796_v10  ;;  %vm1028_vm10 = vweird.f32 %v4206_v48  ;;  %v1031_v52 = vand.u32 2147483647, %v4115_v27  ;;  %2686 = vperm.xlu2 %3115, %v2551_v56  }
 0x162   : > { %v2241_v5 = vmul.f32 %v2200_v59, %v6223_v21  ;;  %v1668_v46 = vadd.f32 1.4214138, %v1627_v42  ;;  %vm1029_vm11 = vmor %vm1027_vm6, %vm1028_vm10  ;;  %v6224_v9 = vand.u32 2147483648, %v4115_v27  ;;  %v4829_v44 = vsel %vm731_vm9, 1.0, %v6084_v43 }
 0x163   : > { %v1811_v47 = vadd.f32 0.2548296, %v1770_v17  ;;  %v4824_v17 = vpop.eup %3224  ;;  %6225 = vst [vmem:[#allocation23_spill] sm:$0xff] %v4829_v44  ;;  %v1030_v59 = vsel %vm1029_vm11, %v4206_v48, %v1026_v37  ;;  %vm1032_vm12 = vcmp.eq.f32.partialorder %v1031_v52, 8.507059e+37  ;;  %v4842_v22 = vmul.f32 %v4758_v34, %v1099_v13  ;;  %v2555_v44 = vld [vmem:[%s6040_s5 + $0xd8] sm:$0xff] }
 0x164   : > { %v1034_v20 = vor.u32 1.1754944e-38, %v6224_v9  ;;  %3063 = vmatmul.msk.f32.gmra.mxu2 %vm2263_vm14, %v2241_v5  ;;  %v1709_v21 = vmul.f32 %v1668_v46, %v4776_v60  ;;  %3228 = vpow2.f32 %v2036_v35  ;;  %v855_v48 = vmul.f32 0.3275911, %v4811_v58  ;;  %2706 = vperm.xlu0 %3113, %v2555_v44  }
 0x165   : > { %v1852_v18 = vmul.f32 %v1811_v47, %v4723_v26  ;;  %v1900_v26 = vsub.f32 0.0, %v4766_v15  ;;  %v4833_v47 = vpop.eup %3226  ;;  %v4846_v37 = vadd.f32 %v4193_v45, %v537_v25  ;;  %3230 = vrcp.f32 %v4808_v61  ;;  %v6227_v45 = vld [vmem:[#allocation35_spill] sm:$0xff] }
 0x166   : > { %v4839_v9 = vsel %vm1032_vm12, %v1034_v20, %v1030_v59  ;;  %v1750_v56 = vadd.f32 -0.28449672, %v1709_v21  ;;  %v1341_v13 = vadd.f32 %v4224_v30, %v4305_v24  ;;  %vm1343_vm13 = vweird.f32 %v4224_v30 }
 0x167   : > { %v2057_v42 = vmul.f32 %v4126_v40, %v1852_v18  ;;  %v1525_v5 = vmul.f32 1.0614054, %v4839_v9  ;;  %v1413_v40 = vmul.f32 %v4833_v47, %v4772_v11  ;;  %v1941_v18 = vmul.f32 %v1900_v26, %v4766_v15  ;;  %vm4863_vm15 = vmor %vm1342_vm8, %vm1343_vm13 }
 0x168   : > { %v4857_v35 = vmul.f32 0.5, %v4721_v29  ;;  %v1791_v25 = vmul.f32 %v1750_v56, %v4776_v60  ;;  %v4867_v15 = vadd.f32 1.0, %v855_v48  ;;  %v4870_v24 = vmul.f32 0.70710677, %v4846_v37  ;;  %v600_v56 = vpop.f32.mrf.mxu3 }
 0x169   : > { %v2098_v52 = vsub.f32 1.0, %v2057_v42  ;;  %v1566_v20 = vadd.f32 -1.4531521, %v1525_v5  ;;  %v1345_v29 = vsel %vm4863_vm15, %v4224_v30, %v1341_v13  ;;  %v1346_v26 = vand.u32 2147483647, %v4144_v57  ;;  %v6232_v30 = vld [vmem:[#allocation32_spill] sm:$0xff] }
 0x16a   : > { %6226 = vst [vmem:[#allocation38_spill] sm:$0xff] %v4857_v35  ;;  %v1832_v21 = vadd.f32 0.2548296, %v1791_v25  ;;  %v6230_v5 = vand.u32 2147483648, %v4144_v57  ;;  %v4879_v27 = vpop.eup %3228  ;;  %v1414_v48 = vsub.f32 1.0, %v1413_v40  ;;  %vm711_vm1 = vcmp.ge.f32.partialorder %v4739_v41, 0.0 }
 0x16b   : > { %v2139_v46 = vmul.f32 %v2098_v52, %v6227_v45  ;;  %v1607_v52 = vmul.f32 %v1566_v20, %v4839_v9  ;;  %6231 = vst [vmem:[#allocation30_spill] sm:$0xff] %v4879_v27  ;;  %v1996_v35 = vmul.f32 1.442695, %v1941_v18  ;;  %vm1347_vm2 = vcmp.eq.f32.partialorder %v1346_v26, 8.507059e+37  ;;  %v4882_v51 = vpop.eup %3230  ;;  %v4893_v40 = vld [vmem:[%s6037_s2] ss:$0 sm:$0xff] }
 0x16c   : > { %v1349_v45 = vor.u32 1.1754944e-38, %v6230_v5  ;;  %vm1042_vm3 = vweird.f32 %v4238_v2  ;;  %vm732_vm4 = vcmp.ge.f32.partialorder %v4796_v10, 0.0  ;;  %v1921_v57 = vsub.f32 0.0, %v4811_v58  ;;  %v2556_v27 = vld [vmem:[%s6040_s5 + $0xe0] sm:$0xff] }
 0x16d   : > { %v2180_v42 = vadd.f32 1.0, %v2139_v46  ;;  %v1873_v46 = vmul.f32 %v1832_v21, %v4776_v60  ;;  %v1648_v25 = vadd.f32 1.4214138, %v1607_v52  ;;  %v794_v20 = vand.u32 2147483647, %v4870_v24  ;;  %2711 = vperm.xlu1 %3114, %v2556_v27  }
 0x16e   : > { %v4896_v18 = vadd.f32 %v4893_v40, %v600_v56  ;;  %v4898_v59 = vsel %vm1347_vm2, %v1349_v45, %v1345_v29  ;;  %3232 = vrcp.f32 %v4867_v15  ;;  %v4908_v21 = vsel %vm711_vm1, 1.0, %v6084_v43  ;;  %v6236_v29 = vld [vmem:[#allocation39_spill] sm:$0xff] }
 0x16f   : > { %v2221_v13 = vmul.f32 %v2180_v42, %v6232_v30  ;;  %v2078_v60 = vmul.f32 %v4166_v28, %v1873_v46  ;;  %v1689_v26 = vmul.f32 %v1648_v25, %v4839_v9  ;;  %v1546_v42 = vmul.f32 1.0614054, %v4898_v59  ;;  %6233 = vst [vmem:[#allocation28_spill] sm:$0xff] %v4908_v21 }
 0x170   : > { %v1113_v52 = vmul.f32 %v4882_v51, %v4808_v61  ;;  %v4914_v56 = vmul.f32 0.5, %v4769_v14  ;;  %v4917_v5 = vmul.f32 %v4833_v47, %v1414_v48  ;;  %3234 = vpow2.f32 %v1996_v35 }
 0x171   : > { %3043 = vmatmul.msk.f32.gmra.mxu1 %vm2263_vm14, %v2221_v13  ;;  %v2119_v28 = vsub.f32 1.0, %v2078_v60  ;;  %v1730_v45 = vadd.f32 -0.28449672, %v1689_v26  ;;  %v1587_v30 = vadd.f32 -1.4531521, %v1546_v42  ;;  %v540_v13 = vpop.f32.mrf.mxu0  ;;  %v4922_v41 = vsel %vm732_vm4, 1.0, %v6084_v43 }
 0x172   : > { %6234 = vst [vmem:[#allocation35_spill] sm:$0xff] %v4914_v56  ;;  %v835_v46 = vmul.f32 0.3275911, %v794_v20  ;;  %v4925_v25 = vmul.f32 0.70710677, %v4896_v18  ;;  %v1962_v14 = vmul.f32 %v1921_v57, %v4811_v58  ;;  %vm1357_vm5 = vweird.f32 %v4298_v33 }
 0x173   : > { %6235 = vst [vmem:[#allocation32_spill] sm:$0xff] %v4922_v41  ;;  %v2160_v56 = vmul.f32 %v2119_v28, %v6236_v29  ;;  %v1771_v48 = vmul.f32 %v1730_v45, %v4839_v9  ;;  %v1628_v60 = vmul.f32 %v1587_v30, %v4898_v59  ;;  %v1114_v35 = vsub.f32 1.0, %v1113_v52  ;;  %v6240_v30 = vld [vmem:[#allocation36_spill] sm:$0xff] }
 0x174   : > { %v1901_v26 = vsub.f32 0.0, %v794_v20  ;;  %v4933_v10 = vadd.f32 %v4893_v40, %v540_v13  ;;  %v1041_v42 = vadd.f32 %v4302_v55, %v4393_v1  ;;  %v4937_v41 = vpop.eup %3232  ;;  %vm1043_vm6 = vweird.f32 %v4302_v55 }
 0x175   : > { %v2201_v21 = vadd.f32 1.0, %v2160_v56  ;;  %v1812_v58 = vadd.f32 0.2548296, %v1771_v48  ;;  %v1669_v57 = vadd.f32 1.4214138, %v1628_v60  ;;  %v4940_v29 = vadd.f32 1.0, %v835_v46  ;;  %vm4947_vm7 = vmor %vm1042_vm3, %vm1043_vm6 }
 0x176   : > { %v4943_v28 = vand.u32 2147483647, %v4925_v25  ;;  %v1046_v1 = vand.u32 2147483647, %v4238_v2  ;;  %v6239_v45 = vand.u32 2147483648, %v4238_v2  ;;  %v1045_v60 = vsel %vm4947_vm7, %v4302_v55, %v1041_v42  ;;  %v4966_v2 = vpop.eup %3234  ;;  %v6242_v55 = vld [vmem:[#allocation5_spill] sm:$0xff] }
 0x177   : > { %v2242_v13 = vmul.f32 %v2201_v21, %v6240_v30  ;;  %v1853_v48 = vmul.f32 %v1812_v58, %v4839_v9  ;;  %v1710_v46 = vmul.f32 %v1669_v57, %v4898_v59  ;;  %6241 = vst [vmem:[#allocation39_spill] sm:$0xff] %v4966_v2  ;;  %v1428_v21 = vmul.f32 %v4937_v41, %v4867_v15 }
 0x178   : > { %v1049_v56 = vor.u32 1.1754944e-38, %v6239_v45  ;;  %v2038_v9 = vmul.f32 1.442695, %v1962_v14  ;;  %v1942_v58 = vmul.f32 %v1901_v26, %v794_v20  ;;  %vm1047_vm8 = vcmp.eq.f32.partialorder %v1046_v1, 8.507059e+37 }
 0x179   : > { %3064 = vmatmul.msk.f32.gmra.mxu2 %vm2263_vm14, %v2242_v13  ;;  %v2058_v42 = vmul.f32 %v6242_v55, %v1853_v48  ;;  %v1751_v57 = vadd.f32 -0.28449672, %v1710_v46  ;;  %v4973_v52 = vmul.f32 0.70710677, %v4933_v10  ;;  %v4979_v2 = vmul.f32 0.5, %v4846_v37  ;;  %v6244_v13 = vld [vmem:[#allocation41_spill] sm:$0xff] }
 0x17a   : > { %v4975_v45 = vsel %vm1047_vm8, %v1049_v56, %v1045_v60  ;;  %vm712_vm9 = vcmp.ge.f32.partialorder %v4870_v24, 0.0  ;;  %3236 = vrcp.f32 %v4940_v29  ;;  %v856_v27 = vmul.f32 0.3275911, %v4943_v28 }
 0x17b   : > { %6243 = vst [vmem:[#allocation36_spill] sm:$0xff] %v4979_v2  ;;  %v2099_v44 = vsub.f32 1.0, %v2058_v42  ;;  %v1792_v20 = vmul.f32 %v1751_v57, %v4898_v59  ;;  %v1526_v14 = vmul.f32 1.0614054, %v4975_v45  ;;  %v4987_v26 = vmul.f32 %v4882_v51, %v1114_v35  ;;  %v603_v57 = vpop.f32.mrf.mxu3 }
 0x17c   : > { %v1429_v1 = vsub.f32 1.0, %v1428_v21  ;;  %3238 = vpow2.f32 %v2038_v9  ;;  %v1998_v56 = vmul.f32 1.442695, %v1942_v58  ;;  %v795_v24 = vand.u32 2147483647, %v4973_v52 }
 0x17d   : > { %v2140_v37 = vmul.f32 %v2099_v44, %v6244_v13  ;;  %v1833_v48 = vadd.f32 0.2548296, %v1792_v20  ;;  %v1567_v46 = vadd.f32 -1.4531521, %v1526_v14  ;;  %v4992_v60 = vsel %vm712_vm9, 1.0, %v6084_v43 }
 0x17e   : > { %6245 = vst [vmem:[#allocation5_spill] sm:$0xff] %v4992_v60  ;;  %v1356_v55 = vadd.f32 %v4364_v49, %v4451_v23  ;;  %vm1358_vm10 = vweird.f32 %v4364_v49  ;;  %v1361_v35 = vand.u32 2147483647, %v4298_v33  ;;  %vm1057_vm11 = vweird.f32 %v4348_v54 }
 0x17f   : > { %v2181_v21 = vadd.f32 1.0, %v2140_v37  ;;  %v4999_v9 = vadd.f32 1.0, %v856_v27  ;;  %v1874_v58 = vmul.f32 %v1833_v48, %v4898_v59  ;;  %v1608_v42 = vmul.f32 %v1567_v46, %v4975_v45  ;;  %vm5005_vm12 = vmor %vm1357_vm5, %vm1358_vm10  ;;  %v6248_v59 = vld [vmem:[#allocation40_spill] sm:$0xff] }
 0x180   : > { %v5009_v23 = vpop.eup %3236  ;;  %v5012_v20 = vmul.f32 %v4937_v41, %v1429_v1  ;;  %3240 = vpow2.f32 %v1998_v56  ;;  %v1922_v27 = vsub.f32 0.0, %v4943_v28  ;;  %v836_v48 = vmul.f32 0.3275911, %v795_v24 }
 0x181   : > { %v2222_v13 = vmul.f32 %v2181_v21, %v6248_v59  ;;  %v2079_v37 = vmul.f32 %v4330_v31, %v1874_v58  ;;  %v1649_v46 = vadd.f32 1.4214138, %v1608_v42  ;;  %v5021_v2 = vadd.f32 %v4893_v40, %v603_v57 }
 0x182   : > { %v5018_v30 = vpop.eup %3238  ;;  %v1360_v1 = vsel %vm5005_vm12, %v4364_v49, %v1356_v55  ;;  %vm1362_vm13 = vcmp.eq.f32.partialorder %v1361_v35, 8.507059e+37  ;;  %v6250_v56 = vand.u32 2147483648, %v4298_v33  ;;  %vm733_vm15 = vcmp.ge.f32.partialorder %v4925_v25, 0.0  ;;  %v6252_v33 = vld [vmem:[#allocation43_spill] sm:$0xff] }
 0x183   : > { %6249 = vst [vmem:[#allocation41_spill] sm:$0xff] %v5018_v30  ;;  %3044 = vmatmul.msk.f32.gmra.mxu1 %vm2263_vm14, %v2222_v13  ;;  %3242 = vrcp.f32 %v4999_v9  ;;  %v2120_v31 = vsub.f32 1.0, %v2079_v37  ;;  %v1690_v21 = vmul.f32 %v1649_v46, %v4975_v45  ;;  %v1128_v58 = vmul.f32 %v5009_v23, %v4940_v29 }
 0x184   : > { %v1364_v14 = vor.u32 1.1754944e-38, %v6250_v56  ;;  %v5035_v42 = vmul.f32 0.5, %v4896_v18  ;;  %v1963_v49 = vmul.f32 %v1922_v27, %v4943_v28  ;;  %v1902_v55 = vsub.f32 0.0, %v795_v24 }
 0x185   : > { %v2161_v35 = vmul.f32 %v2120_v31, %v6252_v33  ;;  %v1731_v57 = vadd.f32 -0.28449672, %v1690_v21  ;;  %v1056_v25 = vadd.f32 %v4403_v6, %v4482_v39  ;;  %v5046_v13 = vsel %vm733_vm15, 1.0, %v6084_v43 }
 0x186   : > { %6251 = vst [vmem:[#allocation40_spill] sm:$0xff] %v5035_v42  ;;  %v5039_v44 = vsel %vm1362_vm13, %v1364_v14, %v1360_v1  ;;  %v5043_v59 = vpop.eup %3240  ;;  %v5048_v37 = vadd.f32 1.0, %v836_v48  ;;  %v5051_v18 = vmul.f32 0.70710677, %v5021_v2  ;;  %v543_v14 = vpop.f32.mrf.mxu0  ;;  %vm1058_vm1 = vweird.f32 %v4403_v6 }
 0x187   : > { %6253 = vst [vmem:[#allocation43_spill] sm:$0xff] %v5043_v59  ;;  %v1547_v28 = vmul.f32 1.0614054, %v5039_v44  ;;  %v2202_v27 = vadd.f32 1.0, %v2161_v35  ;;  %v1772_v46 = vmul.f32 %v1731_v57, %v4975_v45  ;;  %v1061_v39 = vand.u32 2147483647, %v4348_v54  ;;  %vm5060_vm3 = vmor %vm1057_vm11, %vm1058_vm1 }
 0x188   : > { %6254 = vst [vmem:[#allocation45_spill] sm:$0xff] %v5046_v13  ;;  %vm1372_vm2 = vweird.f32 %v4414_v12  ;;  %v1129_v1 = vsub.f32 1.0, %v1128_v58  ;;  %v2040_v56 = vmul.f32 1.442695, %v1963_v49  ;;  %v1943_v31 = vmul.f32 %v1902_v55, %v795_v24  ;;  %v6257_v35 = vld [vmem:[#allocation42_spill] sm:$0xff]  ;;  %v2558_v24 = vld [vmem:[%s6040_s5 + $0xf0] sm:$0xff] }
 0x189   : > { %v1588_v48 = vadd.f32 -1.4531521, %v1547_v28  ;;  %v5064_v33 = vpop.eup %3242  ;;  %v2243_v57 = vmul.f32 %v2202_v27, %v6257_v35  ;;  %v1813_v42 = vadd.f32 0.2548296, %v1772_v46  ;;  %v1060_v13 = vsel %vm5060_vm3, %v4403_v6, %v1056_v25  ;;  %v2559_v55 = vld [vmem:[%s6040_s5 + $0xf8] sm:$0xff]  ;;  %2721 = vperm.xlu0 %3113, %v2558_v24  }
 0x18a   : > { %v6258_v58 = vand.u32 2147483648, %v4348_v54  ;;  %v816_v28 = vand.u32 2147483647, %v5051_v18  ;;  %v5081_v46 = vadd.f32 %v4893_v40, %v543_v14  ;;  %vm1062_vm4 = vcmp.eq.f32.partialorder %v1061_v39, 8.507059e+37  ;;  %2726 = vperm.xlu1 %3114, %v2559_v55  }
 0x18b   : > { %v1629_v27 = vmul.f32 %v1588_v48, %v5039_v44  ;;  %3065 = vmatmul.msk.f32.gmra.mxu2 %vm2263_vm14, %v2243_v57  ;;  %vm713_vm5 = vcmp.ge.f32.partialorder %v4973_v52, 0.0  ;;  %3244 = vrcp.f32 %v5048_v37  ;;  %v1854_v54 = vmul.f32 %v1813_v42, %v4975_v45 }
 0x18c   : > { %v1064_v49 = vor.u32 1.1754944e-38, %v6258_v58  ;;  %v1443_v25 = vmul.f32 %v5064_v33, %v4999_v9  ;;  %v2000_v48 = vmul.f32 1.442695, %v1943_v31  ;;  %v5093_v39 = vmul.f32 %v5009_v23, %v1129_v1  ;;  %v6269_v1 = vld [vmem:[#allocation13_spill] sm:$0xff] }
 0x18d   : > { %v1670_v21 = vadd.f32 1.4214138, %v1629_v27  ;;  %v5097_v57 = vmul.f32 0.5, %v4933_v10  ;;  %v2059_v58 = vmul.f32 %v4385_v7, %v1854_v54  ;;  %3246 = vpow2.f32 %v2040_v56  ;;  %v6262_v27 = vld [vmem:[#allocation11_spill] sm:$0xff] }
 0x18e   : > { %v5087_v6 = vsel %vm1062_vm4, %v1064_v49, %v1060_v13  ;;  %v857_v45 = vmul.f32 0.3275911, %v816_v28  ;;  %v5102_v13 = vmul.f32 0.70710677, %v5081_v46  ;;  %v5107_v31 = vsel %vm713_vm5, 1.0, %v6084_v43 }
 0x18f   : > { %v1527_v14 = vmul.f32 1.0614054, %v5087_v6  ;;  %6259 = vst [vmem:[#allocation42_spill] sm:$0xff] %v5097_v57  ;;  %v1711_v42 = vmul.f32 %v1670_v21, %v5039_v44  ;;  %v2100_v49 = vsub.f32 1.0, %v2059_v58  ;;  %v1444_v10 = vsub.f32 1.0, %v1443_v25  ;;  %v6264_v57 = vld [vmem:[#allocation19_spill] sm:$0xff] }
 0x190   : > { %6260 = vst [vmem:[#allocation46_spill] sm:$0xff] %v5107_v31  ;;  %3248 = vpow2.f32 %v2000_v48  ;;  %v1371_v7 = vadd.f32 %v4469_v36, %v4548_v32  ;;  %v5116_v21 = vmul.f32 0.5, %v5021_v2  ;;  %v1923_v52 = vsub.f32 0.0, %v816_v28  ;;  %v606_v32 = vpop.f32.mrf.mxu3  ;;  %v6272_v2 = vld [vmem:[#allocation4_spill] sm:$0xff] }
 0x191   : > { %v1568_v24 = vadd.f32 -1.4531521, %v1527_v14  ;;  %v1752_v55 = vadd.f32 -0.28449672, %v1711_v42  ;;  %v5112_v56 = vpop.eup %3244  ;;  %v2141_v54 = vmul.f32 %v2100_v49, %v6262_v27  ;;  %vm1072_vm6 = vweird.f32 %v6264_v57 }
 0x192   : > { %6261 = vst [vmem:[#allocation47_spill] sm:$0xff] %v5112_v56  ;;  %v5120_v58 = vadd.f32 1.0, %v857_v45  ;;  %v5124_v48 = vand.u32 2147483647, %v5102_v13  ;;  %vm1373_vm7 = vweird.f32 %v4469_v36  ;;  %v1376_v49 = vand.u32 2147483647, %v4414_v12 }
 0x193   : > { %6263 = vst [vmem:[#allocation11_spill] sm:$0xff] %v5116_v21  ;;  %v1609_v35 = vmul.f32 %v1568_v24, %v5087_v6  ;;  %v1793_v25 = vmul.f32 %v1752_v55, %v5039_v44  ;;  %v2182_v14 = vadd.f32 1.0, %v2141_v54  ;;  %vm5129_vm8 = vmor %vm1372_vm2, %vm1373_vm7  ;;  %v6267_v45 = vand.u32 2147483648, %v4414_v12  ;;  %v5136_v55 = vpop.eup %3246 }
 0x194   : > { %6268 = vst [vmem:[#allocation19_spill] sm:$0xff] %v5136_v55  ;;  %v1143_v27 = vmul.f32 %v5112_v56, %v5048_v37  ;;  %vm734_vm9 = vcmp.ge.f32.partialorder %v5051_v18, 0.0  ;;  %v5147_v60 = vadd.f32 %v4893_v40, %v606_v32  ;;  %vm1377_vm10 = vcmp.eq.f32.partialorder %v1376_v49, 8.507059e+37 }
 0x195   : > { %v1650_v42 = vadd.f32 1.4214138, %v1609_v35  ;;  %v1379_v24 = vor.u32 1.1754944e-38, %v6267_v45  ;;  %v1834_v54 = vadd.f32 0.2548296, %v1793_v25  ;;  %v1375_v35 = vsel %vm5129_vm8, %v4469_v36, %v1371_v7 }
 0x196   : > { %v2223_v21 = vmul.f32 %v2182_v14, %v6269_v1  ;;  %v5149_v12 = vpop.eup %3248  ;;  %v5152_v45 = vmul.f32 %v5064_v33, %v1444_v10  ;;  %3250 = vrcp.f32 %v5120_v58  ;;  %v1964_v18 = vmul.f32 %v1923_v52, %v816_v28  ;;  %v546_v14 = vpop.f32.mrf.mxu0  ;;  %v6273_v28 = vld [vmem:[#allocation10_spill] sm:$0xff] }
 0x197   : > { %v1691_v31 = vmul.f32 %v1650_v42, %v5087_v6  ;;  %6270 = vst [vmem:[#allocation13_spill] sm:$0xff] %v5149_v12  ;;  %v1875_v25 = vmul.f32 %v1834_v54, %v5039_v44  ;;  %v5158_v36 = vsel %vm734_vm9, 1.0, %v6084_v43  ;;  %v837_v1 = vmul.f32 0.3275911, %v5124_v48 }
 0x198   : > { %3045 = vmatmul.msk.f32.gmra.mxu1 %vm2263_vm14, %v2223_v21  ;;  %6271 = vst [vmem:[#allocation48_spill] sm:$0xff] %v5158_v36  ;;  %v5161_v32 = vsel %vm1377_vm10, %v1379_v24, %v1375_v35  ;;  %v1144_v42 = vsub.f32 1.0, %v1143_v27  ;;  %v1071_v52 = vadd.f32 %v6273_v28, %v4602_v16  ;;  %v5170_v54 = vmul.f32 0.70710677, %v5147_v60 }
 0x199   : > { %v1732_v7 = vadd.f32 -0.28449672, %v1691_v31  ;;  %v2080_v10 = vmul.f32 %v6272_v2, %v1875_v25  ;;  %v1548_v49 = vmul.f32 1.0614054, %v5161_v32  ;;  %vm1073_vm11 = vweird.f32 %v6273_v28  ;;  %v6274_v31 = vld [vmem:[#allocation44_spill] sm:$0xff] }
 0x19a   : > { %vm1387_vm12 = vweird.f32 %v6274_v31  ;;  %v2042_v24 = vmul.f32 1.442695, %v1964_v18  ;;  %v5175_v25 = vadd.f32 %v4893_v40, %v546_v14  ;;  %vm714_vm13 = vcmp.ge.f32.partialorder %v5102_v13, 0.0  ;;  %vm5182_vm15 = vmor %vm1072_vm6, %vm1073_vm11  ;;  %v6277_v18 = vld [vmem:[#allocation18_spill] sm:$0xff] }
 0x19b   : > { %v1773_v21 = vmul.f32 %v1732_v7, %v5087_v6  ;;  %v2121_v27 = vsub.f32 1.0, %v2080_v10  ;;  %v1589_v35 = vadd.f32 -1.4531521, %v1548_v49  ;;  %v5178_v16 = vadd.f32 1.0, %v837_v1  ;;  %v6285_v13 = vld [vmem:[#allocation14_spill] sm:$0xff] }
 0x19c   : > { %v1076_v44 = vand.u32 2147483647, %v6264_v57  ;;  %v5187_v36 = vpop.eup %3250  ;;  %v1903_v14 = vsub.f32 0.0, %v5124_v48  ;;  %v1075_v1 = vsel %vm5182_vm15, %v6273_v28, %v1071_v52  ;;  %v817_v55 = vand.u32 2147483647, %v5170_v54 }
 0x19d   : > { %v1814_v2 = vadd.f32 0.2548296, %v1773_v21  ;;  %v2162_v10 = vmul.f32 %v2121_v27, %v6277_v18  ;;  %v1630_v49 = vmul.f32 %v1589_v35, %v5161_v32  ;;  %v5196_v21 = vmul.f32 %v5112_v56, %v1144_v42  ;;  %v2554_v27 = vld [vmem:[%s6040_s5 + $0xd0] sm:$0xff]  ;;  %v2561_v35 = vld [vmem:[%s6040_s5 + $0x108] sm:$0xff]  ;;  %v609_v18 = vpop.f32.mrf.mxu3 }
 0x19e   : > { %v6279_v59 = vand.u32 2147483648, %v6264_v57  ;;  %v2562_v42 = vld [vmem:[%s6040_s5 + $0x110] sm:$0xff]  ;;  %vm1077_vm1 = vcmp.eq.f32.partialorder %v1076_v44, 8.507059e+37  ;;  %2701 = vperm.xlu2 %3115, %v2554_v27   ;;  %2736 = vperm.xlu0 %3113, %v2561_v35   ;;  %3252 = vrcp.f32 %v5178_v16  ;;  %v5224_v56 = vmul.f32 0.5, %v5081_v46 }
 0x19f   : > { %6278 = vst [vmem:[#allocation4_spill] sm:$0xff] %v5196_v21  ;;  %v1855_v12 = vmul.f32 %v1814_v2, %v5087_v6  ;;  %v2203_v28 = vadd.f32 1.0, %v2162_v10  ;;  %v1671_v52 = vadd.f32 1.4214138, %v1630_v49  ;;  %v5212_v6 = vmul.f32 0.70710677, %v5175_v25  ;;  %2741 = vperm.xlu1 %3114, %v2562_v42  }
 0x1a0   : > { %v1079_v30 = vor.u32 1.1754944e-38, %v6279_v59  ;;  %v5216_v59 = vmul.f32 %v5187_v36, %v5120_v58  ;;  %v6280_v57 = vld [vmem:[#allocation12_spill] sm:$0xff]  ;;  %3254 = vpow2.f32 %v2042_v24  ;;  %v6281_v10 = vld [vmem:[#allocation3_spill] sm:$0xff]  ;;  %6282 = vst [vmem:[#allocation10_spill] sm:$0xff] %v5224_v56  ;;  %v5230_v27 = vsel %vm714_vm13, 1.0, %v6084_v43 }
 0x1a1   : > { %v2060_v2 = vmul.f32 %v6280_v57, %v1855_v12  ;;  %v2244_v49 = vmul.f32 %v2203_v28, %v6281_v10  ;;  %v1712_v44 = vmul.f32 %v1671_v52, %v5161_v32  ;;  %6283 = vst [vmem:[#allocation44_spill] sm:$0xff] %v5230_v27  ;;  %v858_v21 = vmul.f32 0.3275911, %v817_v55  ;;  %v549_v27 = vpop.f32.mrf.mxu0 }
 0x1a2   : > { %v5220_v7 = vsel %vm1077_vm1, %v1079_v30, %v1075_v1  ;;  %v1944_v12 = vmul.f32 %v1903_v14, %v5124_v48  ;;  %v5236_v1 = vand.u32 2147483647, %v5212_v6  ;;  %v5239_v46 = vadd.f32 %v4893_v40, %v609_v18 }
 0x1a3   : > { %v2101_v35 = vsub.f32 1.0, %v2060_v2  ;;  %v1528_v30 = vmul.f32 1.0614054, %v5220_v7  ;;  %3066 = vmatmul.msk.f32.gmra.mxu2 %vm2263_vm14, %v2244_v49  ;;  %v1753_v24 = vadd.f32 -0.28449672, %v1712_v44  ;;  %v1459_v42 = vsub.f32 1.0, %v5216_v59 }
 0x1a4   : > { %6284 = vst [vmem:[#allocation18_spill] sm:$0xff] %v5239_v46  ;;  %v1924_v52 = vsub.f32 0.0, %v817_v55  ;;  %v1386_v10 = vadd.f32 %v4599_v3, %v4672_v63  ;;  %vm1388_vm2 = vweird.f32 %v4599_v3  ;;  %v1391_v48 = vand.u32 2147483647, %v6274_v31  ;;  %v5248_v14 = vpop.eup %3252 }
 0x1a5   : > { %v2142_v28 = vmul.f32 %v2101_v35, %v6285_v13  ;;  %v1569_v57 = vadd.f32 -1.4531521, %v1528_v30  ;;  %v1794_v2 = vmul.f32 %v1753_v24, %v5161_v32  ;;  %v5251_v18 = vmul.f32 0.5, %v5147_v60  ;;  %vm5258_vm3 = vmor %vm1387_vm12, %vm1388_vm2 }
 0x1a6   : > { %v5253_v59 = vadd.f32 1.0, %v858_v21  ;;  %v5262_v63 = vpop.eup %3254  ;;  %v838_v24 = vmul.f32 0.3275911, %v5236_v1  ;;  %v5266_v13 = vmul.f32 0.70710677, %v5239_v46  ;;  %v1390_v60 = vsel %vm5258_vm3, %v4599_v3, %v1386_v10  ;;  %v6291_v21 = vld [vmem:[#allocation7_spill] sm:$0xff] }
 0x1a7   : > { %v2183_v49 = vadd.f32 1.0, %v2142_v28  ;;  %6286 = vst [vmem:[#allocation12_spill] sm:$0xff] %v5251_v18  ;;  %v1610_v44 = vmul.f32 %v1569_v57, %v5220_v7  ;;  %v1835_v30 = vadd.f32 0.2548296, %v1794_v2  ;;  %vm1392_vm4 = vcmp.eq.f32.partialorder %v1391_v48, 8.507059e+37 }
 0x1a8   : > { %6289 = vst [vmem:[#allocation3_spill] sm:$0xff] %v5262_v63  ;;  %v6292_v18 = vand.u32 2147483648, %v6274_v31  ;;  %vm1087_vm5 = vweird.f32 %v4609_v53  ;;  %v1158_v2 = vmul.f32 %v5248_v14, %v5178_v16  ;;  %v1965_v63 = vmul.f32 %v1924_v52, %v817_v55 }
 0x1a9   : > { %6290 = vst [vmem:[#allocation14_spill] sm:$0xff] %v5266_v13  ;;  %v2224_v28 = vmul.f32 %v2183_v49, %v6291_v21  ;;  %v1651_v57 = vadd.f32 1.4214138, %v1610_v44  ;;  %v1876_v46 = vmul.f32 %v1835_v30, %v5161_v32  ;;  %v5279_v50 = vadd.f32 %v4893_v40, %v549_v27  ;;  %v6294_v49 = vld [vmem:[#allocation25_spill] sm:$0xff]  ;;  %v6298_v21 = vld [vmem:[#allocation6_spill] sm:$0xff] }
 0x1aa   : > { %v1394_v56 = vor.u32 1.1754944e-38, %v6292_v18  ;;  %v2002_v10 = vmul.f32 1.442695, %v1944_v12  ;;  %vm735_vm6 = vcmp.ge.f32.partialorder %v5170_v54, 0.0  ;;  %v5289_v55 = vand.u32 2147483647, %v5266_v13 }
 0x1ab   : > { %6293 = vst [vmem:[#allocation7_spill] sm:$0xff] %v5279_v50  ;;  %3046 = vmatmul.msk.f32.gmra.mxu1 %vm2263_vm14, %v2224_v28  ;;  %v1692_v31 = vmul.f32 %v1651_v57, %v5220_v7  ;;  %v2081_v18 = vmul.f32 %v6294_v49, %v1876_v46  ;;  %3256 = vrcp.f32 %v5253_v59  ;;  %v5293_v27 = vadd.f32 1.0, %v838_v24  ;;  %v6296_v44 = vld [vmem:[#allocation29_spill] sm:$0xff]  ;;  %v6303_v49 = vld [vmem:[#allocation31_spill] sm:$0xff] }
 0x1ac   : > { %v5284_v48 = vsel %vm1392_vm4, %v1394_v56, %v1390_v60  ;;  %v5296_v52 = vmul.f32 0.70710677, %v5279_v50  ;;  %vm1402_vm7 = vweird.f32 %v6296_v44  ;;  %v5300_v56 = vmul.f32 %v5187_v36, %v1459_v42 }
 0x1ad   : > { %v1549_v32 = vmul.f32 1.0614054, %v5284_v48  ;;  %v1733_v12 = vadd.f32 -0.28449672, %v1692_v31  ;;  %v1159_v54 = vsub.f32 1.0, %v1158_v2  ;;  %v2122_v35 = vsub.f32 1.0, %v2081_v18 }
 0x1ae   : > { %6295 = vst [vmem:[#allocation25_spill] sm:$0xff] %v5296_v52  ;;  %v2044_v46 = vmul.f32 1.442695, %v1965_v63  ;;  %3258 = vpow2.f32 %v2002_v10  ;;  %v5303_v30 = vsel %vm735_vm6, 1.0, %v6084_v43  ;;  %v859_v57 = vmul.f32 0.3275911, %v5289_v55 }
 0x1af   : > { %6297 = vst [vmem:[#allocation29_spill] sm:$0xff] %v5303_v30  ;;  %v1774_v60 = vmul.f32 %v1733_v12, %v5220_v7  ;;  %v1590_v24 = vadd.f32 -1.4531521, %v1549_v32  ;;  %v2163_v28 = vmul.f32 %v2122_v35, %v6298_v21  ;;  %v1086_v31 = vadd.f32 %v4677_v62, %v4779_v0 }
 0x1b0   : > { %vm1088_vm8 = vweird.f32 %v4677_v62  ;;  %3260 = vrcp.f32 %v5293_v27  ;;  %v5314_v2 = vand.u32 2147483647, %v5296_v52  ;;  %v5317_v10 = vmul.f32 %v5248_v14, %v1159_v54 }
 0x1b1   : > { %v1815_v42 = vadd.f32 0.2548296, %v1774_v60  ;;  %v1631_v63 = vmul.f32 %v1590_v24, %v5284_v48  ;;  %3262 = vpow2.f32 %v2044_v46  ;;  %v2204_v18 = vadd.f32 1.0, %v2163_v28  ;;  %v5320_v32 = vpop.eup %3256  ;;  %vm5326_vm9 = vmor %vm1087_vm5, %vm1088_vm8  ;;  %v6301_v24 = vld [vmem:[#allocation8_spill] sm:$0xff] }
 0x1b2   : > { %v1904_v0 = vsub.f32 0.0, %v5236_v1  ;;  %v1091_v54 = vand.u32 2147483647, %v4609_v53  ;;  %vm715_vm10 = vcmp.ge.f32.partialorder %v5212_v6, 0.0  ;;  %v5333_v46 = vadd.f32 1.0, %v859_v57 }
 0x1b3   : > { %v1856_v12 = vmul.f32 %v1815_v42, %v5220_v7  ;;  %v1672_v35 = vadd.f32 1.4214138, %v1631_v63  ;;  %v2245_v21 = vmul.f32 %v2204_v18, %v6301_v24  ;;  %v1090_v28 = vsel %vm5326_vm9, %v4677_v62, %v1086_v31  ;;  %v2564_v7 = vld [vmem:[%s6040_s5 + $0x120] sm:$0xff]  ;;  %v2565_v42 = vld [vmem:[%s6040_s5 + $0x128] sm:$0xff]  ;;  %v612_v62 = vpop.f32.mrf.mxu3 }
 0x1b4   : > { %v5344_v63 = vpop.eup %3258  ;;  %v839_v57 = vmul.f32 0.3275911, %v5314_v2  ;;  %v6304_v3 = vand.u32 2147483648, %v4609_v53  ;;  %2751 = vperm.xlu0 %3113, %v2564_v7   ;;  %2756 = vperm.xlu1 %3114, %v2565_v42   ;;  %v1473_v31 = vmul.f32 %v5320_v32, %v5253_v59  ;;  %v1925_v50 = vsub.f32 0.0, %v5289_v55 }
 0x1b5   : > { %6302 = vst [vmem:[#allocation6_spill] sm:$0xff] %v5344_v63  ;;  %v2061_v18 = vmul.f32 %v6303_v49, %v1856_v12  ;;  %v1713_v24 = vmul.f32 %v1672_v35, %v5284_v48  ;;  %3067 = vmatmul.msk.f32.gmra.mxu2 %vm2263_vm14, %v2245_v21  ;;  %vm1092_vm11 = vcmp.eq.f32.partialorder %v1091_v54, 8.507059e+37  ;;  %v1401_v49 = vadd.f32 %v4708_v4, %v4792_v38  ;;  %v6307_v38 = vld [vmem:[#allocation9_spill] sm:$0xff] }
 0x1b6   : > { %v1094_v60 = vor.u32 1.1754944e-38, %v6304_v3  ;;  %v5357_v12 = vpop.eup %3260  ;;  %v1945_v35 = vmul.f32 %v1904_v0, %v5236_v1  ;;  %3264 = vrcp.f32 %v5333_v46  ;;  %v5367_v52 = vadd.f32 %v4893_v40, %v612_v62 }
 0x1b7   : > { %v2102_v53 = vsub.f32 1.0, %v2061_v18  ;;  %v1754_v3 = vadd.f32 -0.28449672, %v1713_v24  ;;  %v5362_v42 = vpop.eup %3262  ;;  %vm1403_vm12 = vweird.f32 %v4708_v4  ;;  %v5372_v1 = vadd.f32 1.0, %v839_v57 }
 0x1b8   : > { %v5360_v7 = vsel %vm1092_vm11, %v1094_v60, %v1090_v28  ;;  %6305 = vst [vmem:[#allocation8_spill] sm:$0xff] %v5362_v42  ;;  %vm5376_vm13 = vmor %vm1402_vm7, %vm1403_vm12  ;;  %v1406_v28 = vand.u32 2147483647, %v6296_v44  ;;  %v1173_v18 = vmul.f32 %v5357_v12, %v5293_v27  ;;  %v1966_v24 = vmul.f32 %v1925_v50, %v5289_v55 }
 0x1b9   : > { %v1529_v21 = vmul.f32 1.0614054, %v5360_v7  ;;  %6306 = vst [vmem:[#allocation31_spill] sm:$0xff] %v5367_v52  ;;  %v2143_v54 = vmul.f32 %v2102_v53, %v6307_v38  ;;  %v1795_v13 = vmul.f32 %v1754_v3, %v5284_v48  ;;  %v1405_v62 = vsel %vm5376_vm13, %v4708_v4, %v1401_v49 }
 0x1ba   : > { %vm1407_vm15 = vcmp.eq.f32.partialorder %v1406_v28, 8.507059e+37  ;;  %v6310_v3 = vand.u32 2147483648, %v6296_v44  ;;  %vm1102_vm1 = vweird.f32 %v4687_v19  ;;  %v1474_v30 = vsub.f32 1.0, %v1473_v31  ;;  %v6312_v28 = vld [vmem:[#allocation16_spill] sm:$0xff] }
 0x1bb   : > { %v1570_v60 = vadd.f32 -1.4531521, %v1529_v21  ;;  %v2184_v57 = vadd.f32 1.0, %v2143_v54  ;;  %v1836_v53 = vadd.f32 0.2548296, %v1795_v13  ;;  %v1905_v42 = vsub.f32 0.0, %v5314_v2 }
 0x1bc   : > { %v1409_v38 = vor.u32 1.1754944e-38, %v6310_v3  ;;  %v5393_v50 = vmul.f32 0.70710677, %v5367_v52  ;;  %v2004_v55 = vmul.f32 1.442695, %v1945_v35  ;;  %v6311_v21 = vld [vmem:[#allocation24_spill] sm:$0xff]  ;;  %3266 = vrcp.f32 %v5372_v1  ;;  %v5398_v13 = vpop.eup %3264 }
 0x1bd   : > { %v1611_v63 = vmul.f32 %v1570_v60, %v5360_v7  ;;  %v2225_v0 = vmul.f32 %v2184_v57, %v6311_v21  ;;  %v1877_v4 = vmul.f32 %v1836_v53, %v5284_v48  ;;  %v5401_v44 = vmul.f32 0.5, %v5175_v25 }
 0x1be   : > { %v5406_v31 = vsel %vm715_vm10, 1.0, %v6084_v43  ;;  %v5408_v54 = vsel %vm1407_vm15, %v1409_v38, %v1405_v62  ;;  %vm1417_vm2 = vweird.f32 %v4772_v11  ;;  %v1174_v35 = vsub.f32 1.0, %v1173_v18 }
 0x1bf   : > { %v1652_v49 = vadd.f32 1.4214138, %v1611_v63  ;;  %3047 = vmatmul.msk.f32.gmra.mxu1 %vm2263_vm14, %v2225_v0  ;;  %v2046_v48 = vmul.f32 1.442695, %v1966_v24  ;;  %v2082_v60 = vmul.f32 %v6312_v28, %v1877_v4  ;;  %v1550_v57 = vmul.f32 1.0614054, %v5408_v54  ;;  %v552_v0 = vpop.f32.mrf.mxu0 }
 0x1c0   : > { %v5415_v25 = vmul.f32 %v5320_v32, %v1474_v30  ;;  %v1946_v6 = vmul.f32 %v1905_v42, %v5314_v2  ;;  %v819_v63 = vand.u32 2147483647, %v5393_v50  ;;  %3268 = vpow2.f32 %v2004_v55  ;;  %v6313_v4 = vld [vmem:[#allocation33_spill] sm:$0xff] }
 0x1c1   : > { %v1693_v53 = vmul.f32 %v1652_v49, %v5360_v7  ;;  %v2123_v18 = vsub.f32 1.0, %v2082_v60  ;;  %v1591_v3 = vadd.f32 -1.4531521, %v1550_v57  ;;  %v1488_v24 = vmul.f32 %v5398_v13, %v5333_v46 }
 0x1c2   : > { %v1101_v30 = vadd.f32 %v4758_v34, %v4842_v22  ;;  %v5426_v2 = vpop.eup %3266  ;;  %v5429_v42 = vmul.f32 %v5357_v12, %v1174_v35  ;;  %3270 = vpow2.f32 %v2046_v48  ;;  %v2006_v28 = vmul.f32 1.442695, %v1946_v6 }
 0x1c3   : > { %v1734_v21 = vadd.f32 -0.28449672, %v1693_v53  ;;  %v2164_v55 = vmul.f32 %v2123_v18, %v6313_v4  ;;  %v1632_v49 = vmul.f32 %v1591_v3, %v5408_v54  ;;  %v860_v57 = vmul.f32 0.3275911, %v819_v63 }
 0x1c4   : > { %vm1103_vm3 = vweird.f32 %v4758_v34  ;;  %v5436_v22 = vadd.f32 %v4893_v40, %v552_v0  ;;  %v1106_v48 = vand.u32 2147483647, %v4687_v19  ;;  %vm1117_vm5 = vweird.f32 %v4808_v61  ;;  %v6316_v0 = vld [vmem:[#allocation15_spill] sm:$0xff] }
 0x1c5   : > { %v1775_v60 = vmul.f32 %v1734_v21, %v5360_v7  ;;  %v2205_v53 = vadd.f32 1.0, %v2164_v55  ;;  %v1673_v38 = vadd.f32 1.4214138, %v1632_v49  ;;  %vm5440_vm4 = vmor %vm1102_vm1, %vm1103_vm3  ;;  %v1489_v6 = vsub.f32 1.0, %v1488_v24  ;;  %v2567_v24 = vld [vmem:[%s6040_s5 + $0x138] sm:$0xff] }
 0x1c6   : > { %v5448_v18 = vmul.f32 %v5426_v2, %v5372_v1  ;;  %v1105_v40 = vsel %vm5440_vm4, %v4758_v34, %v1101_v30  ;;  %v5453_v21 = vpop.eup %3268  ;;  %v1926_v55 = vsub.f32 0.0, %v819_v63  ;;  %v6317_v62 = vand.u32 2147483648, %v4687_v19  ;;  %2766 = vperm.xlu0 %3113, %v2567_v24  }
 0x1c7   : > { %v1816_v3 = vadd.f32 0.2548296, %v1775_v60  ;;  %v2246_v4 = vmul.f32 %v2205_v53, %v6316_v0  ;;  %v1714_v49 = vmul.f32 %v1673_v38, %v5408_v54  ;;  %v2568_v60 = vld [vmem:[%s6040_s5 + $0x140] sm:$0xf]  ;;  %v5466_v30 = vadd.f32 1.0, %v860_v57 }
 0x1c8   : > { %v1109_v52 = vor.u32 1.1754944e-38, %v6317_v62  ;;  %vm1107_vm6 = vcmp.eq.f32.partialorder %v1106_v48, 8.507059e+37  ;;  %2771 = vperm.xlu1 %3114, %v2568_v60   ;;  %v1416_v38 = vadd.f32 %v4833_v47, %v4917_v5  ;;  %v5470_v19 = vpop.eup %3270  ;;  %v5474_v53 = vmul.f32 0.70710677, %v5436_v22  ;;  %v6318_v5 = vld [vmem:[#allocation26_spill] sm:$0xff] }
 0x1c9   : > { %v1857_v34 = vmul.f32 %v1816_v3, %v5360_v7  ;;  %3068 = vmatmul.msk.f32.gmra.mxu2 %vm2263_vm14, %v2246_v4  ;;  %v1755_v62 = vadd.f32 -0.28449672, %v1714_v49  ;;  %vm1418_vm7 = vweird.f32 %v4833_v47  ;;  %vm1432_vm8 = vweird.f32 %v4867_v15 }
 0x1ca   : > { %v5476_v35 = vsel %vm1107_vm6, %v1109_v52, %v1105_v40  ;;  %v5481_v7 = vmul.f32 %v5398_v13, %v1489_v6  ;;  %3272 = vpow2.f32 %v2006_v28  ;;  %vm5487_vm9 = vmor %vm1417_vm2, %vm1418_vm7  ;;  %v5492_v40 = vmul.f32 %v1926_v55, %v819_v63 }
 0x1cb   : > { %v2062_v48 = vmul.f32 %v6318_v5, %v1857_v34  ;;  %v1796_v0 = vmul.f32 %v1755_v62, %v5408_v54  ;;  %v1530_v6 = vmul.f32 1.0614054, %v5476_v35  ;;  %v1420_v28 = vsel %vm5487_vm9, %v4833_v47, %v1416_v38  ;;  %v6322_v62 = vld [vmem:[#allocation21_spill] sm:$0xff] }
 0x1cc   : > { %v1421_v49 = vand.u32 2147483647, %v4772_v11  ;;  %v6321_v24 = vand.u32 2147483648, %v4772_v11  ;;  %3274 = vrcp.f32 %v5466_v30  ;;  %v5504_v63 = vand.u32 2147483647, %v5474_v53 }
 0x1cd   : > { %v2103_v4 = vsub.f32 1.0, %v2062_v48  ;;  %v1837_v34 = vadd.f32 0.2548296, %v1796_v0  ;;  %v1571_v55 = vadd.f32 -1.4531521, %v1530_v6  ;;  %v1116_v48 = vadd.f32 %v4882_v51, %v4987_v26  ;;  %v2557_v26 = vld [vmem:[%s6040_s5 + $0xe8] sm:$0xff] }
 0x1ce   : > { %v1424_v60 = vor.u32 1.1754944e-38, %v6321_v24  ;;  %vm1422_vm10 = vcmp.eq.f32.partialorder %v1421_v49, 8.507059e+37  ;;  %vm1118_vm11 = vweird.f32 %v4882_v51  ;;  %v1121_v0 = vand.u32 2147483647, %v4808_v61  ;;  %2716 = vperm.xlu2 %3115, %v2557_v26  }
 0x1cf   : > { %v2144_v5 = vmul.f32 %v2103_v4, %v6322_v62  ;;  %v1878_v47 = vmul.f32 %v1837_v34, %v5408_v54  ;;  %v1612_v11 = vmul.f32 %v1571_v55, %v5476_v35  ;;  %vm5516_vm12 = vmor %vm1117_vm5, %vm1118_vm11  ;;  %vm1132_vm13 = vweird.f32 %v4940_v29  ;;  %v6326_v62 = vld [vmem:[#allocation20_spill] sm:$0xff] }
 0x1d0   : > { %v5512_v38 = vsel %vm1422_vm10, %v1424_v60, %v1420_v28  ;;  %v5524_v6 = vpop.eup %3272  ;;  %v1120_v28 = vsel %vm5516_vm12, %v4882_v51, %v1116_v48  ;;  %v6325_v49 = vand.u32 2147483648, %v4808_v61  ;;  %v840_v34 = vmul.f32 0.3275911, %v5504_v63 }
 0x1d1   : > { %v2185_v54 = vadd.f32 1.0, %v2144_v5  ;;  %v1551_v4 = vmul.f32 1.0614054, %v5512_v38  ;;  %v2083_v60 = vmul.f32 %v4762_v8, %v1878_v47  ;;  %v1653_v55 = vadd.f32 1.4214138, %v1612_v11 }
 0x1d2   : > { %v1124_v24 = vor.u32 1.1754944e-38, %v6325_v49  ;;  %vm1122_vm15 = vcmp.eq.f32.partialorder %v1121_v0, 8.507059e+37  ;;  %vm1447_vm1 = vweird.f32 %v4999_v9  ;;  %v1431_v51 = vadd.f32 %v4937_v41, %v5012_v20  ;;  %v5541_v48 = vpop.eup %3274 }
 0x1d3   : > { %v2226_v5 = vmul.f32 %v2185_v54, %v6326_v62  ;;  %v1592_v57 = vadd.f32 -1.4531521, %v1551_v4  ;;  %v1513_v61 = vand.u32 2147483648, %v5466_v30  ;;  %v2124_v3 = vsub.f32 1.0, %v2083_v60  ;;  %v6328_v54 = vld [vmem:[#allocation34_spill] sm:$0xff] }
 0x1d4   : > { %v5537_v52 = vsel %vm1122_vm15, %v1124_v24, %v1120_v28  ;;  %v1694_v8 = vmul.f32 %v1653_v55, %v5476_v35  ;;  %vm1433_vm2 = vweird.f32 %v4937_v41  ;;  %v1436_v0 = vand.u32 2147483647, %v4867_v15 }
 0x1d5   : > { %v1531_v47 = vmul.f32 1.0614054, %v5537_v52  ;;  %3048 = vmatmul.msk.f32.gmra.mxu1 %vm2263_vm14, %v2226_v5  ;;  %v1633_v11 = vmul.f32 %v1592_v57, %v5512_v38  ;;  %v6327_v26 = vand.u32 2147483648, %v4867_v15  ;;  %v2165_v4 = vmul.f32 %v2124_v3, %v6328_v54  ;;  %vm1434_vm3 = vmor %vm1432_vm8, %vm1433_vm2 }
 0x1d6   : > { %v5553_v28 = vadd.f32 1.0, %v840_v34  ;;  %v1735_v49 = vadd.f32 -0.28449672, %v1694_v8  ;;  %v1435_v55 = vsel %vm1434_vm3, %v4937_v41, %v1431_v51  ;;  %vm1437_vm4 = vcmp.eq.f32.partialorder %v1436_v0, 8.507059e+37  ;;  %v2560_v41 = vld [vmem:[%s6040_s5 + $0x100] sm:$0xff] }
 0x1d7   : > { %v1439_v20 = vor.u32 1.1754944e-38, %v6327_v26  ;;  %v1572_v24 = vadd.f32 -1.4531521, %v1531_v47  ;;  %v1674_v60 = vadd.f32 1.4214138, %v1633_v11  ;;  %v1131_v57 = vadd.f32 %v5009_v23, %v5093_v39  ;;  %v6329_v39 = vld [vmem:[#allocation17_spill] sm:$0xff]  ;;  %2731 = vperm.xlu2 %3115, %v2560_v41   ;;  %v2572_v41 = vpop.permute.xlu0 %2571 }
 0x1d8   : > { %v2206_v62 = vadd.f32 1.0, %v2165_v4  ;;  %v1776_v5 = vmul.f32 %v1735_v49, %v5476_v35  ;;  %vm1133_vm5 = vweird.f32 %v5009_v23  ;;  %v1136_v15 = vand.u32 2147483647, %v4940_v29 }
 0x1d9   : > { %v1613_v26 = vmul.f32 %v1572_v24, %v5537_v52  ;;  %v5562_v3 = vsel %vm1437_vm4, %v1439_v20, %v1435_v55  ;;  %v1715_v34 = vmul.f32 %v1674_v60, %v5512_v38  ;;  %vm1134_vm6 = vmor %vm1132_vm13, %vm1133_vm5  ;;  %v6330_v0 = vand.u32 2147483648, %v4940_v29  ;;  %v2404_v24 = vpop.f32.mrf.mxu1  ;;  %v5586_v29 = vld [vmem:[%s6039_s4] ss:$0 sm:$0xff] }
 0x1da   : > { %v1552_v8 = vmul.f32 1.0614054, %v5562_v3  ;;  %v2247_v51 = vmul.f32 %v2206_v62, %v6329_v39  ;;  %v1817_v47 = vadd.f32 0.2548296, %v1776_v5  ;;  %v1135_v49 = vsel %vm1134_vm6, %v5009_v23, %v1131_v57 }
 0x1db   : > { %v1654_v11 = vadd.f32 1.4214138, %v1613_v26  ;;  %v1139_v20 = vor.u32 1.1754944e-38, %v6330_v0  ;;  %v1756_v54 = vadd.f32 -0.28449672, %v1715_v34  ;;  %vm1137_vm7 = vcmp.eq.f32.partialorder %v1136_v15, 8.507059e+37 }
 0x1dc   : > { %v1593_v4 = vadd.f32 -1.4531521, %v1552_v8  ;;  %vm1147_vm8 = vweird.f32 %v5048_v37  ;;  %3069 = vmatmul.msk.f32.gmra.mxu2 %vm2263_vm14, %v2247_v51  ;;  %v1858_v60 = vmul.f32 %v1817_v47, %v5476_v35  ;;  %v1446_v23 = vadd.f32 %v5064_v33, %v5152_v45 }
 0x1dd   : > { %v1695_v55 = vmul.f32 %v1654_v11, %v5537_v52  ;;  %v5581_v62 = vsel %vm1137_vm7, %v1139_v20, %v1135_v49  ;;  %v1797_v57 = vmul.f32 %v1756_v54, %v5512_v38  ;;  %vm1448_vm9 = vweird.f32 %v5064_v33 }
 0x1de   : > { %v1634_v5 = vmul.f32 %v1593_v4, %v5562_v3  ;;  %v1532_v26 = vmul.f32 1.0614054, %v5581_v62  ;;  %v2063_v35 = vmul.f32 %v4824_v17, %v1858_v60  ;;  %v2405_v8 = vadd.f32 %v5586_v29, %v2404_v24  ;;  %vm5598_vm10 = vmor %vm1447_vm1, %vm1448_vm9 }
 0x1df   : > { %v1736_v34 = vadd.f32 -0.28449672, %v1695_v55  ;;  %v1451_v45 = vand.u32 2147483647, %v4999_v9  ;;  %v1838_v39 = vadd.f32 0.2548296, %v1797_v57  ;;  %v1450_v11 = vsel %vm5598_vm10, %v5064_v33, %v1446_v23 }
 0x1e0   : > { %v1675_v51 = vadd.f32 1.4214138, %v1634_v5  ;;  %v1573_v47 = vadd.f32 -1.4531521, %v1532_v26  ;;  %vm1462_vm11 = vweird.f32 %v5120_v58  ;;  %v2104_v17 = vsub.f32 1.0, %v2063_v35  ;;  %v6334_v55 = vld [vmem:[#allocation37_spill] sm:$0xff] }
 0x1e1   : > { %v1777_v0 = vmul.f32 %v1736_v34, %v5537_v52  ;;  %v2774_v20 = vmul.f32 %v2572_v41, %v2405_v8  ;;  %vm1452_vm12 = vcmp.eq.f32.partialorder %v1451_v45, 8.507059e+37  ;;  %v1879_v54 = vmul.f32 %v1838_v39, %v5512_v38  ;;  %v6335_v23 = vld [vmem:[#allocation4_spill] sm:$0xff]  ;;  %v6336_v26 = vld [vmem:[#allocation47_spill] sm:$0xff]  ;;  %v6337_v34 = vld [vmem:[#allocation30_spill] sm:$0xff] }
 0x1e2   : > { %v1716_v4 = vmul.f32 %v1675_v51, %v5562_v3  ;;  %v1614_v49 = vmul.f32 %v1573_v47, %v5581_v62  ;;  %v6333_v24 = vand.u32 2147483648, %v4999_v9  ;;  %v2145_v57 = vmul.f32 %v2104_v17, %v6334_v55 }
 0x1e3   : > { %v1818_v5 = vadd.f32 0.2548296, %v1777_v0  ;;  %v5615_v33 = vsel %vm351_vm0, %v2774_v20, 0.0  ;;  %v1146_v35 = vadd.f32 %v6336_v26, %v6335_v23  ;;  %v2084_v8 = vmul.f32 %v6337_v34, %v1879_v54  ;;  %v6340_v20 = vld [vmem:[#allocation22_spill] sm:$0xff] }
 0x1e4   : > { %v1454_v60 = vor.u32 1.1754944e-38, %v6333_v24  ;;  %v1757_v15 = vadd.f32 -0.28449672, %v1716_v4  ;;  %v1655_v38 = vadd.f32 1.4214138, %v1614_v49  ;;  %v2186_v41 = vadd.f32 1.0, %v2145_v57 }
 0x1e5   : > { %v1859_v39 = vmul.f32 %v1818_v5, %v5537_v52  ;;  %vm1148_vm13 = vweird.f32 %v6336_v26  ;;  %v2125_v51 = vsub.f32 1.0, %v2084_v8  ;;  %v6341_v52 = vld [vmem:[#allocation39_spill] sm:$0xff]  ;;  %v2563_v34 = vld [vmem:[%s6040_s5 + $0x118] sm:$0xff]  ;;  %vm1162_vm2 = vweird.f32 %v5178_v16 }
 0x1e6   : > { %v5620_v45 = vsel %vm1452_vm12, %v1454_v60, %v1450_v11  ;;  %v1798_v47 = vmul.f32 %v1757_v15, %v5562_v3  ;;  %v1696_v17 = vmul.f32 %v1655_v38, %v5581_v62  ;;  %vm5629_vm15 = vmor %vm1147_vm8, %vm1148_vm13  ;;  %v1151_v11 = vand.u32 2147483647, %v5048_v37  ;;  %v6342_v60 = vld [vmem:[#allocation23_spill] sm:$0xff]  ;;  %2746 = vperm.xlu2 %3115, %v2563_v34   ;;  %v2407_v38 = vpop.f32.mrf.mxu1 }
 0x1e7   : > { %v1553_v9 = vmul.f32 1.0614054, %v5620_v45  ;;  %v2227_v54 = vmul.f32 %v2186_v41, %v6340_v20  ;;  %v2064_v4 = vmul.f32 %v6341_v52, %v1859_v39  ;;  %v1150_v24 = vsel %vm5629_vm15, %v6336_v26, %v1146_v35 }
 0x1e8   : > { %v2166_v55 = vmul.f32 %v2125_v51, %v6342_v60  ;;  %v1839_v57 = vadd.f32 0.2548296, %v1798_v47  ;;  %v1737_v5 = vadd.f32 -0.28449672, %v1696_v17  ;;  %vm5640_vm1 = vcmp.eq.f32.partialorder %v1151_v11, 8.507059e+37  ;;  %v6346_v17 = vld [vmem:[#allocation28_spill] sm:$0xff] }
 0x1e9   : > { %v1594_v49 = vadd.f32 -1.4531521, %v1553_v9  ;;  %3049 = vmatmul.msk.f32.gmra.mxu1 %vm2263_vm14, %v2227_v54  ;;  %v2105_v8 = vsub.f32 1.0, %v2064_v4  ;;  %v6345_v26 = vand.u32 2147483648, %v5048_v37  ;;  %v1461_v41 = vadd.f32 %v5187_v36, %v5300_v56  ;;  %v2577_v37 = vpop.permute.xlu0 %2576  ;;  %v6347_v54 = vld [vmem:[#allocation27_spill] sm:$0xff]  ;;  %v6348_v56 = vld [vmem:[#allocation41_spill] sm:$0xff] }
 0x1ea   : > { %v2207_v39 = vadd.f32 1.0, %v2166_v55  ;;  %v1880_v9 = vmul.f32 %v1839_v57, %v5562_v3  ;;  %v1778_v51 = vmul.f32 %v1737_v5, %v5581_v62  ;;  %v2408_v47 = vadd.f32 %v5586_v29, %v2407_v38  ;;  %v6357_v60 = vld [vmem:[#allocation35_spill] sm:$0xff] }
 0x1eb   : > { %v1635_v15 = vmul.f32 %v1594_v49, %v5620_v45  ;;  %v1154_v35 = vor.u32 1.1754944e-38, %v6345_v26  ;;  %v2146_v0 = vmul.f32 %v2105_v8, %v6346_v17  ;;  %vm1463_vm3 = vweird.f32 %v5187_v36  ;;  %v6351_v26 = vld [vmem:[#allocation38_spill] sm:$0xff] }
 0x1ec   : > { %v2248_v52 = vmul.f32 %v2207_v39, %v6347_v54  ;;  %v2085_v4 = vmul.f32 %v6348_v56, %v1880_v9  ;;  %v1819_v49 = vadd.f32 0.2548296, %v1778_v51  ;;  %vm5668_vm4 = vmor %vm1462_vm11, %vm1463_vm3  ;;  %v2775_v57 = vmul.f32 %v2577_v37, %v2408_v47  ;;  %v6353_v47 = vld [vmem:[#allocation32_spill] sm:$0xff] }
 0x1ed   : > { %v1676_v11 = vadd.f32 1.4214138, %v1635_v15  ;;  %v5660_v20 = vsel %vm5640_vm1, %v1154_v35, %v1150_v24  ;;  %v2187_v55 = vadd.f32 1.0, %v2146_v0  ;;  %v1465_v5 = vsel %vm5668_vm4, %v5187_v36, %v1461_v41  ;;  %v6354_v41 = vld [vmem:[#allocation43_spill] sm:$0xff] }
 0x1ee   : > { %v1533_v3 = vmul.f32 1.0614054, %v5660_v20  ;;  %3070 = vmatmul.msk.f32.gmra.mxu2 %vm2263_vm14, %v2248_v52  ;;  %v2126_v23 = vsub.f32 1.0, %v2085_v4  ;;  %v1860_v34 = vmul.f32 %v1819_v49, %v5581_v62  ;;  %v1466_v15 = vand.u32 2147483647, %v5120_v58 }
 0x1ef   : > { %v1717_v24 = vmul.f32 %v1676_v11, %v5620_v45  ;;  %v2228_v35 = vmul.f32 %v2187_v55, %v6351_v26  ;;  %v2816_v39 = vsel %vm351_vm0, %v2775_v57, 0.0  ;;  %v6352_v9 = vand.u32 2147483648, %v5120_v58 }
 0x1f0   : > { %v1574_v8 = vadd.f32 -1.4531521, %v1533_v3  ;;  %vm1477_vm5 = vweird.f32 %v5253_v59  ;;  %v2167_v36 = vmul.f32 %v2126_v23, %v6353_v47  ;;  %v2065_v17 = vmul.f32 %v6354_v41, %v1860_v34  ;;  %v6360_v47 = vld [vmem:[#allocation19_spill] sm:$0xff] }
 0x1f1   : > { %v1758_v38 = vadd.f32 -0.28449672, %v1717_v24  ;;  %v1469_v51 = vor.u32 1.1754944e-38, %v6352_v9  ;;  %v2817_v62 = vadd.f32 %v2816_v39, %v5615_v33  ;;  %3050 = vmatmul.msk.f32.gmra.mxu1 %vm2263_vm14, %v2228_v35  ;;  %vm1467_vm6 = vcmp.eq.f32.partialorder %v1466_v15, 8.507059e+37  ;;  %v6358_v24 = vld [vmem:[#allocation5_spill] sm:$0xff]  ;;  %v2410_v35 = vpop.f32.mrf.mxu1 }
 0x1f2   : > { %v1615_v0 = vmul.f32 %v1574_v8, %v5660_v20  ;;  %v1161_v37 = vadd.f32 %v5248_v14, %v5317_v10  ;;  %vm1163_vm7 = vweird.f32 %v5248_v14  ;;  %v2208_v58 = vadd.f32 1.0, %v2167_v36  ;;  %v2566_v8 = vld [vmem:[%s6040_s5 + $0x130] sm:$0xff] }
 0x1f3   : > { %v1799_v11 = vmul.f32 %v1758_v38, %v5620_v45  ;;  %v2106_v54 = vsub.f32 1.0, %v2065_v17  ;;  %v5693_v56 = vsel %vm1467_vm6, %v1469_v51, %v1465_v5  ;;  %vm5697_vm8 = vmor %vm1162_vm2, %vm1163_vm7  ;;  %v1166_v3 = vand.u32 2147483647, %v5178_v16  ;;  %2761 = vperm.xlu2 %3115, %v2566_v8   ;;  %v2582_v51 = vpop.permute.xlu1 %2581  ;;  %v6361_v17 = vld [vmem:[#allocation36_spill] sm:$0xff] }
 0x1f4   : > { %v1656_v52 = vadd.f32 1.4214138, %v1615_v0  ;;  %v1554_v49 = vmul.f32 1.0614054, %v5693_v56  ;;  %v1165_v10 = vsel %vm5697_vm8, %v5248_v14, %v1161_v37  ;;  %v2249_v55 = vmul.f32 %v2208_v58, %v6357_v60  ;;  %v6362_v60 = vld [vmem:[#allocation45_spill] sm:$0xff] }
 0x1f5   : > { %v1840_v33 = vadd.f32 0.2548296, %v1799_v11  ;;  %v2147_v57 = vmul.f32 %v2106_v54, %v6358_v24  ;;  %v6359_v23 = vand.u32 2147483648, %v5178_v16  ;;  %v5716_v15 = vmul.f32 %v5541_v48, %v5466_v30 }
 0x1f6   : > { %v1697_v5 = vmul.f32 %v1656_v52, %v5660_v20  ;;  %v1595_v26 = vadd.f32 -1.4531521, %v1554_v49  ;;  %vm1167_vm9 = vcmp.eq.f32.partialorder %v1166_v3, 8.507059e+37  ;;  %vm1177_vm10 = vweird.f32 %v5293_v27  ;;  %3071 = vmatmul.msk.f32.gmra.mxu2 %vm2263_vm14, %v2249_v55 }
 0x1f7   : > { %v1169_v34 = vor.u32 1.1754944e-38, %v6359_v23  ;;  %v1881_v14 = vmul.f32 %v1840_v33, %v5620_v45  ;;  %v2188_v16 = vadd.f32 1.0, %v2147_v57  ;;  %v2411_v9 = vadd.f32 %v5586_v29, %v2410_v35 }
 0x1f8   : > { %v1738_v38 = vadd.f32 -0.28449672, %v1697_v5  ;;  %3276 = vrcp.f32 %v5553_v28  ;;  %v1636_v45 = vmul.f32 %v1595_v26, %v5693_v56  ;;  %v1476_v58 = vadd.f32 %v5320_v32, %v5415_v25 }
 0x1f9   : > { %v5721_v39 = vsel %vm1167_vm9, %v1169_v34, %v1165_v10  ;;  %v2086_v36 = vmul.f32 %v6360_v47, %v1881_v14  ;;  %v2229_v0 = vmul.f32 %v2188_v16, %v6361_v17  ;;  %v2776_v37 = vmul.f32 %v2582_v51, %v2411_v9 }
 0x1fa   : > { %v1534_v41 = vmul.f32 1.0614054, %v5721_v39  ;;  %v1779_v11 = vmul.f32 %v1738_v38, %v5660_v20  ;;  %v1504_v54 = vsub.f32 1.0, %v5716_v15  ;;  %v1677_v4 = vadd.f32 1.4214138, %v1636_v45 }
 0x1fb   : > { %v2127_v52 = vsub.f32 1.0, %v2086_v36  ;;  %vm1492_vm11 = vweird.f32 %v5333_v46  ;;  %3051 = vmatmul.msk.f32.gmra.mxu1 %vm2263_vm14, %v2229_v0  ;;  %v2818_v10 = vsel %vm351_vm0, %v2776_v37, 0.0  ;;  %vm1478_vm12 = vweird.f32 %v5320_v32  ;;  %v2413_v0 = vpop.f32.mrf.mxu1 }
 0x1fc   : > { %v1575_v33 = vadd.f32 -1.4531521, %v1534_v41  ;;  %v1820_v49 = vadd.f32 0.2548296, %v1779_v11  ;;  %v1481_v3 = vand.u32 2147483647, %v5253_v59  ;;  %v1718_v25 = vmul.f32 %v1677_v4, %v5693_v56  ;;  %vm1479_vm13 = vmor %vm1477_vm5, %vm1478_vm12 }
 0x1fd   : > { %v2168_v55 = vmul.f32 %v2127_v52, %v6362_v60  ;;  %v2819_v57 = vadd.f32 %v2818_v10, %v2817_v62  ;;  %v1480_v23 = vsel %vm1479_vm13, %v5320_v32, %v1476_v58  ;;  %v6363_v34 = vand.u32 2147483648, %v5253_v59  ;;  %v6364_v62 = vld [vmem:[#allocation13_spill] sm:$0xff] }
 0x1fe   : > { %v1616_v24 = vmul.f32 %v1575_v33, %v5721_v39  ;;  %v1861_v5 = vmul.f32 %v1820_v49, %v5660_v20  ;;  %vm1482_vm15 = vcmp.eq.f32.partialorder %v1481_v3, 8.507059e+37  ;;  %v5747_v15 = vpop.eup %3276  ;;  %v1759_v26 = vadd.f32 -0.28449672, %v1718_v25  ;;  %v6365_v20 = vld [vmem:[#allocation40_spill] sm:$0xff]  ;;  %v6368_v33 = vld [vmem:[#allocation46_spill] sm:$0xff]  ;;  %v2587_v3 = vpop.permute.xlu1 %2586 }
 0x1ff   : > { %v1484_v8 = vor.u32 1.1754944e-38, %v6363_v34  ;;  %v2209_v14 = vadd.f32 1.0, %v2168_v55  ;;  %v1176_v16 = vadd.f32 %v5357_v12, %v5429_v42  ;;  %vm1178_vm1 = vweird.f32 %v5357_v12  ;;  %v6369_v34 = vld [vmem:[#allocation3_spill] sm:$0xff] }
 0x200   : > { %v1657_v35 = vadd.f32 1.4214138, %v1616_v24  ;;  %v2066_v38 = vmul.f32 %v6364_v62, %v1861_v5  ;;  %v1181_v32 = vand.u32 2147483647, %v5293_v27  ;;  %v1800_v59 = vmul.f32 %v1759_v26, %v5693_v56  ;;  %vm1179_vm2 = vmor %vm1177_vm10, %vm1178_vm1 }
 0x201   : > { %v5752_v9 = vsel %vm1482_vm15, %v1484_v8, %v1480_v23  ;;  %v2250_v51 = vmul.f32 %v2209_v14, %v6365_v20  ;;  %v1180_v45 = vsel %vm1179_vm2, %v5357_v12, %v1176_v16  ;;  %v6366_v41 = vand.u32 2147483648, %v5293_v27  ;;  %v6372_v16 = vld [vmem:[#allocation42_spill] sm:$0xff] }
 0x202   : > { %v1698_v47 = vmul.f32 %v1657_v35, %v5721_v39  ;;  %v1555_v36 = vmul.f32 1.0614054, %v5752_v9  ;;  %v2107_v42 = vsub.f32 1.0, %v2066_v38  ;;  %vm1182_vm3 = vcmp.eq.f32.partialorder %v1181_v32, 8.507059e+37 }
 0x203   : > { %v1184_v17 = vor.u32 1.1754944e-38, %v6366_v41  ;;  %v6367_v11 = vsub.f32 1.0, %v5448_v18  ;;  %3072 = vmatmul.msk.f32.gmra.mxu2 %vm2263_vm14, %v2250_v51  ;;  %v1841_v58 = vadd.f32 0.2548296, %v1800_v59  ;;  %vm1192_vm4 = vweird.f32 %v5372_v1 }
 0x204   : > { %v1739_v52 = vadd.f32 -0.28449672, %v1698_v47  ;;  %v1596_v4 = vadd.f32 -1.4531521, %v1555_v36  ;;  %v2148_v49 = vmul.f32 %v2107_v42, %v6368_v33  ;;  %v2414_v12 = vadd.f32 %v5586_v29, %v2413_v0  ;;  %v6375_v0 = vld [vmem:[#allocation6_spill] sm:$0xff] }
 0x205   : > { %v1190_v37 = vmul.f32 %v5426_v2, %v6367_v11  ;;  %v5771_v10 = vsel %vm1182_vm3, %v1184_v17, %v1180_v45  ;;  %v1491_v27 = vadd.f32 %v5398_v13, %v5481_v7  ;;  %v1882_v18 = vmul.f32 %v1841_v58, %v5693_v56 }
 0x206   : > { %v1780_v60 = vmul.f32 %v1739_v52, %v5721_v39  ;;  %v1637_v55 = vmul.f32 %v1596_v4, %v5752_v9  ;;  %v1535_v25 = vmul.f32 1.0614054, %v5771_v10  ;;  %v1505_v24 = vmul.f32 %v5541_v48, %v1504_v54 }
 0x207   : > { %v2189_v5 = vadd.f32 1.0, %v2148_v49  ;;  %v2777_v23 = vmul.f32 %v2587_v3, %v2414_v12  ;;  %vm1493_vm5 = vweird.f32 %v5398_v13  ;;  %v2087_v8 = vmul.f32 %v6369_v34, %v1882_v18  ;;  %v2416_v18 = vpop.f32.mrf.mxu1 }
 0x208   : > { %v1821_v14 = vadd.f32 0.2548296, %v1780_v60  ;;  %v1678_v26 = vadd.f32 1.4214138, %v1637_v55  ;;  %v1576_v7 = vadd.f32 -1.4531521, %v1535_v25  ;;  %vm5785_vm6 = vmor %vm1492_vm11, %vm1493_vm5  ;;  %v1203_v35 = vmul.f32 %v5747_v15, %v5553_v28 }
 0x209   : > { %v2230_v54 = vmul.f32 %v2189_v5, %v6372_v16  ;;  %v2820_v62 = vsel %vm351_vm0, %v2777_v23, 0.0  ;;  %v1495_v38 = vsel %vm5785_vm6, %v5398_v13, %v1491_v27  ;;  %v2128_v32 = vsub.f32 1.0, %v2087_v8  ;;  %v6374_v13 = vld [vmem:[#allocation48_spill] sm:$0xff]  ;;  %v6377_v60 = vld [vmem:[#allocation11_spill] sm:$0xff] }
 0x20a   : > { %v1862_v20 = vmul.f32 %v1821_v14, %v5721_v39  ;;  %v1719_v51 = vmul.f32 %v1678_v26, %v5752_v9  ;;  %v1617_v59 = vmul.f32 %v1576_v7, %v5771_v10  ;;  %vm1507_vm7 = vweird.f32 %v5466_v30  ;;  %v6378_v25 = vld [vmem:[#allocation44_spill] sm:$0xff]  ;;  %v2592_v7 = vpop.permute.xlu2 %2591 }
 0x20b   : > { %3052 = vmatmul.msk.f32.gmra.mxu1 %vm2263_vm14, %v2230_v54  ;;  %v2821_v47 = vadd.f32 %v2820_v62, %v2819_v57  ;;  %v1496_v36 = vand.u32 2147483647, %v5333_v46  ;;  %v6373_v42 = vand.u32 2147483648, %v5333_v46  ;;  %v1191_v41 = vadd.f32 %v5426_v2, %v1190_v37 }
 0x20c   : > { %v2169_v17 = vmul.f32 %v2128_v32, %v6374_v13  ;;  %v2067_v39 = vmul.f32 %v6375_v0, %v1862_v20  ;;  %v1760_v11 = vadd.f32 -0.28449672, %v1719_v51  ;;  %v1658_v58 = vadd.f32 1.4214138, %v1617_v59  ;;  %v6379_v20 = vld [vmem:[#allocation10_spill] sm:$0xff]  ;;  %v6380_v59 = vld [vmem:[#allocation8_spill] sm:$0xff] }
 0x20d   : > { %v1499_v45 = vor.u32 1.1754944e-38, %v6373_v42  ;;  %v1204_v52 = vsub.f32 1.0, %v1203_v35  ;;  %vm1497_vm8 = vcmp.eq.f32.partialorder %v1496_v36, 8.507059e+37  ;;  %vm1193_vm9 = vweird.f32 %v5426_v2 }
 0x20e   : > { %v1196_v4 = vand.u32 2147483647, %v5372_v1  ;;  %v2210_v57 = vadd.f32 1.0, %v2169_v17  ;;  %v2108_v33 = vsub.f32 1.0, %v2067_v39  ;;  %v1801_v49 = vmul.f32 %v1760_v11, %v5752_v9  ;;  %vm1194_vm10 = vmor %vm1192_vm4, %vm1193_vm9 }
 0x20f   : > { %v1699_v46 = vmul.f32 %v1658_v58, %v5771_v10  ;;  %v5813_v37 = vsel %vm1497_vm8, %v1499_v45, %v1495_v38  ;;  %v1195_v12 = vsel %vm1194_vm10, %v5426_v2, %v1191_v41  ;;  %v6376_v27 = vand.u32 2147483648, %v5372_v1 }
 0x210   : > { %vm1197_vm11 = vcmp.eq.f32.partialorder %v1196_v4, 8.507059e+37  ;;  %v2251_v55 = vmul.f32 %v2210_v57, %v6377_v60  ;;  %v2149_v5 = vmul.f32 %v2108_v33, %v6378_v25  ;;  %v1842_v23 = vadd.f32 0.2548296, %v1801_v49  ;;  %v6381_v4 = vld [vmem:[#allocation29_spill] sm:$0xff]  ;;  %v6382_v25 = vld [vmem:[#allocation12_spill] sm:$0xff] }
 0x211   : > { %v1199_v3 = vor.u32 1.1754944e-38, %v6376_v27  ;;  %v1740_v34 = vadd.f32 -0.28449672, %v1699_v46  ;;  %vm1207_vm12 = vweird.f32 %v5553_v28  ;;  %v1213_v8 = vand.u32 2147483648, %v5553_v28 }
 0x212   : > { %v1556_v14 = vmul.f32 1.0614054, %v5813_v37  ;;  %v2417_v2 = vadd.f32 %v5586_v29, %v2416_v18  ;;  %3073 = vmatmul.msk.f32.gmra.mxu2 %vm2263_vm14, %v2251_v55  ;;  %v2190_v1 = vadd.f32 1.0, %v2149_v5  ;;  %v1883_v56 = vmul.f32 %v1842_v23, %v5752_v9  ;;  %v2419_v55 = vpop.f32.mrf.mxu1 }
 0x213   : > { %v5823_v26 = vsel %vm1197_vm11, %v1199_v3, %v1195_v12  ;;  %v1781_v35 = vmul.f32 %v1740_v34, %v5771_v10  ;;  %v1205_v54 = vmul.f32 %v5747_v15, %v1204_v52  ;;  %v1506_v32 = vadd.f32 %v5541_v48, %v1505_v24 }
 0x214   : > { %v1536_v16 = vmul.f32 1.0614054, %v5823_v26  ;;  %v1597_v62 = vadd.f32 -1.4531521, %v1556_v14  ;;  %v2778_v38 = vmul.f32 %v2592_v7, %v2417_v2  ;;  %v2231_v51 = vmul.f32 %v2190_v1, %v6379_v20 }
 0x215   : > { %v2088_v36 = vmul.f32 %v6380_v59, %v1883_v56  ;;  %v1822_v42 = vadd.f32 0.2548296, %v1781_v35  ;;  %vm1508_vm13 = vweird.f32 %v5541_v48  ;;  %v1511_v13 = vand.u32 2147483647, %v5466_v30  ;;  %v2597_v56 = vpop.permute.xlu2 %2596  ;;  %v6383_v59 = vld [vmem:[#allocation14_spill] sm:$0xff] }
 0x216   : > { %v1577_v45 = vadd.f32 -1.4531521, %v1536_v16  ;;  %v1638_v41 = vmul.f32 %v1597_v62, %v5813_v37  ;;  %v2822_v9 = vsel %vm351_vm0, %v2778_v38, 0.0  ;;  %3053 = vmatmul.msk.f32.gmra.mxu1 %vm2263_vm14, %v2231_v51  ;;  %vm1509_vm15 = vmor %vm1507_vm7, %vm1508_vm13  ;;  %v1514_v52 = vor.u32 1.1754944e-38, %v1513_v61 }
 0x217   : > { %v2129_v17 = vsub.f32 1.0, %v2088_v36  ;;  %v1863_v0 = vmul.f32 %v1822_v42, %v5771_v10  ;;  %v2823_v39 = vadd.f32 %v2822_v9, %v2821_v47  ;;  %v1510_v58 = vsel %vm1509_vm15, %v5541_v48, %v1506_v32 }
 0x218   : > { %v1618_v24 = vmul.f32 %v1577_v45, %v5823_v26  ;;  %v1679_v11 = vadd.f32 1.4214138, %v1638_v41  ;;  %vm1512_vm1 = vcmp.eq.f32.partialorder %v1511_v13, 8.507059e+37  ;;  %v1206_v10 = vadd.f32 %v5747_v15, %v1205_v54  ;;  %v6384_v13 = vld [vmem:[#allocation25_spill] sm:$0xff] }
 0x219   : > { %v2170_v57 = vmul.f32 %v2129_v17, %v6381_v4  ;;  %v2068_v33 = vmul.f32 %v5453_v21, %v1863_v0  ;;  %v5850_v47 = vsel %vm1512_vm1, %v1514_v52, %v1510_v58  ;;  %vm1208_vm2 = vweird.f32 %v5747_v15  ;;  %v5858_v21 = vpop.f32.mrf.mxu2  ;;  %v2602_v58 = vpop.permute.xlu0 %2601 }
 0x21a   : > { %v1659_v49 = vadd.f32 1.4214138, %v1618_v24  ;;  %v1720_v46 = vmul.f32 %v1679_v11, %v5813_v37  ;;  %v1211_v12 = vand.u32 2147483647, %v5553_v28  ;;  %v1557_v61 = vmul.f32 1.0614054, %v5850_v47  ;;  %vm1209_vm3 = vmor %vm1207_vm12, %vm1208_vm2  ;;  %v2422_v0 = vpop.f32.mrf.mxu1 }
 0x21b   : > { %v2211_v48 = vadd.f32 1.0, %v2170_v57  ;;  %v2109_v27 = vsub.f32 1.0, %v2068_v33  ;;  %v1210_v18 = vsel %vm1209_vm3, %v5747_v15, %v1206_v10  ;;  %v1214_v60 = vor.u32 1.1754944e-38, %v1213_v8 }
 0x21c   : > { %v1700_v30 = vmul.f32 %v1659_v49, %v5823_v26  ;;  %v1761_v3 = vadd.f32 -0.28449672, %v1720_v46  ;;  %vm1212_vm4 = vcmp.eq.f32.partialorder %v1211_v12, 8.507059e+37  ;;  %v1598_v14 = vadd.f32 -1.4531521, %v1557_v61  ;;  %v6385_v61 = vld [vmem:[#allocation18_spill] sm:$0xff] }
 0x21d   : > { %v2252_v5 = vmul.f32 %v2211_v48, %v6382_v25  ;;  %v2150_v23 = vmul.f32 %v2109_v27, %v5406_v31  ;;  %v1906_v2 = vsub.f32 0.0, %v5504_v63  ;;  %v5865_v28 = vsel %vm1212_vm4, %v1214_v60, %v1210_v18 }
 0x21e   : > { %v1741_v34 = vadd.f32 -0.28449672, %v1700_v30  ;;  %v1802_v7 = vmul.f32 %v1761_v3, %v5813_v37  ;;  %v2420_v1 = vadd.f32 %v5586_v29, %v2419_v55  ;;  %v1639_v35 = vmul.f32 %v1598_v14, %v5850_v47  ;;  %v6386_v55 = vld [vmem:[#allocation7_spill] sm:$0xff] }
 0x21f   : > { %3074 = vmatmul.msk.f32.gmra.mxu2 %vm2263_vm14, %v2252_v5  ;;  %v2191_v15 = vadd.f32 1.0, %v2150_v23  ;;  %v1537_v31 = vmul.f32 1.0614054, %v5865_v28  ;;  %v2048_v16 = vmul.f32 1.442695, %v5492_v40  ;;  %vm736_vm5 = vcmp.ge.f32.partialorder %v6383_v59, 0.0 }
 0x220   : > { %v1782_v8 = vmul.f32 %v1741_v34, %v5823_v26  ;;  %v1843_v54 = vadd.f32 0.2548296, %v1802_v7  ;;  %v2779_v62 = vmul.f32 %v2597_v56, %v2420_v1  ;;  %v1680_v20 = vadd.f32 1.4214138, %v1639_v35 }
 0x221   : > { %v2232_v38 = vmul.f32 %v2191_v15, %v5401_v44  ;;  %v1578_v51 = vadd.f32 -1.4531521, %v1537_v31  ;;  %v1947_v36 = vmul.f32 %v1906_v2, %v5504_v63  ;;  %vm716_vm6 = vcmp.ge.f32.partialorder %v6384_v13, 0.0  ;;  %v5889_v4 = vpop.f32.mrf.mxu2 }
 0x222   : > { %v1823_v32 = vadd.f32 0.2548296, %v1782_v8  ;;  %v1884_v42 = vmul.f32 %v1843_v54, %v5813_v37  ;;  %v2824_v45 = vsel %vm351_vm0, %v2779_v62, 0.0  ;;  %v1721_v40 = vmul.f32 %v1680_v20, %v5850_v47  ;;  %v2425_v2 = vpop.f32.mrf.mxu1  ;;  %v2607_v8 = vpop.permute.xlu1 %2606 }
 0x223   : > { %3054 = vmatmul.msk.f32.gmra.mxu1 %vm2263_vm14, %v2232_v38  ;;  %v1619_v9 = vmul.f32 %v1578_v51, %v5865_v28  ;;  %v2825_v44 = vadd.f32 %v2824_v45, %v2823_v39  ;;  %3278 = vpow2.f32 %v2048_v16  ;;  %v2423_v11 = vadd.f32 %v5586_v29, %v2422_v0  ;;  %v6387_v51 = vld [vmem:[#allocation31_spill] sm:$0xff] }
 0x224   : > { %v1864_v41 = vmul.f32 %v1823_v32, %v5823_v26  ;;  %v2089_v17 = vmul.f32 %v5470_v19, %v1884_v42  ;;  %v1762_v37 = vadd.f32 -0.28449672, %v1721_v40  ;;  %v777_v26 = vsel %vm736_vm5, 1.0, %v6084_v43 }
 0x225   : > { %v1660_v24 = vadd.f32 1.4214138, %v1619_v9  ;;  %v2008_v52 = vmul.f32 1.442695, %v1947_v36  ;;  %v2780_v49 = vmul.f32 %v2602_v58, %v2423_v11  ;;  %v654_v3 = vmul.f32 0.5, %v6385_v61 }
 0x226   : > { %v2069_v63 = vmul.f32 %v5524_v6, %v1864_v41  ;;  %v2130_v39 = vsub.f32 1.0, %v2089_v17  ;;  %v1803_v33 = vmul.f32 %v1762_v37, %v5850_v47  ;;  %v757_v6 = vsel %vm716_vm6, 1.0, %v6084_v43 }
 0x227   : > { %v1701_v19 = vmul.f32 %v1660_v24, %v5865_v28  ;;  %v2826_v27 = vsel %vm351_vm0, %v2780_v49, 0.0  ;;  %3280 = vpow2.f32 %v2008_v52  ;;  %v634_v25 = vmul.f32 0.5, %v6386_v55 }
 0x228   : > { %v2110_v57 = vsub.f32 1.0, %v2069_v63  ;;  %v2171_v10 = vmul.f32 %v2130_v39, %v777_v26  ;;  %v1844_v12 = vadd.f32 0.2548296, %v1803_v33  ;;  %v2827_v60 = vadd.f32 %v2826_v27, %v2825_v44  ;;  %v2612_v44 = vpop.permute.xlu2 %2611  ;;  %v2617_v26 = vpop.permute.xlu0 %2616 }
 0x229   : > { %v1742_v48 = vadd.f32 -0.28449672, %v1701_v19  ;;  %v3279_v30 = vpop.eup %3278  ;;  %vm737_vm7 = vcmp.ge.f32.partialorder %v5393_v50, 0.0  ;;  %v2426_v15 = vadd.f32 %v5586_v29, %v2425_v2  ;;  %v5907_v50 = vpop.f32.mrf.mxu2  ;;  %vm717_vm8 = vcmp.ge.f32.partialorder %v5474_v53, 0.0 }
 0x22a   : > { %v2151_v46 = vmul.f32 %v2110_v57, %v757_v6  ;;  %v2212_v18 = vadd.f32 1.0, %v2171_v10  ;;  %v1885_v23 = vmul.f32 %v1844_v12, %v5850_v47  ;;  %v778_v54 = vsel %vm737_vm7, 1.0, %v6084_v43 }
 0x22b   : > { %v1783_v34 = vmul.f32 %v1742_v48, %v5865_v28  ;;  %v2781_v47 = vmul.f32 %v2607_v8, %v2426_v15  ;;  %v655_v59 = vmul.f32 0.5, %v6387_v51  ;;  %v758_v45 = vsel %vm717_vm8, 1.0, %v6084_v43 }
 0x22c   : > { %v2192_v5 = vadd.f32 1.0, %v2151_v46  ;;  %v2253_v14 = vmul.f32 %v2212_v18, %v654_v3  ;;  %v2090_v1 = vmul.f32 %v3279_v30, %v1885_v23  ;;  %v635_v13 = vmul.f32 0.5, %v5436_v22  ;;  %v2622_v30 = vpop.permute.xlu1 %2621 }
 0x22d   : > { %v1824_v56 = vadd.f32 0.2548296, %v1783_v34  ;;  %v3281_v16 = vpop.eup %3280  ;;  %v2828_v32 = vsel %vm351_vm0, %v2781_v47, 0.0  ;;  %vm2894_vm9 = vcmask 125952  }
 0x22e   : > { %v2233_v7 = vmul.f32 %v2192_v5, %v634_v25  ;;  %3075 = vmatmul.msk.f32.gmra.mxu2 %vm2263_vm14, %v2253_v14  ;;  %v2131_v35 = vsub.f32 1.0, %v2090_v1  ;;  %v2829_v20 = vadd.f32 %v2828_v32, %v2827_v60 }
 0x22f   : > { %v1865_v31 = vmul.f32 %v1824_v56, %v5865_v28  ;;  %v2428_v28 = vpop.f32.mrf.mxu1 }
 0x230   : > { %3055 = vmatmul.msk.f32.gmra.mxu1 %vm2263_vm14, %v2233_v7  ;;  %v2172_v62 = vmul.f32 %v2131_v35, %v778_v54  ;;  %v2429_v9 = vadd.f32 %v5586_v29, %v2428_v28  ;;  %v2627_v3 = vpop.permute.xlu2 %2626  ;;  %v2632_v60 = vpop.permute.xlu0 %2631 }
 0x231   : > { %v2070_v38 = vmul.f32 %v3281_v16, %v1865_v31  ;;  %v5917_v37 = vpop.f32.mrf.mxu2 }
 0x232   : > { %v2213_v36 = vadd.f32 1.0, %v2172_v62  ;;  %v2782_v17 = vmul.f32 %v2612_v44, %v2429_v9 }
 0x233   : > { %v2111_v42 = vsub.f32 1.0, %v2070_v38 }
 0x234   : > { %v2254_v41 = vmul.f32 %v2213_v36, %v655_v59  ;;  %v2830_v63 = vsel %vm351_vm0, %v2782_v17, 0.0  ;;  %v2637_v55 = vpop.permute.xlu1 %2636 }
 0x235   : > { %v2152_v40 = vmul.f32 %v2111_v42, %v758_v45  ;;  %v2831_v24 = vadd.f32 %v2830_v63, %v2829_v20 }
 0x236   : > { %3076 = vmatmul.msk.f32.gmra.mxu2 %vm2263_vm14, %v2254_v41 }
 0x237   : > { %v2193_v53 = vadd.f32 1.0, %v2152_v40  ;;  %v2431_v43 = vpop.f32.mrf.mxu1 }
 0x238   : > { %v2432_v11 = vadd.f32 %v5586_v29, %v2431_v43  ;;  %v2642_v5 = vpop.permute.xlu2 %2641  ;;  %v2647_v34 = vpop.permute.xlu0 %2646 }
 0x239   : > { %v2234_v0 = vmul.f32 %v2193_v53, %v635_v13  ;;  %v5922_v39 = vpop.f32.mrf.mxu2 }
 0x23a   : > { %v2783_v58 = vmul.f32 %v2617_v26, %v2432_v11 }
 0x23b   : > { %3056 = vmatmul.msk.f32.gmra.mxu1 %vm2263_vm14, %v2234_v0  ;;  %vm302_vm14 = vcmask 122880  }
 0x23c   : > { %v2832_v52 = vsel %vm351_vm0, %v2783_v58, 0.0  ;;  %v2652_v14 = vpop.permute.xlu1 %2651 }
 0x23d   : > { %v2833_v22 = vadd.f32 %v2832_v52, %v2831_v24 }
 0x23f   : > { %v2434_v33 = vpop.f32.mrf.mxu1 }
 0x240   : > { %v2657_v7 = vpop.permute.xlu2 %2656  ;;  %v2662_v56 = vpop.permute.xlu0 %2661  ;;  %v2435_v35 = vadd.f32 %v5586_v29, %v2434_v33 }
 0x241   : > { %v5924_v57 = vpop.f32.mrf.mxu2 }
 0x242   : > { %v2784_v47 = vmul.f32 %v2622_v30, %v2435_v35 }
 0x244   : > { %v2667_v15 = vpop.permute.xlu1 %2666  ;;  %v2834_v51 = vsel %vm351_vm0, %v2784_v47, 0.0 }
 0x245   : > { %v2835_v9 = vadd.f32 %v2834_v51, %v2833_v22 }
 0x247   : > { %v2437_v49 = vpop.f32.mrf.mxu1 }
 0x248   : > { %v2438_v31 = vadd.f32 %v5586_v29, %v2437_v49  ;;  %v2672_v54 = vpop.permute.xlu2 %2671  ;;  %v2677_v20 = vpop.permute.xlu0 %2676 }
 0x249   : > { %v5926_v19 = vpop.f32.mrf.mxu2 }
 0x24a   : > { %v2785_v38 = vmul.f32 %v2627_v3, %v2438_v31  ;;  %v3311_v3 = vmov 0.0  }
 0x24b   : > { %303 = vst.msk [vmem:[#allocation2] sm:$0x1] %vm302_vm14, %v3311_v3 }
 0x24c   : > { %v2682_v42 = vpop.permute.xlu1 %2681  ;;  %v2836_v28 = vsel %vm351_vm0, %v2785_v38, 0.0 }
 0x24d   : > { %v2837_v17 = vadd.f32 %v2836_v28, %v2835_v9  ;;  %v2477_v9 = vadd.f32 %v5586_v29, %v5917_v37 }
 0x250   : > { %v2687_v43 = vpop.permute.xlu2 %2686  ;;  %v2692_v58 = vpop.permute.xlu0 %2691 }
 0x251   : > { %v5928_v6 = vpop.f32.mrf.mxu2 }
 0x252   : > { %v2440_v10 = vpop.f32.mrf.mxu1 }
 0x253   : > { %v2441_v16 = vadd.f32 %v5586_v29, %v2440_v10 }
 0x254   : > { %v2697_v49 = vpop.permute.xlu1 %2696 }
 0x255   : > { %v2786_v59 = vmul.f32 %v2632_v60, %v2441_v16 }
 0x257   : > { %v2838_v44 = vsel %vm351_vm0, %v2786_v59, 0.0 }
 0x258   : > { %v2839_v11 = vadd.f32 %v2838_v44, %v2837_v17  ;;  %v2707_v31 = vpop.permute.xlu0 %2706 }
 0x259   : > { %v5930_v46 = vpop.f32.mrf.mxu2 }
 0x25c   : > { %v2712_v16 = vpop.permute.xlu1 %2711 }
 0x261   : > { %v5932_v48 = vpop.f32.mrf.mxu2 }
 0x266   : > { %v2443_v12 = vpop.f32.mrf.mxu1 }
 0x267   : > { %v2444_v32 = vadd.f32 %v5586_v29, %v2443_v12 }
 0x269   : > { %v5934_v61 = vpop.f32.mrf.mxu2  ;;  %v2787_v41 = vmul.f32 %v2637_v55, %v2444_v32  ;;  %v2471_v32 = vadd.f32 %v5586_v29, %v5889_v4 }
 0x26b   : > { %v2840_v0 = vsel %vm351_vm0, %v2787_v41, 0.0 }
 0x26c   : > { %v2841_v10 = vadd.f32 %v2840_v0, %v2839_v11  ;;  %v2722_v0 = vpop.permute.xlu0 %2721 }
 0x26e   : > { %v2446_v27 = vpop.f32.mrf.mxu1 }
 0x26f   : > { %v2447_v36 = vadd.f32 %v5586_v29, %v2446_v27 }
 0x271   : > { %v5936_v25 = vpop.f32.mrf.mxu2  ;;  %v2788_v13 = vmul.f32 %v2642_v5, %v2447_v36  ;;  %v2474_v36 = vadd.f32 %v5586_v29, %v5907_v50 }
 0x273   : > { %v2842_v52 = vsel %vm351_vm0, %v2788_v13, 0.0  ;;  %v2797_v17 = vmul.f32 %v2687_v43, %v2474_v36 }
 0x275   : > { %v2860_v11 = vsel %vm351_vm0, %v2797_v17, 0.0 }
 0x278   : > { %v2449_v18 = vpop.f32.mrf.mxu1 }
 0x279   : > { %v5938_v2 = vpop.f32.mrf.mxu2  ;;  %v2450_v40 = vadd.f32 %v5586_v29, %v2449_v18  ;;  %v2843_v18 = vadd.f32 %v2842_v52, %v2841_v10  ;;  %v2486_v52 = vadd.f32 %v5586_v29, %v5926_v19 }
 0x27b   : > { %v2789_v63 = vmul.f32 %v2647_v34, %v2450_v40  ;;  %v2796_v40 = vmul.f32 %v2682_v42, %v2471_v32  ;;  %v2483_v42 = vadd.f32 %v5586_v29, %v5924_v57  ;;  %v2801_v57 = vmul.f32 %v2707_v31, %v2486_v52 }
 0x27d   : > { %v2844_v12 = vsel %vm351_vm0, %v2789_v63, 0.0  ;;  %v2798_v63 = vmul.f32 %v2692_v58, %v2477_v9 }
 0x281   : > { %v5940_v8 = vpop.f32.mrf.mxu2 }
 0x288   : > { %v2452_v23 = vpop.f32.mrf.mxu1 }
 0x289   : > { %v5948_v45 = vpop.f32.mrf.mxu2  ;;  %v2453_v53 = vadd.f32 %v5586_v29, %v2452_v23  ;;  %v2845_v23 = vadd.f32 %v2844_v12, %v2843_v18  ;;  %v2495_v18 = vadd.f32 %v5586_v29, %v5932_v48 }
 0x28b   : > { %v2790_v33 = vmul.f32 %v2652_v14, %v2453_v53 }
 0x28d   : > { %v2846_v55 = vsel %vm351_vm0, %v2790_v33, 0.0  ;;  %v2862_v33 = vsel %vm351_vm0, %v2798_v63, 0.0 }
 0x28e   : > { %v2847_v35 = vadd.f32 %v2846_v55, %v2845_v23  ;;  %v2737_v55 = vpop.permute.xlu0 %2736 }
 0x291   : > { %v5961_v60 = vpop.f32.mrf.mxu2 }
 0x293   : > { %v2455_v1 = vpop.f32.mrf.mxu1 }
 0x294   : > { %v2456_v24 = vadd.f32 %v5586_v29, %v2455_v1  ;;  %v2702_v1 = vpop.permute.xlu2 %2701 }
 0x296   : > { %v2791_v27 = vmul.f32 %v2657_v7, %v2456_v24  ;;  %v2468_v7 = vadd.f32 %v5586_v29, %v5858_v21  ;;  %v2727_v24 = vpop.permute.xlu1 %2726 }
 0x298   : > { %v2848_v34 = vsel %vm351_vm0, %v2791_v27, 0.0  ;;  %v2492_v27 = vadd.f32 %v5586_v29, %v5930_v46 }
 0x299   : > { %v5974_v21 = vpop.f32.mrf.mxu2 }
 0x29c   : > { %v2717_v4 = vpop.permute.xlu2 %2716 }
 0x29d   : > { %v2803_v23 = vmul.f32 %v2717_v4, %v2492_v27 }
 0x29e   : > { %v2742_v46 = vpop.permute.xlu1 %2741 }
 0x2a0   : > { %v2458_v62 = vpop.f32.mrf.mxu1 }
 0x2a1   : > { %v2459_v22 = vadd.f32 %v5586_v29, %v2458_v62  ;;  %v2849_v62 = vadd.f32 %v2848_v34, %v2847_v35  ;;  %v3284_v34 = vld [vmem:[%s6039_s4] ss:$0 sm:$0xff] }
 0x2a2   : > { %v2518_v10 = vpop.f32.mrf.mxu2  ;;  %v2501_v31 = vadd.f32 %v3284_v34, %v5936_v25  ;;  %v2510_v25 = vadd.f32 %v3284_v34, %v5948_v45 }
 0x2a3   : > { %v2792_v5 = vmul.f32 %v2662_v56, %v2459_v22  ;;  %v2489_v22 = vadd.f32 %v5586_v29, %v5928_v6  ;;  %v2868_v6 = vsel %vm351_vm0, %v2801_v57, 0.0 }
 0x2a5   : > { %v2850_v47 = vsel %vm351_vm0, %v2792_v5, 0.0  ;;  %v2802_v19 = vmul.f32 %v2712_v16, %v2489_v22  ;;  %v2504_v16 = vadd.f32 %v3284_v34, %v5938_v2  ;;  %v2513_v2 = vadd.f32 %v3284_v34, %v5961_v60 }
 0x2a6   : > { %v2851_v59 = vadd.f32 %v2850_v47, %v2849_v62 }
 0x2a7   : > { %v2870_v35 = vsel %vm351_vm0, %v2802_v19, 0.0  ;;  %v2807_v36 = vmul.f32 %v2737_v55, %v2504_v16 }
 0x2ad   : > { %v2461_v26 = vpop.f32.mrf.mxu1 }
 0x2ae   : > { %v2462_v30 = vadd.f32 %v5586_v29, %v2461_v26 }
 0x2b0   : > { %v2793_v14 = vmul.f32 %v2667_v15, %v2462_v30  ;;  %v2795_v15 = vmul.f32 %v2677_v20, %v2468_v7  ;;  %v2480_v20 = vadd.f32 %v5586_v29, %v5922_v39  ;;  %v2800_v39 = vmul.f32 %v2702_v1, %v2483_v42  ;;  %v2732_v30 = vpop.permute.xlu2 %2731 }
 0x2b1   : > { %v2804_v7 = vmul.f32 %v2722_v0, %v2495_v18  ;;  %v2521_v62 = vpop.f32.mrf.mxu2 }
 0x2b2   : > { %v2852_v56 = vsel %vm351_vm0, %v2793_v14, 0.0  ;;  %v2856_v53 = vsel %vm351_vm0, %v2795_v15, 0.0  ;;  %v2799_v26 = vmul.f32 %v2697_v49, %v2480_v20  ;;  %v2866_v3 = vsel %vm351_vm0, %v2800_v39, 0.0 }
 0x2b3   : > { %v2853_v41 = vadd.f32 %v2852_v56, %v2851_v59  ;;  %v2498_v14 = vadd.f32 %v3284_v34, %v5934_v61  ;;  %v2874_v32 = vsel %vm351_vm0, %v2804_v7, 0.0  ;;  %v2806_v56 = vmul.f32 %v2732_v30, %v2501_v31 }
 0x2b4   : > { %v2864_v12 = vsel %vm351_vm0, %v2799_v26, 0.0  ;;  %v2507_v61 = vadd.f32 %v3284_v34, %v5940_v8  ;;  %v2516_v8 = vadd.f32 %v3284_v34, %v5974_v21 }
 0x2b5   : > { %v2805_v48 = vmul.f32 %v2727_v24, %v2498_v14  ;;  %v2522_v24 = vadd.f32 %v3284_v34, %v2521_v62 }
 0x2b6   : > { %v2808_v9 = vmul.f32 %v2742_v46, %v2507_v61 }
 0x2b7   : > { %v2876_v15 = vsel %vm351_vm0, %v2805_v48, 0.0 }
 0x2b8   : > { %v2464_v38 = vpop.f32.mrf.mxu1  ;;  %v2882_v20 = vsel %vm351_vm0, %v2808_v9, 0.0 }
 0x2b9   : > { %v2465_v51 = vadd.f32 %v5586_v29, %v2464_v38  ;;  %v2872_v29 = vsel %vm351_vm0, %v2803_v23, 0.0  ;;  %v2524_v45 = vpop.f32.mrf.mxu2  ;;  %v2527_v23 = vld [vmem:[#allocation2] sm:$0x1] }
 0x2ba   : > { %v2525_v52 = vadd.f32 %v3284_v34, %v2524_v45 }
 0x2bb   : > { %v2794_v28 = vmul.f32 %v2672_v54, %v2465_v51  ;;  %v2858_v54 = vsel %vm351_vm0, %v2796_v40, 0.0  ;;  %v2747_v51 = vpop.permute.xlu2 %2746  ;;  %v2878_v40 = vsel %vm351_vm0, %v2806_v56, 0.0 }
 0x2bd   : > { %v2854_v44 = vsel %vm351_vm0, %v2794_v28, 0.0  ;;  %v2752_v28 = vpop.permute.xlu0 %2751 }
 0x2be   : > { %v2855_v13 = vadd.f32 %v2854_v44, %v2853_v41  ;;  %v2757_v44 = vpop.permute.xlu1 %2756  ;;  %v2810_v0 = vmul.f32 %v2752_v28, %v2513_v2 }
 0x2bf   : > { %v2811_v42 = vmul.f32 %v2757_v44, %v2516_v8 }
 0x2c0   : > { %v2857_v50 = vadd.f32 %v2856_v53, %v2855_v13  ;;  %v2880_v13 = vsel %vm351_vm0, %v2807_v36, 0.0  ;;  %v2809_v53 = vmul.f32 %v2747_v51, %v2510_v25 }
 0x2c1   : > { %v2888_v21 = vsel %vm351_vm0, %v2811_v42, 0.0 }
 0x2c2   : > { %v2859_v37 = vadd.f32 %v2858_v54, %v2857_v50  ;;  %v2519_v50 = vadd.f32 %v3284_v34, %v2518_v10  ;;  %v2884_v63 = vsel %vm351_vm0, %v2809_v53, 0.0 }
 0x2c4   : > { %v2861_v43 = vadd.f32 %v2860_v11, %v2859_v37  ;;  %v2762_v37 = vpop.permute.xlu2 %2761  ;;  %v2886_v11 = vsel %vm351_vm0, %v2810_v0, 0.0 }
 0x2c5   : > { %v2812_v26 = vmul.f32 %v2762_v37, %v2519_v50 }
 0x2c6   : > { %v2863_v58 = vadd.f32 %v2862_v33, %v2861_v43  ;;  %v2767_v43 = vpop.permute.xlu0 %2766  ;;  %v2772_v22 = vpop.permute.xlu1 %2771 }
 0x2c7   : > { %v2813_v39 = vmul.f32 %v2767_v43, %v2522_v24  ;;  %v2890_v10 = vsel %vm351_vm0, %v2812_v26, 0.0 }
 0x2c8   : > { %v2865_v49 = vadd.f32 %v2864_v12, %v2863_v58  ;;  %v2814_v12 = vmul.f32 %v2772_v22, %v2525_v52 }
 0x2c9   : > { %v2892_v27 = vsel %vm351_vm0, %v2813_v39, 0.0 }
 0x2ca   : > { %v2867_v5 = vadd.f32 %v2866_v3, %v2865_v49  ;;  %v2895_v49 = vsel %vm2894_vm9, %v2814_v12, 0.0 }
 0x2cc   : > { %v2869_v1 = vadd.f32 %v2868_v6, %v2867_v5 }
 0x2ce   : > { %v2871_v47 = vadd.f32 %v2870_v35, %v2869_v1 }
 0x2d0   : > { %v2873_v38 = vadd.f32 %v2872_v29, %v2871_v47 }
 0x2d2   : > { %v2875_v59 = vadd.f32 %v2874_v32, %v2873_v38 }
 0x2d4   : > { %v2877_v41 = vadd.f32 %v2876_v15, %v2875_v59 }
 0x2d6   : > { %v2879_v4 = vadd.f32 %v2878_v40, %v2877_v41 }
 0x2d8   : > { %v2881_v17 = vadd.f32 %v2880_v13, %v2879_v4 }
 0x2da   : > { %v2883_v54 = vadd.f32 %v2882_v20, %v2881_v17 }
 0x2dc   : > { %v2885_v60 = vadd.f32 %v2884_v63, %v2883_v54 }
 0x2de   : > { %v2887_v33 = vadd.f32 %v2886_v11, %v2885_v60 }
 0x2e0   : > { %v2889_v58 = vadd.f32 %v2888_v21, %v2887_v33 }
 0x2e2   : > { %v2891_v57 = vadd.f32 %v2890_v10, %v2889_v58 }
 0x2e4   : > { %v2893_v30 = vadd.f32 %v2892_v27, %v2891_v57 }
 0x2e6   : > { %v2896_v3 = vadd.f32 %v2895_v49, %v2893_v30 }
 0x2e8   : > { %v2897_v19 = vrot.slane %v2896_v3, 4 }
 0x2ea   : > { %v2898_v18 = vadd.f32 %v2897_v19, %v2896_v3 }
 0x2ec   : > { %v2899_v55 = vrot.slane %v2898_v18, 2 }
 0x2ee   : > { %v2900_v5 = vadd.f32 %v2899_v55, %v2898_v18 }
 0x2f0   : > { %v2901_v6 = vrot.slane %v2900_v5, 1 }
 0x2f2   : > { %v2902_v34 = vadd.f32 %v2901_v6, %v2900_v5 }
 0x2f4   : > { %v2903_v14 = vadd.f32 %v2902_v34, %v2527_v23 }
 0x2f6   : > { %2905 = vst.msk [vmem:[#allocation2] sm:$0x1] %vm302_vm14, %v2903_v14 }
 0x2fd   : > { %v2909_v46 = vld [vmem:[#allocation2] sm:$0x1] }
 0x2fe   : > { %2910 = vst.msk [vmem:[%s297_s12] sm:$0x1] %vm302_vm14, %v2909_v46 }
 0x2ff PF: > { %s16_s23 = sadd.s32 1, %s3307_s23   ;;  %s6388_s21 = smov %s3303_s22 }
 0x300   : > { %p13_p5 = scmp.ge.s32.totalorder %s16_s23, 4   ;;  %s6389_s22 = smov %s6391_s24 }
 0x302   :  { %15 = sbr.rel (!%p13_p5) target bundleno = 2 (0x2), region = 85 }

</bundles_post_ra>
